<compile_context>
chip_gen: v7x
topology: tpu7x:2x2x1
jax: 0.10.0
libtpu: 0.0.40
codegen_flags: <defaults>
</compile_context>

<pallas_src>
import functools

import numpy as np
import jax
import jax.numpy as jnp
from jax.experimental import pallas as pl
from jax.experimental.pallas import tpu as pltpu

_VMEM_SPEC = pl.BlockSpec(memory_space=pltpu.MemorySpace.VMEM)
_BN_EPS = 1e-5


# ---------------------------------------------------------------------------
# compile-time (numpy) constants
# ---------------------------------------------------------------------------

def _expand_conv_np(w, s):
    """(k,k,ci,co) conv weight -> (k, s*ci, s*co) banded per-dy matrices.

    Entry [(j+dx)*ci+ci_, j*co+co_] = w[dy,dx,ci_,co_]; columns with j+dx
    outside [0,s) are absent, so width zero-padding is free (no masks).
    """
    k, _, ci, co = w.shape
    p = k // 2
    out = np.zeros((k, s * ci, s * co), np.float32)
    for idy in range(k):
        for idx in range(k):
            dx = idx - p
            for j in range(s):
                jj = j + dx
                if 0 <= jj < s:
                    out[idy, jj * ci:(jj + 1) * ci, j * co:(j + 1) * co] = w[idy, idx]
    return out


def _shift_mats_np(n, h, k):
    """(k, n*h, n*h) 0/1 row-shift matrices; handle height borders and keep
    images isolated (no cross-image bleed)."""
    p = k // 2
    r = n * h
    out = np.zeros((k, r, r), np.float32)
    for idy in range(k):
        dy = idy - p
        for b in range(n):
            for i in range(h):
                if 0 <= i + dy < h:
                    out[idy, b * h + i, b * h + i + dy] = 1.0
    return out


def _pool_h_np(n, h):
    out = np.zeros((n * (h // 2), n * h), np.float32)
    for b in range(n):
        for i in range(h // 2):
            out[b * (h // 2) + i, b * h + 2 * i] = 0.5
            out[b * (h // 2) + i, b * h + 2 * i + 1] = 0.5
    return out


def _pool_w_np(s, c):
    out = np.zeros((s * c, (s // 2) * c), np.float32)
    for j in range(s // 2):
        for a in range(2):
            for cc in range(c):
                out[(2 * j + a) * c + cc, j * c + cc] = 0.5
    return out


def _up_h_np(n, h):
    out = np.zeros((n * 2 * h, n * h), np.float32)
    for b in range(n):
        for i in range(2 * h):
            out[b * 2 * h + i, b * h + i // 2] = 1.0
    return out


def _up_w_np(s, c):
    out = np.zeros((s * c, 2 * s * c), np.float32)
    for j in range(s):
        for cc in range(c):
            for a in range(2):
                out[j * c + cc, (2 * j + a) * c + cc] = 1.0
    return out


def _bn_reduce_np(s, c):
    """(s*c, c): averages the s lane-groups of each channel."""
    out = np.zeros((s * c, c), np.float32)
    for j in range(s):
        for cc in range(c):
            out[j * c + cc, cc] = 1.0 / s
    return out


def _bn_bcast_np(s, c):
    """(c, s*c): broadcasts a per-channel value back to all lane groups."""
    out = np.zeros((c, s * c), np.float32)
    for j in range(s):
        for cc in range(c):
            out[cc, j * c + cc] = 1.0
    return out


def _nhwc_to_nchw_perm_np(h, w, c):
    """perm[q_nhwc] = q_nchw so that flat_nhwc[q] == flat_nchw[perm[q]]."""
    hh, ww, cc = np.meshgrid(np.arange(h), np.arange(w), np.arange(c), indexing="ij")
    return (cc * h * w + hh * w + ww).reshape(-1).astype(np.int64)


# ---------------------------------------------------------------------------
# in-kernel building blocks (activations are (N*H, W*C) f32 values)
# ---------------------------------------------------------------------------

def _act(y, act):
    if act == "lrelu":
        return jnp.where(y >= 0.0, y, 0.2 * y)
    if act == "relu":
        return jnp.maximum(y, 0.0)
    if act == "sigmoid":
        return 0.5 * (jnp.tanh(0.5 * y) + 1.0)   # stable sigmoid via EUP tanh
    return y


def _bn_ld(y, red, bcast, gb):
    """Training-mode BatchNorm over (N,H,W) in lane-dense layout, two-pass."""
    m = jnp.mean(y, axis=0, keepdims=True)                       # per-lane mean
    mfull = jnp.dot(jnp.dot(m, red, preferred_element_type=jnp.float32), bcast,
                    preferred_element_type=jnp.float32)          # per-channel, re-broadcast
    d = y - mfull
    v = jnp.mean(d * d, axis=0, keepdims=True)
    vfull = jnp.dot(jnp.dot(v, red, preferred_element_type=jnp.float32), bcast,
                    preferred_element_type=jnp.float32)
    return d * jax.lax.rsqrt(vfull + _BN_EPS) * gb[0:1, :] + gb[1:2, :]


def _conv_ld(y, w_ref, sh_ref, k):
    """'same' conv as k banded matmuls (one per dy) in bf16 with f32 accum."""
    p = k // 2
    yb = y.astype(jnp.bfloat16)
    acc = jnp.dot(yb, w_ref[p], preferred_element_type=jnp.float32)   # dy = 0
    for idy in range(k):
        if idy == p:
            continue
        ys = jnp.dot(sh_ref[idy], yb, preferred_element_type=jnp.float32)
        acc = acc + jnp.dot(ys.astype(jnp.bfloat16), w_ref[idy],
                            preferred_element_type=jnp.float32)
    return acc


def _run_ops(y, ops, ins):
    for op in ops:
        tag = op[0]
        if tag == "conv":
            _, wi, si, k = op
            y = _conv_ld(y, ins[wi], ins[si], k)
        elif tag == "bn":
            _, ri, bi, gi = op
            y = _bn_ld(y, ins[ri][...], ins[bi][...], ins[gi][...])
        elif tag == "bias":
            y = y + ins[op[1]][...]
        elif tag == "act":
            y = _act(y, op[1])
        elif tag == "lr":           # avgpool / nearest upsample (factorized)
            _, li, ri = op
            y = jnp.dot(ins[li][...], y.astype(jnp.bfloat16),
                        preferred_element_type=jnp.float32)
            y = jnp.dot(y.astype(jnp.bfloat16), ins[ri][...],
                        preferred_element_type=jnp.float32)
        elif tag == "resblock":
            _, si, wei, w1, r1, b1, g1, w2, r2, b2, g2 = op
            if wei < 0:
                identity = y
            else:
                identity = jnp.dot(y.astype(jnp.bfloat16), ins[wei][...],
                                   preferred_element_type=jnp.float32)
            h = _conv_ld(y, ins[w1], ins[si], 3)
            h = _act(_bn_ld(h, ins[r1][...], ins[b1][...], ins[g1][...]), "lrelu")
            h = _conv_ld(h, ins[w2], ins[si], 3)
            y = _act(_bn_ld(h + identity, ins[r2][...], ins[b2][...], ins[g2][...]),
                     "lrelu")
    return y


def _lraad_kernel(meta, *refs):
    n_in = meta["n_inputs"]
    ins = refs[:n_in]
    mu_ref, lv_ref, z_ref, rec_ref = refs[n_in:n_in + 4]

    feat = meta["feat"]
    latent = meta["latent"]
    chunk = meta["fc_chunk"]

    # ------------------------ encoder conv stack --------------------------
    y = ins[meta["x_idx"]][...].astype(jnp.float32)
    y = _run_ops(y, meta["enc_ops"], ins)

    # --------------- encoder head: fc -> mu/logvar -> z (fused) -----------
    wfc = ins[meta["enc_fc_w"]][...]          # (num_fc, 2*latent) bf16, permuted
    bfc = ins[meta["enc_fc_b"]][...]          # (1, 2*latent) f32
    sel = ins[meta["enc_sel"]]                # (feat, N, N*feat) bf16 ref
    yb = y.astype(jnp.bfloat16)
    stats = bfc
    for hh in range(feat):
        rows = jnp.dot(sel[hh], yb, preferred_element_type=jnp.float32)
        stats = stats + jnp.dot(rows.astype(jnp.bfloat16),
                                wfc[hh * chunk:(hh + 1) * chunk, :],
                                preferred_element_type=jnp.float32)
    mu = stats[:, :latent]
    logvar = stats[:, latent:2 * latent]
    z = mu + ins[meta["eps_idx"]][...] * jnp.exp(0.5 * logvar)
    mu_ref[...] = mu
    lv_ref[...] = logvar
    z_ref[...] = z

    # ------------- decoder head: fc + ReLU, re-laid out lane-dense ---------
    wd = ins[meta["dec_fc_w"]][...]           # (latent, num_fc) bf16, permuted
    bd = ins[meta["dec_fc_b"]][...]           # (1, num_fc) f32
    selT = ins[meta["dec_selT"]]              # (feat, N*feat, N) bf16 ref
    zb = z.astype(jnp.bfloat16)
    y = None
    for hh in range(feat):
        part = jnp.dot(zb, wd[:, hh * chunk:(hh + 1) * chunk],
                       preferred_element_type=jnp.float32)
        part = jnp.maximum(part + bd[:, hh * chunk:(hh + 1) * chunk], 0.0)
        placed = jnp.dot(selT[hh], part.astype(jnp.bfloat16),
                         preferred_element_type=jnp.float32)
        y = placed if y is None else y + placed

    # ------------- decoder conv stack + predict conv + sigmoid -------------
    y = _run_ops(y, meta["dec_ops"], ins)
    rec_ref[...] = y.astype(rec_ref.dtype)


# ---------------------------------------------------------------------------
# parameters (same raw structure as the PyTorch module)
# ---------------------------------------------------------------------------

def _winit(key, shape, scale=0.1):
    return jax.random.normal(key, shape, jnp.float32) * scale


def _init_resblock(key, inc, outc):
    k0, k1, k2 = jax.random.split(key, 3)
    p = {
        "conv1_w": _winit(k1, (3, 3, inc, outc)),
        "bn1_g": jnp.ones((outc,), jnp.float32),
        "bn1_b": jnp.zeros((outc,), jnp.float32),
        "conv2_w": _winit(k2, (3, 3, outc, outc)),
        "bn2_g": jnp.ones((outc,), jnp.float32),
        "bn2_b": jnp.zeros((outc,), jnp.float32),
    }
    if inc != outc:
        p["expand_w"] = _winit(k0, (1, 1, inc, outc))
    return p


def init_lraad(key, *, in_channels=3, latent_dim=32, channels=(8, 16, 16), image_size=16):
    n_down = len(channels)
    feat = image_size // (2 ** n_down)
    num_fc = channels[-1] * feat * feat

    keys = iter(jax.random.split(key, 64))
    params = {}

    # encoder
    params["enc_conv0_w"] = _winit(next(keys), (5, 5, in_channels, channels[0]))
    params["enc_bn0_g"] = jnp.ones((channels[0],), jnp.float32)
    params["enc_bn0_b"] = jnp.zeros((channels[0],), jnp.float32)
    enc_blocks, inc = [], channels[0]
    for ch in channels[1:]:
        enc_blocks.append(_init_resblock(next(keys), inc, ch))
        inc = ch
    params["enc_blocks"] = enc_blocks
    params["enc_final"] = _init_resblock(next(keys), inc, inc)
    params["enc_fc_w"] = _winit(next(keys), (num_fc, 2 * latent_dim))
    params["enc_fc_b"] = jnp.zeros((2 * latent_dim,), jnp.float32)

    # decoder (channels reversed)
    dch = channels[::-1]
    params["dec_fc_w"] = _winit(next(keys), (latent_dim, num_fc))
    params["dec_fc_b"] = jnp.zeros((num_fc,), jnp.float32)
    dec_blocks, inc = [], dch[0]
    for ch in dch:
        dec_blocks.append(_init_resblock(next(keys), inc, ch))
        inc = ch
    params["dec_blocks"] = dec_blocks
    params["dec_final"] = _init_resblock(next(keys), inc, inc)
    params["dec_pred_w"] = _winit(next(keys), (5, 5, inc, in_channels))
    params["dec_pred_b"] = jnp.zeros((in_channels,), jnp.float32)
    return params


# ---------------------------------------------------------------------------
# build the fused-kernel program once (constants + static op list)
# ---------------------------------------------------------------------------

def build_lraad_program(params, batch, *, in_channels=3, latent_dim=32,
                        channels=(8, 16, 16), image_size=16):
    consts = []
    cache = {}

    def add(key, builder):
        if key not in cache:
            consts.append(builder())
            cache[key] = len(consts) + 1          # kernel inputs: [x, eps] + consts
        return cache[key]

    def shift_idx(s, k):
        return add(("shift", s, k),
                   lambda: jnp.asarray(_shift_mats_np(batch, s, k), jnp.bfloat16))

    def conv_idx(w, s, k, tag):
        w_np = np.asarray(w, np.float32)
        wi = add(("convw", tag),
                 lambda: jnp.asarray(_expand_conv_np(w_np, s), jnp.bfloat16))
        return wi, shift_idx(s, k)

    def bn_idx(s, c, gamma, beta, tag):
        ri = add(("bnred", s, c), lambda: jnp.asarray(_bn_reduce_np(s, c), jnp.float32))
        bi = add(("bnbc", s, c), lambda: jnp.asarray(_bn_bcast_np(s, c), jnp.float32))
        gb = np.stack([np.tile(np.asarray(gamma, np.float32), s),
                       np.tile(np.asarray(beta, np.float32), s)], axis=0)
        gi = add(("gb", tag), lambda: jnp.asarray(gb, jnp.float32))
        return ri, bi, gi

    def pool_op(s, c):
        li = add(("ph", s), lambda: jnp.asarray(_pool_h_np(batch, s), jnp.bfloat16))
        ri = add(("pw", s, c), lambda: jnp.asarray(_pool_w_np(s, c), jnp.bfloat16))
        return ("lr", li, ri)

    def up_op(s, c):
        li = add(("uh", s), lambda: jnp.asarray(_up_h_np(batch, s), jnp.bfloat16))
        ri = add(("uw", s, c), lambda: jnp.asarray(_up_w_np(s, c), jnp.bfloat16))
        return ("lr", li, ri)

    def resblock_op(blk, s, cin, cout, tag):
        w1, si = conv_idx(blk["conv1_w"], s, 3, tag + "c1")
        w2, _ = conv_idx(blk["conv2_w"], s, 3, tag + "c2")
        r1, b1, g1 = bn_idx(s, cout, blk["bn1_g"], blk["bn1_b"], tag + "bn1")
        r2, b2, g2 = bn_idx(s, cout, blk["bn2_g"], blk["bn2_b"], tag + "bn2")
        if cin != cout:
            we_np = np.asarray(blk["expand_w"], np.float32)
            wei = add(("convw", tag + "ex"),
                      lambda: jnp.asarray(_expand_conv_np(we_np, s)[0], jnp.bfloat16))
        else:
            wei = -1
        return ("resblock", si, wei, w1, r1, b1, g1, w2, r2, b2, g2)

    # ------------------------------ encoder --------------------------------
    enc_ops = []
    s = image_size
    wi, si = conv_idx(params["enc_conv0_w"], s, 5, "e0")
    enc_ops.append(("conv", wi, si, 5))
    ri, bi, gi = bn_idx(s, channels[0], params["enc_bn0_g"], params["enc_bn0_b"], "e0")
    enc_ops.append(("bn", ri, bi, gi))
    enc_ops.append(("act", "lrelu"))
    enc_ops.append(pool_op(s, channels[0]))
    s //= 2
    cin = channels[0]
    for i, ch in enumerate(channels[1:]):
        enc_ops.append(resblock_op(params["enc_blocks"][i], s, cin, ch, f"eb{i}"))
        enc_ops.append(pool_op(s, ch))
        s //= 2
        cin = ch
    enc_ops.append(resblock_op(params["enc_final"], s, cin, cin, "ef"))
    feat, cfeat = s, cin
    chunk = feat * cfeat                         # fc rows per image-row group

    # encoder / decoder heads (torch NCHW .view(N,-1) order folded into weights)
    perm = _nhwc_to_nchw_perm_np(feat, feat, cfeat)
    enc_fc_w = add(("encfcw",), lambda: jnp.asarray(
        np.asarray(params["enc_fc_w"], np.float32)[perm], jnp.bfloat16))
    enc_fc_b = add(("encfcb",), lambda: jnp.asarray(
        np.asarray(params["enc_fc_b"], np.float32).reshape(1, -1), jnp.float32))
    dec_fc_w = add(("decfcw",), lambda: jnp.asarray(
        np.asarray(params["dec_fc_w"], np.float32)[:, perm], jnp.bfloat16))
    dec_fc_b = add(("decfcb",), lambda: jnp.asarray(
        np.asarray(params["dec_fc_b"], np.float32)[perm].reshape(1, -1), jnp.float32))

    sel = np.zeros((feat, batch, batch * feat), np.float32)
    selT = np.zeros((feat, batch * feat, batch), np.float32)
    for hh in range(feat):
        for b in range(batch):
            sel[hh, b, b * feat + hh] = 1.0
            selT[hh, b * feat + hh, b] = 1.0
    enc_sel = add(("encsel",), lambda: jnp.asarray(sel, jnp.bfloat16))
    dec_selT = add(("decselT",), lambda: jnp.asarray(selT, jnp.bfloat16))

    # ------------------------------ decoder --------------------------------
    dec_ops = []
    dch = channels[::-1]
    s = feat
    cin = dch[0]
    for i, ch in enumerate(dch):
        dec_ops.append(resblock_op(params["dec_blocks"][i], s, cin, ch, f"db{i}"))
        dec_ops.append(up_op(s, ch))
        s *= 2
        cin = ch
    dec_ops.append(resblock_op(params["dec_final"], s, cin, cin, "df"))
    wi, si = conv_idx(params["dec_pred_w"], s, 5, "pred")
    dec_ops.append(("conv", wi, si, 5))
    pred_b = np.tile(np.asarray(params["dec_pred_b"], np.float32), s).reshape(1, -1)
    dec_ops.append(("bias", add(("predb",), lambda: jnp.asarray(pred_b, jnp.float32))))
    dec_ops.append(("act", "sigmoid"))

    meta = dict(
        n_inputs=2 + len(consts), x_idx=0, eps_idx=1,
        enc_ops=tuple(enc_ops), dec_ops=tuple(dec_ops),
        feat=feat, latent=latent_dim, fc_chunk=chunk,
        enc_fc_w=enc_fc_w, enc_fc_b=enc_fc_b, enc_sel=enc_sel,
        dec_fc_w=dec_fc_w, dec_fc_b=dec_fc_b, dec_selT=dec_selT,
        batch=batch, image=image_size, in_ch=in_channels,
    )
    return tuple(consts), meta


# ---------------------------------------------------------------------------
# LRAAD forward: a single fused pallas_call
# ---------------------------------------------------------------------------

def lraad_forward(consts, meta, x_nchw, eps):
    n, s, cin, lat = meta["batch"], meta["image"], meta["in_ch"], meta["latent"]
    # NCHW -> lane-dense (N*H, W*C) rows (layout glue only)
    x_ld = jnp.transpose(x_nchw.astype(jnp.float32), (0, 2, 3, 1)).reshape(n * s, s * cin)

    kernel = functools.partial(_lraad_kernel, meta)
    out_shape = (
        jax.ShapeDtypeStruct((n, lat), jnp.float32),
        jax.ShapeDtypeStruct((n, lat), jnp.float32),
        jax.ShapeDtypeStruct((n, lat), jnp.float32),
        jax.ShapeDtypeStruct((n * s, s * cin), jnp.float32),
    )
    mu, logvar, z, rec_ld = pl.pallas_call(
        kernel,
        out_shape=out_shape,
        in_specs=[_VMEM_SPEC] * (2 + len(consts)),
        out_specs=(_VMEM_SPEC, _VMEM_SPEC, _VMEM_SPEC, _VMEM_SPEC),
    )(x_ld, eps.astype(jnp.float32), *consts)

    rec = jnp.transpose(rec_ld.reshape(n, s, s, cin), (0, 3, 1, 2))
    return mu, logvar, z, rec


# ---------------------------------------------------------------------------
# main
# ---------------------------------------------------------------------------

if __name__ == "__main__":
    key = jax.random.PRNGKey(0)
    kp, kx, ke = jax.random.split(key, 3)

    # small config consistent with the module structure:
    # in_channels=3, latent_dim=32, channels=(8,16,16), image_size=16, batch=2
    cfg = dict(in_channels=3, latent_dim=32, channels=(8, 16, 16), image_size=16)
    batch = 2

    params = init_lraad(kp, **cfg)
    consts, meta = build_lraad_program(params, batch, **cfg)

    x = jax.random.normal(kx, (batch, cfg["in_channels"],
                               cfg["image_size"], cfg["image_size"]), jnp.float32)
    eps = jax.random.normal(ke, (batch, cfg["latent_dim"]), jnp.float32)

    fwd = jax.jit(lambda c, xx, ee: lraad_forward(c, meta, xx, ee))
    mu, logvar, z, rec = fwd(consts, x, eps)
    jax.block_until_ready((mu, logvar, z, rec))

    assert mu.shape == (2, 32) and logvar.shape == (2, 32)
    assert z.shape == (2, 32) and rec.shape == (2, 3, 16, 16)
    assert bool(jnp.all(jnp.isfinite(rec)))
    assert bool(jnp.all((rec >= 0.0) & (rec <= 1.0)))   # sigmoid output range
    print("KERNEL_OK")
</pallas_src>

<mosaic_0001>
module attributes {stable_mosaic.version = 11 : i64} {
  func.func @_lraad_kernel(%arg0: memref<32x48xf32, #tpu.memory_space<vmem>>, %arg1: memref<2x32xf32, #tpu.memory_space<vmem>>, %arg2: memref<5x48x128xbf16, #tpu.memory_space<vmem>>, %arg3: memref<5x32x32xbf16, #tpu.memory_space<vmem>>, %arg4: memref<128x8xf32, #tpu.memory_space<vmem>>, %arg5: memref<8x128xf32, #tpu.memory_space<vmem>>, %arg6: memref<2x128xf32, #tpu.memory_space<vmem>>, %arg7: memref<16x32xbf16, #tpu.memory_space<vmem>>, %arg8: memref<128x64xbf16, #tpu.memory_space<vmem>>, %arg9: memref<3x64x128xbf16, #tpu.memory_space<vmem>>, %arg10: memref<3x16x16xbf16, #tpu.memory_space<vmem>>, %arg11: memref<3x128x128xbf16, #tpu.memory_space<vmem>>, %arg12: memref<128x16xf32, #tpu.memory_space<vmem>>, %arg13: memref<16x128xf32, #tpu.memory_space<vmem>>, %arg14: memref<2x128xf32, #tpu.memory_space<vmem>>, %arg15: memref<2x128xf32, #tpu.memory_space<vmem>>, %arg16: memref<64x128xbf16, #tpu.memory_space<vmem>>, %arg17: memref<8x16xbf16, #tpu.memory_space<vmem>>, %arg18: memref<128x64xbf16, #tpu.memory_space<vmem>>, %arg19: memref<3x64x64xbf16, #tpu.memory_space<vmem>>, %arg20: memref<3x8x8xbf16, #tpu.memory_space<vmem>>, %arg21: memref<3x64x64xbf16, #tpu.memory_space<vmem>>, %arg22: memref<64x16xf32, #tpu.memory_space<vmem>>, %arg23: memref<16x64xf32, #tpu.memory_space<vmem>>, %arg24: memref<2x64xf32, #tpu.memory_space<vmem>>, %arg25: memref<2x64xf32, #tpu.memory_space<vmem>>, %arg26: memref<4x8xbf16, #tpu.memory_space<vmem>>, %arg27: memref<64x32xbf16, #tpu.memory_space<vmem>>, %arg28: memref<3x32x32xbf16, #tpu.memory_space<vmem>>, %arg29: memref<3x4x4xbf16, #tpu.memory_space<vmem>>, %arg30: memref<3x32x32xbf16, #tpu.memory_space<vmem>>, %arg31: memref<32x16xf32, #tpu.memory_space<vmem>>, %arg32: memref<16x32xf32, #tpu.memory_space<vmem>>, %arg33: memref<2x32xf32, #tpu.memory_space<vmem>>, %arg34: memref<2x32xf32, #tpu.memory_space<vmem>>, %arg35: memref<64x64xbf16, #tpu.memory_space<vmem>>, %arg36: memref<1x64xf32, #tpu.memory_space<vmem>>, %arg37: memref<32x64xbf16, #tpu.memory_space<vmem>>, %arg38: memref<1x64xf32, #tpu.memory_space<vmem>>, %arg39: memref<2x2x4xbf16, #tpu.memory_space<vmem>>, %arg40: memref<2x4x2xbf16, #tpu.memory_space<vmem>>, %arg41: memref<3x32x32xbf16, #tpu.memory_space<vmem>>, %arg42: memref<3x32x32xbf16, #tpu.memory_space<vmem>>, %arg43: memref<2x32xf32, #tpu.memory_space<vmem>>, %arg44: memref<2x32xf32, #tpu.memory_space<vmem>>, %arg45: memref<8x4xbf16, #tpu.memory_space<vmem>>, %arg46: memref<32x64xbf16, #tpu.memory_space<vmem>>, %arg47: memref<3x64x64xbf16, #tpu.memory_space<vmem>>, %arg48: memref<3x64x64xbf16, #tpu.memory_space<vmem>>, %arg49: memref<2x64xf32, #tpu.memory_space<vmem>>, %arg50: memref<2x64xf32, #tpu.memory_space<vmem>>, %arg51: memref<16x8xbf16, #tpu.memory_space<vmem>>, %arg52: memref<64x128xbf16, #tpu.memory_space<vmem>>, %arg53: memref<3x128x64xbf16, #tpu.memory_space<vmem>>, %arg54: memref<3x64x64xbf16, #tpu.memory_space<vmem>>, %arg55: memref<64x8xf32, #tpu.memory_space<vmem>>, %arg56: memref<8x64xf32, #tpu.memory_space<vmem>>, %arg57: memref<2x64xf32, #tpu.memory_space<vmem>>, %arg58: memref<2x64xf32, #tpu.memory_space<vmem>>, %arg59: memref<128x64xbf16, #tpu.memory_space<vmem>>, %arg60: memref<32x16xbf16, #tpu.memory_space<vmem>>, %arg61: memref<64x128xbf16, #tpu.memory_space<vmem>>, %arg62: memref<3x128x128xbf16, #tpu.memory_space<vmem>>, %arg63: memref<3x32x32xbf16, #tpu.memory_space<vmem>>, %arg64: memref<3x128x128xbf16, #tpu.memory_space<vmem>>, %arg65: memref<2x128xf32, #tpu.memory_space<vmem>>, %arg66: memref<2x128xf32, #tpu.memory_space<vmem>>, %arg67: memref<5x128x48xbf16, #tpu.memory_space<vmem>>, %arg68: memref<1x48xf32, #tpu.memory_space<vmem>>, %arg69: memref<2x32xf32, #tpu.memory_space<vmem>>, %arg70: memref<2x32xf32, #tpu.memory_space<vmem>>, %arg71: memref<2x32xf32, #tpu.memory_space<vmem>>, %arg72: memref<32x48xf32, #tpu.memory_space<vmem>>) attributes {dimension_semantics = [], scalar_prefetch = 0 : i64, scratch_operands = 0 : i64, tpu.core_type = #tpu.core_type<tc>} {
    %c0 = arith.constant 0 : index
    %c0_0 = arith.constant 0 : index
    %0 = vector.load %arg0[%c0, %c0_0] : memref<32x48xf32, #tpu.memory_space<vmem>>, vector<32x48xf32>
    %1 = arith.truncf %0 : vector<32x48xf32> to vector<32x48xbf16>
    %c2 = arith.constant 2 : index
    %c0_1 = arith.constant 0 : index
    %c0_2 = arith.constant 0 : index
    %2 = vector.load %arg2[%c2, %c0_1, %c0_2] : memref<5x48x128xbf16, #tpu.memory_space<vmem>>, vector<1x48x128xbf16>
    %3 = vector.shape_cast %2 : vector<1x48x128xbf16> to vector<48x128xbf16>
    %cst = arith.constant dense<0.000000e+00> : vector<32x128xf32>
    %4 = tpu.matmul %1, %3, %cst {dimension_numbers = #tpu.dot_dimension_numbers<[1], [0], [0], [1], [0, 0, 1, 1], [], []>} : vector<32x48xbf16>, vector<48x128xbf16>, vector<32x128xf32> -> vector<32x128xf32>
    %c0_3 = arith.constant 0 : index
    %c0_4 = arith.constant 0 : index
    %c0_5 = arith.constant 0 : index
    %5 = vector.load %arg3[%c0_3, %c0_4, %c0_5] : memref<5x32x32xbf16, #tpu.memory_space<vmem>>, vector<1x32x32xbf16>
    %6 = vector.shape_cast %5 : vector<1x32x32xbf16> to vector<32x32xbf16>
    %cst_6 = arith.constant dense<0.000000e+00> : vector<32x48xf32>
    %7 = tpu.matmul %6, %1, %cst_6 {dimension_numbers = #tpu.dot_dimension_numbers<[1], [0], [0], [1], [0, 0, 1, 1], [], []>} : vector<32x32xbf16>, vector<32x48xbf16>, vector<32x48xf32> -> vector<32x48xf32>
    %8 = arith.truncf %7 : vector<32x48xf32> to vector<32x48xbf16>
    %c0_7 = arith.constant 0 : index
    %c0_8 = arith.constant 0 : index
    %c0_9 = arith.constant 0 : index
    %9 = vector.load %arg2[%c0_7, %c0_8, %c0_9] : memref<5x48x128xbf16, #tpu.memory_space<vmem>>, vector<1x48x128xbf16>
    %10 = vector.shape_cast %9 : vector<1x48x128xbf16> to vector<48x128xbf16>
    %cst_10 = arith.constant dense<0.000000e+00> : vector<32x128xf32>
    %11 = tpu.matmul %8, %10, %cst_10 {dimension_numbers = #tpu.dot_dimension_numbers<[1], [0], [0], [1], [0, 0, 1, 1], [], []>} : vector<32x48xbf16>, vector<48x128xbf16>, vector<32x128xf32> -> vector<32x128xf32>
    %12 = arith.addf %4, %11 : vector<32x128xf32>
    %c1 = arith.constant 1 : index
    %c0_11 = arith.constant 0 : index
    %c0_12 = arith.constant 0 : index
    %13 = vector.load %arg3[%c1, %c0_11, %c0_12] : memref<5x32x32xbf16, #tpu.memory_space<vmem>>, vector<1x32x32xbf16>
    %14 = vector.shape_cast %13 : vector<1x32x32xbf16> to vector<32x32xbf16>
    %cst_13 = arith.constant dense<0.000000e+00> : vector<32x48xf32>
    %15 = tpu.matmul %14, %1, %cst_13 {dimension_numbers = #tpu.dot_dimension_numbers<[1], [0], [0], [1], [0, 0, 1, 1], [], []>} : vector<32x32xbf16>, vector<32x48xbf16>, vector<32x48xf32> -> vector<32x48xf32>
    %16 = arith.truncf %15 : vector<32x48xf32> to vector<32x48xbf16>
    %c1_14 = arith.constant 1 : index
    %c0_15 = arith.constant 0 : index
    %c0_16 = arith.constant 0 : index
    %17 = vector.load %arg2[%c1_14, %c0_15, %c0_16] : memref<5x48x128xbf16, #tpu.memory_space<vmem>>, vector<1x48x128xbf16>
    %18 = vector.shape_cast %17 : vector<1x48x128xbf16> to vector<48x128xbf16>
    %cst_17 = arith.constant dense<0.000000e+00> : vector<32x128xf32>
    %19 = tpu.matmul %16, %18, %cst_17 {dimension_numbers = #tpu.dot_dimension_numbers<[1], [0], [0], [1], [0, 0, 1, 1], [], []>} : vector<32x48xbf16>, vector<48x128xbf16>, vector<32x128xf32> -> vector<32x128xf32>
    %20 = arith.addf %12, %19 : vector<32x128xf32>
    %c3 = arith.constant 3 : index
    %c0_18 = arith.constant 0 : index
    %c0_19 = arith.constant 0 : index
    %21 = vector.load %arg3[%c3, %c0_18, %c0_19] : memref<5x32x32xbf16, #tpu.memory_space<vmem>>, vector<1x32x32xbf16>
    %22 = vector.shape_cast %21 : vector<1x32x32xbf16> to vector<32x32xbf16>
    %cst_20 = arith.constant dense<0.000000e+00> : vector<32x48xf32>
    %23 = tpu.matmul %22, %1, %cst_20 {dimension_numbers = #tpu.dot_dimension_numbers<[1], [0], [0], [1], [0, 0, 1, 1], [], []>} : vector<32x32xbf16>, vector<32x48xbf16>, vector<32x48xf32> -> vector<32x48xf32>
    %24 = arith.truncf %23 : vector<32x48xf32> to vector<32x48xbf16>
    %c3_21 = arith.constant 3 : index
    %c0_22 = arith.constant 0 : index
    %c0_23 = arith.constant 0 : index
    %25 = vector.load %arg2[%c3_21, %c0_22, %c0_23] : memref<5x48x128xbf16, #tpu.memory_space<vmem>>, vector<1x48x128xbf16>
    %26 = vector.shape_cast %25 : vector<1x48x128xbf16> to vector<48x128xbf16>
    %cst_24 = arith.constant dense<0.000000e+00> : vector<32x128xf32>
    %27 = tpu.matmul %24, %26, %cst_24 {dimension_numbers = #tpu.dot_dimension_numbers<[1], [0], [0], [1], [0, 0, 1, 1], [], []>} : vector<32x48xbf16>, vector<48x128xbf16>, vector<32x128xf32> -> vector<32x128xf32>
    %28 = arith.addf %20, %27 : vector<32x128xf32>
    %c4 = arith.constant 4 : index
    %c0_25 = arith.constant 0 : index
    %c0_26 = arith.constant 0 : index
    %29 = vector.load %arg3[%c4, %c0_25, %c0_26] : memref<5x32x32xbf16, #tpu.memory_space<vmem>>, vector<1x32x32xbf16>
    %30 = vector.shape_cast %29 : vector<1x32x32xbf16> to vector<32x32xbf16>
    %cst_27 = arith.constant dense<0.000000e+00> : vector<32x48xf32>
    %31 = tpu.matmul %30, %1, %cst_27 {dimension_numbers = #tpu.dot_dimension_numbers<[1], [0], [0], [1], [0, 0, 1, 1], [], []>} : vector<32x32xbf16>, vector<32x48xbf16>, vector<32x48xf32> -> vector<32x48xf32>
    %32 = arith.truncf %31 : vector<32x48xf32> to vector<32x48xbf16>
    %c4_28 = arith.constant 4 : index
    %c0_29 = arith.constant 0 : index
    %c0_30 = arith.constant 0 : index
    %33 = vector.load %arg2[%c4_28, %c0_29, %c0_30] : memref<5x48x128xbf16, #tpu.memory_space<vmem>>, vector<1x48x128xbf16>
    %34 = vector.shape_cast %33 : vector<1x48x128xbf16> to vector<48x128xbf16>
    %cst_31 = arith.constant dense<0.000000e+00> : vector<32x128xf32>
    %35 = tpu.matmul %32, %34, %cst_31 {dimension_numbers = #tpu.dot_dimension_numbers<[1], [0], [0], [1], [0, 0, 1, 1], [], []>} : vector<32x48xbf16>, vector<48x128xbf16>, vector<32x128xf32> -> vector<32x128xf32>
    %36 = arith.addf %28, %35 : vector<32x128xf32>
    %c0_32 = arith.constant 0 : index
    %c0_33 = arith.constant 0 : index
    %37 = vector.load %arg4[%c0_32, %c0_33] : memref<128x8xf32, #tpu.memory_space<vmem>>, vector<128x8xf32>
    %c0_34 = arith.constant 0 : index
    %c0_35 = arith.constant 0 : index
    %38 = vector.load %arg5[%c0_34, %c0_35] : memref<8x128xf32, #tpu.memory_space<vmem>>, vector<8x128xf32>
    %c0_36 = arith.constant 0 : index
    %c0_37 = arith.constant 0 : index
    %39 = vector.load %arg6[%c0_36, %c0_37] : memref<2x128xf32, #tpu.memory_space<vmem>>, vector<2x128xf32>
    %cst_38 = arith.constant dense<0.000000e+00> : vector<128xf32>
    %40 = vector.multi_reduction <add>, %36, %cst_38 [0] : vector<32x128xf32> to vector<128xf32>
    %41 = vector.shape_cast %40 : vector<128xf32> to vector<1x128xf32>
    %cst_39 = arith.constant 3.200000e+01 : f32
    %42 = vector.broadcast %cst_39 : f32 to vector<1x128xf32>
    %43 = arith.divf %41, %42 : vector<1x128xf32>
    %cst_40 = arith.constant dense<0.000000e+00> : vector<1x8xf32>
    %44 = tpu.matmul %43, %37, %cst_40 {dimension_numbers = #tpu.dot_dimension_numbers<[1], [0], [0], [1], [0, 0, 1, 1], [], []>} : vector<1x128xf32>, vector<128x8xf32>, vector<1x8xf32> -> vector<1x8xf32>
    %cst_41 = arith.constant dense<0.000000e+00> : vector<1x128xf32>
    %45 = tpu.matmul %44, %38, %cst_41 {dimension_numbers = #tpu.dot_dimension_numbers<[1], [0], [0], [1], [0, 0, 1, 1], [], []>} : vector<1x8xf32>, vector<8x128xf32>, vector<1x128xf32> -> vector<1x128xf32>
    %46 = vector.broadcast %45 : vector<1x128xf32> to vector<32x128xf32>
    %47 = arith.subf %36, %46 : vector<32x128xf32>
    %48 = arith.mulf %47, %47 : vector<32x128xf32>
    %cst_42 = arith.constant dense<0.000000e+00> : vector<128xf32>
    %49 = vector.multi_reduction <add>, %48, %cst_42 [0] : vector<32x128xf32> to vector<128xf32>
    %50 = vector.shape_cast %49 : vector<128xf32> to vector<1x128xf32>
    %cst_43 = arith.constant 3.200000e+01 : f32
    %51 = vector.broadcast %cst_43 : f32 to vector<1x128xf32>
    %52 = arith.divf %50, %51 : vector<1x128xf32>
    %cst_44 = arith.constant dense<0.000000e+00> : vector<1x8xf32>
    %53 = tpu.matmul %52, %37, %cst_44 {dimension_numbers = #tpu.dot_dimension_numbers<[1], [0], [0], [1], [0, 0, 1, 1], [], []>} : vector<1x128xf32>, vector<128x8xf32>, vector<1x8xf32> -> vector<1x8xf32>
    %cst_45 = arith.constant dense<0.000000e+00> : vector<1x128xf32>
    %54 = tpu.matmul %53, %38, %cst_45 {dimension_numbers = #tpu.dot_dimension_numbers<[1], [0], [0], [1], [0, 0, 1, 1], [], []>} : vector<1x8xf32>, vector<8x128xf32>, vector<1x128xf32> -> vector<1x128xf32>
    %cst_46 = arith.constant 9.99999974E-6 : f32
    %55 = vector.broadcast %cst_46 : f32 to vector<1x128xf32>
    %56 = arith.addf %54, %55 : vector<1x128xf32>
    %57 = math.rsqrt %56 : vector<1x128xf32>
    %58 = vector.broadcast %57 : vector<1x128xf32> to vector<32x128xf32>
    %59 = arith.mulf %47, %58 : vector<32x128xf32>
    %60 = vector.extract_strided_slice %39 {offsets = [0, 0], sizes = [1, 128], strides = [1, 1]} : vector<2x128xf32> to vector<1x128xf32>
    %61 = vector.broadcast %60 : vector<1x128xf32> to vector<32x128xf32>
    %62 = arith.mulf %59, %61 : vector<32x128xf32>
    %63 = vector.extract_strided_slice %39 {offsets = [1, 0], sizes = [1, 128], strides = [1, 1]} : vector<2x128xf32> to vector<1x128xf32>
    %64 = vector.broadcast %63 : vector<1x128xf32> to vector<32x128xf32>
    %65 = arith.addf %62, %64 : vector<32x128xf32>
    %cst_47 = arith.constant 0.000000e+00 : f32
    %66 = vector.broadcast %cst_47 : f32 to vector<32x128xf32>
    %67 = arith.cmpf oge, %65, %66 : vector<32x128xf32>
    %cst_48 = arith.constant 2.000000e-01 : f32
    %68 = vector.broadcast %cst_48 : f32 to vector<32x128xf32>
    %69 = arith.mulf %68, %65 : vector<32x128xf32>
    %70 = arith.select %67, %65, %69 : vector<32x128xi1>, vector<32x128xf32>
    %c0_49 = arith.constant 0 : index
    %c0_50 = arith.constant 0 : index
    %71 = vector.load %arg7[%c0_49, %c0_50] : memref<16x32xbf16, #tpu.memory_space<vmem>>, vector<16x32xbf16>
    %72 = arith.truncf %70 : vector<32x128xf32> to vector<32x128xbf16>
    %cst_51 = arith.constant dense<0.000000e+00> : vector<16x128xf32>
    %73 = tpu.matmul %71, %72, %cst_51 {dimension_numbers = #tpu.dot_dimension_numbers<[1], [0], [0], [1], [0, 0, 1, 1], [], []>} : vector<16x32xbf16>, vector<32x128xbf16>, vector<16x128xf32> -> vector<16x128xf32>
    %74 = arith.truncf %73 : vector<16x128xf32> to vector<16x128xbf16>
    %c0_52 = arith.constant 0 : index
    %c0_53 = arith.constant 0 : index
    %75 = vector.load %arg8[%c0_52, %c0_53] : memref<128x64xbf16, #tpu.memory_space<vmem>>, vector<128x64xbf16>
    %cst_54 = arith.constant dense<0.000000e+00> : vector<16x64xf32>
    %76 = tpu.matmul %74, %75, %cst_54 {dimension_numbers = #tpu.dot_dimension_numbers<[1], [0], [0], [1], [0, 0, 1, 1], [], []>} : vector<16x128xbf16>, vector<128x64xbf16>, vector<16x64xf32> -> vector<16x64xf32>
    %77 = arith.truncf %76 : vector<16x64xf32> to vector<16x64xbf16>
    %c0_55 = arith.constant 0 : index
    %c0_56 = arith.constant 0 : index
    %78 = vector.load %arg16[%c0_55, %c0_56] : memref<64x128xbf16, #tpu.memory_space<vmem>>, vector<64x128xbf16>
    %cst_57 = arith.constant dense<0.000000e+00> : vector<16x128xf32>
    %79 = tpu.matmul %77, %78, %cst_57 {dimension_numbers = #tpu.dot_dimension_numbers<[1], [0], [0], [1], [0, 0, 1, 1], [], []>} : vector<16x64xbf16>, vector<64x128xbf16>, vector<16x128xf32> -> vector<16x128xf32>
    %80 = arith.truncf %76 : vector<16x64xf32> to vector<16x64xbf16>
    %c1_58 = arith.constant 1 : index
    %c0_59 = arith.constant 0 : index
    %c0_60 = arith.constant 0 : index
    %81 = vector.load %arg9[%c1_58, %c0_59, %c0_60] : memref<3x64x128xbf16, #tpu.memory_space<vmem>>, vector<1x64x128xbf16>
    %82 = vector.shape_cast %81 : vector<1x64x128xbf16> to vector<64x128xbf16>
    %cst_61 = arith.constant dense<0.000000e+00> : vector<16x128xf32>
    %83 = tpu.matmul %80, %82, %cst_61 {dimension_numbers = #tpu.dot_dimension_numbers<[1], [0], [0], [1], [0, 0, 1, 1], [], []>} : vector<16x64xbf16>, vector<64x128xbf16>, vector<16x128xf32> -> vector<16x128xf32>
    %c0_62 = arith.constant 0 : index
    %c0_63 = arith.constant 0 : index
    %c0_64 = arith.constant 0 : index
    %84 = vector.load %arg10[%c0_62, %c0_63, %c0_64] : memref<3x16x16xbf16, #tpu.memory_space<vmem>>, vector<1x16x16xbf16>
    %85 = vector.shape_cast %84 : vector<1x16x16xbf16> to vector<16x16xbf16>
    %cst_65 = arith.constant dense<0.000000e+00> : vector<16x64xf32>
    %86 = tpu.matmul %85, %80, %cst_65 {dimension_numbers = #tpu.dot_dimension_numbers<[1], [0], [0], [1], [0, 0, 1, 1], [], []>} : vector<16x16xbf16>, vector<16x64xbf16>, vector<16x64xf32> -> vector<16x64xf32>
    %87 = arith.truncf %86 : vector<16x64xf32> to vector<16x64xbf16>
    %c0_66 = arith.constant 0 : index
    %c0_67 = arith.constant 0 : index
    %c0_68 = arith.constant 0 : index
    %88 = vector.load %arg9[%c0_66, %c0_67, %c0_68] : memref<3x64x128xbf16, #tpu.memory_space<vmem>>, vector<1x64x128xbf16>
    %89 = vector.shape_cast %88 : vector<1x64x128xbf16> to vector<64x128xbf16>
    %cst_69 = arith.constant dense<0.000000e+00> : vector<16x128xf32>
    %90 = tpu.matmul %87, %89, %cst_69 {dimension_numbers = #tpu.dot_dimension_numbers<[1], [0], [0], [1], [0, 0, 1, 1], [], []>} : vector<16x64xbf16>, vector<64x128xbf16>, vector<16x128xf32> -> vector<16x128xf32>
    %91 = arith.addf %83, %90 : vector<16x128xf32>
    %c2_70 = arith.constant 2 : index
    %c0_71 = arith.constant 0 : index
    %c0_72 = arith.constant 0 : index
    %92 = vector.load %arg10[%c2_70, %c0_71, %c0_72] : memref<3x16x16xbf16, #tpu.memory_space<vmem>>, vector<1x16x16xbf16>
    %93 = vector.shape_cast %92 : vector<1x16x16xbf16> to vector<16x16xbf16>
    %cst_73 = arith.constant dense<0.000000e+00> : vector<16x64xf32>
    %94 = tpu.matmul %93, %80, %cst_73 {dimension_numbers = #tpu.dot_dimension_numbers<[1], [0], [0], [1], [0, 0, 1, 1], [], []>} : vector<16x16xbf16>, vector<16x64xbf16>, vector<16x64xf32> -> vector<16x64xf32>
    %95 = arith.truncf %94 : vector<16x64xf32> to vector<16x64xbf16>
    %c2_74 = arith.constant 2 : index
    %c0_75 = arith.constant 0 : index
    %c0_76 = arith.constant 0 : index
    %96 = vector.load %arg9[%c2_74, %c0_75, %c0_76] : memref<3x64x128xbf16, #tpu.memory_space<vmem>>, vector<1x64x128xbf16>
    %97 = vector.shape_cast %96 : vector<1x64x128xbf16> to vector<64x128xbf16>
    %cst_77 = arith.constant dense<0.000000e+00> : vector<16x128xf32>
    %98 = tpu.matmul %95, %97, %cst_77 {dimension_numbers = #tpu.dot_dimension_numbers<[1], [0], [0], [1], [0, 0, 1, 1], [], []>} : vector<16x64xbf16>, vector<64x128xbf16>, vector<16x128xf32> -> vector<16x128xf32>
    %99 = arith.addf %91, %98 : vector<16x128xf32>
    %c0_78 = arith.constant 0 : index
    %c0_79 = arith.constant 0 : index
    %100 = vector.load %arg12[%c0_78, %c0_79] : memref<128x16xf32, #tpu.memory_space<vmem>>, vector<128x16xf32>
    %c0_80 = arith.constant 0 : index
    %c0_81 = arith.constant 0 : index
    %101 = vector.load %arg13[%c0_80, %c0_81] : memref<16x128xf32, #tpu.memory_space<vmem>>, vector<16x128xf32>
    %c0_82 = arith.constant 0 : index
    %c0_83 = arith.constant 0 : index
    %102 = vector.load %arg14[%c0_82, %c0_83] : memref<2x128xf32, #tpu.memory_space<vmem>>, vector<2x128xf32>
    %cst_84 = arith.constant dense<0.000000e+00> : vector<128xf32>
    %103 = vector.multi_reduction <add>, %99, %cst_84 [0] : vector<16x128xf32> to vector<128xf32>
    %104 = vector.shape_cast %103 : vector<128xf32> to vector<1x128xf32>
    %cst_85 = arith.constant 1.600000e+01 : f32
    %105 = vector.broadcast %cst_85 : f32 to vector<1x128xf32>
    %106 = arith.divf %104, %105 : vector<1x128xf32>
    %cst_86 = arith.constant dense<0.000000e+00> : vector<1x16xf32>
    %107 = tpu.matmul %106, %100, %cst_86 {dimension_numbers = #tpu.dot_dimension_numbers<[1], [0], [0], [1], [0, 0, 1, 1], [], []>} : vector<1x128xf32>, vector<128x16xf32>, vector<1x16xf32> -> vector<1x16xf32>
    %cst_87 = arith.constant dense<0.000000e+00> : vector<1x128xf32>
    %108 = tpu.matmul %107, %101, %cst_87 {dimension_numbers = #tpu.dot_dimension_numbers<[1], [0], [0], [1], [0, 0, 1, 1], [], []>} : vector<1x16xf32>, vector<16x128xf32>, vector<1x128xf32> -> vector<1x128xf32>
    %109 = vector.broadcast %108 : vector<1x128xf32> to vector<16x128xf32>
    %110 = arith.subf %99, %109 : vector<16x128xf32>
    %111 = arith.mulf %110, %110 : vector<16x128xf32>
    %cst_88 = arith.constant dense<0.000000e+00> : vector<128xf32>
    %112 = vector.multi_reduction <add>, %111, %cst_88 [0] : vector<16x128xf32> to vector<128xf32>
    %113 = vector.shape_cast %112 : vector<128xf32> to vector<1x128xf32>
    %cst_89 = arith.constant 1.600000e+01 : f32
    %114 = vector.broadcast %cst_89 : f32 to vector<1x128xf32>
    %115 = arith.divf %113, %114 : vector<1x128xf32>
    %cst_90 = arith.constant dense<0.000000e+00> : vector<1x16xf32>
    %116 = tpu.matmul %115, %100, %cst_90 {dimension_numbers = #tpu.dot_dimension_numbers<[1], [0], [0], [1], [0, 0, 1, 1], [], []>} : vector<1x128xf32>, vector<128x16xf32>, vector<1x16xf32> -> vector<1x16xf32>
    %cst_91 = arith.constant dense<0.000000e+00> : vector<1x128xf32>
    %117 = tpu.matmul %116, %101, %cst_91 {dimension_numbers = #tpu.dot_dimension_numbers<[1], [0], [0], [1], [0, 0, 1, 1], [], []>} : vector<1x16xf32>, vector<16x128xf32>, vector<1x128xf32> -> vector<1x128xf32>
    %cst_92 = arith.constant 9.99999974E-6 : f32
    %118 = vector.broadcast %cst_92 : f32 to vector<1x128xf32>
    %119 = arith.addf %117, %118 : vector<1x128xf32>
    %120 = math.rsqrt %119 : vector<1x128xf32>
    %121 = vector.broadcast %120 : vector<1x128xf32> to vector<16x128xf32>
    %122 = arith.mulf %110, %121 : vector<16x128xf32>
    %123 = vector.extract_strided_slice %102 {offsets = [0, 0], sizes = [1, 128], strides = [1, 1]} : vector<2x128xf32> to vector<1x128xf32>
    %124 = vector.broadcast %123 : vector<1x128xf32> to vector<16x128xf32>
    %125 = arith.mulf %122, %124 : vector<16x128xf32>
    %126 = vector.extract_strided_slice %102 {offsets = [1, 0], sizes = [1, 128], strides = [1, 1]} : vector<2x128xf32> to vector<1x128xf32>
    %127 = vector.broadcast %126 : vector<1x128xf32> to vector<16x128xf32>
    %128 = arith.addf %125, %127 : vector<16x128xf32>
    %cst_93 = arith.constant 0.000000e+00 : f32
    %129 = vector.broadcast %cst_93 : f32 to vector<16x128xf32>
    %130 = arith.cmpf oge, %128, %129 : vector<16x128xf32>
    %cst_94 = arith.constant 2.000000e-01 : f32
    %131 = vector.broadcast %cst_94 : f32 to vector<16x128xf32>
    %132 = arith.mulf %131, %128 : vector<16x128xf32>
    %133 = arith.select %130, %128, %132 : vector<16x128xi1>, vector<16x128xf32>
    %134 = arith.truncf %133 : vector<16x128xf32> to vector<16x128xbf16>
    %c1_95 = arith.constant 1 : index
    %c0_96 = arith.constant 0 : index
    %c0_97 = arith.constant 0 : index
    %135 = vector.load %arg11[%c1_95, %c0_96, %c0_97] : memref<3x128x128xbf16, #tpu.memory_space<vmem>>, vector<1x128x128xbf16>
    %136 = vector.shape_cast %135 : vector<1x128x128xbf16> to vector<128x128xbf16>
    %cst_98 = arith.constant dense<0.000000e+00> : vector<16x128xf32>
    %137 = tpu.matmul %134, %136, %cst_98 {dimension_numbers = #tpu.dot_dimension_numbers<[1], [0], [0], [1], [0, 0, 1, 1], [], []>} : vector<16x128xbf16>, vector<128x128xbf16>, vector<16x128xf32> -> vector<16x128xf32>
    %c0_99 = arith.constant 0 : index
    %c0_100 = arith.constant 0 : index
    %c0_101 = arith.constant 0 : index
    %138 = vector.load %arg10[%c0_99, %c0_100, %c0_101] : memref<3x16x16xbf16, #tpu.memory_space<vmem>>, vector<1x16x16xbf16>
    %139 = vector.shape_cast %138 : vector<1x16x16xbf16> to vector<16x16xbf16>
    %cst_102 = arith.constant dense<0.000000e+00> : vector<16x128xf32>
    %140 = tpu.matmul %139, %134, %cst_102 {dimension_numbers = #tpu.dot_dimension_numbers<[1], [0], [0], [1], [0, 0, 1, 1], [], []>} : vector<16x16xbf16>, vector<16x128xbf16>, vector<16x128xf32> -> vector<16x128xf32>
    %141 = arith.truncf %140 : vector<16x128xf32> to vector<16x128xbf16>
    %c0_103 = arith.constant 0 : index
    %c0_104 = arith.constant 0 : index
    %c0_105 = arith.constant 0 : index
    %142 = vector.load %arg11[%c0_103, %c0_104, %c0_105] : memref<3x128x128xbf16, #tpu.memory_space<vmem>>, vector<1x128x128xbf16>
    %143 = vector.shape_cast %142 : vector<1x128x128xbf16> to vector<128x128xbf16>
    %cst_106 = arith.constant dense<0.000000e+00> : vector<16x128xf32>
    %144 = tpu.matmul %141, %143, %cst_106 {dimension_numbers = #tpu.dot_dimension_numbers<[1], [0], [0], [1], [0, 0, 1, 1], [], []>} : vector<16x128xbf16>, vector<128x128xbf16>, vector<16x128xf32> -> vector<16x128xf32>
    %145 = arith.addf %137, %144 : vector<16x128xf32>
    %c2_107 = arith.constant 2 : index
    %c0_108 = arith.constant 0 : index
    %c0_109 = arith.constant 0 : index
    %146 = vector.load %arg10[%c2_107, %c0_108, %c0_109] : memref<3x16x16xbf16, #tpu.memory_space<vmem>>, vector<1x16x16xbf16>
    %147 = vector.shape_cast %146 : vector<1x16x16xbf16> to vector<16x16xbf16>
    %cst_110 = arith.constant dense<0.000000e+00> : vector<16x128xf32>
    %148 = tpu.matmul %147, %134, %cst_110 {dimension_numbers = #tpu.dot_dimension_numbers<[1], [0], [0], [1], [0, 0, 1, 1], [], []>} : vector<16x16xbf16>, vector<16x128xbf16>, vector<16x128xf32> -> vector<16x128xf32>
    %149 = arith.truncf %148 : vector<16x128xf32> to vector<16x128xbf16>
    %c2_111 = arith.constant 2 : index
    %c0_112 = arith.constant 0 : index
    %c0_113 = arith.constant 0 : index
    %150 = vector.load %arg11[%c2_111, %c0_112, %c0_113] : memref<3x128x128xbf16, #tpu.memory_space<vmem>>, vector<1x128x128xbf16>
    %151 = vector.shape_cast %150 : vector<1x128x128xbf16> to vector<128x128xbf16>
    %cst_114 = arith.constant dense<0.000000e+00> : vector<16x128xf32>
    %152 = tpu.matmul %149, %151, %cst_114 {dimension_numbers = #tpu.dot_dimension_numbers<[1], [0], [0], [1], [0, 0, 1, 1], [], []>} : vector<16x128xbf16>, vector<128x128xbf16>, vector<16x128xf32> -> vector<16x128xf32>
    %153 = arith.addf %145, %152 : vector<16x128xf32>
    %154 = arith.addf %153, %79 : vector<16x128xf32>
    %c0_115 = arith.constant 0 : index
    %c0_116 = arith.constant 0 : index
    %155 = vector.load %arg12[%c0_115, %c0_116] : memref<128x16xf32, #tpu.memory_space<vmem>>, vector<128x16xf32>
    %c0_117 = arith.constant 0 : index
    %c0_118 = arith.constant 0 : index
    %156 = vector.load %arg13[%c0_117, %c0_118] : memref<16x128xf32, #tpu.memory_space<vmem>>, vector<16x128xf32>
    %c0_119 = arith.constant 0 : index
    %c0_120 = arith.constant 0 : index
    %157 = vector.load %arg15[%c0_119, %c0_120] : memref<2x128xf32, #tpu.memory_space<vmem>>, vector<2x128xf32>
    %cst_121 = arith.constant dense<0.000000e+00> : vector<128xf32>
    %158 = vector.multi_reduction <add>, %154, %cst_121 [0] : vector<16x128xf32> to vector<128xf32>
    %159 = vector.shape_cast %158 : vector<128xf32> to vector<1x128xf32>
    %cst_122 = arith.constant 1.600000e+01 : f32
    %160 = vector.broadcast %cst_122 : f32 to vector<1x128xf32>
    %161 = arith.divf %159, %160 : vector<1x128xf32>
    %cst_123 = arith.constant dense<0.000000e+00> : vector<1x16xf32>
    %162 = tpu.matmul %161, %155, %cst_123 {dimension_numbers = #tpu.dot_dimension_numbers<[1], [0], [0], [1], [0, 0, 1, 1], [], []>} : vector<1x128xf32>, vector<128x16xf32>, vector<1x16xf32> -> vector<1x16xf32>
    %cst_124 = arith.constant dense<0.000000e+00> : vector<1x128xf32>
    %163 = tpu.matmul %162, %156, %cst_124 {dimension_numbers = #tpu.dot_dimension_numbers<[1], [0], [0], [1], [0, 0, 1, 1], [], []>} : vector<1x16xf32>, vector<16x128xf32>, vector<1x128xf32> -> vector<1x128xf32>
    %164 = vector.broadcast %163 : vector<1x128xf32> to vector<16x128xf32>
    %165 = arith.subf %154, %164 : vector<16x128xf32>
    %166 = arith.mulf %165, %165 : vector<16x128xf32>
    %cst_125 = arith.constant dense<0.000000e+00> : vector<128xf32>
    %167 = vector.multi_reduction <add>, %166, %cst_125 [0] : vector<16x128xf32> to vector<128xf32>
    %168 = vector.shape_cast %167 : vector<128xf32> to vector<1x128xf32>
    %cst_126 = arith.constant 1.600000e+01 : f32
    %169 = vector.broadcast %cst_126 : f32 to vector<1x128xf32>
    %170 = arith.divf %168, %169 : vector<1x128xf32>
    %cst_127 = arith.constant dense<0.000000e+00> : vector<1x16xf32>
    %171 = tpu.matmul %170, %155, %cst_127 {dimension_numbers = #tpu.dot_dimension_numbers<[1], [0], [0], [1], [0, 0, 1, 1], [], []>} : vector<1x128xf32>, vector<128x16xf32>, vector<1x16xf32> -> vector<1x16xf32>
    %cst_128 = arith.constant dense<0.000000e+00> : vector<1x128xf32>
    %172 = tpu.matmul %171, %156, %cst_128 {dimension_numbers = #tpu.dot_dimension_numbers<[1], [0], [0], [1], [0, 0, 1, 1], [], []>} : vector<1x16xf32>, vector<16x128xf32>, vector<1x128xf32> -> vector<1x128xf32>
    %cst_129 = arith.constant 9.99999974E-6 : f32
    %173 = vector.broadcast %cst_129 : f32 to vector<1x128xf32>
    %174 = arith.addf %172, %173 : vector<1x128xf32>
    %175 = math.rsqrt %174 : vector<1x128xf32>
    %176 = vector.broadcast %175 : vector<1x128xf32> to vector<16x128xf32>
    %177 = arith.mulf %165, %176 : vector<16x128xf32>
    %178 = vector.extract_strided_slice %157 {offsets = [0, 0], sizes = [1, 128], strides = [1, 1]} : vector<2x128xf32> to vector<1x128xf32>
    %179 = vector.broadcast %178 : vector<1x128xf32> to vector<16x128xf32>
    %180 = arith.mulf %177, %179 : vector<16x128xf32>
    %181 = vector.extract_strided_slice %157 {offsets = [1, 0], sizes = [1, 128], strides = [1, 1]} : vector<2x128xf32> to vector<1x128xf32>
    %182 = vector.broadcast %181 : vector<1x128xf32> to vector<16x128xf32>
    %183 = arith.addf %180, %182 : vector<16x128xf32>
    %cst_130 = arith.constant 0.000000e+00 : f32
    %184 = vector.broadcast %cst_130 : f32 to vector<16x128xf32>
    %185 = arith.cmpf oge, %183, %184 : vector<16x128xf32>
    %cst_131 = arith.constant 2.000000e-01 : f32
    %186 = vector.broadcast %cst_131 : f32 to vector<16x128xf32>
    %187 = arith.mulf %186, %183 : vector<16x128xf32>
    %188 = arith.select %185, %183, %187 : vector<16x128xi1>, vector<16x128xf32>
    %c0_132 = arith.constant 0 : index
    %c0_133 = arith.constant 0 : index
    %189 = vector.load %arg17[%c0_132, %c0_133] : memref<8x16xbf16, #tpu.memory_space<vmem>>, vector<8x16xbf16>
    %190 = arith.truncf %188 : vector<16x128xf32> to vector<16x128xbf16>
    %cst_134 = arith.constant dense<0.000000e+00> : vector<8x128xf32>
    %191 = tpu.matmul %189, %190, %cst_134 {dimension_numbers = #tpu.dot_dimension_numbers<[1], [0], [0], [1], [0, 0, 1, 1], [], []>} : vector<8x16xbf16>, vector<16x128xbf16>, vector<8x128xf32> -> vector<8x128xf32>
    %192 = arith.truncf %191 : vector<8x128xf32> to vector<8x128xbf16>
    %c0_135 = arith.constant 0 : index
    %c0_136 = arith.constant 0 : index
    %193 = vector.load %arg18[%c0_135, %c0_136] : memref<128x64xbf16, #tpu.memory_space<vmem>>, vector<128x64xbf16>
    %cst_137 = arith.constant dense<0.000000e+00> : vector<8x64xf32>
    %194 = tpu.matmul %192, %193, %cst_137 {dimension_numbers = #tpu.dot_dimension_numbers<[1], [0], [0], [1], [0, 0, 1, 1], [], []>} : vector<8x128xbf16>, vector<128x64xbf16>, vector<8x64xf32> -> vector<8x64xf32>
    %195 = arith.truncf %194 : vector<8x64xf32> to vector<8x64xbf16>
    %c1_138 = arith.constant 1 : index
    %c0_139 = arith.constant 0 : index
    %c0_140 = arith.constant 0 : index
    %196 = vector.load %arg19[%c1_138, %c0_139, %c0_140] : memref<3x64x64xbf16, #tpu.memory_space<vmem>>, vector<1x64x64xbf16>
    %197 = vector.shape_cast %196 : vector<1x64x64xbf16> to vector<64x64xbf16>
    %cst_141 = arith.constant dense<0.000000e+00> : vector<8x64xf32>
    %198 = tpu.matmul %195, %197, %cst_141 {dimension_numbers = #tpu.dot_dimension_numbers<[1], [0], [0], [1], [0, 0, 1, 1], [], []>} : vector<8x64xbf16>, vector<64x64xbf16>, vector<8x64xf32> -> vector<8x64xf32>
    %c0_142 = arith.constant 0 : index
    %c0_143 = arith.constant 0 : index
    %c0_144 = arith.constant 0 : index
    %199 = vector.load %arg20[%c0_142, %c0_143, %c0_144] : memref<3x8x8xbf16, #tpu.memory_space<vmem>>, vector<1x8x8xbf16>
    %200 = vector.shape_cast %199 : vector<1x8x8xbf16> to vector<8x8xbf16>
    %cst_145 = arith.constant dense<0.000000e+00> : vector<8x64xf32>
    %201 = tpu.matmul %200, %195, %cst_145 {dimension_numbers = #tpu.dot_dimension_numbers<[1], [0], [0], [1], [0, 0, 1, 1], [], []>} : vector<8x8xbf16>, vector<8x64xbf16>, vector<8x64xf32> -> vector<8x64xf32>
    %202 = arith.truncf %201 : vector<8x64xf32> to vector<8x64xbf16>
    %c0_146 = arith.constant 0 : index
    %c0_147 = arith.constant 0 : index
    %c0_148 = arith.constant 0 : index
    %203 = vector.load %arg19[%c0_146, %c0_147, %c0_148] : memref<3x64x64xbf16, #tpu.memory_space<vmem>>, vector<1x64x64xbf16>
    %204 = vector.shape_cast %203 : vector<1x64x64xbf16> to vector<64x64xbf16>
    %cst_149 = arith.constant dense<0.000000e+00> : vector<8x64xf32>
    %205 = tpu.matmul %202, %204, %cst_149 {dimension_numbers = #tpu.dot_dimension_numbers<[1], [0], [0], [1], [0, 0, 1, 1], [], []>} : vector<8x64xbf16>, vector<64x64xbf16>, vector<8x64xf32> -> vector<8x64xf32>
    %206 = arith.addf %198, %205 : vector<8x64xf32>
    %c2_150 = arith.constant 2 : index
    %c0_151 = arith.constant 0 : index
    %c0_152 = arith.constant 0 : index
    %207 = vector.load %arg20[%c2_150, %c0_151, %c0_152] : memref<3x8x8xbf16, #tpu.memory_space<vmem>>, vector<1x8x8xbf16>
    %208 = vector.shape_cast %207 : vector<1x8x8xbf16> to vector<8x8xbf16>
    %cst_153 = arith.constant dense<0.000000e+00> : vector<8x64xf32>
    %209 = tpu.matmul %208, %195, %cst_153 {dimension_numbers = #tpu.dot_dimension_numbers<[1], [0], [0], [1], [0, 0, 1, 1], [], []>} : vector<8x8xbf16>, vector<8x64xbf16>, vector<8x64xf32> -> vector<8x64xf32>
    %210 = arith.truncf %209 : vector<8x64xf32> to vector<8x64xbf16>
    %c2_154 = arith.constant 2 : index
    %c0_155 = arith.constant 0 : index
    %c0_156 = arith.constant 0 : index
    %211 = vector.load %arg19[%c2_154, %c0_155, %c0_156] : memref<3x64x64xbf16, #tpu.memory_space<vmem>>, vector<1x64x64xbf16>
    %212 = vector.shape_cast %211 : vector<1x64x64xbf16> to vector<64x64xbf16>
    %cst_157 = arith.constant dense<0.000000e+00> : vector<8x64xf32>
    %213 = tpu.matmul %210, %212, %cst_157 {dimension_numbers = #tpu.dot_dimension_numbers<[1], [0], [0], [1], [0, 0, 1, 1], [], []>} : vector<8x64xbf16>, vector<64x64xbf16>, vector<8x64xf32> -> vector<8x64xf32>
    %214 = arith.addf %206, %213 : vector<8x64xf32>
    %c0_158 = arith.constant 0 : index
    %c0_159 = arith.constant 0 : index
    %215 = vector.load %arg22[%c0_158, %c0_159] : memref<64x16xf32, #tpu.memory_space<vmem>>, vector<64x16xf32>
    %c0_160 = arith.constant 0 : index
    %c0_161 = arith.constant 0 : index
    %216 = vector.load %arg23[%c0_160, %c0_161] : memref<16x64xf32, #tpu.memory_space<vmem>>, vector<16x64xf32>
    %c0_162 = arith.constant 0 : index
    %c0_163 = arith.constant 0 : index
    %217 = vector.load %arg24[%c0_162, %c0_163] : memref<2x64xf32, #tpu.memory_space<vmem>>, vector<2x64xf32>
    %cst_164 = arith.constant dense<0.000000e+00> : vector<64xf32>
    %218 = vector.multi_reduction <add>, %214, %cst_164 [0] : vector<8x64xf32> to vector<64xf32>
    %219 = vector.shape_cast %218 : vector<64xf32> to vector<1x64xf32>
    %cst_165 = arith.constant 8.000000e+00 : f32
    %220 = vector.broadcast %cst_165 : f32 to vector<1x64xf32>
    %221 = arith.divf %219, %220 : vector<1x64xf32>
    %cst_166 = arith.constant dense<0.000000e+00> : vector<1x16xf32>
    %222 = tpu.matmul %221, %215, %cst_166 {dimension_numbers = #tpu.dot_dimension_numbers<[1], [0], [0], [1], [0, 0, 1, 1], [], []>} : vector<1x64xf32>, vector<64x16xf32>, vector<1x16xf32> -> vector<1x16xf32>
    %cst_167 = arith.constant dense<0.000000e+00> : vector<1x64xf32>
    %223 = tpu.matmul %222, %216, %cst_167 {dimension_numbers = #tpu.dot_dimension_numbers<[1], [0], [0], [1], [0, 0, 1, 1], [], []>} : vector<1x16xf32>, vector<16x64xf32>, vector<1x64xf32> -> vector<1x64xf32>
    %224 = vector.broadcast %223 : vector<1x64xf32> to vector<8x64xf32>
    %225 = arith.subf %214, %224 : vector<8x64xf32>
    %226 = arith.mulf %225, %225 : vector<8x64xf32>
    %cst_168 = arith.constant dense<0.000000e+00> : vector<64xf32>
    %227 = vector.multi_reduction <add>, %226, %cst_168 [0] : vector<8x64xf32> to vector<64xf32>
    %228 = vector.shape_cast %227 : vector<64xf32> to vector<1x64xf32>
    %cst_169 = arith.constant 8.000000e+00 : f32
    %229 = vector.broadcast %cst_169 : f32 to vector<1x64xf32>
    %230 = arith.divf %228, %229 : vector<1x64xf32>
    %cst_170 = arith.constant dense<0.000000e+00> : vector<1x16xf32>
    %231 = tpu.matmul %230, %215, %cst_170 {dimension_numbers = #tpu.dot_dimension_numbers<[1], [0], [0], [1], [0, 0, 1, 1], [], []>} : vector<1x64xf32>, vector<64x16xf32>, vector<1x16xf32> -> vector<1x16xf32>
    %cst_171 = arith.constant dense<0.000000e+00> : vector<1x64xf32>
    %232 = tpu.matmul %231, %216, %cst_171 {dimension_numbers = #tpu.dot_dimension_numbers<[1], [0], [0], [1], [0, 0, 1, 1], [], []>} : vector<1x16xf32>, vector<16x64xf32>, vector<1x64xf32> -> vector<1x64xf32>
    %cst_172 = arith.constant 9.99999974E-6 : f32
    %233 = vector.broadcast %cst_172 : f32 to vector<1x64xf32>
    %234 = arith.addf %232, %233 : vector<1x64xf32>
    %235 = math.rsqrt %234 : vector<1x64xf32>
    %236 = vector.broadcast %235 : vector<1x64xf32> to vector<8x64xf32>
    %237 = arith.mulf %225, %236 : vector<8x64xf32>
    %238 = vector.extract_strided_slice %217 {offsets = [0, 0], sizes = [1, 64], strides = [1, 1]} : vector<2x64xf32> to vector<1x64xf32>
    %239 = vector.broadcast %238 : vector<1x64xf32> to vector<8x64xf32>
    %240 = arith.mulf %237, %239 : vector<8x64xf32>
    %241 = vector.extract_strided_slice %217 {offsets = [1, 0], sizes = [1, 64], strides = [1, 1]} : vector<2x64xf32> to vector<1x64xf32>
    %242 = vector.broadcast %241 : vector<1x64xf32> to vector<8x64xf32>
    %243 = arith.addf %240, %242 : vector<8x64xf32>
    %cst_173 = arith.constant 0.000000e+00 : f32
    %244 = vector.broadcast %cst_173 : f32 to vector<8x64xf32>
    %245 = arith.cmpf oge, %243, %244 : vector<8x64xf32>
    %cst_174 = arith.constant 2.000000e-01 : f32
    %246 = vector.broadcast %cst_174 : f32 to vector<8x64xf32>
    %247 = arith.mulf %246, %243 : vector<8x64xf32>
    %248 = arith.select %245, %243, %247 : vector<8x64xi1>, vector<8x64xf32>
    %249 = arith.truncf %248 : vector<8x64xf32> to vector<8x64xbf16>
    %c1_175 = arith.constant 1 : index
    %c0_176 = arith.constant 0 : index
    %c0_177 = arith.constant 0 : index
    %250 = vector.load %arg21[%c1_175, %c0_176, %c0_177] : memref<3x64x64xbf16, #tpu.memory_space<vmem>>, vector<1x64x64xbf16>
    %251 = vector.shape_cast %250 : vector<1x64x64xbf16> to vector<64x64xbf16>
    %cst_178 = arith.constant dense<0.000000e+00> : vector<8x64xf32>
    %252 = tpu.matmul %249, %251, %cst_178 {dimension_numbers = #tpu.dot_dimension_numbers<[1], [0], [0], [1], [0, 0, 1, 1], [], []>} : vector<8x64xbf16>, vector<64x64xbf16>, vector<8x64xf32> -> vector<8x64xf32>
    %c0_179 = arith.constant 0 : index
    %c0_180 = arith.constant 0 : index
    %c0_181 = arith.constant 0 : index
    %253 = vector.load %arg20[%c0_179, %c0_180, %c0_181] : memref<3x8x8xbf16, #tpu.memory_space<vmem>>, vector<1x8x8xbf16>
    %254 = vector.shape_cast %253 : vector<1x8x8xbf16> to vector<8x8xbf16>
    %cst_182 = arith.constant dense<0.000000e+00> : vector<8x64xf32>
    %255 = tpu.matmul %254, %249, %cst_182 {dimension_numbers = #tpu.dot_dimension_numbers<[1], [0], [0], [1], [0, 0, 1, 1], [], []>} : vector<8x8xbf16>, vector<8x64xbf16>, vector<8x64xf32> -> vector<8x64xf32>
    %256 = arith.truncf %255 : vector<8x64xf32> to vector<8x64xbf16>
    %c0_183 = arith.constant 0 : index
    %c0_184 = arith.constant 0 : index
    %c0_185 = arith.constant 0 : index
    %257 = vector.load %arg21[%c0_183, %c0_184, %c0_185] : memref<3x64x64xbf16, #tpu.memory_space<vmem>>, vector<1x64x64xbf16>
    %258 = vector.shape_cast %257 : vector<1x64x64xbf16> to vector<64x64xbf16>
    %cst_186 = arith.constant dense<0.000000e+00> : vector<8x64xf32>
    %259 = tpu.matmul %256, %258, %cst_186 {dimension_numbers = #tpu.dot_dimension_numbers<[1], [0], [0], [1], [0, 0, 1, 1], [], []>} : vector<8x64xbf16>, vector<64x64xbf16>, vector<8x64xf32> -> vector<8x64xf32>
    %260 = arith.addf %252, %259 : vector<8x64xf32>
    %c2_187 = arith.constant 2 : index
    %c0_188 = arith.constant 0 : index
    %c0_189 = arith.constant 0 : index
    %261 = vector.load %arg20[%c2_187, %c0_188, %c0_189] : memref<3x8x8xbf16, #tpu.memory_space<vmem>>, vector<1x8x8xbf16>
    %262 = vector.shape_cast %261 : vector<1x8x8xbf16> to vector<8x8xbf16>
    %cst_190 = arith.constant dense<0.000000e+00> : vector<8x64xf32>
    %263 = tpu.matmul %262, %249, %cst_190 {dimension_numbers = #tpu.dot_dimension_numbers<[1], [0], [0], [1], [0, 0, 1, 1], [], []>} : vector<8x8xbf16>, vector<8x64xbf16>, vector<8x64xf32> -> vector<8x64xf32>
    %264 = arith.truncf %263 : vector<8x64xf32> to vector<8x64xbf16>
    %c2_191 = arith.constant 2 : index
    %c0_192 = arith.constant 0 : index
    %c0_193 = arith.constant 0 : index
    %265 = vector.load %arg21[%c2_191, %c0_192, %c0_193] : memref<3x64x64xbf16, #tpu.memory_space<vmem>>, vector<1x64x64xbf16>
    %266 = vector.shape_cast %265 : vector<1x64x64xbf16> to vector<64x64xbf16>
    %cst_194 = arith.constant dense<0.000000e+00> : vector<8x64xf32>
    %267 = tpu.matmul %264, %266, %cst_194 {dimension_numbers = #tpu.dot_dimension_numbers<[1], [0], [0], [1], [0, 0, 1, 1], [], []>} : vector<8x64xbf16>, vector<64x64xbf16>, vector<8x64xf32> -> vector<8x64xf32>
    %268 = arith.addf %260, %267 : vector<8x64xf32>
    %269 = arith.addf %268, %194 : vector<8x64xf32>
    %c0_195 = arith.constant 0 : index
    %c0_196 = arith.constant 0 : index
    %270 = vector.load %arg22[%c0_195, %c0_196] : memref<64x16xf32, #tpu.memory_space<vmem>>, vector<64x16xf32>
    %c0_197 = arith.constant 0 : index
    %c0_198 = arith.constant 0 : index
    %271 = vector.load %arg23[%c0_197, %c0_198] : memref<16x64xf32, #tpu.memory_space<vmem>>, vector<16x64xf32>
    %c0_199 = arith.constant 0 : index
    %c0_200 = arith.constant 0 : index
    %272 = vector.load %arg25[%c0_199, %c0_200] : memref<2x64xf32, #tpu.memory_space<vmem>>, vector<2x64xf32>
    %cst_201 = arith.constant dense<0.000000e+00> : vector<64xf32>
    %273 = vector.multi_reduction <add>, %269, %cst_201 [0] : vector<8x64xf32> to vector<64xf32>
    %274 = vector.shape_cast %273 : vector<64xf32> to vector<1x64xf32>
    %cst_202 = arith.constant 8.000000e+00 : f32
    %275 = vector.broadcast %cst_202 : f32 to vector<1x64xf32>
    %276 = arith.divf %274, %275 : vector<1x64xf32>
    %cst_203 = arith.constant dense<0.000000e+00> : vector<1x16xf32>
    %277 = tpu.matmul %276, %270, %cst_203 {dimension_numbers = #tpu.dot_dimension_numbers<[1], [0], [0], [1], [0, 0, 1, 1], [], []>} : vector<1x64xf32>, vector<64x16xf32>, vector<1x16xf32> -> vector<1x16xf32>
    %cst_204 = arith.constant dense<0.000000e+00> : vector<1x64xf32>
    %278 = tpu.matmul %277, %271, %cst_204 {dimension_numbers = #tpu.dot_dimension_numbers<[1], [0], [0], [1], [0, 0, 1, 1], [], []>} : vector<1x16xf32>, vector<16x64xf32>, vector<1x64xf32> -> vector<1x64xf32>
    %279 = vector.broadcast %278 : vector<1x64xf32> to vector<8x64xf32>
    %280 = arith.subf %269, %279 : vector<8x64xf32>
    %281 = arith.mulf %280, %280 : vector<8x64xf32>
    %cst_205 = arith.constant dense<0.000000e+00> : vector<64xf32>
    %282 = vector.multi_reduction <add>, %281, %cst_205 [0] : vector<8x64xf32> to vector<64xf32>
    %283 = vector.shape_cast %282 : vector<64xf32> to vector<1x64xf32>
    %cst_206 = arith.constant 8.000000e+00 : f32
    %284 = vector.broadcast %cst_206 : f32 to vector<1x64xf32>
    %285 = arith.divf %283, %284 : vector<1x64xf32>
    %cst_207 = arith.constant dense<0.000000e+00> : vector<1x16xf32>
    %286 = tpu.matmul %285, %270, %cst_207 {dimension_numbers = #tpu.dot_dimension_numbers<[1], [0], [0], [1], [0, 0, 1, 1], [], []>} : vector<1x64xf32>, vector<64x16xf32>, vector<1x16xf32> -> vector<1x16xf32>
    %cst_208 = arith.constant dense<0.000000e+00> : vector<1x64xf32>
    %287 = tpu.matmul %286, %271, %cst_208 {dimension_numbers = #tpu.dot_dimension_numbers<[1], [0], [0], [1], [0, 0, 1, 1], [], []>} : vector<1x16xf32>, vector<16x64xf32>, vector<1x64xf32> -> vector<1x64xf32>
    %cst_209 = arith.constant 9.99999974E-6 : f32
    %288 = vector.broadcast %cst_209 : f32 to vector<1x64xf32>
    %289 = arith.addf %287, %288 : vector<1x64xf32>
    %290 = math.rsqrt %289 : vector<1x64xf32>
    %291 = vector.broadcast %290 : vector<1x64xf32> to vector<8x64xf32>
    %292 = arith.mulf %280, %291 : vector<8x64xf32>
    %293 = vector.extract_strided_slice %272 {offsets = [0, 0], sizes = [1, 64], strides = [1, 1]} : vector<2x64xf32> to vector<1x64xf32>
    %294 = vector.broadcast %293 : vector<1x64xf32> to vector<8x64xf32>
    %295 = arith.mulf %292, %294 : vector<8x64xf32>
    %296 = vector.extract_strided_slice %272 {offsets = [1, 0], sizes = [1, 64], strides = [1, 1]} : vector<2x64xf32> to vector<1x64xf32>
    %297 = vector.broadcast %296 : vector<1x64xf32> to vector<8x64xf32>
    %298 = arith.addf %295, %297 : vector<8x64xf32>
    %cst_210 = arith.constant 0.000000e+00 : f32
    %299 = vector.broadcast %cst_210 : f32 to vector<8x64xf32>
    %300 = arith.cmpf oge, %298, %299 : vector<8x64xf32>
    %cst_211 = arith.constant 2.000000e-01 : f32
    %301 = vector.broadcast %cst_211 : f32 to vector<8x64xf32>
    %302 = arith.mulf %301, %298 : vector<8x64xf32>
    %303 = arith.select %300, %298, %302 : vector<8x64xi1>, vector<8x64xf32>
    %c0_212 = arith.constant 0 : index
    %c0_213 = arith.constant 0 : index
    %304 = vector.load %arg26[%c0_212, %c0_213] : memref<4x8xbf16, #tpu.memory_space<vmem>>, vector<4x8xbf16>
    %305 = arith.truncf %303 : vector<8x64xf32> to vector<8x64xbf16>
    %cst_214 = arith.constant dense<0.000000e+00> : vector<4x64xf32>
    %306 = tpu.matmul %304, %305, %cst_214 {dimension_numbers = #tpu.dot_dimension_numbers<[1], [0], [0], [1], [0, 0, 1, 1], [], []>} : vector<4x8xbf16>, vector<8x64xbf16>, vector<4x64xf32> -> vector<4x64xf32>
    %307 = arith.truncf %306 : vector<4x64xf32> to vector<4x64xbf16>
    %c0_215 = arith.constant 0 : index
    %c0_216 = arith.constant 0 : index
    %308 = vector.load %arg27[%c0_215, %c0_216] : memref<64x32xbf16, #tpu.memory_space<vmem>>, vector<64x32xbf16>
    %cst_217 = arith.constant dense<0.000000e+00> : vector<4x32xf32>
    %309 = tpu.matmul %307, %308, %cst_217 {dimension_numbers = #tpu.dot_dimension_numbers<[1], [0], [0], [1], [0, 0, 1, 1], [], []>} : vector<4x64xbf16>, vector<64x32xbf16>, vector<4x32xf32> -> vector<4x32xf32>
    %310 = arith.truncf %309 : vector<4x32xf32> to vector<4x32xbf16>
    %c1_218 = arith.constant 1 : index
    %c0_219 = arith.constant 0 : index
    %c0_220 = arith.constant 0 : index
    %311 = vector.load %arg28[%c1_218, %c0_219, %c0_220] : memref<3x32x32xbf16, #tpu.memory_space<vmem>>, vector<1x32x32xbf16>
    %312 = vector.shape_cast %311 : vector<1x32x32xbf16> to vector<32x32xbf16>
    %cst_221 = arith.constant dense<0.000000e+00> : vector<4x32xf32>
    %313 = tpu.matmul %310, %312, %cst_221 {dimension_numbers = #tpu.dot_dimension_numbers<[1], [0], [0], [1], [0, 0, 1, 1], [], []>} : vector<4x32xbf16>, vector<32x32xbf16>, vector<4x32xf32> -> vector<4x32xf32>
    %c0_222 = arith.constant 0 : index
    %c0_223 = arith.constant 0 : index
    %c0_224 = arith.constant 0 : index
    %314 = vector.load %arg29[%c0_222, %c0_223, %c0_224] : memref<3x4x4xbf16, #tpu.memory_space<vmem>>, vector<1x4x4xbf16>
    %315 = vector.shape_cast %314 : vector<1x4x4xbf16> to vector<4x4xbf16>
    %cst_225 = arith.constant dense<0.000000e+00> : vector<4x32xf32>
    %316 = tpu.matmul %315, %310, %cst_225 {dimension_numbers = #tpu.dot_dimension_numbers<[1], [0], [0], [1], [0, 0, 1, 1], [], []>} : vector<4x4xbf16>, vector<4x32xbf16>, vector<4x32xf32> -> vector<4x32xf32>
    %317 = arith.truncf %316 : vector<4x32xf32> to vector<4x32xbf16>
    %c0_226 = arith.constant 0 : index
    %c0_227 = arith.constant 0 : index
    %c0_228 = arith.constant 0 : index
    %318 = vector.load %arg28[%c0_226, %c0_227, %c0_228] : memref<3x32x32xbf16, #tpu.memory_space<vmem>>, vector<1x32x32xbf16>
    %319 = vector.shape_cast %318 : vector<1x32x32xbf16> to vector<32x32xbf16>
    %cst_229 = arith.constant dense<0.000000e+00> : vector<4x32xf32>
    %320 = tpu.matmul %317, %319, %cst_229 {dimension_numbers = #tpu.dot_dimension_numbers<[1], [0], [0], [1], [0, 0, 1, 1], [], []>} : vector<4x32xbf16>, vector<32x32xbf16>, vector<4x32xf32> -> vector<4x32xf32>
    %321 = arith.addf %313, %320 : vector<4x32xf32>
    %c2_230 = arith.constant 2 : index
    %c0_231 = arith.constant 0 : index
    %c0_232 = arith.constant 0 : index
    %322 = vector.load %arg29[%c2_230, %c0_231, %c0_232] : memref<3x4x4xbf16, #tpu.memory_space<vmem>>, vector<1x4x4xbf16>
    %323 = vector.shape_cast %322 : vector<1x4x4xbf16> to vector<4x4xbf16>
    %cst_233 = arith.constant dense<0.000000e+00> : vector<4x32xf32>
    %324 = tpu.matmul %323, %310, %cst_233 {dimension_numbers = #tpu.dot_dimension_numbers<[1], [0], [0], [1], [0, 0, 1, 1], [], []>} : vector<4x4xbf16>, vector<4x32xbf16>, vector<4x32xf32> -> vector<4x32xf32>
    %325 = arith.truncf %324 : vector<4x32xf32> to vector<4x32xbf16>
    %c2_234 = arith.constant 2 : index
    %c0_235 = arith.constant 0 : index
    %c0_236 = arith.constant 0 : index
    %326 = vector.load %arg28[%c2_234, %c0_235, %c0_236] : memref<3x32x32xbf16, #tpu.memory_space<vmem>>, vector<1x32x32xbf16>
    %327 = vector.shape_cast %326 : vector<1x32x32xbf16> to vector<32x32xbf16>
    %cst_237 = arith.constant dense<0.000000e+00> : vector<4x32xf32>
    %328 = tpu.matmul %325, %327, %cst_237 {dimension_numbers = #tpu.dot_dimension_numbers<[1], [0], [0], [1], [0, 0, 1, 1], [], []>} : vector<4x32xbf16>, vector<32x32xbf16>, vector<4x32xf32> -> vector<4x32xf32>
    %329 = arith.addf %321, %328 : vector<4x32xf32>
    %c0_238 = arith.constant 0 : index
    %c0_239 = arith.constant 0 : index
    %330 = vector.load %arg31[%c0_238, %c0_239] : memref<32x16xf32, #tpu.memory_space<vmem>>, vector<32x16xf32>
    %c0_240 = arith.constant 0 : index
    %c0_241 = arith.constant 0 : index
    %331 = vector.load %arg32[%c0_240, %c0_241] : memref<16x32xf32, #tpu.memory_space<vmem>>, vector<16x32xf32>
    %c0_242 = arith.constant 0 : index
    %c0_243 = arith.constant 0 : index
    %332 = vector.load %arg33[%c0_242, %c0_243] : memref<2x32xf32, #tpu.memory_space<vmem>>, vector<2x32xf32>
    %cst_244 = arith.constant dense<0.000000e+00> : vector<32xf32>
    %333 = vector.multi_reduction <add>, %329, %cst_244 [0] : vector<4x32xf32> to vector<32xf32>
    %334 = vector.shape_cast %333 : vector<32xf32> to vector<1x32xf32>
    %cst_245 = arith.constant 4.000000e+00 : f32
    %335 = vector.broadcast %cst_245 : f32 to vector<1x32xf32>
    %336 = arith.divf %334, %335 : vector<1x32xf32>
    %cst_246 = arith.constant dense<0.000000e+00> : vector<1x16xf32>
    %337 = tpu.matmul %336, %330, %cst_246 {dimension_numbers = #tpu.dot_dimension_numbers<[1], [0], [0], [1], [0, 0, 1, 1], [], []>} : vector<1x32xf32>, vector<32x16xf32>, vector<1x16xf32> -> vector<1x16xf32>
    %cst_247 = arith.constant dense<0.000000e+00> : vector<1x32xf32>
    %338 = tpu.matmul %337, %331, %cst_247 {dimension_numbers = #tpu.dot_dimension_numbers<[1], [0], [0], [1], [0, 0, 1, 1], [], []>} : vector<1x16xf32>, vector<16x32xf32>, vector<1x32xf32> -> vector<1x32xf32>
    %339 = vector.broadcast %338 : vector<1x32xf32> to vector<4x32xf32>
    %340 = arith.subf %329, %339 : vector<4x32xf32>
    %341 = arith.mulf %340, %340 : vector<4x32xf32>
    %cst_248 = arith.constant dense<0.000000e+00> : vector<32xf32>
    %342 = vector.multi_reduction <add>, %341, %cst_248 [0] : vector<4x32xf32> to vector<32xf32>
    %343 = vector.shape_cast %342 : vector<32xf32> to vector<1x32xf32>
    %cst_249 = arith.constant 4.000000e+00 : f32
    %344 = vector.broadcast %cst_249 : f32 to vector<1x32xf32>
    %345 = arith.divf %343, %344 : vector<1x32xf32>
    %cst_250 = arith.constant dense<0.000000e+00> : vector<1x16xf32>
    %346 = tpu.matmul %345, %330, %cst_250 {dimension_numbers = #tpu.dot_dimension_numbers<[1], [0], [0], [1], [0, 0, 1, 1], [], []>} : vector<1x32xf32>, vector<32x16xf32>, vector<1x16xf32> -> vector<1x16xf32>
    %cst_251 = arith.constant dense<0.000000e+00> : vector<1x32xf32>
    %347 = tpu.matmul %346, %331, %cst_251 {dimension_numbers = #tpu.dot_dimension_numbers<[1], [0], [0], [1], [0, 0, 1, 1], [], []>} : vector<1x16xf32>, vector<16x32xf32>, vector<1x32xf32> -> vector<1x32xf32>
    %cst_252 = arith.constant 9.99999974E-6 : f32
    %348 = vector.broadcast %cst_252 : f32 to vector<1x32xf32>
    %349 = arith.addf %347, %348 : vector<1x32xf32>
    %350 = math.rsqrt %349 : vector<1x32xf32>
    %351 = vector.broadcast %350 : vector<1x32xf32> to vector<4x32xf32>
    %352 = arith.mulf %340, %351 : vector<4x32xf32>
    %353 = vector.extract_strided_slice %332 {offsets = [0, 0], sizes = [1, 32], strides = [1, 1]} : vector<2x32xf32> to vector<1x32xf32>
    %354 = vector.broadcast %353 : vector<1x32xf32> to vector<4x32xf32>
    %355 = arith.mulf %352, %354 : vector<4x32xf32>
    %356 = vector.extract_strided_slice %332 {offsets = [1, 0], sizes = [1, 32], strides = [1, 1]} : vector<2x32xf32> to vector<1x32xf32>
    %357 = vector.broadcast %356 : vector<1x32xf32> to vector<4x32xf32>
    %358 = arith.addf %355, %357 : vector<4x32xf32>
    %cst_253 = arith.constant 0.000000e+00 : f32
    %359 = vector.broadcast %cst_253 : f32 to vector<4x32xf32>
    %360 = arith.cmpf oge, %358, %359 : vector<4x32xf32>
    %cst_254 = arith.constant 2.000000e-01 : f32
    %361 = vector.broadcast %cst_254 : f32 to vector<4x32xf32>
    %362 = arith.mulf %361, %358 : vector<4x32xf32>
    %363 = arith.select %360, %358, %362 : vector<4x32xi1>, vector<4x32xf32>
    %364 = arith.truncf %363 : vector<4x32xf32> to vector<4x32xbf16>
    %c1_255 = arith.constant 1 : index
    %c0_256 = arith.constant 0 : index
    %c0_257 = arith.constant 0 : index
    %365 = vector.load %arg30[%c1_255, %c0_256, %c0_257] : memref<3x32x32xbf16, #tpu.memory_space<vmem>>, vector<1x32x32xbf16>
    %366 = vector.shape_cast %365 : vector<1x32x32xbf16> to vector<32x32xbf16>
    %cst_258 = arith.constant dense<0.000000e+00> : vector<4x32xf32>
    %367 = tpu.matmul %364, %366, %cst_258 {dimension_numbers = #tpu.dot_dimension_numbers<[1], [0], [0], [1], [0, 0, 1, 1], [], []>} : vector<4x32xbf16>, vector<32x32xbf16>, vector<4x32xf32> -> vector<4x32xf32>
    %c0_259 = arith.constant 0 : index
    %c0_260 = arith.constant 0 : index
    %c0_261 = arith.constant 0 : index
    %368 = vector.load %arg29[%c0_259, %c0_260, %c0_261] : memref<3x4x4xbf16, #tpu.memory_space<vmem>>, vector<1x4x4xbf16>
    %369 = vector.shape_cast %368 : vector<1x4x4xbf16> to vector<4x4xbf16>
    %cst_262 = arith.constant dense<0.000000e+00> : vector<4x32xf32>
    %370 = tpu.matmul %369, %364, %cst_262 {dimension_numbers = #tpu.dot_dimension_numbers<[1], [0], [0], [1], [0, 0, 1, 1], [], []>} : vector<4x4xbf16>, vector<4x32xbf16>, vector<4x32xf32> -> vector<4x32xf32>
    %371 = arith.truncf %370 : vector<4x32xf32> to vector<4x32xbf16>
    %c0_263 = arith.constant 0 : index
    %c0_264 = arith.constant 0 : index
    %c0_265 = arith.constant 0 : index
    %372 = vector.load %arg30[%c0_263, %c0_264, %c0_265] : memref<3x32x32xbf16, #tpu.memory_space<vmem>>, vector<1x32x32xbf16>
    %373 = vector.shape_cast %372 : vector<1x32x32xbf16> to vector<32x32xbf16>
    %cst_266 = arith.constant dense<0.000000e+00> : vector<4x32xf32>
    %374 = tpu.matmul %371, %373, %cst_266 {dimension_numbers = #tpu.dot_dimension_numbers<[1], [0], [0], [1], [0, 0, 1, 1], [], []>} : vector<4x32xbf16>, vector<32x32xbf16>, vector<4x32xf32> -> vector<4x32xf32>
    %375 = arith.addf %367, %374 : vector<4x32xf32>
    %c2_267 = arith.constant 2 : index
    %c0_268 = arith.constant 0 : index
    %c0_269 = arith.constant 0 : index
    %376 = vector.load %arg29[%c2_267, %c0_268, %c0_269] : memref<3x4x4xbf16, #tpu.memory_space<vmem>>, vector<1x4x4xbf16>
    %377 = vector.shape_cast %376 : vector<1x4x4xbf16> to vector<4x4xbf16>
    %cst_270 = arith.constant dense<0.000000e+00> : vector<4x32xf32>
    %378 = tpu.matmul %377, %364, %cst_270 {dimension_numbers = #tpu.dot_dimension_numbers<[1], [0], [0], [1], [0, 0, 1, 1], [], []>} : vector<4x4xbf16>, vector<4x32xbf16>, vector<4x32xf32> -> vector<4x32xf32>
    %379 = arith.truncf %378 : vector<4x32xf32> to vector<4x32xbf16>
    %c2_271 = arith.constant 2 : index
    %c0_272 = arith.constant 0 : index
    %c0_273 = arith.constant 0 : index
    %380 = vector.load %arg30[%c2_271, %c0_272, %c0_273] : memref<3x32x32xbf16, #tpu.memory_space<vmem>>, vector<1x32x32xbf16>
    %381 = vector.shape_cast %380 : vector<1x32x32xbf16> to vector<32x32xbf16>
    %cst_274 = arith.constant dense<0.000000e+00> : vector<4x32xf32>
    %382 = tpu.matmul %379, %381, %cst_274 {dimension_numbers = #tpu.dot_dimension_numbers<[1], [0], [0], [1], [0, 0, 1, 1], [], []>} : vector<4x32xbf16>, vector<32x32xbf16>, vector<4x32xf32> -> vector<4x32xf32>
    %383 = arith.addf %375, %382 : vector<4x32xf32>
    %384 = arith.addf %383, %309 : vector<4x32xf32>
    %c0_275 = arith.constant 0 : index
    %c0_276 = arith.constant 0 : index
    %385 = vector.load %arg31[%c0_275, %c0_276] : memref<32x16xf32, #tpu.memory_space<vmem>>, vector<32x16xf32>
    %c0_277 = arith.constant 0 : index
    %c0_278 = arith.constant 0 : index
    %386 = vector.load %arg32[%c0_277, %c0_278] : memref<16x32xf32, #tpu.memory_space<vmem>>, vector<16x32xf32>
    %c0_279 = arith.constant 0 : index
    %c0_280 = arith.constant 0 : index
    %387 = vector.load %arg34[%c0_279, %c0_280] : memref<2x32xf32, #tpu.memory_space<vmem>>, vector<2x32xf32>
    %cst_281 = arith.constant dense<0.000000e+00> : vector<32xf32>
    %388 = vector.multi_reduction <add>, %384, %cst_281 [0] : vector<4x32xf32> to vector<32xf32>
    %389 = vector.shape_cast %388 : vector<32xf32> to vector<1x32xf32>
    %cst_282 = arith.constant 4.000000e+00 : f32
    %390 = vector.broadcast %cst_282 : f32 to vector<1x32xf32>
    %391 = arith.divf %389, %390 : vector<1x32xf32>
    %cst_283 = arith.constant dense<0.000000e+00> : vector<1x16xf32>
    %392 = tpu.matmul %391, %385, %cst_283 {dimension_numbers = #tpu.dot_dimension_numbers<[1], [0], [0], [1], [0, 0, 1, 1], [], []>} : vector<1x32xf32>, vector<32x16xf32>, vector<1x16xf32> -> vector<1x16xf32>
    %cst_284 = arith.constant dense<0.000000e+00> : vector<1x32xf32>
    %393 = tpu.matmul %392, %386, %cst_284 {dimension_numbers = #tpu.dot_dimension_numbers<[1], [0], [0], [1], [0, 0, 1, 1], [], []>} : vector<1x16xf32>, vector<16x32xf32>, vector<1x32xf32> -> vector<1x32xf32>
    %394 = vector.broadcast %393 : vector<1x32xf32> to vector<4x32xf32>
    %395 = arith.subf %384, %394 : vector<4x32xf32>
    %396 = arith.mulf %395, %395 : vector<4x32xf32>
    %cst_285 = arith.constant dense<0.000000e+00> : vector<32xf32>
    %397 = vector.multi_reduction <add>, %396, %cst_285 [0] : vector<4x32xf32> to vector<32xf32>
    %398 = vector.shape_cast %397 : vector<32xf32> to vector<1x32xf32>
    %cst_286 = arith.constant 4.000000e+00 : f32
    %399 = vector.broadcast %cst_286 : f32 to vector<1x32xf32>
    %400 = arith.divf %398, %399 : vector<1x32xf32>
    %cst_287 = arith.constant dense<0.000000e+00> : vector<1x16xf32>
    %401 = tpu.matmul %400, %385, %cst_287 {dimension_numbers = #tpu.dot_dimension_numbers<[1], [0], [0], [1], [0, 0, 1, 1], [], []>} : vector<1x32xf32>, vector<32x16xf32>, vector<1x16xf32> -> vector<1x16xf32>
    %cst_288 = arith.constant dense<0.000000e+00> : vector<1x32xf32>
    %402 = tpu.matmul %401, %386, %cst_288 {dimension_numbers = #tpu.dot_dimension_numbers<[1], [0], [0], [1], [0, 0, 1, 1], [], []>} : vector<1x16xf32>, vector<16x32xf32>, vector<1x32xf32> -> vector<1x32xf32>
    %cst_289 = arith.constant 9.99999974E-6 : f32
    %403 = vector.broadcast %cst_289 : f32 to vector<1x32xf32>
    %404 = arith.addf %402, %403 : vector<1x32xf32>
    %405 = math.rsqrt %404 : vector<1x32xf32>
    %406 = vector.broadcast %405 : vector<1x32xf32> to vector<4x32xf32>
    %407 = arith.mulf %395, %406 : vector<4x32xf32>
    %408 = vector.extract_strided_slice %387 {offsets = [0, 0], sizes = [1, 32], strides = [1, 1]} : vector<2x32xf32> to vector<1x32xf32>
    %409 = vector.broadcast %408 : vector<1x32xf32> to vector<4x32xf32>
    %410 = arith.mulf %407, %409 : vector<4x32xf32>
    %411 = vector.extract_strided_slice %387 {offsets = [1, 0], sizes = [1, 32], strides = [1, 1]} : vector<2x32xf32> to vector<1x32xf32>
    %412 = vector.broadcast %411 : vector<1x32xf32> to vector<4x32xf32>
    %413 = arith.addf %410, %412 : vector<4x32xf32>
    %cst_290 = arith.constant 0.000000e+00 : f32
    %414 = vector.broadcast %cst_290 : f32 to vector<4x32xf32>
    %415 = arith.cmpf oge, %413, %414 : vector<4x32xf32>
    %cst_291 = arith.constant 2.000000e-01 : f32
    %416 = vector.broadcast %cst_291 : f32 to vector<4x32xf32>
    %417 = arith.mulf %416, %413 : vector<4x32xf32>
    %418 = arith.select %415, %413, %417 : vector<4x32xi1>, vector<4x32xf32>
    %c0_292 = arith.constant 0 : index
    %c0_293 = arith.constant 0 : index
    %419 = vector.load %arg35[%c0_292, %c0_293] : memref<64x64xbf16, #tpu.memory_space<vmem>>, vector<64x64xbf16>
    %c0_294 = arith.constant 0 : index
    %c0_295 = arith.constant 0 : index
    %420 = vector.load %arg36[%c0_294, %c0_295] : memref<1x64xf32, #tpu.memory_space<vmem>>, vector<1x64xf32>
    %421 = arith.truncf %418 : vector<4x32xf32> to vector<4x32xbf16>
    %c0_296 = arith.constant 0 : index
    %c0_297 = arith.constant 0 : index
    %c0_298 = arith.constant 0 : index
    %422 = vector.load %arg39[%c0_296, %c0_297, %c0_298] : memref<2x2x4xbf16, #tpu.memory_space<vmem>>, vector<1x2x4xbf16>
    %423 = vector.shape_cast %422 : vector<1x2x4xbf16> to vector<2x4xbf16>
    %cst_299 = arith.constant dense<0.000000e+00> : vector<2x32xf32>
    %424 = tpu.matmul %423, %421, %cst_299 {dimension_numbers = #tpu.dot_dimension_numbers<[1], [0], [0], [1], [0, 0, 1, 1], [], []>} : vector<2x4xbf16>, vector<4x32xbf16>, vector<2x32xf32> -> vector<2x32xf32>
    %425 = arith.truncf %424 : vector<2x32xf32> to vector<2x32xbf16>
    %426 = vector.extract_strided_slice %419 {offsets = [0, 0], sizes = [32, 64], strides = [1, 1]} : vector<64x64xbf16> to vector<32x64xbf16>
    %cst_300 = arith.constant dense<0.000000e+00> : vector<2x64xf32>
    %427 = tpu.matmul %425, %426, %cst_300 {dimension_numbers = #tpu.dot_dimension_numbers<[1], [0], [0], [1], [0, 0, 1, 1], [], []>} : vector<2x32xbf16>, vector<32x64xbf16>, vector<2x64xf32> -> vector<2x64xf32>
    %428 = vector.broadcast %420 : vector<1x64xf32> to vector<2x64xf32>
    %429 = arith.addf %428, %427 : vector<2x64xf32>
    %c1_301 = arith.constant 1 : index
    %c0_302 = arith.constant 0 : index
    %c0_303 = arith.constant 0 : index
    %430 = vector.load %arg39[%c1_301, %c0_302, %c0_303] : memref<2x2x4xbf16, #tpu.memory_space<vmem>>, vector<1x2x4xbf16>
    %431 = vector.shape_cast %430 : vector<1x2x4xbf16> to vector<2x4xbf16>
    %cst_304 = arith.constant dense<0.000000e+00> : vector<2x32xf32>
    %432 = tpu.matmul %431, %421, %cst_304 {dimension_numbers = #tpu.dot_dimension_numbers<[1], [0], [0], [1], [0, 0, 1, 1], [], []>} : vector<2x4xbf16>, vector<4x32xbf16>, vector<2x32xf32> -> vector<2x32xf32>
    %433 = arith.truncf %432 : vector<2x32xf32> to vector<2x32xbf16>
    %434 = vector.extract_strided_slice %419 {offsets = [32, 0], sizes = [32, 64], strides = [1, 1]} : vector<64x64xbf16> to vector<32x64xbf16>
    %cst_305 = arith.constant dense<0.000000e+00> : vector<2x64xf32>
    %435 = tpu.matmul %433, %434, %cst_305 {dimension_numbers = #tpu.dot_dimension_numbers<[1], [0], [0], [1], [0, 0, 1, 1], [], []>} : vector<2x32xbf16>, vector<32x64xbf16>, vector<2x64xf32> -> vector<2x64xf32>
    %436 = arith.addf %429, %435 : vector<2x64xf32>
    %437 = vector.extract_strided_slice %436 {offsets = [0, 0], sizes = [2, 32], strides = [1, 1]} : vector<2x64xf32> to vector<2x32xf32>
    %438 = vector.extract_strided_slice %436 {offsets = [0, 32], sizes = [2, 32], strides = [1, 1]} : vector<2x64xf32> to vector<2x32xf32>
    %c0_306 = arith.constant 0 : index
    %c0_307 = arith.constant 0 : index
    %439 = vector.load %arg1[%c0_306, %c0_307] : memref<2x32xf32, #tpu.memory_space<vmem>>, vector<2x32xf32>
    %cst_308 = arith.constant 5.000000e-01 : f32
    %440 = vector.broadcast %cst_308 : f32 to vector<2x32xf32>
    %441 = arith.mulf %440, %438 : vector<2x32xf32>
    %442 = math.exp %441 : vector<2x32xf32>
    %443 = arith.mulf %439, %442 : vector<2x32xf32>
    %444 = arith.addf %437, %443 : vector<2x32xf32>
    %c0_309 = arith.constant 0 : index
    %c0_310 = arith.constant 0 : index
    %445 = vector.load %arg69[%c0_309, %c0_310] : memref<2x32xf32, #tpu.memory_space<vmem>>, vector<2x32xf32>
    tpu.vector_store %arg69[%c0_309, %c0_310], %437 {strides = array<i32>} : memref<2x32xf32, #tpu.memory_space<vmem>>, vector<2x32xf32>,
    %c0_311 = arith.constant 0 : index
    %c0_312 = arith.constant 0 : index
    %446 = vector.load %arg70[%c0_311, %c0_312] : memref<2x32xf32, #tpu.memory_space<vmem>>, vector<2x32xf32>
    tpu.vector_store %arg70[%c0_311, %c0_312], %438 {strides = array<i32>} : memref<2x32xf32, #tpu.memory_space<vmem>>, vector<2x32xf32>,
    %c0_313 = arith.constant 0 : index
    %c0_314 = arith.constant 0 : index
    %447 = vector.load %arg71[%c0_313, %c0_314] : memref<2x32xf32, #tpu.memory_space<vmem>>, vector<2x32xf32>
    tpu.vector_store %arg71[%c0_313, %c0_314], %444 {strides = array<i32>} : memref<2x32xf32, #tpu.memory_space<vmem>>, vector<2x32xf32>,
    %c0_315 = arith.constant 0 : index
    %c0_316 = arith.constant 0 : index
    %448 = vector.load %arg37[%c0_315, %c0_316] : memref<32x64xbf16, #tpu.memory_space<vmem>>, vector<32x64xbf16>
    %c0_317 = arith.constant 0 : index
    %c0_318 = arith.constant 0 : index
    %449 = vector.load %arg38[%c0_317, %c0_318] : memref<1x64xf32, #tpu.memory_space<vmem>>, vector<1x64xf32>
    %450 = arith.truncf %444 : vector<2x32xf32> to vector<2x32xbf16>
    %451 = vector.extract_strided_slice %448 {offsets = [0, 0], sizes = [32, 32], strides = [1, 1]} : vector<32x64xbf16> to vector<32x32xbf16>
    %cst_319 = arith.constant dense<0.000000e+00> : vector<2x32xf32>
    %452 = tpu.matmul %450, %451, %cst_319 {dimension_numbers = #tpu.dot_dimension_numbers<[1], [0], [0], [1], [0, 0, 1, 1], [], []>} : vector<2x32xbf16>, vector<32x32xbf16>, vector<2x32xf32> -> vector<2x32xf32>
    %453 = vector.extract_strided_slice %449 {offsets = [0, 0], sizes = [1, 32], strides = [1, 1]} : vector<1x64xf32> to vector<1x32xf32>
    %454 = vector.broadcast %453 : vector<1x32xf32> to vector<2x32xf32>
    %455 = arith.addf %452, %454 : vector<2x32xf32>
    %cst_320 = arith.constant 0.000000e+00 : f32
    %456 = vector.broadcast %cst_320 : f32 to vector<2x32xf32>
    %457 = arith.maximumf %455, %456 : vector<2x32xf32>
    %c0_321 = arith.constant 0 : index
    %c0_322 = arith.constant 0 : index
    %c0_323 = arith.constant 0 : index
    %458 = vector.load %arg40[%c0_321, %c0_322, %c0_323] : memref<2x4x2xbf16, #tpu.memory_space<vmem>>, vector<1x4x2xbf16>
    %459 = vector.shape_cast %458 : vector<1x4x2xbf16> to vector<4x2xbf16>
    %460 = arith.truncf %457 : vector<2x32xf32> to vector<2x32xbf16>
    %cst_324 = arith.constant dense<0.000000e+00> : vector<4x32xf32>
    %461 = tpu.matmul %459, %460, %cst_324 {dimension_numbers = #tpu.dot_dimension_numbers<[1], [0], [0], [1], [0, 0, 1, 1], [], []>} : vector<4x2xbf16>, vector<2x32xbf16>, vector<4x32xf32> -> vector<4x32xf32>
    %462 = vector.extract_strided_slice %448 {offsets = [0, 32], sizes = [32, 32], strides = [1, 1]} : vector<32x64xbf16> to vector<32x32xbf16>
    %cst_325 = arith.constant dense<0.000000e+00> : vector<2x32xf32>
    %463 = tpu.matmul %450, %462, %cst_325 {dimension_numbers = #tpu.dot_dimension_numbers<[1], [0], [0], [1], [0, 0, 1, 1], [], []>} : vector<2x32xbf16>, vector<32x32xbf16>, vector<2x32xf32> -> vector<2x32xf32>
    %464 = vector.extract_strided_slice %449 {offsets = [0, 32], sizes = [1, 32], strides = [1, 1]} : vector<1x64xf32> to vector<1x32xf32>
    %465 = vector.broadcast %464 : vector<1x32xf32> to vector<2x32xf32>
    %466 = arith.addf %463, %465 : vector<2x32xf32>
    %cst_326 = arith.constant 0.000000e+00 : f32
    %467 = vector.broadcast %cst_326 : f32 to vector<2x32xf32>
    %468 = arith.maximumf %466, %467 : vector<2x32xf32>
    %c1_327 = arith.constant 1 : index
    %c0_328 = arith.constant 0 : index
    %c0_329 = arith.constant 0 : index
    %469 = vector.load %arg40[%c1_327, %c0_328, %c0_329] : memref<2x4x2xbf16, #tpu.memory_space<vmem>>, vector<1x4x2xbf16>
    %470 = vector.shape_cast %469 : vector<1x4x2xbf16> to vector<4x2xbf16>
    %471 = arith.truncf %468 : vector<2x32xf32> to vector<2x32xbf16>
    %cst_330 = arith.constant dense<0.000000e+00> : vector<4x32xf32>
    %472 = tpu.matmul %470, %471, %cst_330 {dimension_numbers = #tpu.dot_dimension_numbers<[1], [0], [0], [1], [0, 0, 1, 1], [], []>} : vector<4x2xbf16>, vector<2x32xbf16>, vector<4x32xf32> -> vector<4x32xf32>
    %473 = arith.addf %461, %472 : vector<4x32xf32>
    %474 = arith.truncf %473 : vector<4x32xf32> to vector<4x32xbf16>
    %c1_331 = arith.constant 1 : index
    %c0_332 = arith.constant 0 : index
    %c0_333 = arith.constant 0 : index
    %475 = vector.load %arg41[%c1_331, %c0_332, %c0_333] : memref<3x32x32xbf16, #tpu.memory_space<vmem>>, vector<1x32x32xbf16>
    %476 = vector.shape_cast %475 : vector<1x32x32xbf16> to vector<32x32xbf16>
    %cst_334 = arith.constant dense<0.000000e+00> : vector<4x32xf32>
    %477 = tpu.matmul %474, %476, %cst_334 {dimension_numbers = #tpu.dot_dimension_numbers<[1], [0], [0], [1], [0, 0, 1, 1], [], []>} : vector<4x32xbf16>, vector<32x32xbf16>, vector<4x32xf32> -> vector<4x32xf32>
    %c0_335 = arith.constant 0 : index
    %c0_336 = arith.constant 0 : index
    %c0_337 = arith.constant 0 : index
    %478 = vector.load %arg29[%c0_335, %c0_336, %c0_337] : memref<3x4x4xbf16, #tpu.memory_space<vmem>>, vector<1x4x4xbf16>
    %479 = vector.shape_cast %478 : vector<1x4x4xbf16> to vector<4x4xbf16>
    %cst_338 = arith.constant dense<0.000000e+00> : vector<4x32xf32>
    %480 = tpu.matmul %479, %474, %cst_338 {dimension_numbers = #tpu.dot_dimension_numbers<[1], [0], [0], [1], [0, 0, 1, 1], [], []>} : vector<4x4xbf16>, vector<4x32xbf16>, vector<4x32xf32> -> vector<4x32xf32>
    %481 = arith.truncf %480 : vector<4x32xf32> to vector<4x32xbf16>
    %c0_339 = arith.constant 0 : index
    %c0_340 = arith.constant 0 : index
    %c0_341 = arith.constant 0 : index
    %482 = vector.load %arg41[%c0_339, %c0_340, %c0_341] : memref<3x32x32xbf16, #tpu.memory_space<vmem>>, vector<1x32x32xbf16>
    %483 = vector.shape_cast %482 : vector<1x32x32xbf16> to vector<32x32xbf16>
    %cst_342 = arith.constant dense<0.000000e+00> : vector<4x32xf32>
    %484 = tpu.matmul %481, %483, %cst_342 {dimension_numbers = #tpu.dot_dimension_numbers<[1], [0], [0], [1], [0, 0, 1, 1], [], []>} : vector<4x32xbf16>, vector<32x32xbf16>, vector<4x32xf32> -> vector<4x32xf32>
    %485 = arith.addf %477, %484 : vector<4x32xf32>
    %c2_343 = arith.constant 2 : index
    %c0_344 = arith.constant 0 : index
    %c0_345 = arith.constant 0 : index
    %486 = vector.load %arg29[%c2_343, %c0_344, %c0_345] : memref<3x4x4xbf16, #tpu.memory_space<vmem>>, vector<1x4x4xbf16>
    %487 = vector.shape_cast %486 : vector<1x4x4xbf16> to vector<4x4xbf16>
    %cst_346 = arith.constant dense<0.000000e+00> : vector<4x32xf32>
    %488 = tpu.matmul %487, %474, %cst_346 {dimension_numbers = #tpu.dot_dimension_numbers<[1], [0], [0], [1], [0, 0, 1, 1], [], []>} : vector<4x4xbf16>, vector<4x32xbf16>, vector<4x32xf32> -> vector<4x32xf32>
    %489 = arith.truncf %488 : vector<4x32xf32> to vector<4x32xbf16>
    %c2_347 = arith.constant 2 : index
    %c0_348 = arith.constant 0 : index
    %c0_349 = arith.constant 0 : index
    %490 = vector.load %arg41[%c2_347, %c0_348, %c0_349] : memref<3x32x32xbf16, #tpu.memory_space<vmem>>, vector<1x32x32xbf16>
    %491 = vector.shape_cast %490 : vector<1x32x32xbf16> to vector<32x32xbf16>
    %cst_350 = arith.constant dense<0.000000e+00> : vector<4x32xf32>
    %492 = tpu.matmul %489, %491, %cst_350 {dimension_numbers = #tpu.dot_dimension_numbers<[1], [0], [0], [1], [0, 0, 1, 1], [], []>} : vector<4x32xbf16>, vector<32x32xbf16>, vector<4x32xf32> -> vector<4x32xf32>
    %493 = arith.addf %485, %492 : vector<4x32xf32>
    %c0_351 = arith.constant 0 : index
    %c0_352 = arith.constant 0 : index
    %494 = vector.load %arg31[%c0_351, %c0_352] : memref<32x16xf32, #tpu.memory_space<vmem>>, vector<32x16xf32>
    %c0_353 = arith.constant 0 : index
    %c0_354 = arith.constant 0 : index
    %495 = vector.load %arg32[%c0_353, %c0_354] : memref<16x32xf32, #tpu.memory_space<vmem>>, vector<16x32xf32>
    %c0_355 = arith.constant 0 : index
    %c0_356 = arith.constant 0 : index
    %496 = vector.load %arg43[%c0_355, %c0_356] : memref<2x32xf32, #tpu.memory_space<vmem>>, vector<2x32xf32>
    %cst_357 = arith.constant dense<0.000000e+00> : vector<32xf32>
    %497 = vector.multi_reduction <add>, %493, %cst_357 [0] : vector<4x32xf32> to vector<32xf32>
    %498 = vector.shape_cast %497 : vector<32xf32> to vector<1x32xf32>
    %cst_358 = arith.constant 4.000000e+00 : f32
    %499 = vector.broadcast %cst_358 : f32 to vector<1x32xf32>
    %500 = arith.divf %498, %499 : vector<1x32xf32>
    %cst_359 = arith.constant dense<0.000000e+00> : vector<1x16xf32>
    %501 = tpu.matmul %500, %494, %cst_359 {dimension_numbers = #tpu.dot_dimension_numbers<[1], [0], [0], [1], [0, 0, 1, 1], [], []>} : vector<1x32xf32>, vector<32x16xf32>, vector<1x16xf32> -> vector<1x16xf32>
    %cst_360 = arith.constant dense<0.000000e+00> : vector<1x32xf32>
    %502 = tpu.matmul %501, %495, %cst_360 {dimension_numbers = #tpu.dot_dimension_numbers<[1], [0], [0], [1], [0, 0, 1, 1], [], []>} : vector<1x16xf32>, vector<16x32xf32>, vector<1x32xf32> -> vector<1x32xf32>
    %503 = vector.broadcast %502 : vector<1x32xf32> to vector<4x32xf32>
    %504 = arith.subf %493, %503 : vector<4x32xf32>
    %505 = arith.mulf %504, %504 : vector<4x32xf32>
    %cst_361 = arith.constant dense<0.000000e+00> : vector<32xf32>
    %506 = vector.multi_reduction <add>, %505, %cst_361 [0] : vector<4x32xf32> to vector<32xf32>
    %507 = vector.shape_cast %506 : vector<32xf32> to vector<1x32xf32>
    %cst_362 = arith.constant 4.000000e+00 : f32
    %508 = vector.broadcast %cst_362 : f32 to vector<1x32xf32>
    %509 = arith.divf %507, %508 : vector<1x32xf32>
    %cst_363 = arith.constant dense<0.000000e+00> : vector<1x16xf32>
    %510 = tpu.matmul %509, %494, %cst_363 {dimension_numbers = #tpu.dot_dimension_numbers<[1], [0], [0], [1], [0, 0, 1, 1], [], []>} : vector<1x32xf32>, vector<32x16xf32>, vector<1x16xf32> -> vector<1x16xf32>
    %cst_364 = arith.constant dense<0.000000e+00> : vector<1x32xf32>
    %511 = tpu.matmul %510, %495, %cst_364 {dimension_numbers = #tpu.dot_dimension_numbers<[1], [0], [0], [1], [0, 0, 1, 1], [], []>} : vector<1x16xf32>, vector<16x32xf32>, vector<1x32xf32> -> vector<1x32xf32>
    %cst_365 = arith.constant 9.99999974E-6 : f32
    %512 = vector.broadcast %cst_365 : f32 to vector<1x32xf32>
    %513 = arith.addf %511, %512 : vector<1x32xf32>
    %514 = math.rsqrt %513 : vector<1x32xf32>
    %515 = vector.broadcast %514 : vector<1x32xf32> to vector<4x32xf32>
    %516 = arith.mulf %504, %515 : vector<4x32xf32>
    %517 = vector.extract_strided_slice %496 {offsets = [0, 0], sizes = [1, 32], strides = [1, 1]} : vector<2x32xf32> to vector<1x32xf32>
    %518 = vector.broadcast %517 : vector<1x32xf32> to vector<4x32xf32>
    %519 = arith.mulf %516, %518 : vector<4x32xf32>
    %520 = vector.extract_strided_slice %496 {offsets = [1, 0], sizes = [1, 32], strides = [1, 1]} : vector<2x32xf32> to vector<1x32xf32>
    %521 = vector.broadcast %520 : vector<1x32xf32> to vector<4x32xf32>
    %522 = arith.addf %519, %521 : vector<4x32xf32>
    %cst_366 = arith.constant 0.000000e+00 : f32
    %523 = vector.broadcast %cst_366 : f32 to vector<4x32xf32>
    %524 = arith.cmpf oge, %522, %523 : vector<4x32xf32>
    %cst_367 = arith.constant 2.000000e-01 : f32
    %525 = vector.broadcast %cst_367 : f32 to vector<4x32xf32>
    %526 = arith.mulf %525, %522 : vector<4x32xf32>
    %527 = arith.select %524, %522, %526 : vector<4x32xi1>, vector<4x32xf32>
    %528 = arith.truncf %527 : vector<4x32xf32> to vector<4x32xbf16>
    %c1_368 = arith.constant 1 : index
    %c0_369 = arith.constant 0 : index
    %c0_370 = arith.constant 0 : index
    %529 = vector.load %arg42[%c1_368, %c0_369, %c0_370] : memref<3x32x32xbf16, #tpu.memory_space<vmem>>, vector<1x32x32xbf16>
    %530 = vector.shape_cast %529 : vector<1x32x32xbf16> to vector<32x32xbf16>
    %cst_371 = arith.constant dense<0.000000e+00> : vector<4x32xf32>
    %531 = tpu.matmul %528, %530, %cst_371 {dimension_numbers = #tpu.dot_dimension_numbers<[1], [0], [0], [1], [0, 0, 1, 1], [], []>} : vector<4x32xbf16>, vector<32x32xbf16>, vector<4x32xf32> -> vector<4x32xf32>
    %c0_372 = arith.constant 0 : index
    %c0_373 = arith.constant 0 : index
    %c0_374 = arith.constant 0 : index
    %532 = vector.load %arg29[%c0_372, %c0_373, %c0_374] : memref<3x4x4xbf16, #tpu.memory_space<vmem>>, vector<1x4x4xbf16>
    %533 = vector.shape_cast %532 : vector<1x4x4xbf16> to vector<4x4xbf16>
    %cst_375 = arith.constant dense<0.000000e+00> : vector<4x32xf32>
    %534 = tpu.matmul %533, %528, %cst_375 {dimension_numbers = #tpu.dot_dimension_numbers<[1], [0], [0], [1], [0, 0, 1, 1], [], []>} : vector<4x4xbf16>, vector<4x32xbf16>, vector<4x32xf32> -> vector<4x32xf32>
    %535 = arith.truncf %534 : vector<4x32xf32> to vector<4x32xbf16>
    %c0_376 = arith.constant 0 : index
    %c0_377 = arith.constant 0 : index
    %c0_378 = arith.constant 0 : index
    %536 = vector.load %arg42[%c0_376, %c0_377, %c0_378] : memref<3x32x32xbf16, #tpu.memory_space<vmem>>, vector<1x32x32xbf16>
    %537 = vector.shape_cast %536 : vector<1x32x32xbf16> to vector<32x32xbf16>
    %cst_379 = arith.constant dense<0.000000e+00> : vector<4x32xf32>
    %538 = tpu.matmul %535, %537, %cst_379 {dimension_numbers = #tpu.dot_dimension_numbers<[1], [0], [0], [1], [0, 0, 1, 1], [], []>} : vector<4x32xbf16>, vector<32x32xbf16>, vector<4x32xf32> -> vector<4x32xf32>
    %539 = arith.addf %531, %538 : vector<4x32xf32>
    %c2_380 = arith.constant 2 : index
    %c0_381 = arith.constant 0 : index
    %c0_382 = arith.constant 0 : index
    %540 = vector.load %arg29[%c2_380, %c0_381, %c0_382] : memref<3x4x4xbf16, #tpu.memory_space<vmem>>, vector<1x4x4xbf16>
    %541 = vector.shape_cast %540 : vector<1x4x4xbf16> to vector<4x4xbf16>
    %cst_383 = arith.constant dense<0.000000e+00> : vector<4x32xf32>
    %542 = tpu.matmul %541, %528, %cst_383 {dimension_numbers = #tpu.dot_dimension_numbers<[1], [0], [0], [1], [0, 0, 1, 1], [], []>} : vector<4x4xbf16>, vector<4x32xbf16>, vector<4x32xf32> -> vector<4x32xf32>
    %543 = arith.truncf %542 : vector<4x32xf32> to vector<4x32xbf16>
    %c2_384 = arith.constant 2 : index
    %c0_385 = arith.constant 0 : index
    %c0_386 = arith.constant 0 : index
    %544 = vector.load %arg42[%c2_384, %c0_385, %c0_386] : memref<3x32x32xbf16, #tpu.memory_space<vmem>>, vector<1x32x32xbf16>
    %545 = vector.shape_cast %544 : vector<1x32x32xbf16> to vector<32x32xbf16>
    %cst_387 = arith.constant dense<0.000000e+00> : vector<4x32xf32>
    %546 = tpu.matmul %543, %545, %cst_387 {dimension_numbers = #tpu.dot_dimension_numbers<[1], [0], [0], [1], [0, 0, 1, 1], [], []>} : vector<4x32xbf16>, vector<32x32xbf16>, vector<4x32xf32> -> vector<4x32xf32>
    %547 = arith.addf %539, %546 : vector<4x32xf32>
    %548 = arith.addf %547, %473 : vector<4x32xf32>
    %c0_388 = arith.constant 0 : index
    %c0_389 = arith.constant 0 : index
    %549 = vector.load %arg31[%c0_388, %c0_389] : memref<32x16xf32, #tpu.memory_space<vmem>>, vector<32x16xf32>
    %c0_390 = arith.constant 0 : index
    %c0_391 = arith.constant 0 : index
    %550 = vector.load %arg32[%c0_390, %c0_391] : memref<16x32xf32, #tpu.memory_space<vmem>>, vector<16x32xf32>
    %c0_392 = arith.constant 0 : index
    %c0_393 = arith.constant 0 : index
    %551 = vector.load %arg44[%c0_392, %c0_393] : memref<2x32xf32, #tpu.memory_space<vmem>>, vector<2x32xf32>
    %cst_394 = arith.constant dense<0.000000e+00> : vector<32xf32>
    %552 = vector.multi_reduction <add>, %548, %cst_394 [0] : vector<4x32xf32> to vector<32xf32>
    %553 = vector.shape_cast %552 : vector<32xf32> to vector<1x32xf32>
    %cst_395 = arith.constant 4.000000e+00 : f32
    %554 = vector.broadcast %cst_395 : f32 to vector<1x32xf32>
    %555 = arith.divf %553, %554 : vector<1x32xf32>
    %cst_396 = arith.constant dense<0.000000e+00> : vector<1x16xf32>
    %556 = tpu.matmul %555, %549, %cst_396 {dimension_numbers = #tpu.dot_dimension_numbers<[1], [0], [0], [1], [0, 0, 1, 1], [], []>} : vector<1x32xf32>, vector<32x16xf32>, vector<1x16xf32> -> vector<1x16xf32>
    %cst_397 = arith.constant dense<0.000000e+00> : vector<1x32xf32>
    %557 = tpu.matmul %556, %550, %cst_397 {dimension_numbers = #tpu.dot_dimension_numbers<[1], [0], [0], [1], [0, 0, 1, 1], [], []>} : vector<1x16xf32>, vector<16x32xf32>, vector<1x32xf32> -> vector<1x32xf32>
    %558 = vector.broadcast %557 : vector<1x32xf32> to vector<4x32xf32>
    %559 = arith.subf %548, %558 : vector<4x32xf32>
    %560 = arith.mulf %559, %559 : vector<4x32xf32>
    %cst_398 = arith.constant dense<0.000000e+00> : vector<32xf32>
    %561 = vector.multi_reduction <add>, %560, %cst_398 [0] : vector<4x32xf32> to vector<32xf32>
    %562 = vector.shape_cast %561 : vector<32xf32> to vector<1x32xf32>
    %cst_399 = arith.constant 4.000000e+00 : f32
    %563 = vector.broadcast %cst_399 : f32 to vector<1x32xf32>
    %564 = arith.divf %562, %563 : vector<1x32xf32>
    %cst_400 = arith.constant dense<0.000000e+00> : vector<1x16xf32>
    %565 = tpu.matmul %564, %549, %cst_400 {dimension_numbers = #tpu.dot_dimension_numbers<[1], [0], [0], [1], [0, 0, 1, 1], [], []>} : vector<1x32xf32>, vector<32x16xf32>, vector<1x16xf32> -> vector<1x16xf32>
    %cst_401 = arith.constant dense<0.000000e+00> : vector<1x32xf32>
    %566 = tpu.matmul %565, %550, %cst_401 {dimension_numbers = #tpu.dot_dimension_numbers<[1], [0], [0], [1], [0, 0, 1, 1], [], []>} : vector<1x16xf32>, vector<16x32xf32>, vector<1x32xf32> -> vector<1x32xf32>
    %cst_402 = arith.constant 9.99999974E-6 : f32
    %567 = vector.broadcast %cst_402 : f32 to vector<1x32xf32>
    %568 = arith.addf %566, %567 : vector<1x32xf32>
    %569 = math.rsqrt %568 : vector<1x32xf32>
    %570 = vector.broadcast %569 : vector<1x32xf32> to vector<4x32xf32>
    %571 = arith.mulf %559, %570 : vector<4x32xf32>
    %572 = vector.extract_strided_slice %551 {offsets = [0, 0], sizes = [1, 32], strides = [1, 1]} : vector<2x32xf32> to vector<1x32xf32>
    %573 = vector.broadcast %572 : vector<1x32xf32> to vector<4x32xf32>
    %574 = arith.mulf %571, %573 : vector<4x32xf32>
    %575 = vector.extract_strided_slice %551 {offsets = [1, 0], sizes = [1, 32], strides = [1, 1]} : vector<2x32xf32> to vector<1x32xf32>
    %576 = vector.broadcast %575 : vector<1x32xf32> to vector<4x32xf32>
    %577 = arith.addf %574, %576 : vector<4x32xf32>
    %cst_403 = arith.constant 0.000000e+00 : f32
    %578 = vector.broadcast %cst_403 : f32 to vector<4x32xf32>
    %579 = arith.cmpf oge, %577, %578 : vector<4x32xf32>
    %cst_404 = arith.constant 2.000000e-01 : f32
    %580 = vector.broadcast %cst_404 : f32 to vector<4x32xf32>
    %581 = arith.mulf %580, %577 : vector<4x32xf32>
    %582 = arith.select %579, %577, %581 : vector<4x32xi1>, vector<4x32xf32>
    %c0_405 = arith.constant 0 : index
    %c0_406 = arith.constant 0 : index
    %583 = vector.load %arg45[%c0_405, %c0_406] : memref<8x4xbf16, #tpu.memory_space<vmem>>, vector<8x4xbf16>
    %584 = arith.truncf %582 : vector<4x32xf32> to vector<4x32xbf16>
    %cst_407 = arith.constant dense<0.000000e+00> : vector<8x32xf32>
    %585 = tpu.matmul %583, %584, %cst_407 {dimension_numbers = #tpu.dot_dimension_numbers<[1], [0], [0], [1], [0, 0, 1, 1], [], []>} : vector<8x4xbf16>, vector<4x32xbf16>, vector<8x32xf32> -> vector<8x32xf32>
    %586 = arith.truncf %585 : vector<8x32xf32> to vector<8x32xbf16>
    %c0_408 = arith.constant 0 : index
    %c0_409 = arith.constant 0 : index
    %587 = vector.load %arg46[%c0_408, %c0_409] : memref<32x64xbf16, #tpu.memory_space<vmem>>, vector<32x64xbf16>
    %cst_410 = arith.constant dense<0.000000e+00> : vector<8x64xf32>
    %588 = tpu.matmul %586, %587, %cst_410 {dimension_numbers = #tpu.dot_dimension_numbers<[1], [0], [0], [1], [0, 0, 1, 1], [], []>} : vector<8x32xbf16>, vector<32x64xbf16>, vector<8x64xf32> -> vector<8x64xf32>
    %589 = arith.truncf %588 : vector<8x64xf32> to vector<8x64xbf16>
    %c1_411 = arith.constant 1 : index
    %c0_412 = arith.constant 0 : index
    %c0_413 = arith.constant 0 : index
    %590 = vector.load %arg47[%c1_411, %c0_412, %c0_413] : memref<3x64x64xbf16, #tpu.memory_space<vmem>>, vector<1x64x64xbf16>
    %591 = vector.shape_cast %590 : vector<1x64x64xbf16> to vector<64x64xbf16>
    %cst_414 = arith.constant dense<0.000000e+00> : vector<8x64xf32>
    %592 = tpu.matmul %589, %591, %cst_414 {dimension_numbers = #tpu.dot_dimension_numbers<[1], [0], [0], [1], [0, 0, 1, 1], [], []>} : vector<8x64xbf16>, vector<64x64xbf16>, vector<8x64xf32> -> vector<8x64xf32>
    %c0_415 = arith.constant 0 : index
    %c0_416 = arith.constant 0 : index
    %c0_417 = arith.constant 0 : index
    %593 = vector.load %arg20[%c0_415, %c0_416, %c0_417] : memref<3x8x8xbf16, #tpu.memory_space<vmem>>, vector<1x8x8xbf16>
    %594 = vector.shape_cast %593 : vector<1x8x8xbf16> to vector<8x8xbf16>
    %cst_418 = arith.constant dense<0.000000e+00> : vector<8x64xf32>
    %595 = tpu.matmul %594, %589, %cst_418 {dimension_numbers = #tpu.dot_dimension_numbers<[1], [0], [0], [1], [0, 0, 1, 1], [], []>} : vector<8x8xbf16>, vector<8x64xbf16>, vector<8x64xf32> -> vector<8x64xf32>
    %596 = arith.truncf %595 : vector<8x64xf32> to vector<8x64xbf16>
    %c0_419 = arith.constant 0 : index
    %c0_420 = arith.constant 0 : index
    %c0_421 = arith.constant 0 : index
    %597 = vector.load %arg47[%c0_419, %c0_420, %c0_421] : memref<3x64x64xbf16, #tpu.memory_space<vmem>>, vector<1x64x64xbf16>
    %598 = vector.shape_cast %597 : vector<1x64x64xbf16> to vector<64x64xbf16>
    %cst_422 = arith.constant dense<0.000000e+00> : vector<8x64xf32>
    %599 = tpu.matmul %596, %598, %cst_422 {dimension_numbers = #tpu.dot_dimension_numbers<[1], [0], [0], [1], [0, 0, 1, 1], [], []>} : vector<8x64xbf16>, vector<64x64xbf16>, vector<8x64xf32> -> vector<8x64xf32>
    %600 = arith.addf %592, %599 : vector<8x64xf32>
    %c2_423 = arith.constant 2 : index
    %c0_424 = arith.constant 0 : index
    %c0_425 = arith.constant 0 : index
    %601 = vector.load %arg20[%c2_423, %c0_424, %c0_425] : memref<3x8x8xbf16, #tpu.memory_space<vmem>>, vector<1x8x8xbf16>
    %602 = vector.shape_cast %601 : vector<1x8x8xbf16> to vector<8x8xbf16>
    %cst_426 = arith.constant dense<0.000000e+00> : vector<8x64xf32>
    %603 = tpu.matmul %602, %589, %cst_426 {dimension_numbers = #tpu.dot_dimension_numbers<[1], [0], [0], [1], [0, 0, 1, 1], [], []>} : vector<8x8xbf16>, vector<8x64xbf16>, vector<8x64xf32> -> vector<8x64xf32>
    %604 = arith.truncf %603 : vector<8x64xf32> to vector<8x64xbf16>
    %c2_427 = arith.constant 2 : index
    %c0_428 = arith.constant 0 : index
    %c0_429 = arith.constant 0 : index
    %605 = vector.load %arg47[%c2_427, %c0_428, %c0_429] : memref<3x64x64xbf16, #tpu.memory_space<vmem>>, vector<1x64x64xbf16>
    %606 = vector.shape_cast %605 : vector<1x64x64xbf16> to vector<64x64xbf16>
    %cst_430 = arith.constant dense<0.000000e+00> : vector<8x64xf32>
    %607 = tpu.matmul %604, %606, %cst_430 {dimension_numbers = #tpu.dot_dimension_numbers<[1], [0], [0], [1], [0, 0, 1, 1], [], []>} : vector<8x64xbf16>, vector<64x64xbf16>, vector<8x64xf32> -> vector<8x64xf32>
    %608 = arith.addf %600, %607 : vector<8x64xf32>
    %c0_431 = arith.constant 0 : index
    %c0_432 = arith.constant 0 : index
    %609 = vector.load %arg22[%c0_431, %c0_432] : memref<64x16xf32, #tpu.memory_space<vmem>>, vector<64x16xf32>
    %c0_433 = arith.constant 0 : index
    %c0_434 = arith.constant 0 : index
    %610 = vector.load %arg23[%c0_433, %c0_434] : memref<16x64xf32, #tpu.memory_space<vmem>>, vector<16x64xf32>
    %c0_435 = arith.constant 0 : index
    %c0_436 = arith.constant 0 : index
    %611 = vector.load %arg49[%c0_435, %c0_436] : memref<2x64xf32, #tpu.memory_space<vmem>>, vector<2x64xf32>
    %cst_437 = arith.constant dense<0.000000e+00> : vector<64xf32>
    %612 = vector.multi_reduction <add>, %608, %cst_437 [0] : vector<8x64xf32> to vector<64xf32>
    %613 = vector.shape_cast %612 : vector<64xf32> to vector<1x64xf32>
    %cst_438 = arith.constant 8.000000e+00 : f32
    %614 = vector.broadcast %cst_438 : f32 to vector<1x64xf32>
    %615 = arith.divf %613, %614 : vector<1x64xf32>
    %cst_439 = arith.constant dense<0.000000e+00> : vector<1x16xf32>
    %616 = tpu.matmul %615, %609, %cst_439 {dimension_numbers = #tpu.dot_dimension_numbers<[1], [0], [0], [1], [0, 0, 1, 1], [], []>} : vector<1x64xf32>, vector<64x16xf32>, vector<1x16xf32> -> vector<1x16xf32>
    %cst_440 = arith.constant dense<0.000000e+00> : vector<1x64xf32>
    %617 = tpu.matmul %616, %610, %cst_440 {dimension_numbers = #tpu.dot_dimension_numbers<[1], [0], [0], [1], [0, 0, 1, 1], [], []>} : vector<1x16xf32>, vector<16x64xf32>, vector<1x64xf32> -> vector<1x64xf32>
    %618 = vector.broadcast %617 : vector<1x64xf32> to vector<8x64xf32>
    %619 = arith.subf %608, %618 : vector<8x64xf32>
    %620 = arith.mulf %619, %619 : vector<8x64xf32>
    %cst_441 = arith.constant dense<0.000000e+00> : vector<64xf32>
    %621 = vector.multi_reduction <add>, %620, %cst_441 [0] : vector<8x64xf32> to vector<64xf32>
    %622 = vector.shape_cast %621 : vector<64xf32> to vector<1x64xf32>
    %cst_442 = arith.constant 8.000000e+00 : f32
    %623 = vector.broadcast %cst_442 : f32 to vector<1x64xf32>
    %624 = arith.divf %622, %623 : vector<1x64xf32>
    %cst_443 = arith.constant dense<0.000000e+00> : vector<1x16xf32>
    %625 = tpu.matmul %624, %609, %cst_443 {dimension_numbers = #tpu.dot_dimension_numbers<[1], [0], [0], [1], [0, 0, 1, 1], [], []>} : vector<1x64xf32>, vector<64x16xf32>, vector<1x16xf32> -> vector<1x16xf32>
    %cst_444 = arith.constant dense<0.000000e+00> : vector<1x64xf32>
    %626 = tpu.matmul %625, %610, %cst_444 {dimension_numbers = #tpu.dot_dimension_numbers<[1], [0], [0], [1], [0, 0, 1, 1], [], []>} : vector<1x16xf32>, vector<16x64xf32>, vector<1x64xf32> -> vector<1x64xf32>
    %cst_445 = arith.constant 9.99999974E-6 : f32
    %627 = vector.broadcast %cst_445 : f32 to vector<1x64xf32>
    %628 = arith.addf %626, %627 : vector<1x64xf32>
    %629 = math.rsqrt %628 : vector<1x64xf32>
    %630 = vector.broadcast %629 : vector<1x64xf32> to vector<8x64xf32>
    %631 = arith.mulf %619, %630 : vector<8x64xf32>
    %632 = vector.extract_strided_slice %611 {offsets = [0, 0], sizes = [1, 64], strides = [1, 1]} : vector<2x64xf32> to vector<1x64xf32>
    %633 = vector.broadcast %632 : vector<1x64xf32> to vector<8x64xf32>
    %634 = arith.mulf %631, %633 : vector<8x64xf32>
    %635 = vector.extract_strided_slice %611 {offsets = [1, 0], sizes = [1, 64], strides = [1, 1]} : vector<2x64xf32> to vector<1x64xf32>
    %636 = vector.broadcast %635 : vector<1x64xf32> to vector<8x64xf32>
    %637 = arith.addf %634, %636 : vector<8x64xf32>
    %cst_446 = arith.constant 0.000000e+00 : f32
    %638 = vector.broadcast %cst_446 : f32 to vector<8x64xf32>
    %639 = arith.cmpf oge, %637, %638 : vector<8x64xf32>
    %cst_447 = arith.constant 2.000000e-01 : f32
    %640 = vector.broadcast %cst_447 : f32 to vector<8x64xf32>
    %641 = arith.mulf %640, %637 : vector<8x64xf32>
    %642 = arith.select %639, %637, %641 : vector<8x64xi1>, vector<8x64xf32>
    %643 = arith.truncf %642 : vector<8x64xf32> to vector<8x64xbf16>
    %c1_448 = arith.constant 1 : index
    %c0_449 = arith.constant 0 : index
    %c0_450 = arith.constant 0 : index
    %644 = vector.load %arg48[%c1_448, %c0_449, %c0_450] : memref<3x64x64xbf16, #tpu.memory_space<vmem>>, vector<1x64x64xbf16>
    %645 = vector.shape_cast %644 : vector<1x64x64xbf16> to vector<64x64xbf16>
    %cst_451 = arith.constant dense<0.000000e+00> : vector<8x64xf32>
    %646 = tpu.matmul %643, %645, %cst_451 {dimension_numbers = #tpu.dot_dimension_numbers<[1], [0], [0], [1], [0, 0, 1, 1], [], []>} : vector<8x64xbf16>, vector<64x64xbf16>, vector<8x64xf32> -> vector<8x64xf32>
    %c0_452 = arith.constant 0 : index
    %c0_453 = arith.constant 0 : index
    %c0_454 = arith.constant 0 : index
    %647 = vector.load %arg20[%c0_452, %c0_453, %c0_454] : memref<3x8x8xbf16, #tpu.memory_space<vmem>>, vector<1x8x8xbf16>
    %648 = vector.shape_cast %647 : vector<1x8x8xbf16> to vector<8x8xbf16>
    %cst_455 = arith.constant dense<0.000000e+00> : vector<8x64xf32>
    %649 = tpu.matmul %648, %643, %cst_455 {dimension_numbers = #tpu.dot_dimension_numbers<[1], [0], [0], [1], [0, 0, 1, 1], [], []>} : vector<8x8xbf16>, vector<8x64xbf16>, vector<8x64xf32> -> vector<8x64xf32>
    %650 = arith.truncf %649 : vector<8x64xf32> to vector<8x64xbf16>
    %c0_456 = arith.constant 0 : index
    %c0_457 = arith.constant 0 : index
    %c0_458 = arith.constant 0 : index
    %651 = vector.load %arg48[%c0_456, %c0_457, %c0_458] : memref<3x64x64xbf16, #tpu.memory_space<vmem>>, vector<1x64x64xbf16>
    %652 = vector.shape_cast %651 : vector<1x64x64xbf16> to vector<64x64xbf16>
    %cst_459 = arith.constant dense<0.000000e+00> : vector<8x64xf32>
    %653 = tpu.matmul %650, %652, %cst_459 {dimension_numbers = #tpu.dot_dimension_numbers<[1], [0], [0], [1], [0, 0, 1, 1], [], []>} : vector<8x64xbf16>, vector<64x64xbf16>, vector<8x64xf32> -> vector<8x64xf32>
    %654 = arith.addf %646, %653 : vector<8x64xf32>
    %c2_460 = arith.constant 2 : index
    %c0_461 = arith.constant 0 : index
    %c0_462 = arith.constant 0 : index
    %655 = vector.load %arg20[%c2_460, %c0_461, %c0_462] : memref<3x8x8xbf16, #tpu.memory_space<vmem>>, vector<1x8x8xbf16>
    %656 = vector.shape_cast %655 : vector<1x8x8xbf16> to vector<8x8xbf16>
    %cst_463 = arith.constant dense<0.000000e+00> : vector<8x64xf32>
    %657 = tpu.matmul %656, %643, %cst_463 {dimension_numbers = #tpu.dot_dimension_numbers<[1], [0], [0], [1], [0, 0, 1, 1], [], []>} : vector<8x8xbf16>, vector<8x64xbf16>, vector<8x64xf32> -> vector<8x64xf32>
    %658 = arith.truncf %657 : vector<8x64xf32> to vector<8x64xbf16>
    %c2_464 = arith.constant 2 : index
    %c0_465 = arith.constant 0 : index
    %c0_466 = arith.constant 0 : index
    %659 = vector.load %arg48[%c2_464, %c0_465, %c0_466] : memref<3x64x64xbf16, #tpu.memory_space<vmem>>, vector<1x64x64xbf16>
    %660 = vector.shape_cast %659 : vector<1x64x64xbf16> to vector<64x64xbf16>
    %cst_467 = arith.constant dense<0.000000e+00> : vector<8x64xf32>
    %661 = tpu.matmul %658, %660, %cst_467 {dimension_numbers = #tpu.dot_dimension_numbers<[1], [0], [0], [1], [0, 0, 1, 1], [], []>} : vector<8x64xbf16>, vector<64x64xbf16>, vector<8x64xf32> -> vector<8x64xf32>
    %662 = arith.addf %654, %661 : vector<8x64xf32>
    %663 = arith.addf %662, %588 : vector<8x64xf32>
    %c0_468 = arith.constant 0 : index
    %c0_469 = arith.constant 0 : index
    %664 = vector.load %arg22[%c0_468, %c0_469] : memref<64x16xf32, #tpu.memory_space<vmem>>, vector<64x16xf32>
    %c0_470 = arith.constant 0 : index
    %c0_471 = arith.constant 0 : index
    %665 = vector.load %arg23[%c0_470, %c0_471] : memref<16x64xf32, #tpu.memory_space<vmem>>, vector<16x64xf32>
    %c0_472 = arith.constant 0 : index
    %c0_473 = arith.constant 0 : index
    %666 = vector.load %arg50[%c0_472, %c0_473] : memref<2x64xf32, #tpu.memory_space<vmem>>, vector<2x64xf32>
    %cst_474 = arith.constant dense<0.000000e+00> : vector<64xf32>
    %667 = vector.multi_reduction <add>, %663, %cst_474 [0] : vector<8x64xf32> to vector<64xf32>
    %668 = vector.shape_cast %667 : vector<64xf32> to vector<1x64xf32>
    %cst_475 = arith.constant 8.000000e+00 : f32
    %669 = vector.broadcast %cst_475 : f32 to vector<1x64xf32>
    %670 = arith.divf %668, %669 : vector<1x64xf32>
    %cst_476 = arith.constant dense<0.000000e+00> : vector<1x16xf32>
    %671 = tpu.matmul %670, %664, %cst_476 {dimension_numbers = #tpu.dot_dimension_numbers<[1], [0], [0], [1], [0, 0, 1, 1], [], []>} : vector<1x64xf32>, vector<64x16xf32>, vector<1x16xf32> -> vector<1x16xf32>
    %cst_477 = arith.constant dense<0.000000e+00> : vector<1x64xf32>
    %672 = tpu.matmul %671, %665, %cst_477 {dimension_numbers = #tpu.dot_dimension_numbers<[1], [0], [0], [1], [0, 0, 1, 1], [], []>} : vector<1x16xf32>, vector<16x64xf32>, vector<1x64xf32> -> vector<1x64xf32>
    %673 = vector.broadcast %672 : vector<1x64xf32> to vector<8x64xf32>
    %674 = arith.subf %663, %673 : vector<8x64xf32>
    %675 = arith.mulf %674, %674 : vector<8x64xf32>
    %cst_478 = arith.constant dense<0.000000e+00> : vector<64xf32>
    %676 = vector.multi_reduction <add>, %675, %cst_478 [0] : vector<8x64xf32> to vector<64xf32>
    %677 = vector.shape_cast %676 : vector<64xf32> to vector<1x64xf32>
    %cst_479 = arith.constant 8.000000e+00 : f32
    %678 = vector.broadcast %cst_479 : f32 to vector<1x64xf32>
    %679 = arith.divf %677, %678 : vector<1x64xf32>
    %cst_480 = arith.constant dense<0.000000e+00> : vector<1x16xf32>
    %680 = tpu.matmul %679, %664, %cst_480 {dimension_numbers = #tpu.dot_dimension_numbers<[1], [0], [0], [1], [0, 0, 1, 1], [], []>} : vector<1x64xf32>, vector<64x16xf32>, vector<1x16xf32> -> vector<1x16xf32>
    %cst_481 = arith.constant dense<0.000000e+00> : vector<1x64xf32>
    %681 = tpu.matmul %680, %665, %cst_481 {dimension_numbers = #tpu.dot_dimension_numbers<[1], [0], [0], [1], [0, 0, 1, 1], [], []>} : vector<1x16xf32>, vector<16x64xf32>, vector<1x64xf32> -> vector<1x64xf32>
    %cst_482 = arith.constant 9.99999974E-6 : f32
    %682 = vector.broadcast %cst_482 : f32 to vector<1x64xf32>
    %683 = arith.addf %681, %682 : vector<1x64xf32>
    %684 = math.rsqrt %683 : vector<1x64xf32>
    %685 = vector.broadcast %684 : vector<1x64xf32> to vector<8x64xf32>
    %686 = arith.mulf %674, %685 : vector<8x64xf32>
    %687 = vector.extract_strided_slice %666 {offsets = [0, 0], sizes = [1, 64], strides = [1, 1]} : vector<2x64xf32> to vector<1x64xf32>
    %688 = vector.broadcast %687 : vector<1x64xf32> to vector<8x64xf32>
    %689 = arith.mulf %686, %688 : vector<8x64xf32>
    %690 = vector.extract_strided_slice %666 {offsets = [1, 0], sizes = [1, 64], strides = [1, 1]} : vector<2x64xf32> to vector<1x64xf32>
    %691 = vector.broadcast %690 : vector<1x64xf32> to vector<8x64xf32>
    %692 = arith.addf %689, %691 : vector<8x64xf32>
    %cst_483 = arith.constant 0.000000e+00 : f32
    %693 = vector.broadcast %cst_483 : f32 to vector<8x64xf32>
    %694 = arith.cmpf oge, %692, %693 : vector<8x64xf32>
    %cst_484 = arith.constant 2.000000e-01 : f32
    %695 = vector.broadcast %cst_484 : f32 to vector<8x64xf32>
    %696 = arith.mulf %695, %692 : vector<8x64xf32>
    %697 = arith.select %694, %692, %696 : vector<8x64xi1>, vector<8x64xf32>
    %c0_485 = arith.constant 0 : index
    %c0_486 = arith.constant 0 : index
    %698 = vector.load %arg51[%c0_485, %c0_486] : memref<16x8xbf16, #tpu.memory_space<vmem>>, vector<16x8xbf16>
    %699 = arith.truncf %697 : vector<8x64xf32> to vector<8x64xbf16>
    %cst_487 = arith.constant dense<0.000000e+00> : vector<16x64xf32>
    %700 = tpu.matmul %698, %699, %cst_487 {dimension_numbers = #tpu.dot_dimension_numbers<[1], [0], [0], [1], [0, 0, 1, 1], [], []>} : vector<16x8xbf16>, vector<8x64xbf16>, vector<16x64xf32> -> vector<16x64xf32>
    %701 = arith.truncf %700 : vector<16x64xf32> to vector<16x64xbf16>
    %c0_488 = arith.constant 0 : index
    %c0_489 = arith.constant 0 : index
    %702 = vector.load %arg52[%c0_488, %c0_489] : memref<64x128xbf16, #tpu.memory_space<vmem>>, vector<64x128xbf16>
    %cst_490 = arith.constant dense<0.000000e+00> : vector<16x128xf32>
    %703 = tpu.matmul %701, %702, %cst_490 {dimension_numbers = #tpu.dot_dimension_numbers<[1], [0], [0], [1], [0, 0, 1, 1], [], []>} : vector<16x64xbf16>, vector<64x128xbf16>, vector<16x128xf32> -> vector<16x128xf32>
    %704 = arith.truncf %703 : vector<16x128xf32> to vector<16x128xbf16>
    %c0_491 = arith.constant 0 : index
    %c0_492 = arith.constant 0 : index
    %705 = vector.load %arg59[%c0_491, %c0_492] : memref<128x64xbf16, #tpu.memory_space<vmem>>, vector<128x64xbf16>
    %cst_493 = arith.constant dense<0.000000e+00> : vector<16x64xf32>
    %706 = tpu.matmul %704, %705, %cst_493 {dimension_numbers = #tpu.dot_dimension_numbers<[1], [0], [0], [1], [0, 0, 1, 1], [], []>} : vector<16x128xbf16>, vector<128x64xbf16>, vector<16x64xf32> -> vector<16x64xf32>
    %707 = arith.truncf %703 : vector<16x128xf32> to vector<16x128xbf16>
    %c1_494 = arith.constant 1 : index
    %c0_495 = arith.constant 0 : index
    %c0_496 = arith.constant 0 : index
    %708 = vector.load %arg53[%c1_494, %c0_495, %c0_496] : memref<3x128x64xbf16, #tpu.memory_space<vmem>>, vector<1x128x64xbf16>
    %709 = vector.shape_cast %708 : vector<1x128x64xbf16> to vector<128x64xbf16>
    %cst_497 = arith.constant dense<0.000000e+00> : vector<16x64xf32>
    %710 = tpu.matmul %707, %709, %cst_497 {dimension_numbers = #tpu.dot_dimension_numbers<[1], [0], [0], [1], [0, 0, 1, 1], [], []>} : vector<16x128xbf16>, vector<128x64xbf16>, vector<16x64xf32> -> vector<16x64xf32>
    %c0_498 = arith.constant 0 : index
    %c0_499 = arith.constant 0 : index
    %c0_500 = arith.constant 0 : index
    %711 = vector.load %arg10[%c0_498, %c0_499, %c0_500] : memref<3x16x16xbf16, #tpu.memory_space<vmem>>, vector<1x16x16xbf16>
    %712 = vector.shape_cast %711 : vector<1x16x16xbf16> to vector<16x16xbf16>
    %cst_501 = arith.constant dense<0.000000e+00> : vector<16x128xf32>
    %713 = tpu.matmul %712, %707, %cst_501 {dimension_numbers = #tpu.dot_dimension_numbers<[1], [0], [0], [1], [0, 0, 1, 1], [], []>} : vector<16x16xbf16>, vector<16x128xbf16>, vector<16x128xf32> -> vector<16x128xf32>
    %714 = arith.truncf %713 : vector<16x128xf32> to vector<16x128xbf16>
    %c0_502 = arith.constant 0 : index
    %c0_503 = arith.constant 0 : index
    %c0_504 = arith.constant 0 : index
    %715 = vector.load %arg53[%c0_502, %c0_503, %c0_504] : memref<3x128x64xbf16, #tpu.memory_space<vmem>>, vector<1x128x64xbf16>
    %716 = vector.shape_cast %715 : vector<1x128x64xbf16> to vector<128x64xbf16>
    %cst_505 = arith.constant dense<0.000000e+00> : vector<16x64xf32>
    %717 = tpu.matmul %714, %716, %cst_505 {dimension_numbers = #tpu.dot_dimension_numbers<[1], [0], [0], [1], [0, 0, 1, 1], [], []>} : vector<16x128xbf16>, vector<128x64xbf16>, vector<16x64xf32> -> vector<16x64xf32>
    %718 = arith.addf %710, %717 : vector<16x64xf32>
    %c2_506 = arith.constant 2 : index
    %c0_507 = arith.constant 0 : index
    %c0_508 = arith.constant 0 : index
    %719 = vector.load %arg10[%c2_506, %c0_507, %c0_508] : memref<3x16x16xbf16, #tpu.memory_space<vmem>>, vector<1x16x16xbf16>
    %720 = vector.shape_cast %719 : vector<1x16x16xbf16> to vector<16x16xbf16>
    %cst_509 = arith.constant dense<0.000000e+00> : vector<16x128xf32>
    %721 = tpu.matmul %720, %707, %cst_509 {dimension_numbers = #tpu.dot_dimension_numbers<[1], [0], [0], [1], [0, 0, 1, 1], [], []>} : vector<16x16xbf16>, vector<16x128xbf16>, vector<16x128xf32> -> vector<16x128xf32>
    %722 = arith.truncf %721 : vector<16x128xf32> to vector<16x128xbf16>
    %c2_510 = arith.constant 2 : index
    %c0_511 = arith.constant 0 : index
    %c0_512 = arith.constant 0 : index
    %723 = vector.load %arg53[%c2_510, %c0_511, %c0_512] : memref<3x128x64xbf16, #tpu.memory_space<vmem>>, vector<1x128x64xbf16>
    %724 = vector.shape_cast %723 : vector<1x128x64xbf16> to vector<128x64xbf16>
    %cst_513 = arith.constant dense<0.000000e+00> : vector<16x64xf32>
    %725 = tpu.matmul %722, %724, %cst_513 {dimension_numbers = #tpu.dot_dimension_numbers<[1], [0], [0], [1], [0, 0, 1, 1], [], []>} : vector<16x128xbf16>, vector<128x64xbf16>, vector<16x64xf32> -> vector<16x64xf32>
    %726 = arith.addf %718, %725 : vector<16x64xf32>
    %c0_514 = arith.constant 0 : index
    %c0_515 = arith.constant 0 : index
    %727 = vector.load %arg55[%c0_514, %c0_515] : memref<64x8xf32, #tpu.memory_space<vmem>>, vector<64x8xf32>
    %c0_516 = arith.constant 0 : index
    %c0_517 = arith.constant 0 : index
    %728 = vector.load %arg56[%c0_516, %c0_517] : memref<8x64xf32, #tpu.memory_space<vmem>>, vector<8x64xf32>
    %c0_518 = arith.constant 0 : index
    %c0_519 = arith.constant 0 : index
    %729 = vector.load %arg57[%c0_518, %c0_519] : memref<2x64xf32, #tpu.memory_space<vmem>>, vector<2x64xf32>
    %cst_520 = arith.constant dense<0.000000e+00> : vector<64xf32>
    %730 = vector.multi_reduction <add>, %726, %cst_520 [0] : vector<16x64xf32> to vector<64xf32>
    %731 = vector.shape_cast %730 : vector<64xf32> to vector<1x64xf32>
    %cst_521 = arith.constant 1.600000e+01 : f32
    %732 = vector.broadcast %cst_521 : f32 to vector<1x64xf32>
    %733 = arith.divf %731, %732 : vector<1x64xf32>
    %cst_522 = arith.constant dense<0.000000e+00> : vector<1x8xf32>
    %734 = tpu.matmul %733, %727, %cst_522 {dimension_numbers = #tpu.dot_dimension_numbers<[1], [0], [0], [1], [0, 0, 1, 1], [], []>} : vector<1x64xf32>, vector<64x8xf32>, vector<1x8xf32> -> vector<1x8xf32>
    %cst_523 = arith.constant dense<0.000000e+00> : vector<1x64xf32>
    %735 = tpu.matmul %734, %728, %cst_523 {dimension_numbers = #tpu.dot_dimension_numbers<[1], [0], [0], [1], [0, 0, 1, 1], [], []>} : vector<1x8xf32>, vector<8x64xf32>, vector<1x64xf32> -> vector<1x64xf32>
    %736 = vector.broadcast %735 : vector<1x64xf32> to vector<16x64xf32>
    %737 = arith.subf %726, %736 : vector<16x64xf32>
    %738 = arith.mulf %737, %737 : vector<16x64xf32>
    %cst_524 = arith.constant dense<0.000000e+00> : vector<64xf32>
    %739 = vector.multi_reduction <add>, %738, %cst_524 [0] : vector<16x64xf32> to vector<64xf32>
    %740 = vector.shape_cast %739 : vector<64xf32> to vector<1x64xf32>
    %cst_525 = arith.constant 1.600000e+01 : f32
    %741 = vector.broadcast %cst_525 : f32 to vector<1x64xf32>
    %742 = arith.divf %740, %741 : vector<1x64xf32>
    %cst_526 = arith.constant dense<0.000000e+00> : vector<1x8xf32>
    %743 = tpu.matmul %742, %727, %cst_526 {dimension_numbers = #tpu.dot_dimension_numbers<[1], [0], [0], [1], [0, 0, 1, 1], [], []>} : vector<1x64xf32>, vector<64x8xf32>, vector<1x8xf32> -> vector<1x8xf32>
    %cst_527 = arith.constant dense<0.000000e+00> : vector<1x64xf32>
    %744 = tpu.matmul %743, %728, %cst_527 {dimension_numbers = #tpu.dot_dimension_numbers<[1], [0], [0], [1], [0, 0, 1, 1], [], []>} : vector<1x8xf32>, vector<8x64xf32>, vector<1x64xf32> -> vector<1x64xf32>
    %cst_528 = arith.constant 9.99999974E-6 : f32
    %745 = vector.broadcast %cst_528 : f32 to vector<1x64xf32>
    %746 = arith.addf %744, %745 : vector<1x64xf32>
    %747 = math.rsqrt %746 : vector<1x64xf32>
    %748 = vector.broadcast %747 : vector<1x64xf32> to vector<16x64xf32>
    %749 = arith.mulf %737, %748 : vector<16x64xf32>
    %750 = vector.extract_strided_slice %729 {offsets = [0, 0], sizes = [1, 64], strides = [1, 1]} : vector<2x64xf32> to vector<1x64xf32>
    %751 = vector.broadcast %750 : vector<1x64xf32> to vector<16x64xf32>
    %752 = arith.mulf %749, %751 : vector<16x64xf32>
    %753 = vector.extract_strided_slice %729 {offsets = [1, 0], sizes = [1, 64], strides = [1, 1]} : vector<2x64xf32> to vector<1x64xf32>
    %754 = vector.broadcast %753 : vector<1x64xf32> to vector<16x64xf32>
    %755 = arith.addf %752, %754 : vector<16x64xf32>
    %cst_529 = arith.constant 0.000000e+00 : f32
    %756 = vector.broadcast %cst_529 : f32 to vector<16x64xf32>
    %757 = arith.cmpf oge, %755, %756 : vector<16x64xf32>
    %cst_530 = arith.constant 2.000000e-01 : f32
    %758 = vector.broadcast %cst_530 : f32 to vector<16x64xf32>
    %759 = arith.mulf %758, %755 : vector<16x64xf32>
    %760 = arith.select %757, %755, %759 : vector<16x64xi1>, vector<16x64xf32>
    %761 = arith.truncf %760 : vector<16x64xf32> to vector<16x64xbf16>
    %c1_531 = arith.constant 1 : index
    %c0_532 = arith.constant 0 : index
    %c0_533 = arith.constant 0 : index
    %762 = vector.load %arg54[%c1_531, %c0_532, %c0_533] : memref<3x64x64xbf16, #tpu.memory_space<vmem>>, vector<1x64x64xbf16>
    %763 = vector.shape_cast %762 : vector<1x64x64xbf16> to vector<64x64xbf16>
    %cst_534 = arith.constant dense<0.000000e+00> : vector<16x64xf32>
    %764 = tpu.matmul %761, %763, %cst_534 {dimension_numbers = #tpu.dot_dimension_numbers<[1], [0], [0], [1], [0, 0, 1, 1], [], []>} : vector<16x64xbf16>, vector<64x64xbf16>, vector<16x64xf32> -> vector<16x64xf32>
    %c0_535 = arith.constant 0 : index
    %c0_536 = arith.constant 0 : index
    %c0_537 = arith.constant 0 : index
    %765 = vector.load %arg10[%c0_535, %c0_536, %c0_537] : memref<3x16x16xbf16, #tpu.memory_space<vmem>>, vector<1x16x16xbf16>
    %766 = vector.shape_cast %765 : vector<1x16x16xbf16> to vector<16x16xbf16>
    %cst_538 = arith.constant dense<0.000000e+00> : vector<16x64xf32>
    %767 = tpu.matmul %766, %761, %cst_538 {dimension_numbers = #tpu.dot_dimension_numbers<[1], [0], [0], [1], [0, 0, 1, 1], [], []>} : vector<16x16xbf16>, vector<16x64xbf16>, vector<16x64xf32> -> vector<16x64xf32>
    %768 = arith.truncf %767 : vector<16x64xf32> to vector<16x64xbf16>
    %c0_539 = arith.constant 0 : index
    %c0_540 = arith.constant 0 : index
    %c0_541 = arith.constant 0 : index
    %769 = vector.load %arg54[%c0_539, %c0_540, %c0_541] : memref<3x64x64xbf16, #tpu.memory_space<vmem>>, vector<1x64x64xbf16>
    %770 = vector.shape_cast %769 : vector<1x64x64xbf16> to vector<64x64xbf16>
    %cst_542 = arith.constant dense<0.000000e+00> : vector<16x64xf32>
    %771 = tpu.matmul %768, %770, %cst_542 {dimension_numbers = #tpu.dot_dimension_numbers<[1], [0], [0], [1], [0, 0, 1, 1], [], []>} : vector<16x64xbf16>, vector<64x64xbf16>, vector<16x64xf32> -> vector<16x64xf32>
    %772 = arith.addf %764, %771 : vector<16x64xf32>
    %c2_543 = arith.constant 2 : index
    %c0_544 = arith.constant 0 : index
    %c0_545 = arith.constant 0 : index
    %773 = vector.load %arg10[%c2_543, %c0_544, %c0_545] : memref<3x16x16xbf16, #tpu.memory_space<vmem>>, vector<1x16x16xbf16>
    %774 = vector.shape_cast %773 : vector<1x16x16xbf16> to vector<16x16xbf16>
    %cst_546 = arith.constant dense<0.000000e+00> : vector<16x64xf32>
    %775 = tpu.matmul %774, %761, %cst_546 {dimension_numbers = #tpu.dot_dimension_numbers<[1], [0], [0], [1], [0, 0, 1, 1], [], []>} : vector<16x16xbf16>, vector<16x64xbf16>, vector<16x64xf32> -> vector<16x64xf32>
    %776 = arith.truncf %775 : vector<16x64xf32> to vector<16x64xbf16>
    %c2_547 = arith.constant 2 : index
    %c0_548 = arith.constant 0 : index
    %c0_549 = arith.constant 0 : index
    %777 = vector.load %arg54[%c2_547, %c0_548, %c0_549] : memref<3x64x64xbf16, #tpu.memory_space<vmem>>, vector<1x64x64xbf16>
    %778 = vector.shape_cast %777 : vector<1x64x64xbf16> to vector<64x64xbf16>
    %cst_550 = arith.constant dense<0.000000e+00> : vector<16x64xf32>
    %779 = tpu.matmul %776, %778, %cst_550 {dimension_numbers = #tpu.dot_dimension_numbers<[1], [0], [0], [1], [0, 0, 1, 1], [], []>} : vector<16x64xbf16>, vector<64x64xbf16>, vector<16x64xf32> -> vector<16x64xf32>
    %780 = arith.addf %772, %779 : vector<16x64xf32>
    %781 = arith.addf %780, %706 : vector<16x64xf32>
    %c0_551 = arith.constant 0 : index
    %c0_552 = arith.constant 0 : index
    %782 = vector.load %arg55[%c0_551, %c0_552] : memref<64x8xf32, #tpu.memory_space<vmem>>, vector<64x8xf32>
    %c0_553 = arith.constant 0 : index
    %c0_554 = arith.constant 0 : index
    %783 = vector.load %arg56[%c0_553, %c0_554] : memref<8x64xf32, #tpu.memory_space<vmem>>, vector<8x64xf32>
    %c0_555 = arith.constant 0 : index
    %c0_556 = arith.constant 0 : index
    %784 = vector.load %arg58[%c0_555, %c0_556] : memref<2x64xf32, #tpu.memory_space<vmem>>, vector<2x64xf32>
    %cst_557 = arith.constant dense<0.000000e+00> : vector<64xf32>
    %785 = vector.multi_reduction <add>, %781, %cst_557 [0] : vector<16x64xf32> to vector<64xf32>
    %786 = vector.shape_cast %785 : vector<64xf32> to vector<1x64xf32>
    %cst_558 = arith.constant 1.600000e+01 : f32
    %787 = vector.broadcast %cst_558 : f32 to vector<1x64xf32>
    %788 = arith.divf %786, %787 : vector<1x64xf32>
    %cst_559 = arith.constant dense<0.000000e+00> : vector<1x8xf32>
    %789 = tpu.matmul %788, %782, %cst_559 {dimension_numbers = #tpu.dot_dimension_numbers<[1], [0], [0], [1], [0, 0, 1, 1], [], []>} : vector<1x64xf32>, vector<64x8xf32>, vector<1x8xf32> -> vector<1x8xf32>
    %cst_560 = arith.constant dense<0.000000e+00> : vector<1x64xf32>
    %790 = tpu.matmul %789, %783, %cst_560 {dimension_numbers = #tpu.dot_dimension_numbers<[1], [0], [0], [1], [0, 0, 1, 1], [], []>} : vector<1x8xf32>, vector<8x64xf32>, vector<1x64xf32> -> vector<1x64xf32>
    %791 = vector.broadcast %790 : vector<1x64xf32> to vector<16x64xf32>
    %792 = arith.subf %781, %791 : vector<16x64xf32>
    %793 = arith.mulf %792, %792 : vector<16x64xf32>
    %cst_561 = arith.constant dense<0.000000e+00> : vector<64xf32>
    %794 = vector.multi_reduction <add>, %793, %cst_561 [0] : vector<16x64xf32> to vector<64xf32>
    %795 = vector.shape_cast %794 : vector<64xf32> to vector<1x64xf32>
    %cst_562 = arith.constant 1.600000e+01 : f32
    %796 = vector.broadcast %cst_562 : f32 to vector<1x64xf32>
    %797 = arith.divf %795, %796 : vector<1x64xf32>
    %cst_563 = arith.constant dense<0.000000e+00> : vector<1x8xf32>
    %798 = tpu.matmul %797, %782, %cst_563 {dimension_numbers = #tpu.dot_dimension_numbers<[1], [0], [0], [1], [0, 0, 1, 1], [], []>} : vector<1x64xf32>, vector<64x8xf32>, vector<1x8xf32> -> vector<1x8xf32>
    %cst_564 = arith.constant dense<0.000000e+00> : vector<1x64xf32>
    %799 = tpu.matmul %798, %783, %cst_564 {dimension_numbers = #tpu.dot_dimension_numbers<[1], [0], [0], [1], [0, 0, 1, 1], [], []>} : vector<1x8xf32>, vector<8x64xf32>, vector<1x64xf32> -> vector<1x64xf32>
    %cst_565 = arith.constant 9.99999974E-6 : f32
    %800 = vector.broadcast %cst_565 : f32 to vector<1x64xf32>
    %801 = arith.addf %799, %800 : vector<1x64xf32>
    %802 = math.rsqrt %801 : vector<1x64xf32>
    %803 = vector.broadcast %802 : vector<1x64xf32> to vector<16x64xf32>
    %804 = arith.mulf %792, %803 : vector<16x64xf32>
    %805 = vector.extract_strided_slice %784 {offsets = [0, 0], sizes = [1, 64], strides = [1, 1]} : vector<2x64xf32> to vector<1x64xf32>
    %806 = vector.broadcast %805 : vector<1x64xf32> to vector<16x64xf32>
    %807 = arith.mulf %804, %806 : vector<16x64xf32>
    %808 = vector.extract_strided_slice %784 {offsets = [1, 0], sizes = [1, 64], strides = [1, 1]} : vector<2x64xf32> to vector<1x64xf32>
    %809 = vector.broadcast %808 : vector<1x64xf32> to vector<16x64xf32>
    %810 = arith.addf %807, %809 : vector<16x64xf32>
    %cst_566 = arith.constant 0.000000e+00 : f32
    %811 = vector.broadcast %cst_566 : f32 to vector<16x64xf32>
    %812 = arith.cmpf oge, %810, %811 : vector<16x64xf32>
    %cst_567 = arith.constant 2.000000e-01 : f32
    %813 = vector.broadcast %cst_567 : f32 to vector<16x64xf32>
    %814 = arith.mulf %813, %810 : vector<16x64xf32>
    %815 = arith.select %812, %810, %814 : vector<16x64xi1>, vector<16x64xf32>
    %c0_568 = arith.constant 0 : index
    %c0_569 = arith.constant 0 : index
    %816 = vector.load %arg60[%c0_568, %c0_569] : memref<32x16xbf16, #tpu.memory_space<vmem>>, vector<32x16xbf16>
    %817 = arith.truncf %815 : vector<16x64xf32> to vector<16x64xbf16>
    %cst_570 = arith.constant dense<0.000000e+00> : vector<32x64xf32>
    %818 = tpu.matmul %816, %817, %cst_570 {dimension_numbers = #tpu.dot_dimension_numbers<[1], [0], [0], [1], [0, 0, 1, 1], [], []>} : vector<32x16xbf16>, vector<16x64xbf16>, vector<32x64xf32> -> vector<32x64xf32>
    %819 = arith.truncf %818 : vector<32x64xf32> to vector<32x64xbf16>
    %c0_571 = arith.constant 0 : index
    %c0_572 = arith.constant 0 : index
    %820 = vector.load %arg61[%c0_571, %c0_572] : memref<64x128xbf16, #tpu.memory_space<vmem>>, vector<64x128xbf16>
    %cst_573 = arith.constant dense<0.000000e+00> : vector<32x128xf32>
    %821 = tpu.matmul %819, %820, %cst_573 {dimension_numbers = #tpu.dot_dimension_numbers<[1], [0], [0], [1], [0, 0, 1, 1], [], []>} : vector<32x64xbf16>, vector<64x128xbf16>, vector<32x128xf32> -> vector<32x128xf32>
    %822 = arith.truncf %821 : vector<32x128xf32> to vector<32x128xbf16>
    %c1_574 = arith.constant 1 : index
    %c0_575 = arith.constant 0 : index
    %c0_576 = arith.constant 0 : index
    %823 = vector.load %arg62[%c1_574, %c0_575, %c0_576] : memref<3x128x128xbf16, #tpu.memory_space<vmem>>, vector<1x128x128xbf16>
    %824 = vector.shape_cast %823 : vector<1x128x128xbf16> to vector<128x128xbf16>
    %cst_577 = arith.constant dense<0.000000e+00> : vector<32x128xf32>
    %825 = tpu.matmul %822, %824, %cst_577 {dimension_numbers = #tpu.dot_dimension_numbers<[1], [0], [0], [1], [0, 0, 1, 1], [], []>} : vector<32x128xbf16>, vector<128x128xbf16>, vector<32x128xf32> -> vector<32x128xf32>
    %c0_578 = arith.constant 0 : index
    %c0_579 = arith.constant 0 : index
    %c0_580 = arith.constant 0 : index
    %826 = vector.load %arg63[%c0_578, %c0_579, %c0_580] : memref<3x32x32xbf16, #tpu.memory_space<vmem>>, vector<1x32x32xbf16>
    %827 = vector.shape_cast %826 : vector<1x32x32xbf16> to vector<32x32xbf16>
    %cst_581 = arith.constant dense<0.000000e+00> : vector<32x128xf32>
    %828 = tpu.matmul %827, %822, %cst_581 {dimension_numbers = #tpu.dot_dimension_numbers<[1], [0], [0], [1], [0, 0, 1, 1], [], []>} : vector<32x32xbf16>, vector<32x128xbf16>, vector<32x128xf32> -> vector<32x128xf32>
    %829 = arith.truncf %828 : vector<32x128xf32> to vector<32x128xbf16>
    %c0_582 = arith.constant 0 : index
    %c0_583 = arith.constant 0 : index
    %c0_584 = arith.constant 0 : index
    %830 = vector.load %arg62[%c0_582, %c0_583, %c0_584] : memref<3x128x128xbf16, #tpu.memory_space<vmem>>, vector<1x128x128xbf16>
    %831 = vector.shape_cast %830 : vector<1x128x128xbf16> to vector<128x128xbf16>
    %cst_585 = arith.constant dense<0.000000e+00> : vector<32x128xf32>
    %832 = tpu.matmul %829, %831, %cst_585 {dimension_numbers = #tpu.dot_dimension_numbers<[1], [0], [0], [1], [0, 0, 1, 1], [], []>} : vector<32x128xbf16>, vector<128x128xbf16>, vector<32x128xf32> -> vector<32x128xf32>
    %833 = arith.addf %825, %832 : vector<32x128xf32>
    %c2_586 = arith.constant 2 : index
    %c0_587 = arith.constant 0 : index
    %c0_588 = arith.constant 0 : index
    %834 = vector.load %arg63[%c2_586, %c0_587, %c0_588] : memref<3x32x32xbf16, #tpu.memory_space<vmem>>, vector<1x32x32xbf16>
    %835 = vector.shape_cast %834 : vector<1x32x32xbf16> to vector<32x32xbf16>
    %cst_589 = arith.constant dense<0.000000e+00> : vector<32x128xf32>
    %836 = tpu.matmul %835, %822, %cst_589 {dimension_numbers = #tpu.dot_dimension_numbers<[1], [0], [0], [1], [0, 0, 1, 1], [], []>} : vector<32x32xbf16>, vector<32x128xbf16>, vector<32x128xf32> -> vector<32x128xf32>
    %837 = arith.truncf %836 : vector<32x128xf32> to vector<32x128xbf16>
    %c2_590 = arith.constant 2 : index
    %c0_591 = arith.constant 0 : index
    %c0_592 = arith.constant 0 : index
    %838 = vector.load %arg62[%c2_590, %c0_591, %c0_592] : memref<3x128x128xbf16, #tpu.memory_space<vmem>>, vector<1x128x128xbf16>
    %839 = vector.shape_cast %838 : vector<1x128x128xbf16> to vector<128x128xbf16>
    %cst_593 = arith.constant dense<0.000000e+00> : vector<32x128xf32>
    %840 = tpu.matmul %837, %839, %cst_593 {dimension_numbers = #tpu.dot_dimension_numbers<[1], [0], [0], [1], [0, 0, 1, 1], [], []>} : vector<32x128xbf16>, vector<128x128xbf16>, vector<32x128xf32> -> vector<32x128xf32>
    %841 = arith.addf %833, %840 : vector<32x128xf32>
    %c0_594 = arith.constant 0 : index
    %c0_595 = arith.constant 0 : index
    %842 = vector.load %arg4[%c0_594, %c0_595] : memref<128x8xf32, #tpu.memory_space<vmem>>, vector<128x8xf32>
    %c0_596 = arith.constant 0 : index
    %c0_597 = arith.constant 0 : index
    %843 = vector.load %arg5[%c0_596, %c0_597] : memref<8x128xf32, #tpu.memory_space<vmem>>, vector<8x128xf32>
    %c0_598 = arith.constant 0 : index
    %c0_599 = arith.constant 0 : index
    %844 = vector.load %arg65[%c0_598, %c0_599] : memref<2x128xf32, #tpu.memory_space<vmem>>, vector<2x128xf32>
    %cst_600 = arith.constant dense<0.000000e+00> : vector<128xf32>
    %845 = vector.multi_reduction <add>, %841, %cst_600 [0] : vector<32x128xf32> to vector<128xf32>
    %846 = vector.shape_cast %845 : vector<128xf32> to vector<1x128xf32>
    %cst_601 = arith.constant 3.200000e+01 : f32
    %847 = vector.broadcast %cst_601 : f32 to vector<1x128xf32>
    %848 = arith.divf %846, %847 : vector<1x128xf32>
    %cst_602 = arith.constant dense<0.000000e+00> : vector<1x8xf32>
    %849 = tpu.matmul %848, %842, %cst_602 {dimension_numbers = #tpu.dot_dimension_numbers<[1], [0], [0], [1], [0, 0, 1, 1], [], []>} : vector<1x128xf32>, vector<128x8xf32>, vector<1x8xf32> -> vector<1x8xf32>
    %cst_603 = arith.constant dense<0.000000e+00> : vector<1x128xf32>
    %850 = tpu.matmul %849, %843, %cst_603 {dimension_numbers = #tpu.dot_dimension_numbers<[1], [0], [0], [1], [0, 0, 1, 1], [], []>} : vector<1x8xf32>, vector<8x128xf32>, vector<1x128xf32> -> vector<1x128xf32>
    %851 = vector.broadcast %850 : vector<1x128xf32> to vector<32x128xf32>
    %852 = arith.subf %841, %851 : vector<32x128xf32>
    %853 = arith.mulf %852, %852 : vector<32x128xf32>
    %cst_604 = arith.constant dense<0.000000e+00> : vector<128xf32>
    %854 = vector.multi_reduction <add>, %853, %cst_604 [0] : vector<32x128xf32> to vector<128xf32>
    %855 = vector.shape_cast %854 : vector<128xf32> to vector<1x128xf32>
    %cst_605 = arith.constant 3.200000e+01 : f32
    %856 = vector.broadcast %cst_605 : f32 to vector<1x128xf32>
    %857 = arith.divf %855, %856 : vector<1x128xf32>
    %cst_606 = arith.constant dense<0.000000e+00> : vector<1x8xf32>
    %858 = tpu.matmul %857, %842, %cst_606 {dimension_numbers = #tpu.dot_dimension_numbers<[1], [0], [0], [1], [0, 0, 1, 1], [], []>} : vector<1x128xf32>, vector<128x8xf32>, vector<1x8xf32> -> vector<1x8xf32>
    %cst_607 = arith.constant dense<0.000000e+00> : vector<1x128xf32>
    %859 = tpu.matmul %858, %843, %cst_607 {dimension_numbers = #tpu.dot_dimension_numbers<[1], [0], [0], [1], [0, 0, 1, 1], [], []>} : vector<1x8xf32>, vector<8x128xf32>, vector<1x128xf32> -> vector<1x128xf32>
    %cst_608 = arith.constant 9.99999974E-6 : f32
    %860 = vector.broadcast %cst_608 : f32 to vector<1x128xf32>
    %861 = arith.addf %859, %860 : vector<1x128xf32>
    %862 = math.rsqrt %861 : vector<1x128xf32>
    %863 = vector.broadcast %862 : vector<1x128xf32> to vector<32x128xf32>
    %864 = arith.mulf %852, %863 : vector<32x128xf32>
    %865 = vector.extract_strided_slice %844 {offsets = [0, 0], sizes = [1, 128], strides = [1, 1]} : vector<2x128xf32> to vector<1x128xf32>
    %866 = vector.broadcast %865 : vector<1x128xf32> to vector<32x128xf32>
    %867 = arith.mulf %864, %866 : vector<32x128xf32>
    %868 = vector.extract_strided_slice %844 {offsets = [1, 0], sizes = [1, 128], strides = [1, 1]} : vector<2x128xf32> to vector<1x128xf32>
    %869 = vector.broadcast %868 : vector<1x128xf32> to vector<32x128xf32>
    %870 = arith.addf %867, %869 : vector<32x128xf32>
    %cst_609 = arith.constant 0.000000e+00 : f32
    %871 = vector.broadcast %cst_609 : f32 to vector<32x128xf32>
    %872 = arith.cmpf oge, %870, %871 : vector<32x128xf32>
    %cst_610 = arith.constant 2.000000e-01 : f32
    %873 = vector.broadcast %cst_610 : f32 to vector<32x128xf32>
    %874 = arith.mulf %873, %870 : vector<32x128xf32>
    %875 = arith.select %872, %870, %874 : vector<32x128xi1>, vector<32x128xf32>
    %876 = arith.truncf %875 : vector<32x128xf32> to vector<32x128xbf16>
    %c1_611 = arith.constant 1 : index
    %c0_612 = arith.constant 0 : index
    %c0_613 = arith.constant 0 : index
    %877 = vector.load %arg64[%c1_611, %c0_612, %c0_613] : memref<3x128x128xbf16, #tpu.memory_space<vmem>>, vector<1x128x128xbf16>
    %878 = vector.shape_cast %877 : vector<1x128x128xbf16> to vector<128x128xbf16>
    %cst_614 = arith.constant dense<0.000000e+00> : vector<32x128xf32>
    %879 = tpu.matmul %876, %878, %cst_614 {dimension_numbers = #tpu.dot_dimension_numbers<[1], [0], [0], [1], [0, 0, 1, 1], [], []>} : vector<32x128xbf16>, vector<128x128xbf16>, vector<32x128xf32> -> vector<32x128xf32>
    %c0_615 = arith.constant 0 : index
    %c0_616 = arith.constant 0 : index
    %c0_617 = arith.constant 0 : index
    %880 = vector.load %arg63[%c0_615, %c0_616, %c0_617] : memref<3x32x32xbf16, #tpu.memory_space<vmem>>, vector<1x32x32xbf16>
    %881 = vector.shape_cast %880 : vector<1x32x32xbf16> to vector<32x32xbf16>
    %cst_618 = arith.constant dense<0.000000e+00> : vector<32x128xf32>
    %882 = tpu.matmul %881, %876, %cst_618 {dimension_numbers = #tpu.dot_dimension_numbers<[1], [0], [0], [1], [0, 0, 1, 1], [], []>} : vector<32x32xbf16>, vector<32x128xbf16>, vector<32x128xf32> -> vector<32x128xf32>
    %883 = arith.truncf %882 : vector<32x128xf32> to vector<32x128xbf16>
    %c0_619 = arith.constant 0 : index
    %c0_620 = arith.constant 0 : index
    %c0_621 = arith.constant 0 : index
    %884 = vector.load %arg64[%c0_619, %c0_620, %c0_621] : memref<3x128x128xbf16, #tpu.memory_space<vmem>>, vector<1x128x128xbf16>
    %885 = vector.shape_cast %884 : vector<1x128x128xbf16> to vector<128x128xbf16>
    %cst_622 = arith.constant dense<0.000000e+00> : vector<32x128xf32>
    %886 = tpu.matmul %883, %885, %cst_622 {dimension_numbers = #tpu.dot_dimension_numbers<[1], [0], [0], [1], [0, 0, 1, 1], [], []>} : vector<32x128xbf16>, vector<128x128xbf16>, vector<32x128xf32> -> vector<32x128xf32>
    %887 = arith.addf %879, %886 : vector<32x128xf32>
    %c2_623 = arith.constant 2 : index
    %c0_624 = arith.constant 0 : index
    %c0_625 = arith.constant 0 : index
    %888 = vector.load %arg63[%c2_623, %c0_624, %c0_625] : memref<3x32x32xbf16, #tpu.memory_space<vmem>>, vector<1x32x32xbf16>
    %889 = vector.shape_cast %888 : vector<1x32x32xbf16> to vector<32x32xbf16>
    %cst_626 = arith.constant dense<0.000000e+00> : vector<32x128xf32>
    %890 = tpu.matmul %889, %876, %cst_626 {dimension_numbers = #tpu.dot_dimension_numbers<[1], [0], [0], [1], [0, 0, 1, 1], [], []>} : vector<32x32xbf16>, vector<32x128xbf16>, vector<32x128xf32> -> vector<32x128xf32>
    %891 = arith.truncf %890 : vector<32x128xf32> to vector<32x128xbf16>
    %c2_627 = arith.constant 2 : index
    %c0_628 = arith.constant 0 : index
    %c0_629 = arith.constant 0 : index
    %892 = vector.load %arg64[%c2_627, %c0_628, %c0_629] : memref<3x128x128xbf16, #tpu.memory_space<vmem>>, vector<1x128x128xbf16>
    %893 = vector.shape_cast %892 : vector<1x128x128xbf16> to vector<128x128xbf16>
    %cst_630 = arith.constant dense<0.000000e+00> : vector<32x128xf32>
    %894 = tpu.matmul %891, %893, %cst_630 {dimension_numbers = #tpu.dot_dimension_numbers<[1], [0], [0], [1], [0, 0, 1, 1], [], []>} : vector<32x128xbf16>, vector<128x128xbf16>, vector<32x128xf32> -> vector<32x128xf32>
    %895 = arith.addf %887, %894 : vector<32x128xf32>
    %896 = arith.addf %895, %821 : vector<32x128xf32>
    %c0_631 = arith.constant 0 : index
    %c0_632 = arith.constant 0 : index
    %897 = vector.load %arg4[%c0_631, %c0_632] : memref<128x8xf32, #tpu.memory_space<vmem>>, vector<128x8xf32>
    %c0_633 = arith.constant 0 : index
    %c0_634 = arith.constant 0 : index
    %898 = vector.load %arg5[%c0_633, %c0_634] : memref<8x128xf32, #tpu.memory_space<vmem>>, vector<8x128xf32>
    %c0_635 = arith.constant 0 : index
    %c0_636 = arith.constant 0 : index
    %899 = vector.load %arg66[%c0_635, %c0_636] : memref<2x128xf32, #tpu.memory_space<vmem>>, vector<2x128xf32>
    %cst_637 = arith.constant dense<0.000000e+00> : vector<128xf32>
    %900 = vector.multi_reduction <add>, %896, %cst_637 [0] : vector<32x128xf32> to vector<128xf32>
    %901 = vector.shape_cast %900 : vector<128xf32> to vector<1x128xf32>
    %cst_638 = arith.constant 3.200000e+01 : f32
    %902 = vector.broadcast %cst_638 : f32 to vector<1x128xf32>
    %903 = arith.divf %901, %902 : vector<1x128xf32>
    %cst_639 = arith.constant dense<0.000000e+00> : vector<1x8xf32>
    %904 = tpu.matmul %903, %897, %cst_639 {dimension_numbers = #tpu.dot_dimension_numbers<[1], [0], [0], [1], [0, 0, 1, 1], [], []>} : vector<1x128xf32>, vector<128x8xf32>, vector<1x8xf32> -> vector<1x8xf32>
    %cst_640 = arith.constant dense<0.000000e+00> : vector<1x128xf32>
    %905 = tpu.matmul %904, %898, %cst_640 {dimension_numbers = #tpu.dot_dimension_numbers<[1], [0], [0], [1], [0, 0, 1, 1], [], []>} : vector<1x8xf32>, vector<8x128xf32>, vector<1x128xf32> -> vector<1x128xf32>
    %906 = vector.broadcast %905 : vector<1x128xf32> to vector<32x128xf32>
    %907 = arith.subf %896, %906 : vector<32x128xf32>
    %908 = arith.mulf %907, %907 : vector<32x128xf32>
    %cst_641 = arith.constant dense<0.000000e+00> : vector<128xf32>
    %909 = vector.multi_reduction <add>, %908, %cst_641 [0] : vector<32x128xf32> to vector<128xf32>
    %910 = vector.shape_cast %909 : vector<128xf32> to vector<1x128xf32>
    %cst_642 = arith.constant 3.200000e+01 : f32
    %911 = vector.broadcast %cst_642 : f32 to vector<1x128xf32>
    %912 = arith.divf %910, %911 : vector<1x128xf32>
    %cst_643 = arith.constant dense<0.000000e+00> : vector<1x8xf32>
    %913 = tpu.matmul %912, %897, %cst_643 {dimension_numbers = #tpu.dot_dimension_numbers<[1], [0], [0], [1], [0, 0, 1, 1], [], []>} : vector<1x128xf32>, vector<128x8xf32>, vector<1x8xf32> -> vector<1x8xf32>
    %cst_644 = arith.constant dense<0.000000e+00> : vector<1x128xf32>
    %914 = tpu.matmul %913, %898, %cst_644 {dimension_numbers = #tpu.dot_dimension_numbers<[1], [0], [0], [1], [0, 0, 1, 1], [], []>} : vector<1x8xf32>, vector<8x128xf32>, vector<1x128xf32> -> vector<1x128xf32>
    %cst_645 = arith.constant 9.99999974E-6 : f32
    %915 = vector.broadcast %cst_645 : f32 to vector<1x128xf32>
    %916 = arith.addf %914, %915 : vector<1x128xf32>
    %917 = math.rsqrt %916 : vector<1x128xf32>
    %918 = vector.broadcast %917 : vector<1x128xf32> to vector<32x128xf32>
    %919 = arith.mulf %907, %918 : vector<32x128xf32>
    %920 = vector.extract_strided_slice %899 {offsets = [0, 0], sizes = [1, 128], strides = [1, 1]} : vector<2x128xf32> to vector<1x128xf32>
    %921 = vector.broadcast %920 : vector<1x128xf32> to vector<32x128xf32>
    %922 = arith.mulf %919, %921 : vector<32x128xf32>
    %923 = vector.extract_strided_slice %899 {offsets = [1, 0], sizes = [1, 128], strides = [1, 1]} : vector<2x128xf32> to vector<1x128xf32>
    %924 = vector.broadcast %923 : vector<1x128xf32> to vector<32x128xf32>
    %925 = arith.addf %922, %924 : vector<32x128xf32>
    %cst_646 = arith.constant 0.000000e+00 : f32
    %926 = vector.broadcast %cst_646 : f32 to vector<32x128xf32>
    %927 = arith.cmpf oge, %925, %926 : vector<32x128xf32>
    %cst_647 = arith.constant 2.000000e-01 : f32
    %928 = vector.broadcast %cst_647 : f32 to vector<32x128xf32>
    %929 = arith.mulf %928, %925 : vector<32x128xf32>
    %930 = arith.select %927, %925, %929 : vector<32x128xi1>, vector<32x128xf32>
    %931 = arith.truncf %930 : vector<32x128xf32> to vector<32x128xbf16>
    %c2_648 = arith.constant 2 : index
    %c0_649 = arith.constant 0 : index
    %c0_650 = arith.constant 0 : index
    %932 = vector.load %arg67[%c2_648, %c0_649, %c0_650] : memref<5x128x48xbf16, #tpu.memory_space<vmem>>, vector<1x128x48xbf16>
    %933 = vector.shape_cast %932 : vector<1x128x48xbf16> to vector<128x48xbf16>
    %cst_651 = arith.constant dense<0.000000e+00> : vector<32x48xf32>
    %934 = tpu.matmul %931, %933, %cst_651 {dimension_numbers = #tpu.dot_dimension_numbers<[1], [0], [0], [1], [0, 0, 1, 1], [], []>} : vector<32x128xbf16>, vector<128x48xbf16>, vector<32x48xf32> -> vector<32x48xf32>
    %c0_652 = arith.constant 0 : index
    %c0_653 = arith.constant 0 : index
    %c0_654 = arith.constant 0 : index
    %935 = vector.load %arg3[%c0_652, %c0_653, %c0_654] : memref<5x32x32xbf16, #tpu.memory_space<vmem>>, vector<1x32x32xbf16>
    %936 = vector.shape_cast %935 : vector<1x32x32xbf16> to vector<32x32xbf16>
    %cst_655 = arith.constant dense<0.000000e+00> : vector<32x128xf32>
    %937 = tpu.matmul %936, %931, %cst_655 {dimension_numbers = #tpu.dot_dimension_numbers<[1], [0], [0], [1], [0, 0, 1, 1], [], []>} : vector<32x32xbf16>, vector<32x128xbf16>, vector<32x128xf32> -> vector<32x128xf32>
    %938 = arith.truncf %937 : vector<32x128xf32> to vector<32x128xbf16>
    %c0_656 = arith.constant 0 : index
    %c0_657 = arith.constant 0 : index
    %c0_658 = arith.constant 0 : index
    %939 = vector.load %arg67[%c0_656, %c0_657, %c0_658] : memref<5x128x48xbf16, #tpu.memory_space<vmem>>, vector<1x128x48xbf16>
    %940 = vector.shape_cast %939 : vector<1x128x48xbf16> to vector<128x48xbf16>
    %cst_659 = arith.constant dense<0.000000e+00> : vector<32x48xf32>
    %941 = tpu.matmul %938, %940, %cst_659 {dimension_numbers = #tpu.dot_dimension_numbers<[1], [0], [0], [1], [0, 0, 1, 1], [], []>} : vector<32x128xbf16>, vector<128x48xbf16>, vector<32x48xf32> -> vector<32x48xf32>
    %942 = arith.addf %934, %941 : vector<32x48xf32>
    %c1_660 = arith.constant 1 : index
    %c0_661 = arith.constant 0 : index
    %c0_662 = arith.constant 0 : index
    %943 = vector.load %arg3[%c1_660, %c0_661, %c0_662] : memref<5x32x32xbf16, #tpu.memory_space<vmem>>, vector<1x32x32xbf16>
    %944 = vector.shape_cast %943 : vector<1x32x32xbf16> to vector<32x32xbf16>
    %cst_663 = arith.constant dense<0.000000e+00> : vector<32x128xf32>
    %945 = tpu.matmul %944, %931, %cst_663 {dimension_numbers = #tpu.dot_dimension_numbers<[1], [0], [0], [1], [0, 0, 1, 1], [], []>} : vector<32x32xbf16>, vector<32x128xbf16>, vector<32x128xf32> -> vector<32x128xf32>
    %946 = arith.truncf %945 : vector<32x128xf32> to vector<32x128xbf16>
    %c1_664 = arith.constant 1 : index
    %c0_665 = arith.constant 0 : index
    %c0_666 = arith.constant 0 : index
    %947 = vector.load %arg67[%c1_664, %c0_665, %c0_666] : memref<5x128x48xbf16, #tpu.memory_space<vmem>>, vector<1x128x48xbf16>
    %948 = vector.shape_cast %947 : vector<1x128x48xbf16> to vector<128x48xbf16>
    %cst_667 = arith.constant dense<0.000000e+00> : vector<32x48xf32>
    %949 = tpu.matmul %946, %948, %cst_667 {dimension_numbers = #tpu.dot_dimension_numbers<[1], [0], [0], [1], [0, 0, 1, 1], [], []>} : vector<32x128xbf16>, vector<128x48xbf16>, vector<32x48xf32> -> vector<32x48xf32>
    %950 = arith.addf %942, %949 : vector<32x48xf32>
    %c3_668 = arith.constant 3 : index
    %c0_669 = arith.constant 0 : index
    %c0_670 = arith.constant 0 : index
    %951 = vector.load %arg3[%c3_668, %c0_669, %c0_670] : memref<5x32x32xbf16, #tpu.memory_space<vmem>>, vector<1x32x32xbf16>
    %952 = vector.shape_cast %951 : vector<1x32x32xbf16> to vector<32x32xbf16>
    %cst_671 = arith.constant dense<0.000000e+00> : vector<32x128xf32>
    %953 = tpu.matmul %952, %931, %cst_671 {dimension_numbers = #tpu.dot_dimension_numbers<[1], [0], [0], [1], [0, 0, 1, 1], [], []>} : vector<32x32xbf16>, vector<32x128xbf16>, vector<32x128xf32> -> vector<32x128xf32>
    %954 = arith.truncf %953 : vector<32x128xf32> to vector<32x128xbf16>
    %c3_672 = arith.constant 3 : index
    %c0_673 = arith.constant 0 : index
    %c0_674 = arith.constant 0 : index
    %955 = vector.load %arg67[%c3_672, %c0_673, %c0_674] : memref<5x128x48xbf16, #tpu.memory_space<vmem>>, vector<1x128x48xbf16>
    %956 = vector.shape_cast %955 : vector<1x128x48xbf16> to vector<128x48xbf16>
    %cst_675 = arith.constant dense<0.000000e+00> : vector<32x48xf32>
    %957 = tpu.matmul %954, %956, %cst_675 {dimension_numbers = #tpu.dot_dimension_numbers<[1], [0], [0], [1], [0, 0, 1, 1], [], []>} : vector<32x128xbf16>, vector<128x48xbf16>, vector<32x48xf32> -> vector<32x48xf32>
    %958 = arith.addf %950, %957 : vector<32x48xf32>
    %c4_676 = arith.constant 4 : index
    %c0_677 = arith.constant 0 : index
    %c0_678 = arith.constant 0 : index
    %959 = vector.load %arg3[%c4_676, %c0_677, %c0_678] : memref<5x32x32xbf16, #tpu.memory_space<vmem>>, vector<1x32x32xbf16>
    %960 = vector.shape_cast %959 : vector<1x32x32xbf16> to vector<32x32xbf16>
    %cst_679 = arith.constant dense<0.000000e+00> : vector<32x128xf32>
    %961 = tpu.matmul %960, %931, %cst_679 {dimension_numbers = #tpu.dot_dimension_numbers<[1], [0], [0], [1], [0, 0, 1, 1], [], []>} : vector<32x32xbf16>, vector<32x128xbf16>, vector<32x128xf32> -> vector<32x128xf32>
    %962 = arith.truncf %961 : vector<32x128xf32> to vector<32x128xbf16>
    %c4_680 = arith.constant 4 : index
    %c0_681 = arith.constant 0 : index
    %c0_682 = arith.constant 0 : index
    %963 = vector.load %arg67[%c4_680, %c0_681, %c0_682] : memref<5x128x48xbf16, #tpu.memory_space<vmem>>, vector<1x128x48xbf16>
    %964 = vector.shape_cast %963 : vector<1x128x48xbf16> to vector<128x48xbf16>
    %cst_683 = arith.constant dense<0.000000e+00> : vector<32x48xf32>
    %965 = tpu.matmul %962, %964, %cst_683 {dimension_numbers = #tpu.dot_dimension_numbers<[1], [0], [0], [1], [0, 0, 1, 1], [], []>} : vector<32x128xbf16>, vector<128x48xbf16>, vector<32x48xf32> -> vector<32x48xf32>
    %966 = arith.addf %958, %965 : vector<32x48xf32>
    %c0_684 = arith.constant 0 : index
    %c0_685 = arith.constant 0 : index
    %967 = vector.load %arg68[%c0_684, %c0_685] : memref<1x48xf32, #tpu.memory_space<vmem>>, vector<1x48xf32>
    %968 = vector.broadcast %967 : vector<1x48xf32> to vector<32x48xf32>
    %969 = arith.addf %966, %968 : vector<32x48xf32>
    %cst_686 = arith.constant 5.000000e-01 : f32
    %970 = vector.broadcast %cst_686 : f32 to vector<32x48xf32>
    %971 = arith.mulf %970, %969 : vector<32x48xf32>
    %972 = math.tanh %971 : vector<32x48xf32>
    %cst_687 = arith.constant 1.000000e+00 : f32
    %973 = vector.broadcast %cst_687 : f32 to vector<32x48xf32>
    %974 = arith.addf %972, %973 : vector<32x48xf32>
    %cst_688 = arith.constant 5.000000e-01 : f32
    %975 = vector.broadcast %cst_688 : f32 to vector<32x48xf32>
    %976 = arith.mulf %975, %974 : vector<32x48xf32>
    %c0_689 = arith.constant 0 : index
    %c0_690 = arith.constant 0 : index
    %977 = vector.load %arg72[%c0_689, %c0_690] : memref<32x48xf32, #tpu.memory_space<vmem>>, vector<32x48xf32>
    tpu.vector_store %arg72[%c0_689, %c0_690], %976 {strides = array<i32>} : memref<32x48xf32, #tpu.memory_space<vmem>>, vector<32x48xf32>,
    return
  }
}

</mosaic_0001>

<bundles_post_ra>
// kernel: _lambda_.1
= control target key start
LH: loop header
LB: loop body
LE: loop exit
PB: predicated region body
PF: predicated region fallthrough
CT: control target
= control target key end

     0   :  { %s19179_s6 = smov 1   ;;  %s19180_s10 = smov 2   ;;  %s21585_s0 = inlined_call_operand.smem [shape: u32[73], index: -1, kind: input, shape index: {}] }
   0x1   :  { %s19296_s5 = sld [smem:[%s21585_s0]]   ;;  %s19181_s14 = smov 3  }
   0x2   :  { %s19301_s9 = sld [smem:[%s21585_s0 + %s19179_s6]]   ;;  %s19182_s18 = smov 4  }
   0x3   :  { %s19306_s13 = sld [smem:[%s21585_s0 + %s19180_s10]]   ;;  %s19183_s22 = smov 5  }
   0x4   :  { %s19311_s17 = sld [smem:[%s21585_s0 + %s19181_s14]]   ;;  %s19184_s26 = smov 6  }
   0x5   :  { %s19316_s21 = sld [smem:[%s21585_s0 + %s19182_s18]]   ;;  %s19185_s30 = smov 7  }
   0x6   :  { %s19321_s25 = sld [smem:[%s21585_s0 + %s19183_s22]]   ;;  %s19186_s4 = smov 8  }
   0x7   :  { %21631 = sst [smem:[#allocation55_spill]] %s19296_s5  ;;  %s19187_s10 = smov 9  }
   0x8   :  { %21632 = sst [smem:[#allocation56_spill]] %s19301_s9  ;;  %s19188_s15 = smov 10  }
   0x9   :  { %21633 = sst [smem:[#allocation57_spill]] %s19306_s13  ;;  %s19189_s20 = smov 11  }
   0xa   :  { %21634 = sst [smem:[#allocation58_spill]] %s19311_s17  ;;  %s19191_s1 = smov 13  }
   0xb   :  { %21635 = sst [smem:[#allocation59_spill]] %s19316_s21  ;;  %s19192_s7 = smov 14  }
   0xc   :  { %s19326_s29 = sld [smem:[%s21585_s0 + %s19184_s26]]   ;;  %s19190_s26 = smov 12  }
   0xd   :  { %s19331_s3 = sld [smem:[%s21585_s0 + %s19185_s30]]   ;;  %s19194_s22 = smov 16  }
   0xe   :  { %s19336_s8 = sld [smem:[%s21585_s0 + %s19186_s4]]   ;;  %s19195_s28 = smov 17  }
   0xf   :  { %s19341_s14 = sld [smem:[%s21585_s0 + %s19187_s10]]  }
  0x10   :  { %s19346_s19 = sld [smem:[%s21585_s0 + %s19188_s15]]   ;;  %s19193_s15 = smov 15  }
  0x11   :  { %s19351_s24 = sld [smem:[%s21585_s0 + %s19189_s20]]  }
  0x12   :  { %s19356_s30 = sld [smem:[%s21585_s0 + %s19190_s26]]  }
  0x13   :  { %s19361_s6 = sld [smem:[%s21585_s0 + %s19191_s1]]  }
  0x14   :  { %21636 = sst [smem:[#allocation60_spill]] %s19336_s8 }
  0x15   :  { %21637 = sst [smem:[#allocation61_spill]] %s19341_s14 }
  0x16   :  { %s19366_s12 = sld [smem:[%s21585_s0 + %s19192_s7]]   ;;  %s19196_s7 = smov 18  }
  0x17   :  { %21638 = sst [smem:[#allocation62_spill]] %s19351_s24 }
  0x18   :  { %21639 = sst [smem:[#allocation63_spill]] %s19356_s30 }
  0x19   :  { %s19371_s20 = sld [smem:[%s21585_s0 + %s19193_s15]]   ;;  %s19197_s15 = smov 19  }
  0x1a   :  { %s19376_s27 = sld [smem:[%s21585_s0 + %s19194_s22]]   ;;  %s19198_s22 = smov 20  }
  0x1b   :  { %s19381_s4 = sld [smem:[%s21585_s0 + %s19195_s28]]   ;;  %s19199_s28 = smov 21  }
  0x1c   :  { %s19386_s9 = sld [smem:[%s21585_s0 + %s19196_s7]]   ;;  %s19200_s7 = smov 22  }
  0x1d   :  { %s19391_s24 = sld [smem:[%s21585_s0 + %s19197_s15]]   ;;  %s19201_s15 = smov 23  }
  0x1e   :  { %s19396_s30 = sld [smem:[%s21585_s0 + %s19198_s22]]   ;;  %s19202_s22 = smov 24  }
  0x1f   :  { %s19401_s14 = sld [smem:[%s21585_s0 + %s19199_s28]]   ;;  %s19203_s28 = smov 25  }
  0x20   :  { %21640 = sst [smem:[#allocation64_spill]] %s19376_s27 }
  0x21   :  { %s19416_s27 = sld [smem:[%s21585_s0 + %s19202_s22]]   ;;  %s19206_s22 = smov 28  }
  0x22   :  { %21641 = sst [smem:[#allocation65_spill]] %s19386_s9 }
  0x23   :  { %21642 = sst [smem:[#allocation66_spill]] %s19391_s24 }
  0x24   :  { %21643 = sst [smem:[#allocation67_spill]] %s19396_s30 }
  0x25   :  { %21644 = sst [smem:[#allocation68_spill]] %s19401_s14 }
  0x26   :  { %s19406_s9 = sld [smem:[%s21585_s0 + %s19200_s7]]   ;;  %s19204_s7 = smov 26  }
  0x27   :  { %s19411_s24 = sld [smem:[%s21585_s0 + %s19201_s15]]   ;;  %s19205_s15 = smov 27  }
  0x28   :  { %21646 = sst [smem:[#allocation70_spill]] %s19416_s27 }
  0x29   :  { %s19421_s14 = sld [smem:[%s21585_s0 + %s19203_s28]]   ;;  %s19207_s28 = smov 29  }
  0x2a   :  { %s19431_s8 = sld [smem:[%s21585_s0 + %s19205_s15]]   ;;  %s19209_s15 = smov 31  }
  0x2b   :  { %s19436_s21 = sld [smem:[%s21585_s0 + %s19206_s22]]   ;;  %s19210_s22 = smov 32  }
  0x2c   :  { %21645 = sst [smem:[#allocation69_spill]] %s19406_s9 }
  0x2d   :  { %s19426_s9 = sld [smem:[%s21585_s0 + %s19204_s7]]   ;;  %s19208_s7 = smov 30  }
  0x2e   :  { %s19441_s13 = sld [smem:[%s21585_s0 + %s19207_s28]]   ;;  %s19211_s28 = smov 33  }
  0x2f   :  { %s19446_s17 = sld [smem:[%s21585_s0 + %s19208_s7]]   ;;  %s19212_s7 = smov 34  }
  0x30   :  { %21648 = sst [smem:[#allocation72_spill]] %s19431_s8 }
  0x31   :  { %21649 = sst [smem:[#allocation73_spill]] %s19436_s21 }
  0x32   :  { %s19451_s8 = sld [smem:[%s21585_s0 + %s19209_s15]]   ;;  %s19213_s15 = smov 35  }
  0x33   :  { %21647 = sst [smem:[#allocation71_spill]] %s19426_s9 }
  0x34   :  { %s19456_s21 = sld [smem:[%s21585_s0 + %s19210_s22]]   ;;  %s19214_s22 = smov 36  }
  0x35   :  { %21650 = sst [smem:[#allocation74_spill]] %s19446_s17 }
  0x36   :  { %s19461_s5 = sld [smem:[%s21585_s0 + %s19211_s28]]   ;;  %s19215_s28 = smov 37  }
  0x37   :  { %s19466_s17 = sld [smem:[%s21585_s0 + %s19212_s7]]   ;;  %s19216_s7 = smov 38  }
  0x38   :  { %21651 = sst [smem:[#allocation75_spill]] %s19451_s8 }
  0x39   :  { %s19471_s8 = sld [smem:[%s21585_s0 + %s19213_s15]]   ;;  %s19217_s15 = smov 39  }
  0x3a   :  { %21652 = sst [smem:[#allocation76_spill]] %s19456_s21 }
  0x3b   :  { %s19476_s21 = sld [smem:[%s21585_s0 + %s19214_s22]]   ;;  %s19218_s22 = smov 40  }
  0x3c   :  { %21653 = sst [smem:[#allocation77_spill]] %s19461_s5 }
  0x3d   :  { %s19481_s5 = sld [smem:[%s21585_s0 + %s19215_s28]]   ;;  %s19219_s28 = smov 41  }
  0x3e   :  { %s19486_s9 = sld [smem:[%s21585_s0 + %s19216_s7]]   ;;  %s19220_s7 = smov 42  }
  0x3f   :  { %21654 = sst [smem:[#allocation78_spill]] %s19471_s8 }
  0x40   :  { %s19491_s8 = sld [smem:[%s21585_s0 + %s19217_s15]]   ;;  %s19221_s15 = smov 43  }
  0x41   :  { %21655 = sst [smem:[#allocation79_spill]] %s19476_s21 }
  0x42   :  { %s19496_s21 = sld [smem:[%s21585_s0 + %s19218_s22]]   ;;  %s19222_s22 = smov 44  }
  0x43   :  { %21656 = sst [smem:[#allocation80_spill]] %s19481_s5 }
  0x44   :  { %s19501_s5 = sld [smem:[%s21585_s0 + %s19219_s28]]   ;;  %s19223_s28 = smov 45  }
  0x45   :  { %s19506_s27 = sld [smem:[%s21585_s0 + %s19220_s7]]   ;;  %s19224_s7 = smov 46  }
  0x46   :  { %21657 = sst [smem:[#allocation81_spill]] %s19491_s8 }
  0x47   :  { %s19511_s8 = sld [smem:[%s21585_s0 + %s19221_s15]]   ;;  %s19225_s15 = smov 47  }
  0x48   :  { %21658 = sst [smem:[#allocation82_spill]] %s19496_s21 }
  0x49   :  { %s19516_s21 = sld [smem:[%s21585_s0 + %s19222_s22]]   ;;  %s19226_s22 = smov 48  }
  0x4a   :  { %21659 = sst [smem:[#allocation83_spill]] %s19501_s5 }
  0x4b   :  { %21660 = sst [smem:[#allocation84_spill]] %s19506_s27 }
  0x4c   :  { %s19521_s5 = sld [smem:[%s21585_s0 + %s19223_s28]]   ;;  %s19227_s28 = smov 49  }
  0x4d   :  { %s19526_s27 = sld [smem:[%s21585_s0 + %s19224_s7]]   ;;  %s19228_s7 = smov 50  }
  0x4e   :  { %s19531_s30 = sld [smem:[%s21585_s0 + %s19225_s15]]   ;;  %s19229_s15 = smov 51  }
  0x4f   :  { %21661 = sst [smem:[#allocation85_spill]] %s19516_s21 }
  0x50   :  { %s19536_s21 = sld [smem:[%s21585_s0 + %s19226_s22]]   ;;  %s19230_s22 = smov 52  }
  0x52   :  { %21662 = sst [smem:[#allocation86_spill]] %s19521_s5 }
  0x53   :  { %21663 = sst [smem:[#allocation87_spill]] %s19526_s27 }
  0x54   :  { %21664 = sst [smem:[#allocation88_spill]] %s19531_s30 }
  0x55   :  { %s19541_s5 = sld [smem:[%s21585_s0 + %s19227_s28]]   ;;  %s19231_s28 = smov 53  }
  0x56   :  { %21665 = sst [smem:[#allocation89_spill]] %s19536_s21 }
  0x57   :  { %s19546_s27 = sld [smem:[%s21585_s0 + %s19228_s7]]   ;;  %s19232_s7 = smov 54  }
  0x58   :  { %s19551_s30 = sld [smem:[%s21585_s0 + %s19229_s15]]   ;;  %s19233_s15 = smov 55  }
  0x59   :  { %s19556_s21 = sld [smem:[%s21585_s0 + %s19230_s22]]   ;;  %s19234_s22 = smov 56  }
  0x5b   :  { %21666 = sst [smem:[#allocation90_spill]] %s19541_s5 }
  0x5c   :  { %s19561_s5 = sld [smem:[%s21585_s0 + %s19231_s28]]   ;;  %s19235_s28 = smov 57  }
  0x5d   :  { %21667 = sst [smem:[#allocation91_spill]] %s19546_s27 }
  0x5e   :  { %21668 = sst [smem:[#allocation92_spill]] %s19551_s30 }
  0x5f   :  { %21669 = sst [smem:[#allocation93_spill]] %s19556_s21 }
  0x60   :  { %s19566_s27 = sld [smem:[%s21585_s0 + %s19232_s7]]   ;;  %s19236_s7 = smov 58  }
  0x61   :  { %s19571_s30 = sld [smem:[%s21585_s0 + %s19233_s15]]   ;;  %s19237_s15 = smov 59  }
  0x62   :  { %21670 = sst [smem:[#allocation94_spill]] %s19561_s5 }
  0x63   :  { %s19576_s21 = sld [smem:[%s21585_s0 + %s19234_s22]]   ;;  %s19238_s22 = smov 60  }
  0x64   :  { %s19581_s5 = sld [smem:[%s21585_s0 + %s19235_s28]]   ;;  %s19239_s28 = smov 61  }
  0x66   :  { %21671 = sst [smem:[#allocation95_spill]] %s19566_s27 }
  0x67   :  { %21672 = sst [smem:[#allocation96_spill]] %s19571_s30 }
  0x68   :  { %s19586_s27 = sld [smem:[%s21585_s0 + %s19236_s7]]   ;;  %s19240_s7 = smov 62  }
  0x69   :  { %21673 = sst [smem:[#allocation97_spill]] %s19576_s21 }
  0x6a   :  { %21674 = sst [smem:[#allocation98_spill]] %s19581_s5 }
  0x6b   :  { %s19591_s30 = sld [smem:[%s21585_s0 + %s19237_s15]]   ;;  %s19241_s15 = smov 63  }
  0x6c   :  { %s19596_s21 = sld [smem:[%s21585_s0 + %s19238_s22]]   ;;  %s19242_s22 = smov 64  }
  0x6d   :  { %s19601_s5 = sld [smem:[%s21585_s0 + %s19239_s28]]   ;;  %s19243_s28 = smov 65  }
  0x6e   :  { %21675 = sst [smem:[#allocation99_spill]] %s19586_s27 }
  0x6f   :  { %s19606_s27 = sld [smem:[%s21585_s0 + %s19240_s7]]   ;;  %s19244_s7 = smov 66  }
  0x71   :  { %21676 = sst [smem:[#allocation100_spill]] %s19591_s30 }
  0x72   :  { %21677 = sst [smem:[#allocation101_spill]] %s19596_s21 }
  0x73   :  { %21678 = sst [smem:[#allocation102_spill]] %s19601_s5 }
  0x74   :  { %s19611_s30 = sld [smem:[%s21585_s0 + %s19241_s15]]   ;;  %s19245_s15 = smov 67  }
  0x75   :  { %21679 = sst [smem:[#allocation103_spill]] %s19606_s27 }
  0x76   :  { %s19616_s21 = sld [smem:[%s21585_s0 + %s19242_s22]]   ;;  %s19246_s22 = smov 68  }
  0x77   :  { %s19621_s5 = sld [smem:[%s21585_s0 + %s19243_s28]]   ;;  %s19247_s28 = smov 69  }
  0x78   :  { %s19626_s27 = sld [smem:[%s21585_s0 + %s19244_s7]]   ;;  %s19248_s7 = smov 70  }
  0x7a   :  { %21680 = sst [smem:[#allocation104_spill]] %s19611_s30 }
  0x7b   :  { %s19631_s30 = sld [smem:[%s21585_s0 + %s19245_s15]]   ;;  %s19249_s15 = smov 71  }
  0x7c   :  { %21681 = sst [smem:[#allocation105_spill]] %s19616_s21 }
  0x7d   :  { %21682 = sst [smem:[#allocation106_spill]] %s19621_s5 }
  0x7e   :  { %21683 = sst [smem:[#allocation107_spill]] %s19626_s27 }
  0x7f   :  { %s19636_s21 = sld [smem:[%s21585_s0 + %s19246_s22]]   ;;  %s19250_s22 = smov 72  }
  0x80   :  { %s19641_s5 = sld [smem:[%s21585_s0 + %s19247_s28]]  }
  0x81   :  { %21684 = sst [smem:[#allocation108_spill]] %s19631_s30 }
  0x82   :  { %s19646_s27 = sld [smem:[%s21585_s0 + %s19248_s7]]  }
  0x83   :  { %s19651_s30 = sld [smem:[%s21585_s0 + %s19249_s15]]  }
  0x85   :  { %21685 = sst [smem:[#allocation109_spill]] %s19636_s21 }
  0x86   :  { %s19656_s21 = sld [smem:[%s21585_s0 + %s19250_s22]]  }
  0x87   :  { %151 = vsyncpa [#allocation3], 0 }
  0x88   :  { %152 = vsyncpa [#allocation6], 0 }
  0x89   :  { %153 = vsyncpa [#allocation9], 0 }
  0x8a   :  { %154 = vsyncpa [#allocation12], 0 }
  0x8b   :  { %155 = vsyncpa [#allocation15], 0 }
  0x8c   :  { %156 = vsyncpa [#allocation18], 0 }
  0x8d   :  { %157 = vsyncpa [#allocation21], 0 }
  0x8e   :  { %158 = vsyncpa [#allocation24], 0 }
  0x8f   :  { %159 = vsyncpa [#allocation27], 0 }
  0x90   :  { %160 = vsyncpa [#allocation30], 0 }
  0x91   :  { %161 = vsyncpa [#allocation33], 0 }
  0x92   :  { %162 = vsyncpa [#allocation36], 0 }
  0x93   :  { %163 = vsyncpa [#allocation4], 0 }
  0x94   :  { %164 = vsyncpa [#allocation39], 0  ;;  %s19251_s28 = smov [#allocation5]   ;;  %s18601_s1 = scalar_lea.hbm %s19326_s29, 32 }
  0x95   :  { %s191_s0 = sshll.u32 %s19251_s28, 4  ;;  %p18602_p0 = scmp.ne.s32.totalorder %s19326_s29, %s18601_s1  ;;  %s192_s0 = int_to_ptr.vmem [resolvable:$true] %s191_s0 }
  0x96   :  { %p18605_p1 = scmp.lt.u32.totalorder %s18601_s1, %s19326_s29 }
  0x98   :  { %p18607_p2 = pnand %p18605_p1, %p18602_p0 }
  0x9a   :  { %18610 = shalt.err (!%p18607_p2)
}
  0x9b   :  { %s18611_s2 = scalar_lea.vmem %s192_s0, 32  ;;  %p18616_p4 = scmp.lt.s32.totalorder %s192_s0, %s192_s0 }
  0x9c   :  { %p18612_p3 = scmp.ne.s32.totalorder %s192_s0, %s18611_s2  ;;  %p18617_p5 = scmp.lt.s32.totalorder %s18611_s2, %s18611_s2 }
  0x9e   :  { %p18618_p6 = por %p18617_p5, %p18616_p4 }
  0xa0   :  { %p18619_p7 = pnand %p18618_p6, %p18612_p3 }
  0xa2   :  { %18622 = shalt.err (!%p18619_p7)
}
  0xa3   :  { %194 = dma.hbm_to_vmem [thread:$0]  %s19326_s29, 32, %s192_s0, [#allocation6]  }
  0xa4   :  { %s19252_s7 = smov [#allocation8]   ;;  %s19253_s11 = smov [#allocation11]  }
  0xa5   :  { %s216_s10 = sshll.u32 %s19252_s7, 4  ;;  %s245_s15 = sshll.u32 %s19253_s11, 4  ;;  %s217_s10 = int_to_ptr.vmem [resolvable:$true] %s216_s10  ;;  %s246_s15 = int_to_ptr.vmem [resolvable:$true] %s245_s15 }
  0xa6   :  { %s18623_s16 = scalar_lea.hbm %s19346_s19, 384 }
  0xa7   :  { %p18624_p8 = scmp.ne.s32.totalorder %s19346_s19, %s18623_s16  ;;  %p18627_p9 = scmp.lt.u32.totalorder %s18623_s16, %s19346_s19 }
  0xa9   :  { %p18629_p10 = pnand %p18627_p9, %p18624_p8 }
  0xab   :  { %18632 = shalt.err (!%p18629_p10)
}
  0xac   :  { %s18633_s18 = scalar_lea.vmem %s217_s10, 384  ;;  %p18638_p12 = scmp.lt.s32.totalorder %s217_s10, %s217_s10 }
  0xad   :  { %p18634_p11 = scmp.ne.s32.totalorder %s217_s10, %s18633_s18  ;;  %p18639_p13 = scmp.lt.s32.totalorder %s18633_s18, %s18633_s18 }
  0xaf   :  { %p18640_p0 = por %p18639_p13, %p18638_p12 }
  0xb1   :  { %p18641_p1 = pnand %p18640_p0, %p18634_p11 }
  0xb3   :  { %18644 = shalt.err (!%p18641_p1)
}
  0xb4   :  { %s19254_s22 = smov 64   ;;  %s19255_s29 = smov 4  }
  0xb5   :  { %222 = dma.hbm_to_vmem [thread:$0]  %s19346_s19, 384, %s217_s10, [#allocation9], %s19254_s22, %s19254_s22, %s19255_s29  }
  0xb6   :  { %s18645_s23 = scalar_lea.hbm %s19366_s12, 32 }
  0xb7   :  { %p18646_p2 = scmp.ne.s32.totalorder %s19366_s12, %s18645_s23  ;;  %p18649_p3 = scmp.lt.u32.totalorder %s18645_s23, %s19366_s12 }
  0xb9   :  { %p18651_p4 = pnand %p18649_p3, %p18646_p2 }
  0xbb   :  { %18654 = shalt.err (!%p18651_p4)
}
  0xbc   :  { %s18655_s26 = scalar_lea.vmem %s246_s15, 32  ;;  %p18660_p6 = scmp.lt.s32.totalorder %s246_s15, %s246_s15 }
  0xbd   :  { %p18656_p5 = scmp.ne.s32.totalorder %s246_s15, %s18655_s26  ;;  %p18661_p7 = scmp.lt.s32.totalorder %s18655_s26, %s18655_s26 }
  0xbf   :  { %p18662_p8 = por %p18661_p7, %p18660_p6 }
  0xc1   :  { %p18663_p9 = pnand %p18662_p8, %p18656_p5 }
  0xc3   :  { %18666 = shalt.err (!%p18663_p9)
}
  0xc4   :  { %248 = dma.hbm_to_vmem [thread:$0]  %s19366_s12, 32, %s246_s15, [#allocation12]  }
  0xc5   :  { %s19256_s28 = smov [#allocation14]   ;;  %s18667_s0 = scalar_lea.hbm %s19381_s4, 64 }
  0xc6   :  { %s267_s19 = sshll.u32 %s19256_s28, 4  ;;  %p18668_p10 = scmp.ne.s32.totalorder %s19381_s4, %s18667_s0  ;;  %s268_s19 = int_to_ptr.vmem [resolvable:$true] %s267_s19 }
  0xc7   :  { %p18671_p11 = scmp.lt.u32.totalorder %s18667_s0, %s19381_s4 }
  0xc9   :  { %p18673_p12 = pnand %p18671_p11, %p18668_p10 }
  0xcb   :  { %18676 = shalt.err (!%p18673_p12)
}
  0xcc   :  { %s18677_s1 = scalar_lea.vmem %s268_s19, 64  ;;  %p18682_p0 = scmp.lt.s32.totalorder %s268_s19, %s268_s19 }
  0xcd   :  { %p18678_p13 = scmp.ne.s32.totalorder %s268_s19, %s18677_s1  ;;  %p18683_p1 = scmp.lt.s32.totalorder %s18677_s1, %s18677_s1 }
  0xcf   :  { %p18684_p2 = por %p18683_p1, %p18682_p0 }
  0xd1   :  { %p18685_p3 = pnand %p18684_p2, %p18678_p13 }
  0xd3   :  { %18688 = shalt.err (!%p18685_p3)
}
  0xd4   :  { %270 = dma.hbm_to_vmem [thread:$0]  %s19381_s4, 64, %s268_s19, [#allocation15]  }
  0xd5   :  { %s19257_s12 = smov [#allocation17]   ;;  %s19258_s7 = smov [#allocation20]  }
  0xd6   :  { %s296_s2 = sshll.u32 %s19257_s12, 4  ;;  %s319_s10 = sshll.u32 %s19258_s7, 4  ;;  %s297_s2 = int_to_ptr.vmem [resolvable:$true] %s296_s2  ;;  %s320_s10 = int_to_ptr.vmem [resolvable:$true] %s319_s10 }
  0xd7   :  { %s18689_s11 = scalar_lea.hbm %s19411_s24, 256 }
  0xd8   :  { %p18690_p4 = scmp.ne.s32.totalorder %s19411_s24, %s18689_s11  ;;  %p18693_p5 = scmp.lt.u32.totalorder %s18689_s11, %s19411_s24 }
  0xda   :  { %p18695_p6 = pnand %p18693_p5, %p18690_p4 }
  0xdc   :  { %18698 = shalt.err (!%p18695_p6)
}
  0xdd   :  { %s18699_s15 = scalar_lea.vmem %s297_s2, 256  ;;  %p18704_p8 = scmp.lt.s32.totalorder %s297_s2, %s297_s2 }
  0xde   :  { %p18700_p7 = scmp.ne.s32.totalorder %s297_s2, %s18699_s15  ;;  %p18705_p9 = scmp.lt.s32.totalorder %s18699_s15, %s18699_s15 }
  0xe0   :  { %p18706_p10 = por %p18705_p9, %p18704_p8 }
  0xe2   :  { %p18707_p11 = pnand %p18706_p10, %p18700_p7 }
  0xe4   :  { %18710 = shalt.err (!%p18707_p11)
}
  0xe5   :  { %s19259_s16 = smov 128   ;;  %s19260_s4 = smov 8  }
  0xe6   :  { %302 = dma.hbm_to_vmem [thread:$0]  %s19411_s24, 256, %s297_s2, [#allocation18], %s19259_s16, %s19259_s16, %s19260_s4  }
  0xe7   :  { %s18711_s18 = scalar_lea.hbm %s19421_s14, 32 }
  0xe8   :  { %p18712_p12 = scmp.ne.s32.totalorder %s19421_s14, %s18711_s18  ;;  %p18715_p13 = scmp.lt.u32.totalorder %s18711_s18, %s19421_s14 }
  0xea   :  { %p18717_p0 = pnand %p18715_p13, %p18712_p12 }
  0xec   :  { %18720 = shalt.err (!%p18717_p0)
}
  0xed   :  { %s18721_s23 = scalar_lea.vmem %s320_s10, 32  ;;  %p18726_p2 = scmp.lt.s32.totalorder %s320_s10, %s320_s10 }
  0xee   :  { %p18722_p1 = scmp.ne.s32.totalorder %s320_s10, %s18721_s23  ;;  %p18727_p3 = scmp.lt.s32.totalorder %s18721_s23, %s18721_s23 }
  0xf0   :  { %p18728_p4 = por %p18727_p3, %p18726_p2 }
  0xf2   :  { %p18729_p5 = pnand %p18728_p4, %p18722_p1 }
  0xf4   :  { %18732 = shalt.err (!%p18729_p5)
}
  0xf5   :  { %322 = dma.hbm_to_vmem [thread:$0]  %s19421_s14, 32, %s320_s10, [#allocation21]  }
  0xf6   :  { %s19261_s26 = smov [#allocation23]   ;;  %s18733_s24 = scalar_lea.hbm %s19441_s13, 96 }
  0xf7   :  { %s342_s28 = sshll.u32 %s19261_s26, 4  ;;  %p18734_p6 = scmp.ne.s32.totalorder %s19441_s13, %s18733_s24  ;;  %s343_s28 = int_to_ptr.vmem [resolvable:$true] %s342_s28 }
  0xf8   :  { %p18737_p7 = scmp.lt.u32.totalorder %s18733_s24, %s19441_s13 }
  0xfa   :  { %p18739_p8 = pnand %p18737_p7, %p18734_p6 }
  0xfc   :  { %18742 = shalt.err (!%p18739_p8)
}
  0xfd   :  { %s18743_s19 = scalar_lea.vmem %s343_s28, 96  ;;  %p18748_p10 = scmp.lt.s32.totalorder %s343_s28, %s343_s28 }
  0xfe   :  { %p18744_p9 = scmp.ne.s32.totalorder %s343_s28, %s18743_s19  ;;  %p18749_p11 = scmp.lt.s32.totalorder %s18743_s19, %s18743_s19 }
 0x100   :  { %p18750_p12 = por %p18749_p11, %p18748_p10 }
 0x102   :  { %p18751_p13 = pnand %p18750_p12, %p18744_p9 }
 0x104   :  { %18754 = shalt.err (!%p18751_p13)
}
 0x105   :  { %s19262_s0 = smov 32   ;;  %s19263_s14 = smov 2  }
 0x106   :  { %348 = dma.hbm_to_vmem [thread:$0]  %s19441_s13, 96, %s343_s28, [#allocation24], %s19262_s0, %s19262_s0, %s19263_s14  }
 0x107   :  { %s19264_s1 = smov [#allocation26]   ;;  %s19265_s2 = smov [#allocation29]  }
 0x108   :  { %s371_s12 = sshll.u32 %s19264_s1, 4  ;;  %s395_s7 = sshll.u32 %s19265_s2, 4  ;;  %s372_s12 = int_to_ptr.vmem [resolvable:$true] %s371_s12  ;;  %s396_s7 = int_to_ptr.vmem [resolvable:$true] %s395_s7 }
 0x109   :  { %s18755_s10 = scalar_lea.hbm %s19466_s17, 32 }
 0x10a   :  { %p18756_p0 = scmp.ne.s32.totalorder %s19466_s17, %s18755_s10  ;;  %p18759_p1 = scmp.lt.u32.totalorder %s18755_s10, %s19466_s17 }
 0x10c   :  { %p18761_p2 = pnand %p18759_p1, %p18756_p0 }
 0x10e   :  { %18764 = shalt.err (!%p18761_p2)
}
 0x10f   :  { %s18765_s11 = scalar_lea.vmem %s372_s12, 32  ;;  %p18770_p4 = scmp.lt.s32.totalorder %s372_s12, %s372_s12 }
 0x110   :  { %p18766_p3 = scmp.ne.s32.totalorder %s372_s12, %s18765_s11  ;;  %p18771_p5 = scmp.lt.s32.totalorder %s18765_s11, %s18765_s11 }
 0x112   :  { %p18772_p6 = por %p18771_p5, %p18770_p4 }
 0x114   :  { %p18773_p7 = pnand %p18772_p6, %p18766_p3 }
 0x116   :  { %18776 = shalt.err (!%p18773_p7)
}
 0x117   :  { %374 = dma.hbm_to_vmem [thread:$0]  %s19466_s17, 32, %s372_s12, [#allocation27]  }
 0x118   :  { %s18777_s13 = scalar_lea.hbm %s19486_s9, 16 }
 0x119   :  { %p18778_p8 = scmp.ne.s32.totalorder %s19486_s9, %s18777_s13  ;;  %p18781_p9 = scmp.lt.u32.totalorder %s18777_s13, %s19486_s9 }
 0x11b   :  { %p18783_p10 = pnand %p18781_p9, %p18778_p8 }
 0x11d   :  { %18786 = shalt.err (!%p18783_p10)
}
 0x11e   :  { %s18787_s15 = scalar_lea.vmem %s396_s7, 16  ;;  %s18791_s18 = scalar_lea.vmem %s396_s7, 32 }
 0x11f   :  { %p18788_p11 = scmp.ne.s32.totalorder %s396_s7, %s18787_s15  ;;  %p18792_p12 = scmp.lt.s32.totalorder %s396_s7, %s396_s7 }
 0x120   :  { %p18793_p13 = scmp.lt.s32.totalorder %s18791_s18, %s18787_s15 }
 0x122   :  { %p18794_p0 = por %p18793_p13, %p18792_p12 }
 0x124   :  { %p18795_p1 = pnand %p18794_p0, %p18788_p11 }
 0x126   :  { %18798 = shalt.err (!%p18795_p1)
}
 0x127   :  { %398 = dma.hbm_to_vmem [thread:$0]  %s19486_s9, 16, %s396_s7, [#allocation30]  }
 0x128   :  { %s19266_s17 = smov [#allocation32]   ;;  %s19267_s26 = smov [#allocation2]  }
 0x129   :  { %s423_s23 = sshll.u32 %s19266_s17, 4  ;;  %s181_s28 = sshll.u32 %s19267_s26, 4  ;;  %s424_s23 = int_to_ptr.vmem [resolvable:$true] %s423_s23  ;;  %s182_s28 = int_to_ptr.vmem [resolvable:$true] %s181_s28 }
 0x12a   :  { %s18799_s24 = scalar_lea.hbm %s19511_s8, 32 }
 0x12b   :  { %p18800_p2 = scmp.ne.s32.totalorder %s19511_s8, %s18799_s24  ;;  %p18803_p3 = scmp.lt.u32.totalorder %s18799_s24, %s19511_s8 }
 0x12d   :  { %p18805_p4 = pnand %p18803_p3, %p18800_p2 }
 0x12f   :  { %18808 = shalt.err (!%p18805_p4)
}
 0x130   :  { %s18809_s19 = scalar_lea.vmem %s424_s23, 32  ;;  %p18814_p6 = scmp.lt.s32.totalorder %s424_s23, %s424_s23 }
 0x131   :  { %p18810_p5 = scmp.ne.s32.totalorder %s424_s23, %s18809_s19  ;;  %p18815_p7 = scmp.lt.s32.totalorder %s18809_s19, %s18809_s19 }
 0x133   :  { %p18816_p8 = por %p18815_p7, %p18814_p6 }
 0x135   :  { %p18817_p9 = pnand %p18816_p8, %p18810_p5 }
 0x137   :  { %18820 = shalt.err (!%p18817_p9)
}
 0x138   :  { %426 = dma.hbm_to_vmem [thread:$0]  %s19511_s8, 32, %s424_s23, [#allocation33]  }
 0x139   :  { %s18821_s9 = scalar_lea.hbm %s19321_s25, 128 }
 0x13a   :  { %p18822_p10 = scmp.ne.s32.totalorder %s19321_s25, %s18821_s9  ;;  %p18825_p11 = scmp.lt.u32.totalorder %s18821_s9, %s19321_s25 }
 0x13c   :  { %p18827_p12 = pnand %p18825_p11, %p18822_p10 }
 0x13e   :  { %18830 = shalt.err (!%p18827_p12)
}
 0x13f   :  { %s18831_s0 = scalar_lea.vmem %s182_s28, 128  ;;  %p18836_p0 = scmp.lt.s32.totalorder %s182_s28, %s182_s28 }
 0x140   :  { %p18832_p13 = scmp.ne.s32.totalorder %s182_s28, %s18831_s0  ;;  %p18837_p1 = scmp.lt.s32.totalorder %s18831_s0, %s18831_s0 }
 0x142   :  { %p18838_p2 = por %p18837_p1, %p18836_p0 }
 0x144   :  { %p18839_p3 = pnand %p18838_p2, %p18832_p13 }
 0x146   :  { %18842 = shalt.err (!%p18839_p3)
}
 0x147   :  { %184 = dma.hbm_to_vmem [thread:$0]  %s19321_s25, 128, %s182_s28, [#allocation3]  }
 0x148   :  { %s19268_s14 = smov [#allocation7]   ;;  %s19269_s1 = smov [#allocation10]  }
 0x149   :  { %s200_s8 = sshll.u32 %s19268_s14, 4  ;;  %s232_s12 = sshll.u32 %s19269_s1, 4  ;;  %s201_s8 = int_to_ptr.vmem [resolvable:$true] %s200_s8  ;;  %s233_s12 = int_to_ptr.vmem [resolvable:$true] %s232_s12 }
 0x14a   :  { %s18843_s2 = scalar_lea.hbm %s19331_s3, 128 }
 0x14b   :  { %p18844_p4 = scmp.ne.s32.totalorder %s19331_s3, %s18843_s2  ;;  %p18847_p5 = scmp.lt.u32.totalorder %s18843_s2, %s19331_s3 }
 0x14d   :  { %p18849_p6 = pnand %p18847_p5, %p18844_p4 }
 0x14f   :  { %18852 = shalt.err (!%p18849_p6)
}
 0x150   :  { %s18853_s7 = scalar_lea.vmem %s201_s8, 128  ;;  %p18858_p8 = scmp.lt.s32.totalorder %s201_s8, %s201_s8 }
 0x151   :  { %p18854_p7 = scmp.ne.s32.totalorder %s201_s8, %s18853_s7  ;;  %p18859_p9 = scmp.lt.s32.totalorder %s18853_s7, %s18853_s7 }
 0x153   :  { %p18860_p10 = por %p18859_p9, %p18858_p8 }
 0x155   :  { %p18861_p11 = pnand %p18860_p10, %p18854_p7 }
 0x157   :  { %18864 = shalt.err (!%p18861_p11)
}
 0x158   :  { %206 = dma.hbm_to_vmem [thread:$0]  %s19331_s3, 128, %s201_s8, [#allocation6], %s19254_s22, %s19254_s22, %s19255_s29  }
 0x159   :  { %s18865_s25 = scalar_lea.hbm %s19361_s6, 256 }
 0x15a   :  { %p18866_p12 = scmp.ne.s32.totalorder %s19361_s6, %s18865_s25  ;;  %p18869_p13 = scmp.lt.u32.totalorder %s18865_s25, %s19361_s6 }
 0x15c   :  { %p18871_p0 = pnand %p18869_p13, %p18866_p12 }
 0x15e   :  { %18874 = shalt.err (!%p18871_p0)
}
 0x15f   :  { %s18875_s10 = scalar_lea.vmem %s233_s12, 256  ;;  %p18880_p2 = scmp.lt.s32.totalorder %s233_s12, %s233_s12 }
 0x160   :  { %p18876_p1 = scmp.ne.s32.totalorder %s233_s12, %s18875_s10  ;;  %p18881_p3 = scmp.lt.s32.totalorder %s18875_s10, %s18875_s10 }
 0x162   :  { %p18882_p4 = por %p18881_p3, %p18880_p2 }
 0x164   :  { %p18883_p5 = pnand %p18882_p4, %p18876_p1 }
 0x166   :  { %18886 = shalt.err (!%p18883_p5)
}
 0x167   :  { %238 = dma.hbm_to_vmem [thread:$0]  %s19361_s6, 256, %s233_s12, [#allocation9], %s19259_s16, %s19259_s16, %s19260_s4  }
 0x168   :  { %s19270_s3 = smov [#allocation13]   ;;  %s19271_s13 = smov [#allocation16]  }
 0x169   :  { %s255_s11 = sshll.u32 %s19270_s3, 4  ;;  %s280_s15 = sshll.u32 %s19271_s13, 4  ;;  %s256_s11 = int_to_ptr.vmem [resolvable:$true] %s255_s11  ;;  %s281_s15 = int_to_ptr.vmem [resolvable:$true] %s280_s15 }
 0x16a   :  { %s18887_s18 = scalar_lea.hbm %s19371_s20, 32 }
 0x16b   :  { %p18888_p6 = scmp.ne.s32.totalorder %s19371_s20, %s18887_s18  ;;  %p18891_p7 = scmp.lt.u32.totalorder %s18887_s18, %s19371_s20 }
 0x16d   :  { %p18893_p8 = pnand %p18891_p7, %p18888_p6 }
 0x16f   :  { %18896 = shalt.err (!%p18893_p8)
}
 0x170   :  { %s18897_s17 = scalar_lea.vmem %s256_s11, 32  ;;  %p18902_p10 = scmp.lt.s32.totalorder %s256_s11, %s256_s11 }
 0x171   :  { %p18898_p9 = scmp.ne.s32.totalorder %s256_s11, %s18897_s17  ;;  %p18903_p11 = scmp.lt.s32.totalorder %s18897_s17, %s18897_s17 }
 0x173   :  { %p18904_p12 = por %p18903_p11, %p18902_p10 }
 0x175   :  { %p18905_p13 = pnand %p18904_p12, %p18898_p9 }
 0x177   :  { %18908 = shalt.err (!%p18905_p13)
}
 0x178   :  { %s21686_s23 = sld [smem:[#allocation67_spill]] }
 0x179   :  { %258 = dma.hbm_to_vmem [thread:$0]  %s19371_s20, 32, %s256_s11, [#allocation12]  }
 0x17e   :  { %s18909_s6 = scalar_lea.hbm %s21686_s23, 192 }
 0x17f   :  { %p18910_p0 = scmp.ne.s32.totalorder %s21686_s23, %s18909_s6  ;;  %p18913_p1 = scmp.lt.u32.totalorder %s18909_s6, %s21686_s23 }
 0x181   :  { %p18915_p2 = pnand %p18913_p1, %p18910_p0 }
 0x183   :  { %18918 = shalt.err (!%p18915_p2)
}
 0x184   :  { %s18919_s16 = scalar_lea.vmem %s281_s15, 192  ;;  %p18924_p4 = scmp.lt.s32.totalorder %s281_s15, %s281_s15 }
 0x185   :  { %p18920_p3 = scmp.ne.s32.totalorder %s281_s15, %s18919_s16  ;;  %p18925_p5 = scmp.lt.s32.totalorder %s18919_s16, %s18919_s16 }
 0x187   :  { %p18926_p6 = por %p18925_p5, %p18924_p4 }
 0x189   :  { %p18927_p7 = pnand %p18926_p6, %p18920_p3 }
 0x18b   :  { %18930 = shalt.err (!%p18927_p7)
}
 0x18c   :  { %s21687_s4 = sld [smem:[#allocation70_spill]]  ;;  %s19272_s20 = smov [#allocation19]  }
 0x18d   :  { %286 = dma.hbm_to_vmem [thread:$0]  %s21686_s23, 192, %s281_s15, [#allocation15], %s19254_s22, %s19254_s22, %s19255_s29  }
 0x18e   :  { %s309_s26 = sshll.u32 %s19272_s20, 4  ;;  %s19273_s28 = smov [#allocation22]   ;;  %s310_s26 = int_to_ptr.vmem [resolvable:$true] %s309_s26 }
 0x18f   :  { %s329_s24 = sshll.u32 %s19273_s28, 4  ;;  %s330_s24 = int_to_ptr.vmem [resolvable:$true] %s329_s24 }
 0x192   :  { %s18931_s19 = scalar_lea.hbm %s21687_s4, 32 }
 0x193   :  { %p18932_p8 = scmp.ne.s32.totalorder %s21687_s4, %s18931_s19  ;;  %p18935_p9 = scmp.lt.u32.totalorder %s18931_s19, %s21687_s4 }
 0x195   :  { %p18937_p10 = pnand %p18935_p9, %p18932_p8 }
 0x197   :  { %18940 = shalt.err (!%p18937_p10)
}
 0x198   :  { %s18941_s9 = scalar_lea.vmem %s310_s26, 32  ;;  %p18946_p12 = scmp.lt.s32.totalorder %s310_s26, %s310_s26 }
 0x199   :  { %p18942_p11 = scmp.ne.s32.totalorder %s310_s26, %s18941_s9  ;;  %p18947_p13 = scmp.lt.s32.totalorder %s18941_s9, %s18941_s9 }
 0x19b   :  { %p18948_p0 = por %p18947_p13, %p18946_p12 }
 0x19d   :  { %p18949_p1 = pnand %p18948_p0, %p18942_p11 }
 0x19f   :  { %18952 = shalt.err (!%p18949_p1)
}
 0x1a0   :  { %s21688_s0 = sld [smem:[#allocation71_spill]] }
 0x1a1   :  { %312 = dma.hbm_to_vmem [thread:$0]  %s21687_s4, 32, %s310_s26, [#allocation18]  }
 0x1a6   :  { %s18953_s22 = scalar_lea.hbm %s21688_s0, 32 }
 0x1a7   :  { %p18954_p2 = scmp.ne.s32.totalorder %s21688_s0, %s18953_s22  ;;  %p18957_p3 = scmp.lt.u32.totalorder %s18953_s22, %s21688_s0 }
 0x1a9   :  { %p18959_p4 = pnand %p18957_p3, %p18954_p2 }
 0x1ab   :  { %18962 = shalt.err (!%p18959_p4)
}
 0x1ac   :  { %s18963_s29 = scalar_lea.vmem %s330_s24, 32  ;;  %p18968_p6 = scmp.lt.s32.totalorder %s330_s24, %s330_s24 }
 0x1ad   :  { %p18964_p5 = scmp.ne.s32.totalorder %s330_s24, %s18963_s29  ;;  %p18969_p7 = scmp.lt.s32.totalorder %s18963_s29, %s18963_s29 }
 0x1af   :  { %p18970_p8 = por %p18969_p7, %p18968_p6 }
 0x1b1   :  { %p18971_p9 = pnand %p18970_p8, %p18964_p5 }
 0x1b3   :  { %18974 = shalt.err (!%p18971_p9)
}
 0x1b4   :  { %s21689_s14 = sld [smem:[#allocation77_spill]]  ;;  %s19274_s8 = smov [#allocation25]  }
 0x1b5   :  { %332 = dma.hbm_to_vmem [thread:$0]  %s21688_s0, 32, %s330_s24, [#allocation21]  }
 0x1b6   :  { %s361_s1 = sshll.u32 %s19274_s8, 4  ;;  %s19275_s12 = smov [#allocation28]   ;;  %s362_s1 = int_to_ptr.vmem [resolvable:$true] %s361_s1 }
 0x1b7   :  { %s383_s2 = sshll.u32 %s19275_s12, 4  ;;  %s384_s2 = int_to_ptr.vmem [resolvable:$true] %s383_s2 }
 0x1ba   :  { %s18975_s7 = scalar_lea.hbm %s21689_s14, 32 }
 0x1bb   :  { %p18976_p10 = scmp.ne.s32.totalorder %s21689_s14, %s18975_s7  ;;  %p18979_p11 = scmp.lt.u32.totalorder %s18975_s7, %s21689_s14 }
 0x1bd   :  { %p18981_p12 = pnand %p18979_p11, %p18976_p10 }
 0x1bf   :  { %18984 = shalt.err (!%p18981_p12)
}
 0x1c0   :  { %s18985_s25 = scalar_lea.vmem %s362_s1, 32  ;;  %p18990_p0 = scmp.lt.s32.totalorder %s362_s1, %s362_s1 }
 0x1c1   :  { %p18986_p13 = scmp.ne.s32.totalorder %s362_s1, %s18985_s25  ;;  %p18991_p1 = scmp.lt.s32.totalorder %s18985_s25, %s18985_s25 }
 0x1c3   :  { %p18992_p2 = por %p18991_p1, %p18990_p0 }
 0x1c5   :  { %p18993_p3 = pnand %p18992_p2, %p18986_p13 }
 0x1c7   :  { %18996 = shalt.err (!%p18993_p3)
}
 0x1c8   :  { %s21690_s10 = sld [smem:[#allocation79_spill]] }
 0x1c9   :  { %364 = dma.hbm_to_vmem [thread:$0]  %s21689_s14, 32, %s362_s1, [#allocation24]  }
 0x1ce   :  { %s18997_s3 = scalar_lea.hbm %s21690_s10, 16 }
 0x1cf   :  { %p18998_p4 = scmp.ne.s32.totalorder %s21690_s10, %s18997_s3  ;;  %p19001_p5 = scmp.lt.u32.totalorder %s18997_s3, %s21690_s10 }
 0x1d1   :  { %p19003_p6 = pnand %p19001_p5, %p18998_p4 }
 0x1d3   :  { %19006 = shalt.err (!%p19003_p6)
}
 0x1d4   :  { %s19007_s11 = scalar_lea.vmem %s384_s2, 16  ;;  %s19011_s13 = scalar_lea.vmem %s384_s2, 32 }
 0x1d5   :  { %p19008_p7 = scmp.ne.s32.totalorder %s384_s2, %s19007_s11  ;;  %p19012_p8 = scmp.lt.s32.totalorder %s384_s2, %s384_s2 }
 0x1d6   :  { %p19013_p9 = scmp.lt.s32.totalorder %s19011_s13, %s19007_s11 }
 0x1d8   :  { %p19014_p10 = por %p19013_p9, %p19012_p8 }
 0x1da   :  { %p19015_p11 = pnand %p19014_p10, %p19008_p7 }
 0x1dc   :  { %19018 = shalt.err (!%p19015_p11)
}
 0x1dd   :  { %s21691_s15 = sld [smem:[#allocation81_spill]]  ;;  %s19276_s18 = smov [#allocation31]  }
 0x1de   :  { %386 = dma.hbm_to_vmem [thread:$0]  %s21690_s10, 16, %s384_s2, [#allocation27]  }
 0x1df   :  { %s404_s17 = sshll.u32 %s19276_s18, 4  ;;  %s405_s17 = int_to_ptr.vmem [resolvable:$true] %s404_s17 }
 0x1e3   :  { %s19019_s23 = scalar_lea.hbm %s21691_s15, 32 }
 0x1e4   :  { %p19020_p12 = scmp.ne.s32.totalorder %s21691_s15, %s19019_s23  ;;  %p19023_p13 = scmp.lt.u32.totalorder %s19019_s23, %s21691_s15 }
 0x1e6   :  { %p19025_p0 = pnand %p19023_p13, %p19020_p12 }
 0x1e8   :  { %19028 = shalt.err (!%p19025_p0)
}
 0x1e9   :  { %s19029_s6 = scalar_lea.vmem %s405_s17, 32  ;;  %p19034_p2 = scmp.lt.s32.totalorder %s405_s17, %s405_s17 }
 0x1ea   :  { %p19030_p1 = scmp.ne.s32.totalorder %s405_s17, %s19029_s6  ;;  %p19035_p3 = scmp.lt.s32.totalorder %s19029_s6, %s19029_s6 }
 0x1ec   :  { %p19036_p4 = por %p19035_p3, %p19034_p2 }
 0x1ee   :  { %p19037_p5 = pnand %p19036_p4, %p19030_p1 }
 0x1f0   :  { %19040 = shalt.err (!%p19037_p5)
}
 0x1f1   :  { %s19277_s16 = smov 16   ;;  %s21692_s4 = sld [smem:[#allocation85_spill]] }
 0x1f2   :  { %s19278_s20 = smov 1   ;;  %s19279_s26 = smov [#allocation34]  }
 0x1f3   :  { %410 = dma.hbm_to_vmem [thread:$0]  %s21691_s15, 32, %s405_s17, [#allocation30], %s19277_s16, %s19277_s16, %s19278_s20  }
 0x1f4   :  { %s433_s28 = sshll.u32 %s19279_s26, 4  ;;  %s19280_s24 = smov [#allocation35]   ;;  %s434_s28 = int_to_ptr.vmem [resolvable:$true] %s433_s28 }
 0x1f5   :  { %s489_s19 = sshll.u32 %s19280_s24, 4  ;;  %s490_s19 = int_to_ptr.vmem [resolvable:$true] %s489_s19 }
 0x1f7   :  { %s19041_s9 = scalar_lea.hbm %s21692_s4, 32 }
 0x1f8   :  { %p19042_p6 = scmp.ne.s32.totalorder %s21692_s4, %s19041_s9  ;;  %p19045_p7 = scmp.lt.u32.totalorder %s19041_s9, %s21692_s4 }
 0x1fa   :  { %p19047_p8 = pnand %p19045_p7, %p19042_p6 }
 0x1fc   :  { %19050 = shalt.err (!%p19047_p8)
}
 0x1fd   :  { %s19051_s0 = scalar_lea.vmem %s434_s28, 32  ;;  %p19056_p10 = scmp.lt.s32.totalorder %s434_s28, %s434_s28 }
 0x1fe   :  { %p19052_p9 = scmp.ne.s32.totalorder %s434_s28, %s19051_s0  ;;  %p19057_p11 = scmp.lt.s32.totalorder %s19051_s0, %s19051_s0 }
 0x200   :  { %p19058_p12 = por %p19057_p11, %p19056_p10 }
 0x202   :  { %p19059_p13 = pnand %p19058_p12, %p19052_p9 }
 0x204   :  { %19062 = shalt.err (!%p19059_p13)
}
 0x205   :  { %s21693_s22 = sld [smem:[#allocation109_spill]] }
 0x206   :  { %436 = dma.hbm_to_vmem [thread:$0]  %s21692_s4, 32, %s434_s28, [#allocation33]  }
 0x20b   :  { %s19063_s29 = scalar_lea.hbm %s21693_s22, 16 }
 0x20c   :  { %p19064_p0 = scmp.ne.s32.totalorder %s21693_s22, %s19063_s29  ;;  %p19067_p1 = scmp.lt.u32.totalorder %s19063_s29, %s21693_s22 }
 0x20e   :  { %p19069_p2 = pnand %p19067_p1, %p19064_p0 }
 0x210   :  { %19072 = shalt.err (!%p19069_p2)
}
 0x211   :  { %s19073_s14 = scalar_lea.vmem %s490_s19, 16  ;;  %s19077_s8 = scalar_lea.vmem %s490_s19, 32 }
 0x212   :  { %p19074_p3 = scmp.ne.s32.totalorder %s490_s19, %s19073_s14  ;;  %p19078_p4 = scmp.lt.s32.totalorder %s490_s19, %s490_s19 }
 0x213   :  { %p19079_p5 = scmp.lt.s32.totalorder %s19077_s8, %s19073_s14 }
 0x215   :  { %p19080_p6 = por %p19079_p5, %p19078_p4 }
 0x217   :  { %p19081_p7 = pnand %p19080_p6, %p19074_p3 }
 0x219   :  { %19084 = shalt.err (!%p19081_p7)
}
 0x21a   :  { %492 = dma.hbm_to_vmem [thread:$0]  %s21693_s22, 16, %s490_s19, [#allocation36]  }
 0x21b   :  { %19151 = dma.done.wait [#allocation3], 128  }
 0x21c   :  { %19152 = vsyncadd [#allocation3], 4294967168 }
 0x21d   :  { %19153 = dma.done.wait [#allocation6], 160  }
 0x21e   :  { %19154 = vsyncadd [#allocation6], 4294967136 }
 0x21f   :  { %19155 = dma.done.wait [#allocation9], 640  }
 0x220   :  { %19156 = vsyncadd [#allocation9], 4294966656 }
 0x221   :  { %19157 = dma.done.wait [#allocation12], 64  }
 0x222   :  { %19158 = vsyncadd [#allocation12], 4294967232 }
 0x223   :  { %19159 = dma.done.wait [#allocation15], 256  }
 0x224   :  { %19160 = vsyncadd [#allocation15], 4294967040 }
 0x225   :  { %19161 = dma.done.wait [#allocation18], 288  }
 0x226   :  { %19162 = vsyncadd [#allocation18], 4294967008 }
 0x227   :  { %19163 = dma.done.wait [#allocation21], 64  }
 0x228   :  { %19164 = vsyncadd [#allocation21], 4294967232 }
 0x229   :  { %19165 = dma.done.wait [#allocation24], 128  }
 0x22a   :  { %19166 = vsyncadd [#allocation24], 4294967168 }
 0x22b   :  { %19167 = dma.done.wait [#allocation27], 48  }
 0x22c   :  { %19168 = vsyncadd [#allocation27], 4294967248 }
 0x22d   :  { %19169 = dma.done.wait [#allocation30], 48  }
 0x22e   :  { %19170 = vsyncadd [#allocation30], 4294967248 }
 0x22f   :  { %19171 = dma.done.wait [#allocation33], 64  }
 0x230   :  { %19172 = vsyncadd [#allocation33], 4294967232 }
 0x231   :  { %19173 = dma.done.wait [#allocation36], 16  }
 0x232   :  { %19174 = vsyncadd [#allocation36], 4294967280  ;;  %s21694_s1 = sld [smem:[#allocation55_spill]]  ;;  %s21695_s12 = sld [smem:[#allocation58_spill]]  ;;  %vm587_vm0 = vcmask 261120   ;;  %v19281_v21 = vmov 0.0|0.0  }
 0x233   :  { %s21696_s2 = sld [smem:[#allocation57_spill]]  ;;  %s21697_s7 = sld [smem:[#allocation59_spill]]  ;;  %vm669_vm1 = vcmask 392192   ;;  %vm19282_vm2 = vmmov 0   ;;  %vm1365_vm3 = vcmask 64512   ;;  %vm1833_vm8 = vcmask 523264  }
 0x234   :  { %s21698_s25 = sld [smem:[#allocation60_spill]]  ;;  %s21699_s10 = sld [smem:[#allocation64_spill]]  ;;  %vm1894_vm9 = vcmask 130048   ;;  %vm3474_vm14 = vcmask 1043456  }
 0x235   :  { %s21700_s3 = sld [smem:[#allocation61_spill]]  ;;  %s21701_s11 = sld [smem:[#allocation63_spill]] }
 0x236   :  { %s21702_s13 = sld [smem:[#allocation62_spill]]  ;;  %s21703_s15 = sld [smem:[#allocation65_spill]] }
 0x237   :  { %s21704_s18 = sld [smem:[#allocation66_spill]]  ;;  %s21705_s17 = sld [smem:[#allocation69_spill]] }
 0x238   :  { %v560_v0 = vld [vmem:[%s21694_s1] sm:$0xff]  ;;  %v561_v1 = vld [vmem:[%s21694_s1 + $0x8] sm:$0xff]  ;;  %v562_v2 = vld [vmem:[%s21694_s1 + $0x10] sm:$0xff]  ;;  %s21706_s23 = sld [smem:[#allocation68_spill]]  ;;  %s21707_s6 = sld [smem:[#allocation72_spill]] }
 0x239   :  { %v19764_v3 = vpack.c.bf16 %v561_v1, %v560_v0  ;;  %v563_v4 = vld [vmem:[%s21694_s1 + $0x18] sm:$0xff]  ;;  %v18238_v6 = vld [vmem:[%s21695_s12] sm:$0xff]   ;;  %v18239_v7 = vld [vmem:[%s21695_s12 + $0x8] sm:$0xff]   ;;  %s21708_s16 = sld [smem:[#allocation73_spill]]  ;;  %s21709_s4 = sld [smem:[#allocation75_spill]] }
 0x23a   :  { %v19767_v5 = vpack.c.bf16 %v563_v4, %v562_v2  ;;  %15504 = vmatprep.mubr.msk.bf16.mxu0 %vm587_vm0, %v18238_v6  ;;  %v18240_v8 = vld [vmem:[%s21695_s12 + $0x10] sm:$0xff]   ;;  %v18246_v9 = vld [vmem:[%s21696_s2] sm:$0xff]   ;;  %v18247_v10 = vld [vmem:[%s21696_s2 + $0x8] sm:$0xff]   ;;  %s21710_s20 = sld [smem:[#allocation76_spill]]  ;;  %s21711_s26 = sld [smem:[#allocation74_spill]] }
 0x23b   :  { %15500 = vmatprep.subr.bf16.mxu0 %v19764_v3  ;;  %v18241_v11 = vld [vmem:[%s21695_s12 + $0x18] sm:$0xff]   ;;  %15508 = vmatprep.subr.bf16.mxu1 %v18246_v9  ;;  %v18242_v12 = vld [vmem:[%s21695_s12 + $0x30] sm:$0xff]   ;;  %v18244_v14 = vld [vmem:[%s21695_s12 + $0x40] sm:$0xff]   ;;  %s21712_s28 = sld [smem:[#allocation78_spill]]  ;;  %s21713_s24 = sld [smem:[#allocation80_spill]] }
 0x23c   :  { %15501 = vmatpush3.bf16.msra.mxu0 %v19764_v3  ;;  %15509 = vmatpush3.bf16.msra.mxu1 %v18246_v9  ;;  %v18243_v13 = vld [vmem:[%s21695_s12 + $0x38] sm:$0xff]   ;;  %v18245_v15 = vld [vmem:[%s21695_s12 + $0x48] sm:$0xff]   ;;  %v18248_v16 = vld [vmem:[%s21696_s2 + $0x10] sm:$0xff]   ;;  %s19284_s19 = smov 96   ;;  %s21714_s9 = sld [smem:[#allocation56_spill]] }
 0x23d   :  { %15502 = vmatprep.subr.bf16.mxu0 %v19767_v5  ;;  %15510 = vmatprep.subr.bf16.mxu1 %v18247_v10  ;;  %v18249_v17 = vld [vmem:[%s21696_s2 + $0x30] sm:$0xff]   ;;  %v1266_v18 = vld [vmem:[%s21697_s7] sm:$0xff]  ;;  %v1267_v19 = vld [vmem:[%s21697_s7 + $0x8] sm:$0xff]  ;;  %s21715_s0 = sld [smem:[#allocation82_spill]]  ;;  %s21716_s22 = sld [smem:[#allocation83_spill]] }
 0x23e   :  { %v1268_v20 = vld [vmem:[%s21697_s7 + $0x10] sm:$0xff]  ;;  %v19809_v22 = vpack.c.bf16 %v1267_v19, %v1266_v18  ;;  %v1269_v23 = vld [vmem:[%s21697_s7 + $0x18] sm:$0xff]  ;;  %v18251_v33 = vld [vmem:[%s21696_s2 + $0x40] sm:$0xff]   ;;  %s21717_s29 = sld [smem:[#allocation84_spill]]  ;;  %s21718_s14 = sld [smem:[#allocation87_spill]] }
 0x23f   :  { %v19813_v24 = vpack.c.bf16 %v1269_v23, %v1268_v20  ;;  %v18250_v31 = vld [vmem:[%s21696_s2 + $0x38] sm:$0xff]   ;;  %v18253_v41 = vld [vmem:[%s21696_s2 + $0x20] sm:$0xff]   ;;  %v18254_v47 = vld [vmem:[%s21696_s2 + $0x28] sm:$0xff]   ;;  %s21719_s8 = sld [smem:[#allocation86_spill]]  ;;  %s21720_s1 = sld [smem:[#allocation88_spill]] }
 0x240   :  { %15503 = vmatpush3.bf16.msra.mxu0 %v19767_v5  ;;  %15511 = vmatpush3.bf16.msra.mxu1 %v18247_v10  ;;  %v18252_v39 = vld [vmem:[%s21696_s2 + $0x18] sm:$0xff]   ;;  %v18255_v49 = vld [vmem:[%s21696_s2 + $0x48] sm:$0xff]   ;;  %v18256_v55 = vld [vmem:[%s21696_s2 + $0x50] sm:$0xff]  }
 0x241   :  { %15528 = vmatprep.subr.bf16.mxu0 %v19764_v3  ;;  %15512 = vmatprep.subr.bf16.mxu1 %v18248_v16  ;;  %v18257_v56 = vld [vmem:[%s21696_s2 + $0x58] sm:$0xff]   ;;  %v18258_v57 = vld [vmem:[%s21696_s2 + $0x60] sm:$0xff]   ;;  %v18259_v58 = vld [vmem:[%s21696_s2 + $0x68] sm:$0xff]  }
 0x242   :  { %v18260_v59 = vld [vmem:[%s21696_s2 + $0x70] sm:$0xff]   ;;  %v1270_v60 = vld [vmem:[%s21697_s7 + $0x20] sm:$0xff]  ;;  %v1271_v61 = vld [vmem:[%s21697_s7 + $0x28] sm:$0xff]  ;;  %s21721_s2 = sld [smem:[#allocation89_spill]] }
 0x243   :  { %15505 = vmatmul.mubr.msk.bf16.vlgmr.msra.gmra.mrb[0].mxu0 %vm587_vm0, %v18239_v7  ;;  %v17515_v62 = vpack.c.bf16 %v1271_v61, %v1270_v60  ;;  %v1272_v63 = vld [vmem:[%s21697_s7 + $0x30] sm:$0xff]  ;;  %v1273_v0 = vld [vmem:[%s21697_s7 + $0x38] sm:$0xff]  ;;  %v1274_v2 = vld [vmem:[%s21697_s7 + $0x40] sm:$0xff] }
 0x244   :  { %15529 = vmatpush3.bf16.msra.mxu0 %v19764_v3  ;;  %15532 = vmatprep.mubr.msk.bf16.mxu0 %vm587_vm0, %v18240_v8  ;;  %v17518_v1 = vpack.c.bf16 %v1273_v0, %v1272_v63  ;;  %v1277_v6 = vld [vmem:[%s21697_s7 + $0x58] sm:$0xff]  ;;  %v1278_v8 = vld [vmem:[%s21697_s7 + $0x60] sm:$0xff]  ;;  %v1279_v9 = vld [vmem:[%s21697_s7 + $0x68] sm:$0xff] }
 0x245   :  { %15530 = vmatprep.subr.bf16.mxu0 %v19767_v5  ;;  %15513 = vmatpush3.bf16.msra.mxu1 %v18248_v16  ;;  %v17527_v10 = vpack.c.bf16 %v1279_v9, %v1278_v8  ;;  %v18263_v60 = vld [vmem:[%s21698_s25 + $0x8] sm:$0xff]   ;;  %v18264_v61 = vld [vmem:[%s21698_s25 + $0x10] sm:$0xff]   ;;  %v18266_v63 = vld [vmem:[%s21698_s25 + $0x20] sm:$0xff]  }
 0x246   :  { %15518 = vmatprep.subr.bf16.mxu1 %v18249_v17  ;;  %v18267_v0 = vld [vmem:[%s21698_s25 + $0x28] sm:$0xff]  }
 0x248   :  { %15531 = vmatpush3.bf16.msra.mxu0 %v19767_v5 }
 0x249   :  { %15546 = vmatprep.subr.bf16.mxu0 %v19764_v3 }
 0x24b   :  { %15533 = vmatmul.mubr.msk.bf16.vlgmr.msra.gmra.mrb[4].mxu0 %vm587_vm0, %v18241_v11  ;;  %v1280_v11 = vld [vmem:[%s21697_s7 + $0x70] sm:$0xff] }
 0x24c   :  { %15547 = vmatpush3.bf16.msra.mxu0 %v19764_v3  ;;  %15550 = vmatprep.mubr.msk.bf16.mxu0 %vm587_vm0, %v18242_v12  ;;  %v1281_v12 = vld [vmem:[%s21697_s7 + $0x78] sm:$0xff] }
 0x24d   :  { %15548 = vmatprep.subr.bf16.mxu0 %v19767_v5 }
 0x250   :  { %15549 = vmatpush3.bf16.msra.mxu0 %v19767_v5 }
 0x251   :  { %15564 = vmatprep.subr.bf16.mxu0 %v19764_v3 }
 0x253   :  { %15551 = vmatmul.mubr.msk.bf16.vlgmr.msra.gmra.mrb[8].mxu0 %vm587_vm0, %v18243_v13  ;;  %v17530_v13 = vpack.c.bf16 %v1281_v12, %v1280_v11 }
 0x254   :  { %15565 = vmatpush3.bf16.msra.mxu0 %v19764_v3  ;;  %15568 = vmatprep.mubr.msk.bf16.mxu0 %vm587_vm0, %v18244_v14  ;;  %v19283_v14 = vmov 0.0  }
 0x255   :  { %15566 = vmatprep.subr.bf16.mxu0 %v19767_v5 }
 0x258   :  { %15567 = vmatpush3.bf16.msra.mxu0 %v19767_v5 }
 0x259   :  { %17508 = vmatprep.subr.bf16.mxu0 %v19281_v21 }
 0x25b   :  { %15569 = vmatmul.mubr.msk.bf16.vlgmr.msra.gmra.mrb[12].mxu0 %vm587_vm0, %v18245_v15 }
 0x25c   :  { %17510 = vmatpush3.bf16.msra.mxu0 %v19809_v22  ;;  %15614 = vmatprep.mubr.msk.f32.mxu0 %vm19282_vm2, %v19283_v14 }
 0x25d   :  { %17511 = vmatprep.subr.bf16.mxu0 %v19281_v21 }
 0x260   :  { %17513 = vmatpush3.bf16.msra.mxu0 %v19813_v24 }
 0x261   :  { %17514 = vmatprep.subr.bf16.mxu0 %v19281_v21 }
 0x264   :  { %17516 = vmatpush3.bf16.msra.mxu0 %v17515_v62 }
 0x265   :  { %17517 = vmatprep.subr.bf16.mxu0 %v19281_v21 }
 0x268   :  { %17519 = vmatpush3.bf16.msra.mxu0 %v17518_v1 }
 0x269   :  { %17520 = vmatprep.subr.bf16.mxu0 %v19281_v21 }
 0x316   :  { %v15506_v25 = vpop.f32.mrb[0].mxu0 }
 0x317   :  { %v628_v26 = vpop.f32.mrb[1].mxu0 }
 0x318   :  { %v15507_v27 = vpop.f32.mrb[2].mxu0 }
 0x319   :  { %v644_v28 = vpack.c.bf16 %v15507_v27, %v15506_v25  ;;  %v631_v29 = vpop.f32.mrb[3].mxu0 }
 0x31a   :  { %v643_v30 = vpack.c.bf16 %v631_v29, %v628_v26 }
 0x31c   :  { %15514 = vmatprep.mubr.msk.bf16.mxu1 %vm669_vm1, %v643_v30  ;;  %v1282_v30 = vld [vmem:[#allocation2] sm:$0xff] }
 0x31d   :  { %15515 = vmatmul.mubr.msk.bf16.vlgmr.msra.gmra.mrb[0].mxu1 %vm669_vm1, %v644_v28 }
 0x31e   :  { %15519 = vmatpush3.bf16.msra.mxu1 %v18249_v17  ;;  %15524 = vmatprep.mubr.msk.bf16.mxu1 %vm669_vm1, %v19764_v3  ;;  %v15534_v32 = vpop.f32.mrb[4].mxu0  ;;  %v1275_v3 = vld [vmem:[%s21697_s7 + $0x48] sm:$0xff] }
 0x31f   :  { %15520 = vmatprep.subr.bf16.mxu1 %v18250_v31  ;;  %v853_v34 = vpop.f32.mrb[5].mxu0  ;;  %v17521_v4 = vpack.c.bf16 %v1275_v3, %v1274_v2 }
 0x320   :  { %v15535_v35 = vpop.f32.mrb[6].mxu0 }
 0x321   :  { %v869_v36 = vpack.c.bf16 %v15535_v35, %v15534_v32  ;;  %v856_v37 = vpop.f32.mrb[7].mxu0  ;;  %17522 = vmatpush3.bf16.msra.mxu0 %v17521_v4 }
 0x322   :  { %15521 = vmatpush3.bf16.msra.mxu1 %v18250_v31  ;;  %v868_v38 = vpack.c.bf16 %v856_v37, %v853_v34  ;;  %17523 = vmatprep.subr.bf16.mxu0 %v19281_v21 }
 0x323   :  { %15522 = vmatprep.subr.bf16.mxu1 %v18251_v33 }
 0x326   :  { %15523 = vmatpush3.bf16.msra.mxu1 %v18251_v33  ;;  %v15552_v40 = vpop.f32.mrb[8].mxu0  ;;  %v1439_v33 = vlaneseq }
 0x327   :  { %15536 = vmatprep.subr.bf16.mxu1 %v18252_v39  ;;  %v1009_v42 = vpop.f32.mrb[9].mxu0 }
 0x328   :  { %v15553_v43 = vpop.f32.mrb[10].mxu0  ;;  %v1440_v34 = vshrl.u32 %v1439_v33, 7 }
 0x329   :  { %15525 = vmatmul.mubr.msk.bf16.vlgmr.msra.gmra.mrb[0].mxu1 %vm669_vm1, %v19767_v5  ;;  %v1025_v44 = vpack.c.bf16 %v15553_v43, %v15552_v40  ;;  %v1012_v45 = vpop.f32.mrb[11].mxu0  ;;  %v1276_v5 = vld [vmem:[%s21697_s7 + $0x50] sm:$0xff] }
 0x32a   :  { %15537 = vmatpush3.bf16.msra.mxu1 %v18252_v39  ;;  %15542 = vmatprep.mubr.msk.bf16.mxu1 %vm669_vm1, %v868_v38  ;;  %v1024_v46 = vpack.c.bf16 %v1012_v45, %v1009_v42  ;;  %v17524_v7 = vpack.c.bf16 %v1277_v6, %v1276_v5  ;;  %v19881_v35 = vsub.s32 0, %v1440_v34  ;;  %v1283_v5 = vld [vmem:[#allocation5] sm:$0x3]  ;;  %v19903_v6 = vsub.s32 1, %v1440_v34 }
 0x32b   :  { %15538 = vmatprep.subr.bf16.mxu1 %v18253_v41 }
 0x32c   :  { %17525 = vmatpush3.bf16.msra.mxu0 %v17524_v7  ;;  %v1616_v9 = vrot.slane %v1283_v5, %v19881_v35 }
 0x32d   :  { %17526 = vmatprep.subr.bf16.mxu0 %v19281_v21 }
 0x32e   :  { %15539 = vmatpush3.bf16.msra.mxu1 %v18253_v41  ;;  %v15570_v48 = vpop.f32.mrb[12].mxu0 }
 0x32f   :  { %15540 = vmatprep.subr.bf16.mxu1 %v18254_v47  ;;  %v1165_v50 = vpop.f32.mrb[13].mxu0 }
 0x330   :  { %v15571_v51 = vpop.f32.mrb[14].mxu0  ;;  %17528 = vmatpush3.bf16.msra.mxu0 %v17527_v10 }
 0x331   :  { %v1181_v52 = vpack.c.bf16 %v15571_v51, %v15570_v48  ;;  %v1168_v53 = vpop.f32.mrb[15].mxu0  ;;  %17529 = vmatprep.subr.bf16.mxu0 %v19281_v21 }
 0x332   :  { %15541 = vmatpush3.bf16.msra.mxu1 %v18254_v47  ;;  %v1180_v54 = vpack.c.bf16 %v1168_v53, %v1165_v50 }
 0x333   :  { %15554 = vmatprep.subr.bf16.mxu1 %v18255_v49 }
 0x334   :  { %17531 = vmatpush3.bf16.msra.mxu0 %v17530_v13 }
 0x335   :  { %15543 = vmatmul.mubr.msk.bf16.vlgmr.msra.gmra.mrb[0].mxu1 %vm669_vm1, %v869_v36  ;;  %15617 = vmatprep.subr.mxu0 %v19283_v14 }
 0x336   :  { %15555 = vmatpush3.bf16.msra.mxu1 %v18255_v49  ;;  %15560 = vmatprep.mubr.msk.bf16.mxu1 %vm669_vm1, %v1024_v46 }
 0x337   :  { %15556 = vmatprep.subr.bf16.mxu1 %v18256_v55 }
 0x33a   :  { %15557 = vmatpush3.bf16.msra.mxu1 %v18256_v55 }
 0x33b   :  { %15558 = vmatprep.subr.bf16.mxu1 %v18257_v56 }
 0x33e   :  { %15559 = vmatpush3.bf16.msra.mxu1 %v18257_v56 }
 0x33f   :  { %15572 = vmatprep.subr.bf16.mxu1 %v18258_v57 }
 0x341   :  { %15561 = vmatmul.mubr.msk.bf16.vlgmr.msra.gmra.mrb[0].mxu1 %vm669_vm1, %v1025_v44 }
 0x342   :  { %15573 = vmatpush3.bf16.msra.mxu1 %v18258_v57  ;;  %15578 = vmatprep.mubr.msk.bf16.mxu1 %vm669_vm1, %v1180_v54 }
 0x343   :  { %15574 = vmatprep.subr.bf16.mxu1 %v18259_v58 }
 0x346   :  { %15575 = vmatpush3.bf16.msra.mxu1 %v18259_v58 }
 0x347   :  { %15576 = vmatprep.subr.bf16.mxu1 %v18260_v59 }
 0x34a   :  { %15577 = vmatpush3.bf16.msra.mxu1 %v18260_v59  ;;  %v18262_v59 = vld [vmem:[%s21698_s25] sm:$0xff]  }
 0x34b   :  { %17532 = vmatprep.subr.bf16.mxu1 %v19281_v21 }
 0x34d   :  { %15579 = vmatmul.mubr.msk.bf16.vlgmr.msra.gmra.mrb[0].mxu1 %vm669_vm1, %v1181_v52 }
 0x34e   :  { %17534 = vmatpush3.bf16.msra.mxu1 %v19809_v22  ;;  %15654 = vmatprep.mubr.msk.f32.mxu1 %vm19282_vm2, %v19283_v14 }
 0x34f   :  { %17535 = vmatprep.subr.bf16.mxu1 %v19281_v21 }
 0x352   :  { %17537 = vmatpush3.bf16.msra.mxu1 %v19813_v24 }
 0x353   :  { %17538 = vmatprep.subr.bf16.mxu1 %v19281_v21 }
 0x356   :  { %17540 = vmatpush3.bf16.msra.mxu1 %v17515_v62  ;;  %v18265_v62 = vld [vmem:[%s21698_s25 + $0x18] sm:$0xff]  }
 0x357   :  { %17541 = vmatprep.subr.bf16.mxu1 %v19281_v21 }
 0x35a   :  { %17543 = vmatpush3.bf16.msra.mxu1 %v17518_v1  ;;  %v18268_v1 = vld [vmem:[%s21698_s25 + $0x30] sm:$0xff]  }
 0x35b   :  { %17544 = vmatprep.subr.bf16.mxu1 %v19281_v21 }
 0x35e   :  { %17546 = vmatpush3.bf16.msra.mxu1 %v17521_v4 }
 0x35f   :  { %17547 = vmatprep.subr.bf16.mxu1 %v19281_v21 }
 0x362   :  { %17549 = vmatpush3.bf16.msra.mxu1 %v17524_v7 }
 0x363   :  { %17550 = vmatprep.subr.bf16.mxu1 %v19281_v21 }
 0x366   :  { %17552 = vmatpush3.bf16.msra.mxu1 %v17527_v10  ;;  %v1624_v10 = vrot.slane %v1283_v5, %v19903_v6 }
 0x367   :  { %17553 = vmatprep.subr.bf16.mxu1 %v19281_v21 }
 0x36a   :  { %17555 = vmatpush3.bf16.msra.mxu1 %v17530_v13 }
 0x36b   :  { %15670 = vmatprep.subr.bf16.mxu1 %v19283_v14 }
 0x420   :  { %v15580_v15 = vpop.f32.mrb[0].mxu1 }
 0x421   :  { %v1247_v16 = vpop.f32.mrb[1].mxu1 }
 0x422   :  { %v15581_v17 = vpop.f32.mrb[2].mxu1 }
 0x423   :  { %v1250_v18 = vpop.f32.mrb[3].mxu1 }
 0x424   :  { %v1284_v19 = vadd.f32 %v1250_v18, %v1247_v16 }
 0x426   :  { %v1285_v20 = vadd.f32 %v15580_v15, %v1284_v19 }
 0x428   :  { %v1286_v22 = vadd.f32 %v15581_v17, %v1285_v20 }
 0x42a   :  { %v1287_v23 = vrot.slane %v1286_v22, 4 }
 0x42c   :  { %v1288_v24 = vadd.f32 %v1287_v23, %v1286_v22 }
 0x42e   :  { %v1289_v25 = vrot.slane %v1288_v24, 2 }
 0x430   :  { %v1290_v26 = vadd.f32 %v1289_v25, %v1288_v24 }
 0x432   :  { %v1291_v27 = vrot.slane %v1290_v26, 1 }
 0x434   :  { %v1292_v28 = vadd.f32 %v1291_v27, %v1290_v26 }
 0x436   :  { %v1294_v29 = vmul.f32 0.03125, %v1292_v28 }
 0x438   :  { %15615 = vmatmul.mubr.f32.vlgmr.msra.gmra.mrb[16].mxu0 %v1294_v29 }
 0x439   :  { %15619 = vmatprep.mubr.msk.f32.mxu0 %vm19282_vm2, %v19283_v14  ;;  %15618 = vmatpush3.msra.mxu0 %v1282_v30 }
 0x43a   :  { %15657 = vmatprep.subr.mxu0 %v19283_v14 }
 0x50b   :  { %v1361_v31 = vpop.f32.mrb[16].mxu0 }
 0x50c   :  { %v15616_v32 = vpop.f32.mrb[17].mxu0  ;;  %15620 = vmatmul.mubr.msk.f32.vlgmr.msra.gmra.mrb[18].mxu0 %vm1365_vm3, %v1361_v31 }
 0x50d   :  { %15658 = vmatpush3.msra.mxu0 %v1282_v30  ;;  %15659 = vmatprep.mubr.msk.f32.mxu0 %vm19282_vm2, %v19283_v14 }
 0x50e   :  { %15662 = vmatprep.subr.bf16.mxu0 %v19283_v14 }
 0x5df   :  { %v1435_v36 = vpop.f32.mrb[18].mxu0 }
 0x5e0   :  { %v1442_v37 = vrot.slane %v1435_v36, %v19881_v35  ;;  %v15621_v38 = vpop.f32.mrb[19].mxu0  ;;  %v18261_v36 = vld [vmem:[#allocation7] sm:$0xff]  }
 0x5e2   :  { %v1443_v39 = vsub.f32 %v1247_v16, %v1442_v37  ;;  %v1444_v40 = vsub.f32 %v1250_v18, %v1442_v37  ;;  %v1445_v41 = vsub.f32 %v15580_v15, %v1442_v37  ;;  %v1446_v42 = vsub.f32 %v15581_v17, %v1442_v37  ;;  %v18269_v37 = vld [vmem:[%s21698_s25 + $0x38] sm:$0xff]   ;;  %s21722_s25 = sld [smem:[#allocation90_spill]] }
 0x5e4   :  { %v1447_v43 = vmul.f32 %v1443_v39, %v1443_v39  ;;  %v1448_v44 = vmul.f32 %v1444_v40, %v1444_v40  ;;  %v1449_v45 = vmul.f32 %v1445_v41, %v1445_v41  ;;  %v1450_v47 = vmul.f32 %v1446_v42, %v1446_v42 }
 0x5e6   :  { %v1451_v46 = vadd.f32 %v1448_v44, %v1447_v43  ;;  %v18271_v44 = vld [vmem:[%s21699_s10 + $0x8] sm:$0xff]  }
 0x5e8   :  { %v1452_v48 = vadd.f32 %v1451_v46, %v1449_v45  ;;  %v18272_v45 = vld [vmem:[%s21699_s10 + $0x10] sm:$0xff]   ;;  %v18273_v46 = vld [vmem:[%s21699_s10 + $0x18] sm:$0xff]  }
 0x5ea   :  { %v1453_v49 = vadd.f32 %v1452_v48, %v1450_v47  ;;  %v18276_v47 = vld [vmem:[%s21700_s3] sm:$0xff]   ;;  %v18277_v48 = vld [vmem:[%s21700_s3 + $0x8] sm:$0xff]  }
 0x5ec   :  { %v1454_v50 = vrot.slane %v1453_v49, 4 }
 0x5ee   :  { %v1455_v51 = vadd.f32 %v1454_v50, %v1453_v49  ;;  %v18278_v49 = vld [vmem:[%s21700_s3 + $0x10] sm:$0xff]  }
 0x5f0   :  { %v1456_v52 = vrot.slane %v1455_v51, 2 }
 0x5f2   :  { %v1457_v53 = vadd.f32 %v1456_v52, %v1455_v51 }
 0x5f4   :  { %v1458_v54 = vrot.slane %v1457_v53, 1 }
 0x5f6   :  { %v1459_v55 = vadd.f32 %v1458_v54, %v1457_v53 }
 0x5f8   :  { %v1460_v56 = vmul.f32 0.03125, %v1459_v55  ;;  %v19935_v55 = vld [vmem:[#allocation8] sm:$0xff]  }
 0x5fa   :  { %15655 = vmatmul.mubr.f32.vlgmr.msra.gmra.mrb[4].mxu1 %v1460_v56  ;;  %v19942_v56 = vld [vmem:[#allocation8 + $0x10] sm:$0xff]  }
 0x5fb   :  { %15686 = vmatprep.mubr.msk.bf16.mxu1 %vm19282_vm2, %v19283_v14  ;;  %15671 = vmatpush3.bf16.msra.mxu1 %v18262_v59  ;;  %v2214_v59 = vld [vmem:[%s21701_s11 + $0x8] sm:$0xff] }
 0x5fc   :  { %15672 = vmatprep.subr.bf16.mxu1 %v19283_v14 }
 0x5ff   :  { %15673 = vmatpush3.bf16.msra.mxu1 %v18263_v60  ;;  %v2215_v60 = vld [vmem:[%s21701_s11 + $0x10] sm:$0xff] }
 0x600   :  { %15674 = vmatprep.subr.bf16.mxu1 %v19283_v14 }
 0x603   :  { %15675 = vmatpush3.bf16.msra.mxu1 %v18264_v61 }
 0x604   :  { %15676 = vmatprep.subr.bf16.mxu1 %v19283_v14 }
 0x607   :  { %15677 = vmatpush3.bf16.msra.mxu1 %v18265_v62  ;;  %v2216_v62 = vld [vmem:[%s21701_s11 + $0x18] sm:$0xff] }
 0x608   :  { %15678 = vmatprep.subr.bf16.mxu1 %v19283_v14 }
 0x60b   :  { %15679 = vmatpush3.bf16.msra.mxu1 %v18266_v63  ;;  %v19957_v63 = vpack.c.bf16 %v2216_v62, %v2215_v60 }
 0x60c   :  { %15680 = vmatprep.subr.bf16.mxu1 %v19283_v14 }
 0x60f   :  { %15681 = vmatpush3.bf16.msra.mxu1 %v18267_v0  ;;  %v2217_v0 = vld [vmem:[%s21701_s11 + $0x20] sm:$0xff] }
 0x610   :  { %15682 = vmatprep.subr.bf16.mxu1 %v19283_v14 }
 0x613   :  { %15683 = vmatpush3.bf16.msra.mxu1 %v18268_v1  ;;  %v2218_v1 = vld [vmem:[%s21701_s11 + $0x28] sm:$0xff] }
 0x614   :  { %15684 = vmatprep.subr.bf16.mxu1 %v19283_v14 }
 0x617   :  { %15685 = vmatpush3.bf16.msra.mxu1 %v18269_v37  ;;  %v2227_v37 = vld [vmem:[%s21701_s11 + $0x70] sm:$0xff] }
 0x618   :  { %15690 = vmatprep.subr.bf16.mxu1 %v19283_v14 }
 0x6cd   :  { %v1527_v57 = vpop.f32.mrb[4].mxu1 }
 0x6ce   :  { %v15656_v58 = vpop.f32.mrb[5].mxu1  ;;  %15660 = vmatmul.mubr.msk.f32.vlgmr.msra.gmra.mrb[20].mxu0 %vm1365_vm3, %v1527_v57  ;;  %v18279_v57 = vld [vmem:[%s21700_s3 + $0x18] sm:$0xff]  }
 0x6cf   :  { %15666 = vmatprep.mubr.msk.bf16.mxu0 %vm19282_vm2, %v19283_v14  ;;  %v2213_v58 = vld [vmem:[%s21701_s11] sm:$0xff] }
 0x6d0   :  { %v19953_v61 = vpack.c.bf16 %v2214_v59, %v2213_v58 }
 0x7a1   :  { %v1600_v2 = vpop.f32.mrb[20].mxu0 }
 0x7a2   :  { %v1601_v3 = vadd.f32 1e-05, %v1600_v2  ;;  %v15661_v4 = vpop.f32.mrb[21].mxu0  ;;  %v19963_v2 = vpack.c.bf16 %v2218_v1, %v2217_v0 }
 0x7a4   :  { %18561 = vrsqrt.f32 %v1601_v3 }
 0x7ae   :  { %v18562_v7 = vpop.eup %18561 }
 0x7af   :  { %v1608_v8 = vrot.slane %v18562_v7, %v19881_v35  ;;  %v18280_v7 = vld [vmem:[%s21700_s3 + $0x20] sm:$0xff]  }
 0x7b1   :  { %v1609_v11 = vmul.f32 %v1608_v8, %v1443_v39  ;;  %v1610_v12 = vmul.f32 %v1608_v8, %v1444_v40  ;;  %v1611_v13 = vmul.f32 %v1608_v8, %v1445_v41  ;;  %v1612_v15 = vmul.f32 %v1608_v8, %v1446_v42  ;;  %v18270_v41 = vld [vmem:[%s21699_s10] sm:$0xff]   ;;  %s21723_s10 = sld [smem:[#allocation91_spill]] }
 0x7b3   :  { %v1617_v16 = vmul.f32 %v1616_v9, %v1609_v11  ;;  %v1618_v17 = vmul.f32 %v1616_v9, %v1610_v12  ;;  %v1619_v18 = vmul.f32 %v1616_v9, %v1611_v13  ;;  %v1620_v19 = vmul.f32 %v1616_v9, %v1612_v15  ;;  %v18282_v13 = vld [vmem:[%s21700_s3 + $0x30] sm:$0xff]  }
 0x7b5   :  { %v1625_v20 = vadd.f32 %v1624_v10, %v1617_v16  ;;  %v1626_v22 = vadd.f32 %v1624_v10, %v1618_v17  ;;  %v1627_v23 = vadd.f32 %v1624_v10, %v1619_v18  ;;  %v1628_v24 = vadd.f32 %v1624_v10, %v1620_v19  ;;  %v18281_v10 = vld [vmem:[%s21700_s3 + $0x28] sm:$0xff]   ;;  %v18283_v18 = vld [vmem:[%s21700_s3 + $0x38] sm:$0xff]   ;;  %v18284_v19 = vld [vmem:[%s21700_s3 + $0x40] sm:$0xff]  }
 0x7b7   :  { %vm1629_vm4 = vcmp.ge.f32.partialorder %v1625_v20, 0.0  ;;  %vm1630_vm5 = vcmp.ge.f32.partialorder %v1626_v22, 0.0  ;;  %v1633_v25 = vmul.f32 0.2, %v1625_v20  ;;  %v1634_v26 = vmul.f32 0.2, %v1626_v22 }
 0x7b8   :  { %vm1631_vm6 = vcmp.ge.f32.partialorder %v1627_v23, 0.0  ;;  %vm1632_vm7 = vcmp.ge.f32.partialorder %v1628_v24, 0.0  ;;  %v1635_v27 = vmul.f32 0.2, %v1627_v23  ;;  %v1636_v28 = vmul.f32 0.2, %v1628_v24 }
 0x7b9   :  { %v1637_v29 = vsel %vm1629_vm4, %v1625_v20, %v1633_v25  ;;  %v1638_v30 = vsel %vm1630_vm5, %v1626_v22, %v1634_v26  ;;  %v18285_v20 = vld [vmem:[%s21700_s3 + $0x48] sm:$0xff]   ;;  %v18286_v22 = vld [vmem:[%s21700_s3 + $0x50] sm:$0xff]   ;;  %v2220_v25 = vld [vmem:[%s21701_s11 + $0x38] sm:$0xff]  ;;  %vm4911_vm5 = vcmask 1041408  }
 0x7ba   :  { %v1643_v31 = vpack.c.bf16 %v1638_v30, %v1637_v29  ;;  %v1639_v32 = vsel %vm1631_vm6, %v1627_v23, %v1635_v27  ;;  %v1640_v33 = vsel %vm1632_vm7, %v1628_v24, %v1636_v28  ;;  %v18287_v23 = vld [vmem:[%s21700_s3 + $0x58] sm:$0xff]   ;;  %v2219_v24 = vld [vmem:[%s21701_s11 + $0x30] sm:$0xff]  ;;  %v2221_v27 = vld [vmem:[%s21701_s11 + $0x40] sm:$0xff]  ;;  %vm4907_vm6 = vcmask 31744   ;;  %s21724_s3 = sld [smem:[#allocation92_spill]] }
 0x7bb   :  { %v1644_v34 = vpack.c.bf16 %v1640_v33, %v1639_v32  ;;  %v20001_v26 = vpack.c.bf16 %v2220_v25, %v2219_v24  ;;  %v2222_v28 = vld [vmem:[%s21701_s11 + $0x48] sm:$0xff]  ;;  %v2223_v30 = vld [vmem:[%s21701_s11 + $0x50] sm:$0xff]  ;;  %v2225_v33 = vld [vmem:[%s21701_s11 + $0x60] sm:$0xff]  ;;  %vm5183_vm7 = vcmask 257024  }
 0x7bc   :  { %15663 = vmatpush3.bf16.msra.mxu0 %v1643_v31  ;;  %v20009_v29 = vpack.c.bf16 %v2222_v28, %v2221_v27  ;;  %v2224_v31 = vld [vmem:[%s21701_s11 + $0x58] sm:$0xff] }
 0x7bd   :  { %15664 = vmatprep.subr.bf16.mxu0 %v19283_v14  ;;  %v20017_v32 = vpack.c.bf16 %v2224_v31, %v2223_v30 }
 0x7c0   :  { %15665 = vmatpush3.bf16.msra.mxu0 %v1644_v34  ;;  %v2226_v34 = vld [vmem:[%s21701_s11 + $0x68] sm:$0xff] }
 0x7c1   :  { %15708 = vmatprep.subr.bf16.mxu0 %v19283_v14 }
 0x7c3   :  { %15667 = vmatmul.mubr.msk.bf16.vlgmr.msra.gmra.mrb[24].mxu0 %vm587_vm0, %v18261_v36  ;;  %v20025_v36 = vpack.c.bf16 %v2226_v34, %v2225_v33 }
 0x7c4   :  { %15716 = vmatprep.mubr.msk.bf16.mxu0 %vm19282_vm2, %v19283_v14  ;;  %15709 = vmatpush3.bf16.msra.mxu0 %v18276_v47 }
 0x7c5   :  { %15710 = vmatprep.subr.bf16.mxu0 %v19283_v14 }
 0x7c8   :  { %15711 = vmatpush3.bf16.msra.mxu0 %v18277_v48 }
 0x7c9   :  { %15712 = vmatprep.subr.bf16.mxu0 %v19283_v14 }
 0x7cc   :  { %15713 = vmatpush3.bf16.msra.mxu0 %v18278_v49 }
 0x7cd   :  { %15714 = vmatprep.subr.bf16.mxu0 %v19283_v14 }
 0x7d0   :  { %15715 = vmatpush3.bf16.msra.mxu0 %v18279_v57 }
 0x7d1   :  { %15720 = vmatprep.subr.bf16.mxu0 %v19283_v14 }
 0x896   :  { %v1687_v38 = vpop.f32.mrb[24].mxu0 }
 0x897   :  { %v15668_v39 = vpop.f32.mrb[25].mxu0 }
 0x898   :  { %v1690_v40 = vpop.f32.mrb[26].mxu0 }
 0x899   :  { %v1694_v42 = vpack.c.bf16 %v1690_v40, %v1687_v38  ;;  %v15669_v43 = vpop.f32.mrb[27].mxu0  ;;  %v2228_v38 = vld [vmem:[%s21701_s11 + $0x78] sm:$0xff]  ;;  %s21725_s11 = sld [smem:[#allocation93_spill]] }
 0x89a   :  { %v20033_v39 = vpack.c.bf16 %v2228_v38, %v2227_v37 }
 0x89b   :  { %15687 = vmatmul.mubr.bf16.vlgmr.msra.gmra.mrb[8].mxu1 %v1694_v42 }
 0x89c   :  { %15691 = vmatpush3.bf16.msra.mxu1 %v18270_v41  ;;  %15698 = vmatprep.mubr.msk.bf16.mxu1 %vm19282_vm2, %v19283_v14 }
 0x89d   :  { %15692 = vmatprep.subr.bf16.mxu1 %v19283_v14 }
 0x8a0   :  { %15693 = vmatpush3.bf16.msra.mxu1 %v18271_v44 }
 0x8a1   :  { %15694 = vmatprep.subr.bf16.mxu1 %v19283_v14 }
 0x8a4   :  { %15695 = vmatpush3.bf16.msra.mxu1 %v18272_v45 }
 0x8a5   :  { %15696 = vmatprep.subr.bf16.mxu1 %v19283_v14 }
 0x8a8   :  { %15697 = vmatpush3.bf16.msra.mxu1 %v18273_v46 }
 0x8a9   :  { %15702 = vmatprep.subr.bf16.mxu1 %v19283_v14 }
 0x96e   :  { %v1793_v50 = vpop.f32.mrb[8].mxu1 }
 0x96f   :  { %v15688_v51 = vpop.f32.mrb[9].mxu1 }
 0x970   :  { %v1796_v52 = vpop.f32.mrb[10].mxu1  ;;  %v2230_v51 = vld [vmem:[#allocation10 + $0x8] sm:$0xff] }
 0x971   :  { %v1800_v53 = vpack.c.bf16 %v1796_v52, %v1793_v50  ;;  %v15689_v54 = vpop.f32.mrb[11].mxu1  ;;  %v2229_v50 = vld [vmem:[#allocation10] sm:$0xff] }
 0x973   :  { %15699 = vmatmul.mubr.msk.bf16.vlgmr.msra.gmra.mrb[12].mxu1 %vm1833_vm8, %v1800_v53 }
 0x974   :  { %15703 = vmatpush3.bf16.msra.mxu1 %v1800_v53  ;;  %15704 = vmatprep.mubr.msk.bf16.mxu1 %vm19282_vm2, %v19283_v14 }
 0x975   :  { %15732 = vmatprep.subr.bf16.mxu1 %v19283_v14 }
 0x97b   :  { %15705 = vmatmul.mubr.msk.bf16.vlgmr.msra.gmra.mrb[16].mxu1 %vm1894_vm9, %v19935_v55 }
 0x97c   :  { %15733 = vmatpush3.bf16.msra.mxu1 %v1800_v53  ;;  %15734 = vmatprep.mubr.msk.bf16.mxu1 %vm19282_vm2, %v19283_v14 }
 0x97d   :  { %17556 = vmatprep.subr.bf16.mxu1 %v19281_v21 }
 0x983   :  { %15735 = vmatmul.mubr.msk.bf16.vlgmr.msra.gmra.mrb[20].mxu1 %vm1894_vm9, %v19942_v56 }
 0x984   :  { %15782 = vmatprep.mubr.msk.f32.mxu1 %vm19282_vm2, %v19283_v14  ;;  %17558 = vmatpush3.bf16.msra.mxu1 %v19953_v61 }
 0x985   :  { %17559 = vmatprep.subr.bf16.mxu1 %v19281_v21 }
 0x988   :  { %17561 = vmatpush3.bf16.msra.mxu1 %v19957_v63 }
 0x989   :  { %17562 = vmatprep.subr.bf16.mxu1 %v19281_v21 }
 0x98c   :  { %17564 = vmatpush3.bf16.msra.mxu1 %v19963_v2 }
 0x98d   :  { %17565 = vmatprep.subr.bf16.mxu1 %v19281_v21 }
 0x990   :  { %17567 = vmatpush3.bf16.msra.mxu1 %v20001_v26 }
 0x991   :  { %17568 = vmatprep.subr.bf16.mxu1 %v19281_v21 }
 0x994   :  { %17570 = vmatpush3.bf16.msra.mxu1 %v20009_v29 }
 0x995   :  { %17571 = vmatprep.subr.bf16.mxu1 %v19281_v21 }
 0x998   :  { %17573 = vmatpush3.bf16.msra.mxu1 %v20017_v32 }
 0x999   :  { %17574 = vmatprep.subr.bf16.mxu1 %v19281_v21 }
 0x99c   :  { %17576 = vmatpush3.bf16.msra.mxu1 %v20025_v36 }
 0x99d   :  { %17577 = vmatprep.subr.bf16.mxu1 %v19281_v21 }
 0x9a0   :  { %17579 = vmatpush3.bf16.msra.mxu1 %v20033_v39 }
 0x9a1   :  { %17580 = vmatprep.subr.bf16.mxu1 %v19281_v21 }
 0xa4e   :  { %v1932_v3 = vpop.f32.mrb[16].mxu1 }
 0xa4f   :  { %v15706_v4 = vpop.f32.mrb[17].mxu1 }
 0xa50   :  { %v1935_v5 = vpop.f32.mrb[18].mxu1 }
 0xa51   :  { %v1939_v8 = vpack.c.bf16 %v1935_v5, %v1932_v3  ;;  %v15707_v9 = vpop.f32.mrb[19].mxu1 }
 0xa53   :  { %15717 = vmatmul.mubr.msk.bf16.vlgmr.msra.gmra.mrb[28].mxu0 %vm1833_vm8, %v1939_v8 }
 0xa54   :  { %15721 = vmatpush3.bf16.msra.mxu0 %v18280_v7  ;;  %15728 = vmatprep.mubr.msk.bf16.mxu0 %vm19282_vm2, %v19283_v14 }
 0xa55   :  { %15722 = vmatprep.subr.bf16.mxu0 %v19283_v14 }
 0xa56   :  { %v2126_v11 = vpop.f32.mrb[20].mxu1 }
 0xa57   :  { %v15736_v12 = vpop.f32.mrb[21].mxu1 }
 0xa58   :  { %15723 = vmatpush3.bf16.msra.mxu0 %v18281_v10  ;;  %v2129_v15 = vpop.f32.mrb[22].mxu1 }
 0xa59   :  { %15724 = vmatprep.subr.bf16.mxu0 %v19283_v14  ;;  %v2133_v16 = vpack.c.bf16 %v2129_v15, %v2126_v11  ;;  %v15737_v17 = vpop.f32.mrb[23].mxu1 }
 0xa5c   :  { %15725 = vmatpush3.bf16.msra.mxu0 %v18282_v13 }
 0xa5d   :  { %15726 = vmatprep.subr.bf16.mxu0 %v19283_v14 }
 0xa60   :  { %15727 = vmatpush3.bf16.msra.mxu0 %v18283_v18 }
 0xa61   :  { %15738 = vmatprep.subr.bf16.mxu0 %v19283_v14 }
 0xa63   :  { %15729 = vmatmul.mubr.msk.bf16.vlgmr.msra.gmra.mrb[28].mxu0 %vm1833_vm8, %v1800_v53  ;;  %v20039_v53 = vpack.c.bf16 %v2230_v51, %v2229_v50 }
 0xa64   :  { %15739 = vmatpush3.bf16.msra.mxu0 %v18284_v19  ;;  %15746 = vmatprep.mubr.msk.bf16.mxu0 %vm19282_vm2, %v19283_v14 }
 0xa65   :  { %15740 = vmatprep.subr.bf16.mxu0 %v19283_v14 }
 0xa68   :  { %15741 = vmatpush3.bf16.msra.mxu0 %v18285_v20  ;;  %v2231_v20 = vld [vmem:[#allocation11] sm:$0x3] }
 0xa69   :  { %15742 = vmatprep.subr.bf16.mxu0 %v19283_v14  ;;  %v2553_v24 = vrot.slane %v2231_v20, %v19881_v35  ;;  %v2559_v28 = vrot.slane %v2231_v20, %v19903_v6 }
 0xa6c   :  { %15743 = vmatpush3.bf16.msra.mxu0 %v18286_v22 }
 0xa6d   :  { %15744 = vmatprep.subr.bf16.mxu0 %v19283_v14 }
 0xa70   :  { %15745 = vmatpush3.bf16.msra.mxu0 %v18287_v23 }
 0xa71   :  { %17583 = vmatprep.subr.bf16.mxu0 %v19281_v21 }
 0xa73   :  { %15747 = vmatmul.mubr.msk.bf16.vlgmr.msra.gmra.mrb[28].mxu0 %vm1833_vm8, %v2133_v16 }
 0xa74   :  { %17585 = vmatpush3.bf16.msra.mxu0 %v19953_v61  ;;  %15824 = vmatprep.mubr.msk.f32.mxu0 %vm19282_vm2, %v19283_v14 }
 0xa75   :  { %17586 = vmatprep.subr.bf16.mxu0 %v19281_v21 }
 0xa78   :  { %17588 = vmatpush3.bf16.msra.mxu0 %v19957_v63 }
 0xa79   :  { %17589 = vmatprep.subr.bf16.mxu0 %v19281_v21 }
 0xa7c   :  { %17591 = vmatpush3.bf16.msra.mxu0 %v19963_v2 }
 0xa7d   :  { %17592 = vmatprep.subr.bf16.mxu0 %v19281_v21 }
 0xa80   :  { %17594 = vmatpush3.bf16.msra.mxu0 %v20001_v26 }
 0xa81   :  { %17595 = vmatprep.subr.bf16.mxu0 %v19281_v21 }
 0xa84   :  { %17597 = vmatpush3.bf16.msra.mxu0 %v20009_v29 }
 0xa85   :  { %17598 = vmatprep.subr.bf16.mxu0 %v19281_v21 }
 0xa88   :  { %17600 = vmatpush3.bf16.msra.mxu0 %v20017_v32 }
 0xa89   :  { %17601 = vmatprep.subr.bf16.mxu0 %v19281_v21 }
 0xa8c   :  { %17603 = vmatpush3.bf16.msra.mxu0 %v20025_v36 }
 0xa8d   :  { %17604 = vmatprep.subr.bf16.mxu0 %v19281_v21 }
 0xa90   :  { %17606 = vmatpush3.bf16.msra.mxu0 %v20033_v39 }
 0xa91   :  { %15880 = vmatprep.subr.bf16.mxu0 %v19283_v14 }
 0xb46   :  { %v2204_v40 = vpop.f32.mrb[28].mxu0 }
 0xb47   :  { %v15748_v41 = vpop.f32.mrb[29].mxu0 }
 0xb48   :  { %v2207_v42 = vpop.f32.mrb[30].mxu0 }
 0xb49   :  { %v2232_v43 = vadd.f32 %v2207_v42, %v2204_v40  ;;  %v15749_v44 = vpop.f32.mrb[31].mxu0 }
 0xb4a   :  { %v18289_v44 = vld [vmem:[%s21702_s13 + $0x8] sm:$0xff]  }
 0xb4b   :  { %v2233_v45 = vrot.slane %v2232_v43, 4 }
 0xb4d   :  { %v2234_v46 = vadd.f32 %v2233_v45, %v2232_v43  ;;  %v18288_v43 = vld [vmem:[%s21702_s13] sm:$0xff]  }
 0xb4e   :  { %v18292_v45 = vld [vmem:[%s21702_s13 + $0x20] sm:$0xff]  }
 0xb4f   :  { %v2235_v47 = vrot.slane %v2234_v46, 2 }
 0xb51   :  { %v2236_v48 = vadd.f32 %v2235_v47, %v2234_v46  ;;  %v18293_v46 = vld [vmem:[%s21702_s13 + $0x28] sm:$0xff]   ;;  %v18294_v47 = vld [vmem:[%s21702_s13 + $0x30] sm:$0xff]  }
 0xb53   :  { %v2237_v49 = vrot.slane %v2236_v48, 1 }
 0xb55   :  { %v2238_v52 = vadd.f32 %v2237_v49, %v2236_v48  ;;  %v18295_v48 = vld [vmem:[%s21702_s13 + $0x38] sm:$0xff]  }
 0xb57   :  { %v2240_v54 = vmul.f32 0.0625, %v2238_v52 }
 0xb59   :  { %15783 = vmatmul.mubr.f32.vlgmr.msra.gmra.mrb[6].mxu1 %v2240_v54 }
 0xb5a   :  { %17582 = vmatpush3.bf16.msra.mxu1 %v20039_v53  ;;  %15789 = vmatprep.mubr.msk.f32.mxu1 %vm19282_vm2, %v19283_v14 }
 0xb5b   :  { %17607 = vmatprep.subr.bf16.mxu1 %v19281_v21 }
 0xc2c   :  { %v2307_v57 = vpop.f32.mrb[6].mxu1 }
 0xc2d   :  { %v15784_v58 = vpop.f32.mrb[7].mxu1  ;;  %15790 = vmatmul.mubr.msk.f32.vlgmr.msra.gmra.mrb[24].mxu1 %vm1894_vm9, %v2307_v57  ;;  %v18296_v57 = vld [vmem:[%s21702_s13 + $0x40] sm:$0xff]  }
 0xc2e   :  { %17609 = vmatpush3.bf16.msra.mxu1 %v20039_v53  ;;  %15831 = vmatprep.mubr.msk.f32.mxu1 %vm19282_vm2, %v19283_v14 }
 0xc2f   :  { %15834 = vmatprep.subr.bf16.mxu1 %v19283_v14 }
 0xd00   :  { %v2380_v59 = vpop.f32.mrb[24].mxu1 }
 0xd01   :  { %v2387_v60 = vrot.slane %v2380_v59, %v19881_v35  ;;  %v15791_v62 = vpop.f32.mrb[25].mxu1 }
 0xd03   :  { %v2388_v0 = vsub.f32 %v2204_v40, %v2387_v60  ;;  %v2389_v1 = vsub.f32 %v2207_v42, %v2387_v60 }
 0xd05   :  { %v2390_v3 = vmul.f32 %v2388_v0, %v2388_v0  ;;  %v2391_v4 = vmul.f32 %v2389_v1, %v2389_v1 }
 0xd07   :  { %v2392_v5 = vadd.f32 %v2391_v4, %v2390_v3  ;;  %v18298_v3 = vld [vmem:[%s21702_s13 + $0x50] sm:$0xff]   ;;  %v18299_v4 = vld [vmem:[%s21702_s13 + $0x58] sm:$0xff]  }
 0xd09   :  { %v2393_v7 = vrot.slane %v2392_v5, 4 }
 0xd0b   :  { %v2394_v8 = vadd.f32 %v2393_v7, %v2392_v5  ;;  %v18300_v5 = vld [vmem:[%s21702_s13 + $0x60] sm:$0xff]   ;;  %v18301_v7 = vld [vmem:[%s21702_s13 + $0x68] sm:$0xff]  }
 0xd0d   :  { %v2395_v9 = vrot.slane %v2394_v8, 2 }
 0xd0f   :  { %v2396_v10 = vadd.f32 %v2395_v9, %v2394_v8  ;;  %v18302_v8 = vld [vmem:[%s21702_s13 + $0x70] sm:$0xff]   ;;  %v18303_v9 = vld [vmem:[%s21702_s13 + $0x78] sm:$0xff]  }
 0xd11   :  { %v2397_v11 = vrot.slane %v2396_v10, 1 }
 0xd13   :  { %v2398_v12 = vadd.f32 %v2397_v11, %v2396_v10  ;;  %v18304_v10 = vld [vmem:[%s21702_s13 + $0x80] sm:$0xff]   ;;  %v18305_v11 = vld [vmem:[%s21702_s13 + $0x88] sm:$0xff]  }
 0xd15   :  { %v2399_v13 = vmul.f32 0.0625, %v2398_v12  ;;  %v18306_v12 = vld [vmem:[%s21702_s13 + $0x90] sm:$0xff]  }
 0xd17   :  { %15825 = vmatmul.mubr.f32.vlgmr.msra.gmra.mrb[22].mxu0 %v2399_v13  ;;  %v18307_v13 = vld [vmem:[%s21702_s13 + $0x98] sm:$0xff]  }
 0xd18   :  { %15882 = vmatprep.mubr.msk.bf16.mxu0 %vm19282_vm2, %v19283_v14 }
 0xdea   :  { %v2466_v15 = vpop.f32.mrb[22].mxu0 }
 0xdeb   :  { %v15826_v16 = vpop.f32.mrb[23].mxu0  ;;  %15832 = vmatmul.mubr.msk.f32.vlgmr.msra.gmra.mrb[26].mxu1 %vm1894_vm9, %v2466_v15  ;;  %v18308_v15 = vld [vmem:[%s21702_s13 + $0xa0] sm:$0xff]  }
 0xdec   :  { %15836 = vmatprep.mubr.msk.bf16.mxu1 %vm19282_vm2, %v19283_v14  ;;  %v18309_v16 = vld [vmem:[%s21702_s13 + $0xa8] sm:$0xff]  }
 0xebe   :  { %v2539_v17 = vpop.f32.mrb[26].mxu1 }
 0xebf   :  { %v2540_v18 = vadd.f32 1e-05, %v2539_v17  ;;  %v15833_v19 = vpop.f32.mrb[27].mxu1  ;;  %v18310_v17 = vld [vmem:[%s21702_s13 + $0xb0] sm:$0xff]  }
 0xec1   :  { %18563 = vrsqrt.f32 %v2540_v18  ;;  %v18311_v18 = vld [vmem:[%s21702_s13 + $0xb8] sm:$0xff]  }
 0xecb   :  { %v18564_v22 = vpop.eup %18563 }
 0xecc   :  { %v2547_v23 = vrot.slane %v18564_v22, %v19881_v35 }
 0xece   :  { %v2548_v25 = vmul.f32 %v2547_v23, %v2388_v0  ;;  %v2549_v27 = vmul.f32 %v2547_v23, %v2389_v1  ;;  %v18297_v1 = vld [vmem:[%s21702_s13 + $0x48] sm:$0xff]  }
 0xed0   :  { %v2554_v30 = vmul.f32 %v2553_v24, %v2548_v25  ;;  %v2555_v31 = vmul.f32 %v2553_v24, %v2549_v27 }
 0xed2   :  { %v2560_v33 = vadd.f32 %v2559_v28, %v2554_v30  ;;  %v2561_v34 = vadd.f32 %v2559_v28, %v2555_v31 }
 0xed4   :  { %vm2562_vm10 = vcmp.ge.f32.partialorder %v2560_v33, 0.0  ;;  %vm2563_vm11 = vcmp.ge.f32.partialorder %v2561_v34, 0.0  ;;  %v2564_v37 = vmul.f32 0.2, %v2560_v33  ;;  %v2565_v38 = vmul.f32 0.2, %v2561_v34 }
 0xed6   :  { %v2566_v40 = vsel %vm2562_vm10, %v2560_v33, %v2564_v37  ;;  %v2567_v41 = vsel %vm2563_vm11, %v2561_v34, %v2565_v38 }
 0xed7   :  { %v20059_v42 = vpack.c.bf16 %v2567_v41, %v2566_v40 }
 0xed9   :  { %15835 = vmatpush3.bf16.msra.mxu1 %v20059_v42  ;;  %15881 = vmatpush3.bf16.msra.mxu0 %v20059_v42 }
 0xeda   :  { %15840 = vmatprep.subr.bf16.mxu1 %v19283_v14  ;;  %17610 = vmatprep.subr.bf16.mxu0 %v19281_v21 }
 0xedc   :  { %15837 = vmatmul.mubr.msk.bf16.vlgmr.msra.gmra.mrb[28].mxu1 %vm1894_vm9, %v19935_v55  ;;  %15883 = vmatmul.mubr.msk.bf16.vlgmr.msra.gmra.mrb[32].mxu0 %vm1894_vm9, %v19942_v56  ;;  %v18290_v55 = vld [vmem:[%s21702_s13 + $0x10] sm:$0xff]   ;;  %v18291_v56 = vld [vmem:[%s21702_s13 + $0x18] sm:$0xff]   ;;  %s21726_s13 = sld [smem:[#allocation100_spill]] }
 0xedd   :  { %15841 = vmatpush3.bf16.msra.mxu1 %v18288_v43  ;;  %15856 = vmatprep.mubr.msk.bf16.mxu1 %vm19282_vm2, %v19283_v14 }
 0xede   :  { %15842 = vmatprep.subr.bf16.mxu1 %v19283_v14  ;;  %17612 = vmatpush3.bf16.msra.mxu0 %v19953_v61 }
 0xedf   :  { %17613 = vmatprep.subr.bf16.mxu0 %v19281_v21  ;;  %15938 = vmatprep.mubr.msk.f32.mxu0 %vm19282_vm2, %v19283_v14 }
 0xee1   :  { %15843 = vmatpush3.bf16.msra.mxu1 %v18289_v44 }
 0xee2   :  { %15844 = vmatprep.subr.bf16.mxu1 %v19283_v14  ;;  %17615 = vmatpush3.bf16.msra.mxu0 %v19957_v63 }
 0xee3   :  { %17616 = vmatprep.subr.bf16.mxu0 %v19281_v21 }
 0xee5   :  { %15845 = vmatpush3.bf16.msra.mxu1 %v18290_v55 }
 0xee6   :  { %15846 = vmatprep.subr.bf16.mxu1 %v19283_v14  ;;  %17618 = vmatpush3.bf16.msra.mxu0 %v19963_v2 }
 0xee7   :  { %17619 = vmatprep.subr.bf16.mxu0 %v19281_v21 }
 0xee9   :  { %15847 = vmatpush3.bf16.msra.mxu1 %v18291_v56 }
 0xeea   :  { %15848 = vmatprep.subr.bf16.mxu1 %v19283_v14  ;;  %17621 = vmatpush3.bf16.msra.mxu0 %v20001_v26 }
 0xeeb   :  { %17622 = vmatprep.subr.bf16.mxu0 %v19281_v21 }
 0xeed   :  { %15849 = vmatpush3.bf16.msra.mxu1 %v18292_v45 }
 0xeee   :  { %15850 = vmatprep.subr.bf16.mxu1 %v19283_v14  ;;  %17624 = vmatpush3.bf16.msra.mxu0 %v20009_v29 }
 0xeef   :  { %17625 = vmatprep.subr.bf16.mxu0 %v19281_v21 }
 0xef1   :  { %15851 = vmatpush3.bf16.msra.mxu1 %v18293_v46  ;;  %v18312_v46 = vld [vmem:[%s21703_s15] sm:$0xff]  }
 0xef2   :  { %15852 = vmatprep.subr.bf16.mxu1 %v19283_v14  ;;  %17627 = vmatpush3.bf16.msra.mxu0 %v20017_v32 }
 0xef3   :  { %17628 = vmatprep.subr.bf16.mxu0 %v19281_v21 }
 0xef5   :  { %15853 = vmatpush3.bf16.msra.mxu1 %v18294_v47  ;;  %v18313_v47 = vld [vmem:[%s21703_s15 + $0x8] sm:$0xff]  }
 0xef6   :  { %15854 = vmatprep.subr.bf16.mxu1 %v19283_v14  ;;  %17630 = vmatpush3.bf16.msra.mxu0 %v20025_v36 }
 0xef7   :  { %17631 = vmatprep.subr.bf16.mxu0 %v19281_v21 }
 0xef9   :  { %15855 = vmatpush3.bf16.msra.mxu1 %v18295_v48  ;;  %v18314_v48 = vld [vmem:[%s21703_s15 + $0x10] sm:$0xff]  }
 0xefa   :  { %17633 = vmatpush3.bf16.msra.mxu0 %v20033_v39  ;;  %15860 = vmatprep.subr.bf16.mxu1 %v19283_v14 }
 0xefb   :  { %17634 = vmatprep.subr.bf16.mxu0 %v19281_v21 }
 0xfaf   :  { %v2620_v49 = vpop.f32.mrb[28].mxu1  ;;  %v2856_v50 = vpop.f32.mrb[32].mxu0 }
 0xfb0   :  { %v15838_v51 = vpop.f32.mrb[29].mxu1  ;;  %v15884_v52 = vpop.f32.mrb[33].mxu0 }
 0xfb1   :  { %v2623_v54 = vpop.f32.mrb[30].mxu1  ;;  %v2859_v58 = vpop.f32.mrb[34].mxu0  ;;  %v18317_v51 = vld [vmem:[%s21703_s15 + $0x28] sm:$0xff]   ;;  %v18318_v52 = vld [vmem:[%s21703_s15 + $0x30] sm:$0xff]  }
 0xfb2   :  { %v2627_v59 = vpack.c.bf16 %v2623_v54, %v2620_v49  ;;  %v15839_v60 = vpop.f32.mrb[31].mxu1  ;;  %v2863_v62 = vpack.c.bf16 %v2859_v58, %v2856_v50  ;;  %v15885_v0 = vpop.f32.mrb[35].mxu0  ;;  %v18315_v49 = vld [vmem:[%s21703_s15 + $0x18] sm:$0xff]   ;;  %v18316_v50 = vld [vmem:[%s21703_s15 + $0x20] sm:$0xff]  }
 0xfb4   :  { %15857 = vmatmul.mubr.bf16.vlgmr.msra.gmra.mrb[12].mxu1 %v2627_v59  ;;  %v2974_v59 = vld [vmem:[#allocation13] sm:$0x3] }
 0xfb5   :  { %15861 = vmatpush3.bf16.msra.mxu1 %v18296_v57  ;;  %15876 = vmatprep.mubr.msk.bf16.mxu1 %vm19282_vm2, %v19283_v14  ;;  %v3295_v0 = vrot.slane %v2974_v59, %v19881_v35 }
 0xfb6   :  { %15862 = vmatprep.subr.bf16.mxu1 %v19283_v14 }
 0xfb9   :  { %15863 = vmatpush3.bf16.msra.mxu1 %v18297_v1 }
 0xfba   :  { %15864 = vmatprep.subr.bf16.mxu1 %v19283_v14 }
 0xfbd   :  { %15865 = vmatpush3.bf16.msra.mxu1 %v18298_v3 }
 0xfbe   :  { %15866 = vmatprep.subr.bf16.mxu1 %v19283_v14 }
 0xfc1   :  { %15867 = vmatpush3.bf16.msra.mxu1 %v18299_v4  ;;  %v3301_v4 = vrot.slane %v2974_v59, %v19903_v6  ;;  %v3788_v59 = vld [vmem:[%s21705_s17 + $0x28] sm:$0xff] }
 0xfc2   :  { %15868 = vmatprep.subr.bf16.mxu1 %v19283_v14 }
 0xfc5   :  { %15869 = vmatpush3.bf16.msra.mxu1 %v18300_v5 }
 0xfc6   :  { %15870 = vmatprep.subr.bf16.mxu1 %v19283_v14 }
 0xfc9   :  { %15871 = vmatpush3.bf16.msra.mxu1 %v18301_v7 }
 0xfca   :  { %15872 = vmatprep.subr.bf16.mxu1 %v19283_v14 }
 0xfcd   :  { %15873 = vmatpush3.bf16.msra.mxu1 %v18302_v8 }
 0xfce   :  { %15874 = vmatprep.subr.bf16.mxu1 %v19283_v14 }
 0xfd1   :  { %15875 = vmatpush3.bf16.msra.mxu1 %v18303_v9 }
 0xfd2   :  { %15886 = vmatprep.subr.bf16.mxu1 %v19283_v14 }
 0xfd4   :  { %15877 = vmatmul.mubr.bf16.vlgmr.msra.gmra.mrb[12].mxu1 %v20059_v42 }
 0xfd5   :  { %15887 = vmatpush3.bf16.msra.mxu1 %v18304_v10  ;;  %15902 = vmatprep.mubr.msk.bf16.mxu1 %vm19282_vm2, %v19283_v14 }
 0xfd6   :  { %15888 = vmatprep.subr.bf16.mxu1 %v19283_v14 }
 0xfd9   :  { %15889 = vmatpush3.bf16.msra.mxu1 %v18305_v11 }
 0xfda   :  { %15890 = vmatprep.subr.bf16.mxu1 %v19283_v14 }
 0xfdd   :  { %15891 = vmatpush3.bf16.msra.mxu1 %v18306_v12 }
 0xfde   :  { %15892 = vmatprep.subr.bf16.mxu1 %v19283_v14 }
 0xfe1   :  { %15893 = vmatpush3.bf16.msra.mxu1 %v18307_v13 }
 0xfe2   :  { %15894 = vmatprep.subr.bf16.mxu1 %v19283_v14 }
 0xfe5   :  { %15895 = vmatpush3.bf16.msra.mxu1 %v18308_v15 }
 0xfe6   :  { %15896 = vmatprep.subr.bf16.mxu1 %v19283_v14 }
 0xfe9   :  { %15897 = vmatpush3.bf16.msra.mxu1 %v18309_v16  ;;  %v3310_v16 = vld [vmem:[#allocation14] sm:$0xf] }
 0xfea   :  { %15898 = vmatprep.subr.bf16.mxu1 %v19283_v14 }
 0xfed   :  { %15899 = vmatpush3.bf16.msra.mxu1 %v18310_v17  ;;  %v18319_v17 = vld [vmem:[%s21703_s15 + $0x38] sm:$0xff]   ;;  %s21727_s15 = sld [smem:[#allocation94_spill]] }
 0xfee   :  { %15900 = vmatprep.subr.bf16.mxu1 %v19283_v14 }
 0xff1   :  { %15901 = vmatpush3.bf16.msra.mxu1 %v18311_v18 }
 0xff2   :  { %17637 = vmatprep.subr.bf16.mxu1 %v19281_v21 }
 0xff4   :  { %15903 = vmatmul.mubr.bf16.vlgmr.msra.gmra.mrb[12].mxu1 %v2863_v62 }
 0xff5   :  { %17639 = vmatpush3.bf16.msra.mxu1 %v19953_v61  ;;  %15980 = vmatprep.mubr.msk.f32.mxu1 %vm19282_vm2, %v19283_v14 }
 0xff6   :  { %17640 = vmatprep.subr.bf16.mxu1 %v19281_v21 }
 0xff9   :  { %17642 = vmatpush3.bf16.msra.mxu1 %v19957_v63 }
 0xffa   :  { %17643 = vmatprep.subr.bf16.mxu1 %v19281_v21 }
 0xffd   :  { %17645 = vmatpush3.bf16.msra.mxu1 %v19963_v2 }
 0xffe   :  { %17646 = vmatprep.subr.bf16.mxu1 %v19281_v21 }
0x1001   :  { %17648 = vmatpush3.bf16.msra.mxu1 %v20001_v26 }
0x1002   :  { %17649 = vmatprep.subr.bf16.mxu1 %v19281_v21 }
0x1005   :  { %17651 = vmatpush3.bf16.msra.mxu1 %v20009_v29 }
0x1006   :  { %17652 = vmatprep.subr.bf16.mxu1 %v19281_v21 }
0x1009   :  { %17654 = vmatpush3.bf16.msra.mxu1 %v20017_v32 }
0x100a   :  { %17655 = vmatprep.subr.bf16.mxu1 %v19281_v21 }
0x100d   :  { %17657 = vmatpush3.bf16.msra.mxu1 %v20025_v36 }
0x100e   :  { %17658 = vmatprep.subr.bf16.mxu1 %v19281_v21 }
0x1011   :  { %17660 = vmatpush3.bf16.msra.mxu1 %v20033_v39 }
0x1012   :  { %15996 = vmatprep.subr.bf16.mxu1 %v19283_v14 }
0x10c7   :  { %v2963_v61 = vpop.f32.mrb[12].mxu1 }
0x10c8   :  { %v15904_v63 = vpop.f32.mrb[13].mxu1 }
0x10c9   :  { %v2966_v2 = vpop.f32.mrb[14].mxu1 }
0x10ca   :  { %v2975_v26 = vadd.f32 %v2966_v2, %v2963_v61  ;;  %v15905_v19 = vpop.f32.mrb[15].mxu1 }
0x10cc   :  { %v2976_v29 = vrot.slane %v2975_v26, 4 }
0x10ce   :  { %v2977_v20 = vadd.f32 %v2976_v29, %v2975_v26 }
0x10d0   :  { %v2978_v22 = vrot.slane %v2977_v20, 2 }
0x10d2   :  { %v2979_v23 = vadd.f32 %v2978_v22, %v2977_v20 }
0x10d4   :  { %v2980_v32 = vrot.slane %v2979_v23, 1 }
0x10d6   :  { %v2981_v24 = vadd.f32 %v2980_v32, %v2979_v23 }
0x10d8   :  { %v2982_v25 = vmul.f32 0.0625, %v2981_v24  ;;  %v20205_v24 = vld [vmem:[#allocation16] sm:$0xf] }
0x10da   :  { %15939 = vmatmul.mubr.f32.vlgmr.msra.gmra.mrb[36].mxu0 %v2982_v25  ;;  %v20207_v25 = vld [vmem:[#allocation16 + $0x8] sm:$0xf] }
0x10db   :  { %17636 = vmatpush3.bf16.msra.mxu0 %v20039_v53  ;;  %15945 = vmatprep.mubr.msk.f32.mxu0 %vm19282_vm2, %v19283_v14 }
0x10dc   :  { %17661 = vmatprep.subr.bf16.mxu0 %v19281_v21 }
0x11ad   :  { %v3049_v36 = vpop.f32.mrb[36].mxu0 }
0x11ae   :  { %v15940_v39 = vpop.f32.mrb[37].mxu0  ;;  %15946 = vmatmul.mubr.msk.f32.vlgmr.msra.gmra.mrb[38].mxu0 %vm1894_vm9, %v3049_v36  ;;  %v18320_v36 = vld [vmem:[%s21704_s18] sm:$0xff]  }
0x11af   :  { %17663 = vmatpush3.bf16.msra.mxu0 %v20039_v53  ;;  %15987 = vmatprep.mubr.msk.f32.mxu0 %vm19282_vm2, %v19283_v14  ;;  %v18321_v39 = vld [vmem:[%s21704_s18 + $0x8] sm:$0xff]  }
0x11b0   :  { %15990 = vmatprep.subr.bf16.mxu0 %v19283_v14 }
0x1281   :  { %v3122_v27 = vpop.f32.mrb[38].mxu0 }
0x1282   :  { %v3129_v28 = vrot.slane %v3122_v27, %v19881_v35  ;;  %v15947_v30 = vpop.f32.mrb[39].mxu0  ;;  %v18322_v27 = vld [vmem:[%s21704_s18 + $0x10] sm:$0xff]  }
0x1284   :  { %v3130_v31 = vsub.f32 %v2963_v61, %v3129_v28  ;;  %v3131_v33 = vsub.f32 %v2966_v2, %v3129_v28  ;;  %v18323_v28 = vld [vmem:[%s21704_s18 + $0x18] sm:$0xff]  }
0x1286   :  { %v3132_v34 = vmul.f32 %v3130_v31, %v3130_v31  ;;  %v3133_v37 = vmul.f32 %v3131_v33, %v3131_v33 }
0x1288   :  { %v3134_v38 = vadd.f32 %v3133_v37, %v3132_v34 }
0x128a   :  { %v3135_v40 = vrot.slane %v3134_v38, 4 }
0x128c   :  { %v3136_v41 = vadd.f32 %v3135_v40, %v3134_v38 }
0x128e   :  { %v3137_v42 = vrot.slane %v3136_v41, 2 }
0x1290   :  { %v3138_v53 = vadd.f32 %v3137_v42, %v3136_v41 }
0x1292   :  { %v3139_v43 = vrot.slane %v3138_v53, 1 }
0x1294   :  { %v3140_v44 = vadd.f32 %v3139_v43, %v3138_v53  ;;  %v18325_v43 = vld [vmem:[%s21704_s18 + $0x28] sm:$0xff]  }
0x1296   :  { %v3141_v55 = vmul.f32 0.0625, %v3140_v44  ;;  %v18326_v44 = vld [vmem:[%s21704_s18 + $0x30] sm:$0xff]  }
0x1298   :  { %15981 = vmatmul.mubr.f32.vlgmr.msra.gmra.mrb[32].mxu1 %v3141_v55  ;;  %v18327_v55 = vld [vmem:[%s21704_s18 + $0x38] sm:$0xff]  }
0x1299   :  { %16012 = vmatprep.mubr.msk.bf16.mxu1 %vm19282_vm2, %v19283_v14  ;;  %15997 = vmatpush3.bf16.msra.mxu1 %v18312_v46  ;;  %v18330_v46 = vld [vmem:[%s21704_s18 + $0x50] sm:$0xff]  }
0x129a   :  { %15998 = vmatprep.subr.bf16.mxu1 %v19283_v14 }
0x129d   :  { %15999 = vmatpush3.bf16.msra.mxu1 %v18313_v47  ;;  %v18331_v47 = vld [vmem:[%s21704_s18 + $0x58] sm:$0xff]  }
0x129e   :  { %16000 = vmatprep.subr.bf16.mxu1 %v19283_v14 }
0x12a1   :  { %16001 = vmatpush3.bf16.msra.mxu1 %v18314_v48 }
0x12a2   :  { %16002 = vmatprep.subr.bf16.mxu1 %v19283_v14 }
0x12a5   :  { %16003 = vmatpush3.bf16.msra.mxu1 %v18315_v49  ;;  %v3783_v49 = vld [vmem:[%s21705_s17] sm:$0xff] }
0x12a6   :  { %16004 = vmatprep.subr.bf16.mxu1 %v19283_v14 }
0x12a9   :  { %16005 = vmatpush3.bf16.msra.mxu1 %v18316_v50  ;;  %v3784_v50 = vld [vmem:[%s21705_s17 + $0x8] sm:$0xff] }
0x12aa   :  { %16006 = vmatprep.subr.bf16.mxu1 %v19283_v14 }
0x12ad   :  { %16007 = vmatpush3.bf16.msra.mxu1 %v18317_v51  ;;  %v20254_v51 = vpack.c.bf16 %v3784_v50, %v3783_v49 }
0x12ae   :  { %16008 = vmatprep.subr.bf16.mxu1 %v19283_v14 }
0x12b1   :  { %16009 = vmatpush3.bf16.msra.mxu1 %v18318_v52  ;;  %v3785_v52 = vld [vmem:[%s21705_s17 + $0x10] sm:$0xff] }
0x12b2   :  { %16010 = vmatprep.subr.bf16.mxu1 %v19283_v14 }
0x12b5   :  { %16011 = vmatpush3.bf16.msra.mxu1 %v18319_v17 }
0x12b6   :  { %16046 = vmatprep.subr.bf16.mxu1 %v19283_v14 }
0x136b   :  { %v3208_v56 = vpop.f32.mrb[32].mxu1 }
0x136c   :  { %v15982_v45 = vpop.f32.mrb[33].mxu1  ;;  %15988 = vmatmul.mubr.msk.f32.vlgmr.msra.gmra.mrb[40].mxu0 %vm1894_vm9, %v3208_v56  ;;  %v18328_v56 = vld [vmem:[%s21704_s18 + $0x40] sm:$0xff]  }
0x136d   :  { %15992 = vmatprep.mubr.msk.bf16.mxu0 %vm19282_vm2, %v19283_v14  ;;  %v18329_v45 = vld [vmem:[%s21704_s18 + $0x48] sm:$0xff]  }
0x143f   :  { %v3281_v54 = vpop.f32.mrb[40].mxu0 }
0x1440   :  { %v3282_v57 = vadd.f32 1e-05, %v3281_v54  ;;  %v15989_v58 = vpop.f32.mrb[41].mxu0  ;;  %v3786_v54 = vld [vmem:[%s21705_s17 + $0x18] sm:$0xff] }
0x1441   :  { %v3787_v58 = vld [vmem:[%s21705_s17 + $0x20] sm:$0xff] }
0x1442   :  { %18565 = vrsqrt.f32 %v3282_v57  ;;  %v20260_v57 = vpack.c.bf16 %v3786_v54, %v3785_v52 }
0x144c   :  { %v18566_v60 = vpop.eup %18565 }
0x144d   :  { %v3289_v62 = vrot.slane %v18566_v60, %v19881_v35  ;;  %v20266_v60 = vpack.c.bf16 %v3788_v59, %v3787_v58 }
0x144f   :  { %v3290_v1 = vmul.f32 %v3289_v62, %v3130_v31  ;;  %v3291_v3 = vmul.f32 %v3289_v62, %v3131_v33  ;;  %v18324_v31 = vld [vmem:[%s21704_s18 + $0x20] sm:$0xff]   ;;  %v3789_v62 = vld [vmem:[%s21705_s17 + $0x30] sm:$0xff]  ;;  %s21728_s18 = sld [smem:[#allocation96_spill]] }
0x1451   :  { %v3296_v5 = vmul.f32 %v3295_v0, %v3290_v1  ;;  %v3297_v7 = vmul.f32 %v3295_v0, %v3291_v3  ;;  %v3790_v0 = vld [vmem:[%s21705_s17 + $0x38] sm:$0xff]  ;;  %v3791_v3 = vld [vmem:[#allocation17] sm:$0xff] }
0x1452   :  { %v20272_v1 = vpack.c.bf16 %v3790_v0, %v3789_v62  ;;  %v18336_v62 = vld [vmem:[%s21706_s23] sm:$0xff]   ;;  %v18337_v0 = vld [vmem:[%s21706_s23 + $0x8] sm:$0xff]  }
0x1453   :  { %v3302_v8 = vadd.f32 %v3301_v4, %v3296_v5  ;;  %v3303_v9 = vadd.f32 %v3301_v4, %v3297_v7  ;;  %v3792_v4 = vld [vmem:[#allocation17 + $0x8] sm:$0xff] }
0x1454   :  { %v20276_v5 = vpack.c.bf16 %v3792_v4, %v3791_v3  ;;  %v18338_v3 = vld [vmem:[%s21706_s23 + $0x10] sm:$0xff]   ;;  %v18339_v4 = vld [vmem:[%s21706_s23 + $0x18] sm:$0xff]  }
0x1455   :  { %vm3304_vm12 = vcmp.ge.f32.partialorder %v3302_v8, 0.0  ;;  %vm3305_vm13 = vcmp.ge.f32.partialorder %v3303_v9, 0.0  ;;  %v3306_v10 = vmul.f32 0.2, %v3302_v8  ;;  %v3307_v11 = vmul.f32 0.2, %v3303_v9 }
0x1457   :  { %v3308_v12 = vsel %vm3304_vm12, %v3302_v8, %v3306_v10  ;;  %v3309_v13 = vsel %vm3305_vm13, %v3303_v9, %v3307_v11  ;;  %vm6350_vm12 = vcmask 254976   ;;  %vm6485_vm13 = vcmask 1040384  }
0x1458   :  { %v3311_v15 = vpack.c.bf16 %v3309_v13, %v3308_v12 }
0x145a   :  { %15991 = vmatpush3.bf16.msra.mxu0 %v3311_v15 }
0x145b   :  { %16016 = vmatprep.subr.bf16.mxu0 %v19283_v14 }
0x145d   :  { %15993 = vmatmul.mubr.msk.bf16.vlgmr.msra.gmra.mrb[44].mxu0 %vm1894_vm9, %v3310_v16 }
0x145e   :  { %16018 = vmatprep.mubr.msk.bf16.mxu0 %vm19282_vm2, %v19283_v14 }
0x1530   :  { %v3349_v18 = vpop.f32.mrb[44].mxu0 }
0x1531   :  { %v3355_v61 = vpack.c.bf16 %v3349_v18, %v3349_v18  ;;  %v15994_v63 = vpop.f32.mrb[45].mxu0 }
0x1532   :  { %v3352_v2 = vpop.f32.mrb[46].mxu0 }
0x1533   :  { %v15995_v26 = vpop.f32.mrb[47].mxu0  ;;  %16013 = vmatmul.mubr.bf16.vlgmr.msra.gmra.mrb[36].mxu1 %v3355_v61 }
0x1534   :  { %16048 = vmatprep.mubr.msk.bf16.mxu1 %vm19282_vm2, %v19283_v14 }
0x1606   :  { %v20200_v19 = vpop.f32.mrb[36].mxu1 }
0x1607   :  { %v3460_v29 = vpack.c.bf16 %v20200_v19, %v20200_v19  ;;  %v16014_v20 = vpop.f32.mrb[37].mxu1 }
0x1608   :  { %v3457_v22 = vpop.f32.mrb[38].mxu1 }
0x1609   :  { %v16015_v23 = vpop.f32.mrb[39].mxu1  ;;  %v3476_v32 = vsel %vm3474_vm14, %v3460_v29, 0 }
0x160a   :  { %16017 = vmatpush3.bf16.msra.mxu0 %v3476_v32  ;;  %16047 = vmatpush3.bf16.msra.mxu1 %v3476_v32 }
0x160b   :  { %16022 = vmatprep.subr.bf16.mxu0 %v19283_v14  ;;  %17664 = vmatprep.subr.bf16.mxu1 %v19281_v21 }
0x160d   :  { %16019 = vmatmul.mubr.msk.bf16.vlgmr.msra.gmra.mrb[48].mxu0 %vm1365_vm3, %v20205_v24  ;;  %16049 = vmatmul.mubr.msk.bf16.vlgmr.msra.gmra.mrb[40].mxu1 %vm1365_vm3, %v20207_v25 }
0x160e   :  { %16023 = vmatpush3.bf16.msra.mxu0 %v18320_v36  ;;  %16030 = vmatprep.mubr.msk.bf16.mxu0 %vm19282_vm2, %v19283_v14 }
0x160f   :  { %16024 = vmatprep.subr.bf16.mxu0 %v19283_v14  ;;  %16080 = vmatprep.mubr.msk.f32.mxu1 %vm19282_vm2, %v19283_v14 }
0x1610   :  { %17666 = vmatpush3.bf16.msra.mxu1 %v20254_v51 }
0x1611   :  { %17667 = vmatprep.subr.bf16.mxu1 %v19281_v21 }
0x1612   :  { %16025 = vmatpush3.bf16.msra.mxu0 %v18321_v39 }
0x1613   :  { %16026 = vmatprep.subr.bf16.mxu0 %v19283_v14 }
0x1614   :  { %17669 = vmatpush3.bf16.msra.mxu1 %v20260_v57 }
0x1615   :  { %17670 = vmatprep.subr.bf16.mxu1 %v19281_v21 }
0x1616   :  { %16027 = vmatpush3.bf16.msra.mxu0 %v18322_v27 }
0x1617   :  { %16028 = vmatprep.subr.bf16.mxu0 %v19283_v14 }
0x1618   :  { %17672 = vmatpush3.bf16.msra.mxu1 %v20266_v60 }
0x1619   :  { %17673 = vmatprep.subr.bf16.mxu1 %v19281_v21 }
0x161a   :  { %16029 = vmatpush3.bf16.msra.mxu0 %v18323_v28 }
0x161b   :  { %16034 = vmatprep.subr.bf16.mxu0 %v19283_v14 }
0x161c   :  { %17675 = vmatpush3.bf16.msra.mxu1 %v20272_v1 }
0x161d   :  { %17676 = vmatprep.subr.bf16.mxu1 %v19281_v21 }
0x16e0   :  { %v3512_v30 = vpop.f32.mrb[48].mxu0  ;;  %v3699_v33 = vpop.f32.mrb[40].mxu1 }
0x16e1   :  { %v3518_v34 = vpack.c.bf16 %v3512_v30, %v3512_v30  ;;  %v16020_v37 = vpop.f32.mrb[49].mxu0  ;;  %v16050_v38 = vpop.f32.mrb[41].mxu1  ;;  %v3705_v48 = vpack.c.bf16 %v3699_v33, %v3699_v33 }
0x16e2   :  { %v3515_v40 = vpop.f32.mrb[50].mxu0  ;;  %v3702_v41 = vpop.f32.mrb[42].mxu1  ;;  %v18332_v38 = vld [vmem:[%s21706_s23 + $0x20] sm:$0xff]  }
0x16e3   :  { %v16021_v42 = vpop.f32.mrb[51].mxu0  ;;  %16031 = vmatmul.mubr.msk.bf16.vlgmr.msra.gmra.mrb[52].mxu0 %vm1833_vm8, %v3518_v34  ;;  %v16051_v53 = vpop.f32.mrb[43].mxu1  ;;  %v18333_v40 = vld [vmem:[%s21706_s23 + $0x28] sm:$0xff]   ;;  %v18334_v41 = vld [vmem:[%s21706_s23 + $0x30] sm:$0xff]  }
0x16e4   :  { %16035 = vmatpush3.bf16.msra.mxu0 %v18324_v31  ;;  %16042 = vmatprep.mubr.msk.bf16.mxu0 %vm19282_vm2, %v19283_v14  ;;  %v18335_v42 = vld [vmem:[%s21706_s23 + $0x38] sm:$0xff]  }
0x16e5   :  { %16036 = vmatprep.subr.bf16.mxu0 %v19283_v14 }
0x16e8   :  { %16037 = vmatpush3.bf16.msra.mxu0 %v18325_v43 }
0x16e9   :  { %16038 = vmatprep.subr.bf16.mxu0 %v19283_v14 }
0x16ec   :  { %16039 = vmatpush3.bf16.msra.mxu0 %v18326_v44 }
0x16ed   :  { %16040 = vmatprep.subr.bf16.mxu0 %v19283_v14 }
0x16f0   :  { %16041 = vmatpush3.bf16.msra.mxu0 %v18327_v55  ;;  %v3793_v55 = vld [vmem:[#allocation19] sm:$0x3] }
0x16f1   :  { %16052 = vmatprep.subr.bf16.mxu0 %v19283_v14 }
0x16f3   :  { %16043 = vmatmul.mubr.msk.bf16.vlgmr.msra.gmra.mrb[52].mxu0 %vm1833_vm8, %v3460_v29 }
0x16f4   :  { %16053 = vmatpush3.bf16.msra.mxu0 %v18328_v56  ;;  %16060 = vmatprep.mubr.msk.bf16.mxu0 %vm19282_vm2, %v19283_v14 }
0x16f5   :  { %16054 = vmatprep.subr.bf16.mxu0 %v19283_v14 }
0x16f8   :  { %16055 = vmatpush3.bf16.msra.mxu0 %v18329_v45 }
0x16f9   :  { %16056 = vmatprep.subr.bf16.mxu0 %v19283_v14 }
0x16fc   :  { %16057 = vmatpush3.bf16.msra.mxu0 %v18330_v46  ;;  %v4118_v46 = vrot.slane %v3793_v55, %v19881_v35 }
0x16fd   :  { %16058 = vmatprep.subr.bf16.mxu0 %v19283_v14 }
0x1700   :  { %16059 = vmatpush3.bf16.msra.mxu0 %v18331_v47 }
0x1701   :  { %17691 = vmatprep.subr.bf16.mxu0 %v19281_v21 }
0x1703   :  { %16061 = vmatmul.mubr.msk.bf16.vlgmr.msra.gmra.mrb[52].mxu0 %vm1833_vm8, %v3705_v48  ;;  %v4123_v48 = vrot.slane %v3793_v55, %v19903_v6 }
0x1704   :  { %16113 = vmatprep.mubr.msk.f32.mxu0 %vm19282_vm2, %v19283_v14  ;;  %17693 = vmatpush3.bf16.msra.mxu0 %v20276_v5 }
0x1705   :  { %16116 = vmatprep.subr.bf16.mxu0 %v19283_v14 }
0x17d6   :  { %v3776_v7 = vpop.f32.mrb[52].mxu0 }
0x17d7   :  { %v3794_v8 = vsel %vm1833_vm8, %v3776_v7, 0.0  ;;  %v16062_v9 = vpop.f32.mrb[53].mxu0 }
0x17d8   :  { %v3795_v10 = vrot.slane %v3794_v8, 4  ;;  %v3779_v11 = vpop.f32.mrb[54].mxu0 }
0x17d9   :  { %v16063_v12 = vpop.f32.mrb[55].mxu0 }
0x17da   :  { %v3796_v13 = vadd.f32 %v3795_v10, %v3794_v8 }
0x17dc   :  { %v3797_v15 = vrot.slane %v3796_v13, 2 }
0x17de   :  { %v3798_v16 = vadd.f32 %v3797_v15, %v3796_v13 }
0x17e0   :  { %v3799_v17 = vrot.slane %v3798_v16, 1 }
0x17e2   :  { %v3800_v18 = vadd.f32 %v3799_v17, %v3798_v16  ;;  %v18342_v17 = vld [vmem:[%s21706_s23 + $0x50] sm:$0xff]  }
0x17e4   :  { %v3802_v61 = vmul.f32 0.125, %v3800_v18  ;;  %v18343_v18 = vld [vmem:[%s21706_s23 + $0x58] sm:$0xff]  }
0x17e6   :  { %16081 = vmatmul.mubr.msk.f32.vlgmr.msra.gmra.mrb[34].mxu1 %vm1833_vm8, %v3802_v61 }
0x17e7   :  { %17678 = vmatpush3.bf16.msra.mxu1 %v20276_v5  ;;  %16087 = vmatprep.mubr.msk.f32.mxu1 %vm19282_vm2, %v19283_v14 }
0x17e8   :  { %17679 = vmatprep.subr.bf16.mxu1 %v19281_v21 }
0x18b9   :  { %v3872_v63 = vpop.f32.mrb[34].mxu1 }
0x18ba   :  { %v16082_v2 = vpop.f32.mrb[35].mxu1  ;;  %16088 = vmatmul.mubr.msk.f32.vlgmr.msra.gmra.mrb[44].mxu1 %vm1894_vm9, %v3872_v63 }
0x18bb   :  { %17681 = vmatpush3.bf16.msra.mxu1 %v20254_v51  ;;  %16106 = vmatprep.mubr.msk.f32.mxu1 %vm19282_vm2, %v19283_v14 }
0x18bc   :  { %17682 = vmatprep.subr.bf16.mxu1 %v19281_v21 }
0x18bf   :  { %17684 = vmatpush3.bf16.msra.mxu1 %v20260_v57 }
0x18c0   :  { %17685 = vmatprep.subr.bf16.mxu1 %v19281_v21 }
0x18c3   :  { %17687 = vmatpush3.bf16.msra.mxu1 %v20266_v60 }
0x18c4   :  { %17688 = vmatprep.subr.bf16.mxu1 %v19281_v21 }
0x18c7   :  { %17690 = vmatpush3.bf16.msra.mxu1 %v20272_v1 }
0x18c8   :  { %16134 = vmatprep.subr.bf16.mxu1 %v19283_v14 }
0x198d   :  { %v3945_v26 = vpop.f32.mrb[44].mxu1 }
0x198e   :  { %v3952_v29 = vrot.slane %v3945_v26, %v19881_v35  ;;  %v16089_v20 = vpop.f32.mrb[45].mxu1 }
0x1990   :  { %v3953_v22 = vsub.f32 %v3776_v7, %v3952_v29  ;;  %v18340_v7 = vld [vmem:[%s21706_s23 + $0x40] sm:$0xff]  }
0x1992   :  { %v3954_v23 = vmul.f32 %v3953_v22, %v3953_v22 }
0x1994   :  { %v3955_v32 = vsel %vm1833_vm8, %v3954_v23, 0.0 }
0x1995   :  { %v3956_v36 = vrot.slane %v3955_v32, 4 }
0x1997   :  { %v3957_v39 = vadd.f32 %v3956_v36, %v3955_v32 }
0x1999   :  { %v3958_v27 = vrot.slane %v3957_v39, 2 }
0x199b   :  { %v3959_v28 = vadd.f32 %v3958_v27, %v3957_v39 }
0x199d   :  { %v3960_v30 = vrot.slane %v3959_v28, 1 }
0x199f   :  { %v3961_v31 = vadd.f32 %v3960_v30, %v3959_v28 }
0x19a1   :  { %v3962_v33 = vmul.f32 0.125, %v3961_v31 }
0x19a3   :  { %16107 = vmatmul.mubr.msk.f32.vlgmr.msra.gmra.mrb[46].mxu1 %vm1833_vm8, %v3962_v33 }
0x19a4   :  { %16142 = vmatprep.mubr.msk.bf16.mxu1 %vm19282_vm2, %v19283_v14  ;;  %16135 = vmatpush3.bf16.msra.mxu1 %v18332_v38 }
0x19a5   :  { %16136 = vmatprep.subr.bf16.mxu1 %v19283_v14 }
0x19a8   :  { %16137 = vmatpush3.bf16.msra.mxu1 %v18333_v40 }
0x19a9   :  { %16138 = vmatprep.subr.bf16.mxu1 %v19283_v14 }
0x19ac   :  { %16139 = vmatpush3.bf16.msra.mxu1 %v18334_v41 }
0x19ad   :  { %16140 = vmatprep.subr.bf16.mxu1 %v19283_v14 }
0x19b0   :  { %16141 = vmatpush3.bf16.msra.mxu1 %v18335_v42 }
0x19b1   :  { %16152 = vmatprep.subr.bf16.mxu1 %v19283_v14 }
0x1a76   :  { %v4032_v34 = vpop.f32.mrb[46].mxu1 }
0x1a77   :  { %v16108_v37 = vpop.f32.mrb[47].mxu1  ;;  %16114 = vmatmul.mubr.msk.f32.vlgmr.msra.gmra.mrb[42].mxu0 %vm1894_vm9, %v4032_v34 }
0x1a78   :  { %16118 = vmatprep.mubr.msk.bf16.mxu0 %vm19282_vm2, %v19283_v14 }
0x1b4a   :  { %v4105_v53 = vpop.f32.mrb[42].mxu0 }
0x1b4b   :  { %v4106_v43 = vadd.f32 1e-05, %v4105_v53  ;;  %v16115_v44 = vpop.f32.mrb[43].mxu0 }
0x1b4d   :  { %18567 = vrsqrt.f32 %v4106_v43 }
0x1b57   :  { %v18568_v56 = vpop.eup %18567 }
0x1b58   :  { %v4113_v45 = vrot.slane %v18568_v56, %v19881_v35 }
0x1b5a   :  { %v4114_v47 = vmul.f32 %v4113_v45, %v3953_v22 }
0x1b5c   :  { %v4119_v49 = vmul.f32 %v4118_v46, %v4114_v47 }
0x1b5e   :  { %v4124_v50 = vadd.f32 %v4123_v48, %v4119_v49 }
0x1b60   :  { %vm4125_vm15 = vcmp.ge.f32.partialorder %v4124_v50, 0.0  ;;  %v4126_v52 = vmul.f32 0.2, %v4124_v50 }
0x1b62   :  { %v4127_v54 = vsel %vm4125_vm15, %v4124_v50, %v4126_v52  ;;  %vm6481_vm15 = vcmask 15360  }
0x1b63   :  { %v4128_v58 = vpack.c.bf16 %v4127_v54, %v4127_v54 }
0x1b65   :  { %16143 = vmatmul.mubr.msk.bf16.vlgmr.msra.gmra.mrb[48].mxu1 %vm1833_vm8, %v4128_v58  ;;  %v4139_v59 = vsel %vm3474_vm14, %v4128_v58, 0 }
0x1b66   :  { %16117 = vmatpush3.bf16.msra.mxu0 %v4139_v59  ;;  %16160 = vmatprep.mubr.msk.bf16.mxu1 %vm19282_vm2, %v19283_v14 }
0x1b67   :  { %16122 = vmatprep.subr.bf16.mxu0 %v19283_v14  ;;  %16153 = vmatpush3.bf16.msra.mxu1 %v18340_v7 }
0x1b68   :  { %16154 = vmatprep.subr.bf16.mxu1 %v19283_v14 }
0x1b69   :  { %16119 = vmatmul.mubr.msk.bf16.vlgmr.msra.gmra.mrb[56].mxu0 %vm1365_vm3, %v20205_v24 }
0x1b6a   :  { %16123 = vmatpush3.bf16.msra.mxu0 %v18336_v62  ;;  %16130 = vmatprep.mubr.msk.bf16.mxu0 %vm19282_vm2, %v19283_v14 }
0x1b6b   :  { %16124 = vmatprep.subr.bf16.mxu0 %v19283_v14 }
0x1b6e   :  { %16125 = vmatpush3.bf16.msra.mxu0 %v18337_v0  ;;  %v4442_v0 = vld [vmem:[#allocation20] sm:$0x3] }
0x1b6f   :  { %16126 = vmatprep.subr.bf16.mxu0 %v19283_v14  ;;  %v4766_v7 = vrot.slane %v4442_v0, %v19881_v35 }
0x1b72   :  { %16127 = vmatpush3.bf16.msra.mxu0 %v18338_v3 }
0x1b73   :  { %16128 = vmatprep.subr.bf16.mxu0 %v19283_v14 }
0x1b76   :  { %16129 = vmatpush3.bf16.msra.mxu0 %v18339_v4 }
0x1b77   :  { %16146 = vmatprep.subr.bf16.mxu0 %v19283_v14 }
0x1c38   :  { %v4317_v24 = vpop.f32.mrb[48].mxu1 }
0x1c39   :  { %v16144_v8 = vpop.f32.mrb[49].mxu1 }
0x1c3a   :  { %v4320_v9 = vpop.f32.mrb[50].mxu1  ;;  %v4771_v8 = vrot.slane %v4442_v0, %v19903_v6 }
0x1c3b   :  { %v16145_v10 = vpop.f32.mrb[51].mxu1 }
0x1c3c   :  { %v4175_v11 = vpop.f32.mrb[56].mxu0 }
0x1c3d   :  { %v4181_v12 = vpack.c.bf16 %v4175_v11, %v4175_v11  ;;  %v16120_v13 = vpop.f32.mrb[57].mxu0 }
0x1c3e   :  { %v4178_v15 = vpop.f32.mrb[58].mxu0 }
0x1c3f   :  { %v16121_v16 = vpop.f32.mrb[59].mxu0  ;;  %16131 = vmatmul.mubr.msk.bf16.vlgmr.msra.gmra.mrb[60].mxu0 %vm1833_vm8, %v4181_v12 }
0x1c40   :  { %16147 = vmatpush3.bf16.msra.mxu0 %v4139_v59  ;;  %16148 = vmatprep.mubr.msk.bf16.mxu0 %vm19282_vm2, %v19283_v14  ;;  %v4776_v16 = vld [vmem:[#allocation22] sm:$0x3] }
0x1c41   :  { %17694 = vmatprep.subr.bf16.mxu0 %v19281_v21 }
0x1c47   :  { %16149 = vmatmul.mubr.msk.bf16.vlgmr.msra.gmra.mrb[64].mxu0 %vm1365_vm3, %v20207_v25  ;;  %v18341_v25 = vld [vmem:[%s21706_s23 + $0x48] sm:$0xff]   ;;  %s21730_s23 = sld [smem:[#allocation98_spill]] }
0x1c48   :  { %17696 = vmatpush3.bf16.msra.mxu0 %v20254_v51  ;;  %16180 = vmatprep.mubr.msk.f32.mxu0 %vm19282_vm2, %v19283_v14 }
0x1c49   :  { %17697 = vmatprep.subr.bf16.mxu0 %v19281_v21  ;;  %16155 = vmatpush3.bf16.msra.mxu1 %v18341_v25  ;;  %v18344_v25 = vld [vmem:[%s21707_s6] sm:$0xff]  }
0x1c4a   :  { %16156 = vmatprep.subr.bf16.mxu1 %v19283_v14 }
0x1c4c   :  { %17699 = vmatpush3.bf16.msra.mxu0 %v20260_v57 }
0x1c4d   :  { %17700 = vmatprep.subr.bf16.mxu0 %v19281_v21  ;;  %16157 = vmatpush3.bf16.msra.mxu1 %v18342_v17  ;;  %v18345_v17 = vld [vmem:[%s21707_s6 + $0x8] sm:$0xff]  }
0x1c4e   :  { %16158 = vmatprep.subr.bf16.mxu1 %v19283_v14 }
0x1c50   :  { %17702 = vmatpush3.bf16.msra.mxu0 %v20266_v60 }
0x1c51   :  { %17703 = vmatprep.subr.bf16.mxu0 %v19281_v21  ;;  %16159 = vmatpush3.bf16.msra.mxu1 %v18343_v18  ;;  %v18346_v18 = vld [vmem:[%s21707_s6 + $0x10] sm:$0xff]  }
0x1c52   :  { %17706 = vmatprep.subr.bf16.mxu1 %v19281_v21 }
0x1c54   :  { %17705 = vmatpush3.bf16.msra.mxu0 %v20272_v1 }
0x1c55   :  { %17709 = vmatprep.subr.bf16.mxu0 %v19281_v21 }
0x1d12   :  { %v4251_v61 = vpop.f32.mrb[60].mxu0 }
0x1d13   :  { %v4318_v63 = vadd.f32 %v4317_v24, %v4251_v61  ;;  %v16132_v2 = vpop.f32.mrb[61].mxu0  ;;  %v18347_v61 = vld [vmem:[%s21707_s6 + $0x18] sm:$0xff]   ;;  %s21731_s6 = sld [smem:[#allocation95_spill]] }
0x1d14   :  { %v4254_v26 = vpop.f32.mrb[62].mxu0 }
0x1d15   :  { %v16133_v29 = vpop.f32.mrb[63].mxu0 }
0x1d1a   :  { %v4357_v20 = vpop.f32.mrb[64].mxu0 }
0x1d1b   :  { %v4363_v22 = vpack.c.bf16 %v4357_v20, %v4357_v20  ;;  %v16150_v23 = vpop.f32.mrb[65].mxu0 }
0x1d1c   :  { %v4360_v32 = vpop.f32.mrb[66].mxu0 }
0x1d1d   :  { %v16151_v36 = vpop.f32.mrb[67].mxu0  ;;  %16161 = vmatmul.mubr.msk.bf16.vlgmr.msra.gmra.mrb[52].mxu1 %vm1833_vm8, %v4363_v22 }
0x1d1e   :  { %17708 = vmatpush3.bf16.msra.mxu1 %v20276_v5  ;;  %16187 = vmatprep.mubr.msk.f32.mxu1 %vm19282_vm2, %v19283_v14 }
0x1d1f   :  { %17721 = vmatprep.subr.bf16.mxu1 %v19281_v21 }
0x1df0   :  { %v4434_v39 = vpop.f32.mrb[52].mxu1 }
0x1df1   :  { %v4440_v27 = vadd.f32 %v4434_v39, %v4318_v63  ;;  %v16162_v28 = vpop.f32.mrb[53].mxu1 }
0x1df2   :  { %v4437_v30 = vpop.f32.mrb[54].mxu1  ;;  %v20412_v28 = vld [vmem:[#allocation23] sm:$0x3] }
0x1df3   :  { %v4441_v31 = vadd.f32 %v4440_v27, %v20200_v19  ;;  %v16163_v33 = vpop.f32.mrb[55].mxu1  ;;  %v20414_v30 = vld [vmem:[#allocation23 + $0x4] sm:$0x3] }
0x1df4   :  { %v18349_v33 = vld [vmem:[%s21708_s16 + $0x8] sm:$0xff]  }
0x1df5   :  { %v4443_v34 = vsel %vm1833_vm8, %v4441_v31, 0.0 }
0x1df6   :  { %v4444_v37 = vrot.slane %v4443_v34, 4 }
0x1df8   :  { %v4445_v38 = vadd.f32 %v4444_v37, %v4443_v34  ;;  %v18350_v37 = vld [vmem:[%s21708_s16 + $0x10] sm:$0xff]  }
0x1dfa   :  { %v4446_v40 = vrot.slane %v4445_v38, 2 }
0x1dfc   :  { %v4447_v41 = vadd.f32 %v4446_v40, %v4445_v38 }
0x1dfe   :  { %v4448_v42 = vrot.slane %v4447_v41, 1 }
0x1e00   :  { %v4449_v53 = vadd.f32 %v4448_v42, %v4447_v41 }
0x1e02   :  { %v4450_v43 = vmul.f32 0.125, %v4449_v53 }
0x1e04   :  { %16181 = vmatmul.mubr.msk.f32.vlgmr.msra.gmra.mrb[68].mxu0 %vm1833_vm8, %v4450_v43 }
0x1e05   :  { %17711 = vmatpush3.bf16.msra.mxu0 %v20254_v51  ;;  %16206 = vmatprep.mubr.msk.f32.mxu0 %vm19282_vm2, %v19283_v14 }
0x1e06   :  { %17712 = vmatprep.subr.bf16.mxu0 %v19281_v21 }
0x1e09   :  { %17714 = vmatpush3.bf16.msra.mxu0 %v20260_v57 }
0x1e0a   :  { %17715 = vmatprep.subr.bf16.mxu0 %v19281_v21 }
0x1e0d   :  { %17717 = vmatpush3.bf16.msra.mxu0 %v20266_v60 }
0x1e0e   :  { %17718 = vmatprep.subr.bf16.mxu0 %v19281_v21 }
0x1e11   :  { %17720 = vmatpush3.bf16.msra.mxu0 %v20272_v1 }
0x1e12   :  { %16234 = vmatprep.subr.bf16.mxu0 %v19283_v14 }
0x1ed7   :  { %v4520_v19 = vpop.f32.mrb[68].mxu0 }
0x1ed8   :  { %v16182_v44 = vpop.f32.mrb[69].mxu0  ;;  %16188 = vmatmul.mubr.msk.f32.vlgmr.msra.gmra.mrb[56].mxu1 %vm1894_vm9, %v4520_v19 }
0x1ed9   :  { %17723 = vmatpush3.bf16.msra.mxu1 %v20276_v5  ;;  %16213 = vmatprep.mubr.msk.f32.mxu1 %vm19282_vm2, %v19283_v14 }
0x1eda   :  { %16216 = vmatprep.subr.bf16.mxu1 %v19283_v14 }
0x1fab   :  { %v4593_v51 = vpop.f32.mrb[56].mxu1 }
0x1fac   :  { %v4600_v57 = vrot.slane %v4593_v51, %v19881_v35  ;;  %v16189_v60 = vpop.f32.mrb[57].mxu1  ;;  %v18351_v51 = vld [vmem:[%s21708_s16 + $0x18] sm:$0xff]  }
0x1fad   :  { %v18353_v60 = vld [vmem:[%s21708_s16 + $0x28] sm:$0xff]  }
0x1fae   :  { %v4601_v55 = vsub.f32 %v4441_v31, %v4600_v57  ;;  %v18348_v31 = vld [vmem:[%s21708_s16] sm:$0xff]  }
0x1faf   :  { %v18352_v57 = vld [vmem:[%s21708_s16 + $0x20] sm:$0xff]   ;;  %s21732_s16 = sld [smem:[#allocation101_spill]] }
0x1fb0   :  { %v4602_v56 = vmul.f32 %v4601_v55, %v4601_v55 }
0x1fb2   :  { %v4603_v1 = vsel %vm1833_vm8, %v4602_v56, 0.0  ;;  %v5176_v56 = vld [vmem:[%s21709_s4] sm:$0xff] }
0x1fb3   :  { %v4604_v45 = vrot.slane %v4603_v1, 4 }
0x1fb5   :  { %v4605_v46 = vadd.f32 %v4604_v45, %v4603_v1  ;;  %v5177_v1 = vld [vmem:[%s21709_s4 + $0x8] sm:$0xff] }
0x1fb6   :  { %v20449_v45 = vpack.c.bf16 %v5177_v1, %v5176_v56 }
0x1fb7   :  { %v4606_v47 = vrot.slane %v4605_v46, 2 }
0x1fb9   :  { %v4607_v48 = vadd.f32 %v4606_v47, %v4605_v46  ;;  %v5178_v46 = vld [vmem:[%s21709_s4 + $0x10] sm:$0xff]  ;;  %v5179_v47 = vld [vmem:[%s21709_s4 + $0x18] sm:$0xff]  ;;  %s21733_s4 = sld [smem:[#allocation99_spill]] }
0x1fbb   :  { %v4608_v49 = vrot.slane %v4607_v48, 1 }
0x1fbd   :  { %v4609_v50 = vadd.f32 %v4608_v49, %v4607_v48  ;;  %v20457_v48 = vpack.c.bf16 %v5179_v47, %v5178_v46 }
0x1fbf   :  { %v4610_v5 = vmul.f32 0.125, %v4609_v50 }
0x1fc1   :  { %16207 = vmatmul.mubr.msk.f32.vlgmr.msra.gmra.mrb[70].mxu0 %vm1833_vm8, %v4610_v5 }
0x1fc2   :  { %16236 = vmatprep.mubr.msk.bf16.mxu0 %vm19282_vm2, %v19283_v14 }
0x2094   :  { %v4680_v52 = vpop.f32.mrb[70].mxu0 }
0x2095   :  { %v16208_v54 = vpop.f32.mrb[71].mxu0  ;;  %16214 = vmatmul.mubr.msk.f32.vlgmr.msra.gmra.mrb[58].mxu1 %vm1894_vm9, %v4680_v52 }
0x2096   :  { %16218 = vmatprep.mubr.msk.bf16.mxu1 %vm19282_vm2, %v19283_v14 }
0x2168   :  { %v4753_v58 = vpop.f32.mrb[58].mxu1 }
0x2169   :  { %v4754_v59 = vadd.f32 1e-05, %v4753_v58  ;;  %v16215_v62 = vpop.f32.mrb[59].mxu1 }
0x216b   :  { %18569 = vrsqrt.f32 %v4754_v59 }
0x2175   :  { %v18570_v3 = vpop.eup %18569 }
0x2176   :  { %v4761_v4 = vrot.slane %v18570_v3, %v19881_v35 }
0x2178   :  { %v4762_v24 = vmul.f32 %v4761_v4, %v4601_v55  ;;  %v5180_v4 = vld [vmem:[%s21710_s20] sm:$0xff] }
0x217a   :  { %v4767_v9 = vmul.f32 %v4766_v7, %v4762_v24  ;;  %v5181_v7 = vld [vmem:[%s21710_s20 + $0x8] sm:$0xff]  ;;  %s21734_s20 = sld [smem:[#allocation102_spill]] }
0x217c   :  { %v4772_v10 = vadd.f32 %v4771_v8, %v4767_v9  ;;  %v20466_v8 = vpack.c.bf16 %v5181_v7, %v5180_v4 }
0x217e   :  { %vm4773_vm4 = vcmp.ge.f32.partialorder %v4772_v10, 0.0  ;;  %v4774_v11 = vmul.f32 0.2, %v4772_v10 }
0x2180   :  { %v4775_v12 = vsel %vm4773_vm4, %v4772_v10, %v4774_v11 }
0x2181   :  { %v4777_v13 = vpack.c.bf16 %v4775_v12, %v4775_v12 }
0x2183   :  { %v4782_v15 = vsel %vm3474_vm14, %v4777_v13, 0 }
0x2184   :  { %16217 = vmatpush3.bf16.msra.mxu1 %v4782_v15 }
0x2185   :  { %16222 = vmatprep.subr.bf16.mxu1 %v19283_v14 }
0x2187   :  { %16219 = vmatmul.mubr.msk.bf16.vlgmr.msra.gmra.mrb[60].mxu1 %vm1365_vm3, %v4776_v16 }
0x2188   :  { %16223 = vmatpush3.bf16.msra.mxu1 %v18344_v25  ;;  %16230 = vmatprep.mubr.msk.bf16.mxu1 %vm19282_vm2, %v19283_v14 }
0x2189   :  { %16224 = vmatprep.subr.bf16.mxu1 %v19283_v14 }
0x218c   :  { %16225 = vmatpush3.bf16.msra.mxu1 %v18345_v17 }
0x218d   :  { %16226 = vmatprep.subr.bf16.mxu1 %v19283_v14 }
0x2190   :  { %16227 = vmatpush3.bf16.msra.mxu1 %v18346_v18 }
0x2191   :  { %16228 = vmatprep.subr.bf16.mxu1 %v19283_v14 }
0x2194   :  { %16229 = vmatpush3.bf16.msra.mxu1 %v18347_v61 }
0x2195   :  { %16256 = vmatprep.subr.bf16.mxu1 %v19283_v14 }
0x225a   :  { %v4818_v63 = vpop.f32.mrb[60].mxu1 }
0x225b   :  { %v4824_v2 = vpack.c.bf16 %v4818_v63, %v4818_v63  ;;  %v16220_v26 = vpop.f32.mrb[61].mxu1 }
0x225c   :  { %v4821_v29 = vpop.f32.mrb[62].mxu1 }
0x225d   :  { %v16221_v20 = vpop.f32.mrb[63].mxu1  ;;  %16231 = vmatmul.mubr.msk.bf16.vlgmr.msra.gmra.mrb[64].mxu1 %vm1833_vm8, %v4824_v2 }
0x225e   :  { %16258 = vmatprep.mubr.msk.bf16.mxu1 %vm19282_vm2, %v19283_v14 }
0x2330   :  { %v20407_v22 = vpop.f32.mrb[64].mxu1 }
0x2331   :  { %v4900_v23 = vpack.c.bf16 %v20407_v22, %v20407_v22  ;;  %v16232_v32 = vpop.f32.mrb[65].mxu1 }
0x2332   :  { %v4897_v36 = vpop.f32.mrb[66].mxu1 }
0x2333   :  { %v16233_v39 = vpop.f32.mrb[67].mxu1  ;;  %v4913_v27 = vsel %vm4911_vm5, %v4900_v23, 0  ;;  %v18356_v36 = vld [vmem:[%s21711_s26] sm:$0xff]  }
0x2334   :  { %16235 = vmatpush3.bf16.msra.mxu0 %v4913_v27  ;;  %16257 = vmatpush3.bf16.msra.mxu1 %v4913_v27  ;;  %v18357_v39 = vld [vmem:[%s21711_s26 + $0x8] sm:$0xff]  }
0x2335   :  { %16240 = vmatprep.subr.bf16.mxu0 %v19283_v14  ;;  %17724 = vmatprep.subr.bf16.mxu1 %v19281_v21 }
0x2337   :  { %16237 = vmatmul.mubr.msk.bf16.vlgmr.msra.gmra.mrb[72].mxu0 %vm4907_vm6, %v20412_v28  ;;  %16259 = vmatmul.mubr.msk.bf16.vlgmr.msra.gmra.mrb[68].mxu1 %vm4907_vm6, %v20414_v30 }
0x2338   :  { %16241 = vmatpush3.bf16.msra.mxu0 %v18348_v31  ;;  %16244 = vmatprep.mubr.msk.bf16.mxu0 %vm19282_vm2, %v19283_v14 }
0x2339   :  { %16242 = vmatprep.subr.bf16.mxu0 %v19283_v14  ;;  %16278 = vmatprep.mubr.msk.f32.mxu1 %vm19282_vm2, %v19283_v14 }
0x233a   :  { %17726 = vmatpush3.bf16.msra.mxu1 %v20449_v45 }
0x233b   :  { %17727 = vmatprep.subr.bf16.mxu1 %v19281_v21 }
0x233c   :  { %16243 = vmatpush3.bf16.msra.mxu0 %v18349_v33 }
0x233d   :  { %16248 = vmatprep.subr.bf16.mxu0 %v19283_v14 }
0x233e   :  { %17729 = vmatpush3.bf16.msra.mxu1 %v20457_v48 }
0x233f   :  { %17730 = vmatprep.subr.bf16.mxu1 %v19281_v21 }
0x240a   :  { %v4949_v34 = vpop.f32.mrb[72].mxu0  ;;  %v5108_v38 = vpop.f32.mrb[68].mxu1 }
0x240b   :  { %v4955_v40 = vpack.c.bf16 %v4949_v34, %v4949_v34  ;;  %v16238_v41 = vpop.f32.mrb[73].mxu0  ;;  %v16260_v42 = vpop.f32.mrb[69].mxu1  ;;  %v5114_v55 = vpack.c.bf16 %v5108_v38, %v5108_v38  ;;  %v5182_v34 = vld [vmem:[#allocation25] sm:$0x3] }
0x240c   :  { %v4952_v53 = vpop.f32.mrb[74].mxu0  ;;  %v5111_v43 = vpop.f32.mrb[70].mxu1  ;;  %v5513_v42 = vrot.slane %v5182_v34, %v19903_v6 }
0x240d   :  { %v16239_v19 = vpop.f32.mrb[75].mxu0  ;;  %16245 = vmatmul.mubr.msk.bf16.vlgmr.msra.gmra.mrb[76].mxu0 %vm587_vm0, %v4955_v40  ;;  %v16261_v44 = vpop.f32.mrb[71].mxu1  ;;  %v5508_v40 = vrot.slane %v5182_v34, %v19881_v35 }
0x240e   :  { %16249 = vmatpush3.bf16.msra.mxu0 %v18350_v37  ;;  %16252 = vmatprep.mubr.msk.bf16.mxu0 %vm19282_vm2, %v19283_v14 }
0x240f   :  { %16250 = vmatprep.subr.bf16.mxu0 %v19283_v14 }
0x2412   :  { %16251 = vmatpush3.bf16.msra.mxu0 %v18351_v51 }
0x2413   :  { %16262 = vmatprep.subr.bf16.mxu0 %v19283_v14 }
0x2419   :  { %16253 = vmatmul.mubr.msk.bf16.vlgmr.msra.gmra.mrb[76].mxu0 %vm587_vm0, %v4900_v23 }
0x241a   :  { %16263 = vmatpush3.bf16.msra.mxu0 %v18352_v57  ;;  %16266 = vmatprep.mubr.msk.bf16.mxu0 %vm19282_vm2, %v19283_v14 }
0x241b   :  { %16264 = vmatprep.subr.bf16.mxu0 %v19283_v14 }
0x241e   :  { %16265 = vmatpush3.bf16.msra.mxu0 %v18353_v60  ;;  %v18354_v60 = vld [vmem:[%s21711_s26 + $0x10] sm:$0xff]  }
0x241f   :  { %17733 = vmatprep.subr.bf16.mxu0 %v19281_v21 }
0x2425   :  { %16267 = vmatmul.mubr.msk.bf16.vlgmr.msra.gmra.mrb[76].mxu0 %vm587_vm0, %v5114_v55  ;;  %v18355_v55 = vld [vmem:[%s21711_s26 + $0x18] sm:$0xff]  }
0x2426   :  { %16296 = vmatprep.mubr.msk.f32.mxu0 %vm19282_vm2, %v19283_v14  ;;  %17735 = vmatpush3.bf16.msra.mxu0 %v20449_v45 }
0x2427   :  { %17736 = vmatprep.subr.bf16.mxu0 %v19281_v21 }
0x242a   :  { %17738 = vmatpush3.bf16.msra.mxu0 %v20457_v48 }
0x242b   :  { %16312 = vmatprep.subr.bf16.mxu0 %v19283_v14 }
0x24f8   :  { %v5169_v49 = vpop.f32.mrb[76].mxu0 }
0x24f9   :  { %v5184_v50 = vsel %vm5183_vm7, %v5169_v49, 0.0  ;;  %v16268_v5 = vpop.f32.mrb[77].mxu0 }
0x24fa   :  { %v5185_v52 = vrot.slane %v5184_v50, 4  ;;  %v5172_v54 = vpop.f32.mrb[78].mxu0 }
0x24fb   :  { %v16269_v58 = vpop.f32.mrb[79].mxu0  ;;  %v18358_v54 = vld [vmem:[%s21711_s26 + $0x20] sm:$0xff]  }
0x24fc   :  { %v5186_v59 = vadd.f32 %v5185_v52, %v5184_v50  ;;  %v18359_v58 = vld [vmem:[%s21711_s26 + $0x28] sm:$0xff]   ;;  %s21735_s26 = sld [smem:[#allocation104_spill]] }
0x24fe   :  { %v5187_v62 = vrot.slane %v5186_v59, 2 }
0x2500   :  { %v5188_v0 = vadd.f32 %v5187_v62, %v5186_v59 }
0x2502   :  { %v5189_v3 = vrot.slane %v5188_v0, 1 }
0x2504   :  { %v5190_v24 = vadd.f32 %v5189_v3, %v5188_v0 }
0x2506   :  { %v5192_v9 = vmul.f32 0.25, %v5190_v24 }
0x2508   :  { %16279 = vmatmul.mubr.msk.f32.vlgmr.msra.gmra.mrb[72].mxu1 %vm587_vm0, %v5192_v9 }
0x2509   :  { %17732 = vmatpush3.bf16.msra.mxu1 %v20466_v8  ;;  %16285 = vmatprep.mubr.msk.f32.mxu1 %vm19282_vm2, %v19283_v14 }
0x250a   :  { %17739 = vmatprep.subr.bf16.mxu1 %v19281_v21 }
0x25db   :  { %v5262_v10 = vpop.f32.mrb[72].mxu1 }
0x25dc   :  { %v16280_v11 = vpop.f32.mrb[73].mxu1  ;;  %16286 = vmatmul.mubr.msk.f32.vlgmr.msra.gmra.mrb[74].mxu1 %vm1894_vm9, %v5262_v10 }
0x25dd   :  { %17741 = vmatpush3.bf16.msra.mxu1 %v20466_v8  ;;  %16303 = vmatprep.mubr.msk.f32.mxu1 %vm19282_vm2, %v19283_v14 }
0x25de   :  { %16306 = vmatprep.subr.bf16.mxu1 %v19283_v14 }
0x26af   :  { %v5335_v12 = vpop.f32.mrb[74].mxu1 }
0x26b0   :  { %v5342_v13 = vrot.slane %v5335_v12, %v19881_v35  ;;  %v16287_v15 = vpop.f32.mrb[75].mxu1 }
0x26b2   :  { %v5343_v16 = vsub.f32 %v5169_v49, %v5342_v13 }
0x26b4   :  { %v5344_v25 = vmul.f32 %v5343_v16, %v5343_v16 }
0x26b6   :  { %v5345_v17 = vsel %vm5183_vm7, %v5344_v25, 0.0 }
0x26b7   :  { %v5346_v18 = vrot.slane %v5345_v17, 4 }
0x26b9   :  { %v5347_v61 = vadd.f32 %v5346_v18, %v5345_v17 }
0x26bb   :  { %v5348_v63 = vrot.slane %v5347_v61, 2 }
0x26bd   :  { %v5349_v2 = vadd.f32 %v5348_v63, %v5347_v61 }
0x26bf   :  { %v5350_v26 = vrot.slane %v5349_v2, 1 }
0x26c1   :  { %v5351_v29 = vadd.f32 %v5350_v26, %v5349_v2 }
0x26c3   :  { %v5352_v20 = vmul.f32 0.25, %v5351_v29 }
0x26c5   :  { %16297 = vmatmul.mubr.msk.f32.vlgmr.msra.gmra.mrb[80].mxu0 %vm587_vm0, %v5352_v20 }
0x26c6   :  { %16316 = vmatprep.mubr.msk.bf16.mxu0 %vm19282_vm2, %v19283_v14  ;;  %16313 = vmatpush3.bf16.msra.mxu0 %v18356_v36 }
0x26c7   :  { %16314 = vmatprep.subr.bf16.mxu0 %v19283_v14 }
0x26ca   :  { %16315 = vmatpush3.bf16.msra.mxu0 %v18357_v39 }
0x26cb   :  { %16328 = vmatprep.subr.bf16.mxu0 %v19283_v14 }
0x2798   :  { %v5422_v23 = vpop.f32.mrb[80].mxu0 }
0x2799   :  { %v16298_v32 = vpop.f32.mrb[81].mxu0  ;;  %16304 = vmatmul.mubr.msk.f32.vlgmr.msra.gmra.mrb[76].mxu1 %vm1894_vm9, %v5422_v23 }
0x279a   :  { %16308 = vmatprep.mubr.msk.bf16.mxu1 %vm19282_vm2, %v19283_v14 }
0x286c   :  { %v5495_v27 = vpop.f32.mrb[76].mxu1 }
0x286d   :  { %v5496_v31 = vadd.f32 1e-05, %v5495_v27  ;;  %v16305_v33 = vpop.f32.mrb[77].mxu1 }
0x286f   :  { %18571 = vrsqrt.f32 %v5496_v31 }
0x2879   :  { %v18572_v37 = vpop.eup %18571 }
0x287a   :  { %v5503_v38 = vrot.slane %v18572_v37, %v19881_v35 }
0x287c   :  { %v5504_v41 = vmul.f32 %v5503_v38, %v5343_v16 }
0x287e   :  { %v5509_v53 = vmul.f32 %v5508_v40, %v5504_v41 }
0x2880   :  { %v5514_v43 = vadd.f32 %v5513_v42, %v5509_v53 }
0x2882   :  { %vm5515_vm10 = vcmp.ge.f32.partialorder %v5514_v43, 0.0  ;;  %v5516_v19 = vmul.f32 0.2, %v5514_v43 }
0x2884   :  { %v5517_v44 = vsel %vm5515_vm10, %v5514_v43, %v5516_v19 }
0x2885   :  { %v5518_v51 = vpack.c.bf16 %v5517_v44, %v5517_v44  ;;  %v18360_v44 = vld [vmem:[%s21712_s28] sm:$0xff]  }
0x2887   :  { %v5525_v57 = vsel %vm4911_vm5, %v5518_v51, 0 }
0x2888   :  { %16307 = vmatpush3.bf16.msra.mxu1 %v5525_v57 }
0x2889   :  { %16320 = vmatprep.subr.bf16.mxu1 %v19283_v14 }
0x288b   :  { %16309 = vmatmul.mubr.msk.bf16.vlgmr.msra.gmra.mrb[80].mxu1 %vm4907_vm6, %v20412_v28 }
0x288c   :  { %16321 = vmatpush3.bf16.msra.mxu1 %v18354_v60  ;;  %16324 = vmatprep.mubr.msk.bf16.mxu1 %vm19282_vm2, %v19283_v14 }
0x288d   :  { %16322 = vmatprep.subr.bf16.mxu1 %v19283_v14 }
0x2890   :  { %16323 = vmatpush3.bf16.msra.mxu1 %v18355_v55  ;;  %v5784_v55 = vld [vmem:[#allocation26] sm:$0x3] }
0x2891   :  { %16334 = vmatprep.subr.bf16.mxu1 %v19283_v14 }
0x2893   :  { %16325 = vmatmul.mubr.msk.bf16.vlgmr.msra.gmra.mrb[84].mxu1 %vm587_vm0, %v5518_v51 }
0x2894   :  { %16338 = vmatprep.mubr.msk.bf16.mxu1 %vm19282_vm2, %v19283_v14  ;;  %16335 = vmatpush3.bf16.msra.mxu1 %v18358_v54 }
0x2895   :  { %16336 = vmatprep.subr.bf16.mxu1 %v19283_v14 }
0x2898   :  { %16337 = vmatpush3.bf16.msra.mxu1 %v18359_v58 }
0x2899   :  { %17748 = vmatprep.subr.bf16.mxu1 %v19281_v21 }
0x295e   :  { %v5561_v56 = vpop.f32.mrb[80].mxu1 }
0x295f   :  { %v5567_v1 = vpack.c.bf16 %v5561_v56, %v5561_v56  ;;  %v16310_v46 = vpop.f32.mrb[81].mxu1 }
0x2960   :  { %v5564_v47 = vpop.f32.mrb[82].mxu1  ;;  %v6108_v46 = vrot.slane %v5784_v55, %v19881_v35 }
0x2961   :  { %v16311_v28 = vpop.f32.mrb[83].mxu1  ;;  %16317 = vmatmul.mubr.msk.bf16.vlgmr.msra.gmra.mrb[84].mxu0 %vm587_vm0, %v5567_v1 }
0x2962   :  { %16329 = vmatpush3.bf16.msra.mxu0 %v5525_v57  ;;  %16330 = vmatprep.mubr.msk.bf16.mxu0 %vm19282_vm2, %v19283_v14  ;;  %v6113_v28 = vrot.slane %v5784_v55, %v19903_v6 }
0x2963   :  { %17742 = vmatprep.subr.bf16.mxu0 %v19281_v21 }
0x2966   :  { %v5675_v49 = vpop.f32.mrb[84].mxu1 }
0x2967   :  { %v16326_v50 = vpop.f32.mrb[85].mxu1 }
0x2968   :  { %v5678_v5 = vpop.f32.mrb[86].mxu1 }
0x2969   :  { %v16327_v52 = vpop.f32.mrb[87].mxu1  ;;  %16331 = vmatmul.mubr.msk.bf16.vlgmr.msra.gmra.mrb[88].mxu0 %vm4907_vm6, %v20414_v30 }
0x296a   :  { %17744 = vmatpush3.bf16.msra.mxu0 %v20449_v45  ;;  %16350 = vmatprep.mubr.msk.f32.mxu0 %vm19282_vm2, %v19283_v14 }
0x296b   :  { %17745 = vmatprep.subr.bf16.mxu0 %v19281_v21 }
0x296e   :  { %17747 = vmatpush3.bf16.msra.mxu0 %v20457_v48 }
0x296f   :  { %17751 = vmatprep.subr.bf16.mxu0 %v19281_v21 }
0x2a34   :  { %v5621_v30 = vpop.f32.mrb[84].mxu0 }
0x2a35   :  { %v5676_v59 = vadd.f32 %v5675_v49, %v5621_v30  ;;  %v16318_v62 = vpop.f32.mrb[85].mxu0  ;;  %v6128_v30 = vld [vmem:[#allocation31] sm:$0x1] }
0x2a36   :  { %v5624_v0 = vpop.f32.mrb[86].mxu0  ;;  %v18361_v62 = vld [vmem:[%s21712_s28 + $0x8] sm:$0xff]  }
0x2a37   :  { %v16319_v3 = vpop.f32.mrb[87].mxu0 }
0x2a38   :  { %v18362_v3 = vld [vmem:[%s21712_s28 + $0x10] sm:$0xff]  }
0x2a3c   :  { %v5715_v4 = vpop.f32.mrb[88].mxu0 }
0x2a3d   :  { %v5721_v7 = vpack.c.bf16 %v5715_v4, %v5715_v4  ;;  %v16332_v24 = vpop.f32.mrb[89].mxu0 }
0x2a3e   :  { %v5718_v9 = vpop.f32.mrb[90].mxu0 }
0x2a3f   :  { %v16333_v10 = vpop.f32.mrb[91].mxu0  ;;  %16339 = vmatmul.mubr.msk.bf16.vlgmr.msra.gmra.mrb[88].mxu1 %vm587_vm0, %v5721_v7 }
0x2a40   :  { %17750 = vmatpush3.bf16.msra.mxu1 %v20466_v8  ;;  %16357 = vmatprep.mubr.msk.f32.mxu1 %vm19282_vm2, %v19283_v14  ;;  %v18363_v10 = vld [vmem:[%s21712_s28 + $0x18] sm:$0xff]   ;;  %s21736_s28 = sld [smem:[#allocation103_spill]] }
0x2a41   :  { %17757 = vmatprep.subr.bf16.mxu1 %v19281_v21 }
0x2b12   :  { %v5776_v11 = vpop.f32.mrb[88].mxu1 }
0x2b13   :  { %v5782_v12 = vadd.f32 %v5776_v11, %v5676_v59  ;;  %v16340_v13 = vpop.f32.mrb[89].mxu1  ;;  %v6239_v59 = vld [vmem:[#allocation31 + $0x1] sm:$0x1] }
0x2b14   :  { %v5779_v15 = vpop.f32.mrb[90].mxu1 }
0x2b15   :  { %v5783_v16 = vadd.f32 %v5782_v12, %v20407_v22  ;;  %v16341_v25 = vpop.f32.mrb[91].mxu1 }
0x2b16   :  { %v18364_v25 = vld [vmem:[%s21713_s24] sm:$0xff]  }
0x2b17   :  { %v5785_v17 = vsel %vm5183_vm7, %v5783_v16, 0.0  ;;  %6428 = vrot.lane.b32.xlu0 %v18364_v25, %s19284_s19 }
0x2b18   :  { %v5786_v18 = vrot.slane %v5785_v17, 4 }
0x2b1a   :  { %v5787_v61 = vadd.f32 %v5786_v18, %v5785_v17  ;;  %v18365_v17 = vld [vmem:[%s21713_s24 + $0x8] sm:$0xff]   ;;  %s21738_s24 = sld [smem:[#allocation105_spill]] }
0x2b1b   :  { %6430 = vrot.lane.b32.xlu1 %v18365_v17, %s19284_s19 }
0x2b1c   :  { %v5788_v63 = vrot.slane %v5787_v61, 2 }
0x2b1e   :  { %v5789_v2 = vadd.f32 %v5788_v63, %v5787_v61  ;;  %v14078_v61 = vld [vmem:[#allocation28] ss:$0 sm:$0xff] }
0x2b20   :  { %v5790_v26 = vrot.slane %v5789_v2, 1 }
0x2b22   :  { %v5791_v29 = vadd.f32 %v5790_v26, %v5789_v2 }
0x2b24   :  { %v5792_v20 = vmul.f32 0.25, %v5791_v29 }
0x2b26   :  { %16351 = vmatmul.mubr.msk.f32.vlgmr.msra.gmra.mrb[82].mxu0 %vm587_vm0, %v5792_v20 }
0x2b27   :  { %17753 = vmatpush3.bf16.msra.mxu0 %v20449_v45  ;;  %16368 = vmatprep.mubr.msk.f32.mxu0 %vm19282_vm2, %v19283_v14 }
0x2b28   :  { %17754 = vmatprep.subr.bf16.mxu0 %v19281_v21 }
0x2b2b   :  { %17756 = vmatpush3.bf16.msra.mxu0 %v20457_v48 }
0x2b2c   :  { %16384 = vmatprep.subr.bf16.mxu0 %v19283_v14 }
0x2b89   :  { %v6429_v18 = vpop.permute.xlu0 %6428 }
0x2bf9   :  { %v5862_v22 = vpop.f32.mrb[82].mxu0 }
0x2bfa   :  { %v16352_v23 = vpop.f32.mrb[83].mxu0  ;;  %16358 = vmatmul.mubr.msk.f32.vlgmr.msra.gmra.mrb[78].mxu1 %vm1894_vm9, %v5862_v22 }
0x2bfb   :  { %17759 = vmatpush3.bf16.msra.mxu1 %v20466_v8  ;;  %16375 = vmatprep.mubr.msk.f32.mxu1 %vm19282_vm2, %v19283_v14 }
0x2bfc   :  { %16378 = vmatprep.subr.bf16.mxu1 %v19283_v14 }
0x2ccd   :  { %v5935_v32 = vpop.f32.mrb[78].mxu1 }
0x2cce   :  { %v5942_v36 = vrot.slane %v5935_v32, %v19881_v35  ;;  %v16359_v39 = vpop.f32.mrb[79].mxu1  ;;  %v6431_v32 = vpop.permute.xlu1 %6430 }
0x2cd0   :  { %v5943_v27 = vsub.f32 %v5783_v16, %v5942_v36  ;;  %v14083_v36 = vld [vmem:[#allocation29] ss:$0 sm:$0xff] }
0x2cd1   :  { %6434 = vrot.lane.b32.xlu1 %v14083_v36, %s19284_s19 }
0x2cd2   :  { %v5944_v31 = vmul.f32 %v5943_v27, %v5943_v27 }
0x2cd4   :  { %v5945_v33 = vsel %vm5183_vm7, %v5944_v31, 0.0 }
0x2cd5   :  { %v5946_v34 = vrot.slane %v5945_v33, 4 }
0x2cd7   :  { %v5947_v37 = vadd.f32 %v5946_v34, %v5945_v33 }
0x2cd9   :  { %v5948_v38 = vrot.slane %v5947_v37, 2 }
0x2cdb   :  { %v5949_v40 = vadd.f32 %v5948_v38, %v5947_v37 }
0x2cdd   :  { %v5950_v41 = vrot.slane %v5949_v40, 1 }
0x2cdf   :  { %v5951_v42 = vadd.f32 %v5950_v41, %v5949_v40 }
0x2ce1   :  { %v5952_v53 = vmul.f32 0.25, %v5951_v42 }
0x2ce3   :  { %16369 = vmatmul.mubr.msk.f32.vlgmr.msra.gmra.mrb[92].mxu0 %vm587_vm0, %v5952_v53 }
0x2ce4   :  { %16388 = vmatprep.mubr.msk.bf16.mxu0 %vm19282_vm2, %v19283_v14  ;;  %16385 = vmatpush3.bf16.msra.mxu0 %v18360_v44 }
0x2ce5   :  { %16386 = vmatprep.subr.bf16.mxu0 %v19283_v14 }
0x2ce8   :  { %16387 = vmatpush3.bf16.msra.mxu0 %v18361_v62 }
0x2ce9   :  { %16398 = vmatprep.subr.bf16.mxu0 %v19283_v14 }
0x2d43   :  { %v6435_v40 = vpop.permute.xlu1 %6434 }
0x2db6   :  { %v6022_v43 = vpop.f32.mrb[92].mxu0 }
0x2db7   :  { %v16370_v19 = vpop.f32.mrb[93].mxu0  ;;  %16376 = vmatmul.mubr.msk.f32.vlgmr.msra.gmra.mrb[92].mxu1 %vm1894_vm9, %v6022_v43 }
0x2db8   :  { %16380 = vmatprep.mubr.msk.bf16.mxu1 %vm19282_vm2, %v19283_v14 }
0x2e8a   :  { %v6095_v51 = vpop.f32.mrb[92].mxu1 }
0x2e8b   :  { %v6096_v57 = vadd.f32 1e-05, %v6095_v51  ;;  %v16377_v60 = vpop.f32.mrb[93].mxu1 }
0x2e8d   :  { %18573 = vrsqrt.f32 %v6096_v57 }
0x2e97   :  { %v18574_v56 = vpop.eup %18573 }
0x2e98   :  { %v6103_v1 = vrot.slane %v18574_v56, %v19881_v35 }
0x2e9a   :  { %v6104_v47 = vmul.f32 %v6103_v1, %v5943_v27  ;;  %v6340_v27 = vld [vmem:[%s21714_s9] sm:$0x3]  ;;  %s21740_s9 = sld [smem:[#allocation108_spill]] }
0x2e9c   :  { %v6109_v49 = vmul.f32 %v6108_v46, %v6104_v47 }
0x2e9e   :  { %v6114_v50 = vadd.f32 %v6113_v28, %v6109_v49  ;;  %v14088_v49 = vld [vmem:[%s21715_s0 + $0x2] sm:$0x3] }
0x2ea0   :  { %vm6115_vm11 = vcmp.ge.f32.partialorder %v6114_v50, 0.0  ;;  %v6116_v5 = vmul.f32 0.2, %v6114_v50 }
0x2ea2   :  { %v6117_v52 = vsel %vm6115_vm11, %v6114_v50, %v6116_v5  ;;  %v6426_v5 = vld [vmem:[%s21715_s0] sm:$0x3] }
0x2ea3   :  { %v6127_v54 = vpack.c.bf16 %v6117_v52, %v6117_v52 }
0x2ea5   :  { %v6133_v58 = vsel %vm4911_vm5, %v6127_v54, 0 }
0x2ea6   :  { %16379 = vmatpush3.bf16.msra.mxu1 %v6133_v58 }
0x2ea7   :  { %16392 = vmatprep.subr.bf16.mxu1 %v19283_v14 }
0x2ea9   :  { %16381 = vmatmul.mubr.msk.bf16.vlgmr.msra.gmra.mrb[96].mxu1 %vm4907_vm6, %v6128_v30 }
0x2eaa   :  { %16393 = vmatpush3.bf16.msra.mxu1 %v6133_v58  ;;  %16394 = vmatprep.mubr.msk.bf16.mxu1 %vm19282_vm2, %v19283_v14 }
0x2eab   :  { %16406 = vmatprep.subr.bf16.mxu1 %v19283_v14 }
0x2eb1   :  { %16395 = vmatmul.mubr.msk.bf16.vlgmr.msra.gmra.mrb[100].mxu1 %vm4907_vm6, %v6239_v59 }
0x2eb2   :  { %16410 = vmatprep.mubr.msk.bf16.mxu1 %vm19282_vm2, %v19283_v14  ;;  %16407 = vmatpush3.bf16.msra.mxu1 %v18364_v25 }
0x2eb3   :  { %16408 = vmatprep.subr.bf16.mxu1 %v19283_v14 }
0x2eb6   :  { %16409 = vmatpush3.bf16.msra.mxu1 %v18365_v17 }
0x2eb7   :  { %16422 = vmatprep.subr.bf16.mxu1 %v19283_v14 }
0x2f7c   :  { %v6169_v0 = vpop.f32.mrb[96].mxu1 }
0x2f7d   :  { %v6175_v4 = vpack.c.bf16 %v6169_v0, %v6169_v0  ;;  %v16382_v7 = vpop.f32.mrb[97].mxu1  ;;  %v20604_v0 = vld [vmem:[#allocation23] sm:$0x3] }
0x2f7e   :  { %v6172_v24 = vpop.f32.mrb[98].mxu1  ;;  %v18367_v7 = vld [vmem:[%s21716_s22 + $0x8] sm:$0xff]  }
0x2f7f   :  { %v16383_v9 = vpop.f32.mrb[99].mxu1  ;;  %16389 = vmatmul.mubr.msk.bf16.vlgmr.msra.gmra.mrb[96].mxu0 %vm587_vm0, %v6175_v4  ;;  %v18366_v4 = vld [vmem:[%s21716_s22] sm:$0xff]  }
0x2f80   :  { %16399 = vmatpush3.bf16.msra.mxu0 %v18362_v3  ;;  %16402 = vmatprep.mubr.msk.bf16.mxu0 %vm19282_vm2, %v19283_v14  ;;  %v20606_v3 = vld [vmem:[#allocation23 + $0x4] sm:$0x3]  ;;  %v18368_v9 = vld [vmem:[%s21716_s22 + $0x10] sm:$0xff]  }
0x2f81   :  { %16400 = vmatprep.subr.bf16.mxu0 %v19283_v14 }
0x2f84   :  { %v6277_v11 = vpop.f32.mrb[100].mxu1  ;;  %16401 = vmatpush3.bf16.msra.mxu0 %v18363_v10 }
0x2f85   :  { %v16396_v12 = vpop.f32.mrb[101].mxu1  ;;  %16414 = vmatprep.subr.bf16.mxu0 %v19283_v14  ;;  %v6283_v15 = vpack.c.bf16 %v6277_v11, %v6277_v11 }
0x2f86   :  { %v6280_v13 = vpop.f32.mrb[102].mxu1 }
0x2f87   :  { %v16397_v16 = vpop.f32.mrb[103].mxu1 }
0x2f8b   :  { %16403 = vmatmul.mubr.msk.bf16.vlgmr.msra.gmra.mrb[96].mxu0 %vm587_vm0, %v6283_v15 }
0x2f8c   :  { %16418 = vmatprep.mubr.msk.bf16.mxu0 %vm19282_vm2, %v19283_v14  ;;  %16415 = vmatpush3.bf16.msra.mxu0 %v6429_v18  ;;  %v18369_v18 = vld [vmem:[%s21716_s22 + $0x18] sm:$0xff]  }
0x2f8d   :  { %16416 = vmatprep.subr.bf16.mxu0 %v19283_v14 }
0x2f90   :  { %16417 = vmatpush3.bf16.msra.mxu0 %v6431_v32 }
0x2f91   :  { %16434 = vmatprep.subr.bf16.mxu0 %v19283_v14 }
0x305e   :  { %v6333_v63 = vpop.f32.mrb[96].mxu0 }
0x305f   :  { %v18000_v2 = vadd.f32 %v14078_v61, %v6333_v63  ;;  %v16404_v26 = vpop.f32.mrb[97].mxu0  ;;  %v18370_v61 = vld [vmem:[%s21716_s22 + $0x20] sm:$0xff]   ;;  %v18371_v63 = vld [vmem:[%s21716_s22 + $0x28] sm:$0xff]   ;;  %s19286_s22 = smov [#allocation37]  }
0x3060   :  { %v6336_v29 = vpop.f32.mrb[98].mxu0 }
0x3061   :  { %v6341_v20 = vmul.f32 0.5, %v18000_v2  ;;  %v16405_v22 = vpop.f32.mrb[99].mxu0  ;;  %6351 = vst.msk [vmem:[#allocation37] sm:$0x3] %vm6350_vm12, %v18000_v2 }
0x3063   :  { %v6342_v23 = vmul.f32 1.442695, %v6341_v20 }
0x3065   :  { %18575 = vpow2.f32 %v6342_v23 }
0x306f   :  { %v18576_v39 = vpop.eup %18575 }
0x3070   :  { %6345 = vrot.lane.b32.xlu0 %v18576_v39, %s19284_s19 }
0x3074   :  { %6353 = vrot.lane.b32.xlu0 %v18000_v2, %s19284_s19  ;;  %s21739_s19 = sld [smem:[#allocation107_spill]] }
0x30e2   :  { %v6346_v31 = vpop.permute.xlu0 %6345 }
0x30e3   :  { %v6348_v33 = vmul.f32 %v6346_v31, %v6340_v27 }
0x30e5   :  { %v6349_v34 = vadd.f32 %v18000_v2, %v6348_v33 }
0x30e6   :  { %v6354_v37 = vpop.permute.xlu0 %6353 }
0x30e7   :  { %v6363_v38 = vpack.c.bf16 %v6349_v34, %v6349_v34  ;;  %6356 = vst.msk [vmem:[#allocation38] sm:$0x3] %vm6350_vm12, %v6354_v37  ;;  %6357 = vst.msk [vmem:[#allocation40] sm:$0x3] %vm6350_vm12, %v6349_v34 }
0x30e9   :  { %16411 = vmatmul.mubr.msk.bf16.vlgmr.msra.gmra.mrb[104].mxu1 %vm587_vm0, %v6363_v38  ;;  %16419 = vmatmul.mubr.msk.bf16.vlgmr.msra.gmra.mrb[100].mxu0 %vm587_vm0, %v6363_v38 }
0x30ea   :  { %16424 = vmatprep.mubr.msk.bf16.mxu1 %vm19282_vm2, %v19283_v14  ;;  %16436 = vmatprep.mubr.msk.bf16.mxu0 %vm19282_vm2, %v19283_v14 }
0x31bc   :  { %v6419_v41 = vpop.f32.mrb[104].mxu1  ;;  %v6471_v42 = vpop.f32.mrb[100].mxu0 }
0x31bd   :  { %v6420_v53 = vadd.f32 %v14083_v36, %v6419_v41  ;;  %v6472_v43 = vadd.f32 %v6471_v42, %v6435_v40  ;;  %v16412_v19 = vpop.f32.mrb[105].mxu1  ;;  %v16420_v44 = vpop.f32.mrb[101].mxu0 }
0x31be   :  { %v6422_v51 = vpop.f32.mrb[106].mxu1  ;;  %v6474_v57 = vpop.f32.mrb[102].mxu0 }
0x31bf   :  { %v6425_v60 = vmax.f32 %v6420_v53, 0.0  ;;  %v6477_v55 = vmax.f32 %v6472_v43, 0.0  ;;  %v16413_v56 = vpop.f32.mrb[107].mxu1  ;;  %v16421_v1 = vpop.f32.mrb[103].mxu0 }
0x31c1   :  { %v6480_v46 = vpack.c.bf16 %v6477_v55, %v6477_v55  ;;  %v6427_v47 = vpack.c.bf16 %v6425_v60, %v6425_v60 }
0x31c3   :  { %v6487_v28 = vsel %vm6485_vm13, %v6480_v46, 0  ;;  %v6533_v50 = vsel %vm6485_vm13, %v6427_v47, 0 }
0x31c4   :  { %16423 = vmatpush3.bf16.msra.mxu1 %v6487_v28  ;;  %v18374_v28 = vld [vmem:[%s21717_s29] sm:$0xff]  }
0x31c5   :  { %16428 = vmatprep.subr.bf16.mxu1 %v19283_v14 }
0x31c7   :  { %16425 = vmatmul.mubr.msk.bf16.vlgmr.msra.gmra.mrb[108].mxu1 %vm6481_vm15, %v14088_v49  ;;  %v18375_v49 = vld [vmem:[%s21717_s29 + $0x8] sm:$0xff]  }
0x31c8   :  { %16429 = vmatpush3.bf16.msra.mxu1 %v6533_v50  ;;  %16430 = vmatprep.mubr.msk.bf16.mxu1 %vm19282_vm2, %v19283_v14 }
0x31c9   :  { %16456 = vmatprep.subr.bf16.mxu1 %v19283_v14 }
0x31d3   :  { %16431 = vmatmul.mubr.msk.bf16.vlgmr.msra.gmra.mrb[108].mxu1 %vm6481_vm15, %v6426_v5 }
0x31d4   :  { %16458 = vmatprep.mubr.msk.bf16.mxu1 %vm19282_vm2, %v19283_v14 }
0x32a6   :  { %v20599_v52 = vpop.f32.mrb[108].mxu1 }
0x32a7   :  { %v6575_v54 = vpack.c.bf16 %v20599_v52, %v20599_v52  ;;  %v16432_v58 = vpop.f32.mrb[109].mxu1 }
0x32a8   :  { %v6572_v30 = vpop.f32.mrb[110].mxu1  ;;  %v6854_v58 = vld [vmem:[#allocation32] sm:$0x3] }
0x32a9   :  { %v16433_v59 = vpop.f32.mrb[111].mxu1  ;;  %v6586_v62 = vsel %vm4911_vm5, %v6575_v54, 0 }
0x32aa   :  { %16435 = vmatpush3.bf16.msra.mxu0 %v6586_v62  ;;  %16457 = vmatpush3.bf16.msra.mxu1 %v6586_v62  ;;  %v7178_v62 = vrot.slane %v6854_v58, %v19881_v35 }
0x32ab   :  { %16440 = vmatprep.subr.bf16.mxu0 %v19283_v14  ;;  %17760 = vmatprep.subr.bf16.mxu1 %v19281_v21 }
0x32ad   :  { %16437 = vmatmul.mubr.msk.bf16.vlgmr.msra.gmra.mrb[104].mxu0 %vm4907_vm6, %v20604_v0  ;;  %16459 = vmatmul.mubr.msk.bf16.vlgmr.msra.gmra.mrb[112].mxu1 %vm4907_vm6, %v20606_v3 }
0x32ae   :  { %16441 = vmatpush3.bf16.msra.mxu0 %v18366_v4  ;;  %16444 = vmatprep.mubr.msk.bf16.mxu0 %vm19282_vm2, %v19283_v14 }
0x32af   :  { %16442 = vmatprep.subr.bf16.mxu0 %v19283_v14  ;;  %17762 = vmatpush3.bf16.msra.mxu1 %v20449_v45 }
0x32b0   :  { %17763 = vmatprep.subr.bf16.mxu1 %v19281_v21  ;;  %16478 = vmatprep.mubr.msk.f32.mxu1 %vm19282_vm2, %v19283_v14 }
0x32b2   :  { %16443 = vmatpush3.bf16.msra.mxu0 %v18367_v7  ;;  %v7183_v7 = vrot.slane %v6854_v58, %v19903_v6 }
0x32b3   :  { %17765 = vmatpush3.bf16.msra.mxu1 %v20457_v48  ;;  %16448 = vmatprep.subr.bf16.mxu0 %v19283_v14 }
0x32b4   :  { %17766 = vmatprep.subr.bf16.mxu1 %v19281_v21 }
0x3380   :  { %v6622_v24 = vpop.f32.mrb[104].mxu0  ;;  %v6780_v10 = vpop.f32.mrb[112].mxu1 }
0x3381   :  { %v6628_v11 = vpack.c.bf16 %v6622_v24, %v6622_v24  ;;  %v16438_v12 = vpop.f32.mrb[105].mxu0  ;;  %v16460_v13 = vpop.f32.mrb[113].mxu1  ;;  %v6786_v2 = vpack.c.bf16 %v6780_v10, %v6780_v10 }
0x3382   :  { %v6625_v15 = vpop.f32.mrb[106].mxu0  ;;  %v6783_v16 = vpop.f32.mrb[114].mxu1 }
0x3383   :  { %v16439_v25 = vpop.f32.mrb[107].mxu0  ;;  %16445 = vmatmul.mubr.msk.bf16.vlgmr.msra.gmra.mrb[108].mxu0 %vm587_vm0, %v6628_v11  ;;  %v16461_v17 = vpop.f32.mrb[115].mxu1  ;;  %v18372_v15 = vld [vmem:[%s21717_s29 + $0x10] sm:$0xff]   ;;  %v18373_v16 = vld [vmem:[%s21717_s29 + $0x18] sm:$0xff]  }
0x3384   :  { %16449 = vmatpush3.bf16.msra.mxu0 %v18368_v9  ;;  %16452 = vmatprep.mubr.msk.bf16.mxu0 %vm19282_vm2, %v19283_v14 }
0x3385   :  { %16450 = vmatprep.subr.bf16.mxu0 %v19283_v14 }
0x3388   :  { %16451 = vmatpush3.bf16.msra.mxu0 %v18369_v18 }
0x3389   :  { %16462 = vmatprep.subr.bf16.mxu0 %v19283_v14 }
0x338f   :  { %16453 = vmatmul.mubr.msk.bf16.vlgmr.msra.gmra.mrb[108].mxu0 %vm587_vm0, %v6575_v54 }
0x3390   :  { %16463 = vmatpush3.bf16.msra.mxu0 %v18370_v61  ;;  %16466 = vmatprep.mubr.msk.bf16.mxu0 %vm19282_vm2, %v19283_v14 }
0x3391   :  { %16464 = vmatprep.subr.bf16.mxu0 %v19283_v14 }
0x3394   :  { %16465 = vmatpush3.bf16.msra.mxu0 %v18371_v63 }
0x3395   :  { %17775 = vmatprep.subr.bf16.mxu0 %v19281_v21 }
0x339b   :  { %16467 = vmatmul.mubr.msk.bf16.vlgmr.msra.gmra.mrb[108].mxu0 %vm587_vm0, %v6786_v2 }
0x339c   :  { %17777 = vmatpush3.bf16.msra.mxu0 %v20466_v8  ;;  %16503 = vmatprep.mubr.msk.f32.mxu0 %vm19282_vm2, %v19283_v14 }
0x339d   :  { %16512 = vmatprep.subr.bf16.mxu0 %v19283_v14 }
0x346e   :  { %v6841_v26 = vpop.f32.mrb[108].mxu0 }
0x346f   :  { %v6855_v29 = vsel %vm5183_vm7, %v6841_v26, 0.0  ;;  %v16468_v20 = vpop.f32.mrb[109].mxu0 }
0x3470   :  { %v6856_v22 = vrot.slane %v6855_v29, 4  ;;  %v6844_v23 = vpop.f32.mrb[110].mxu0  ;;  %v18376_v20 = vld [vmem:[%s21717_s29 + $0x20] sm:$0xff]  }
0x3471   :  { %v16469_v32 = vpop.f32.mrb[111].mxu0 }
0x3472   :  { %v6857_v36 = vadd.f32 %v6856_v22, %v6855_v29  ;;  %v18377_v22 = vld [vmem:[%s21717_s29 + $0x28] sm:$0xff]   ;;  %s13625_s29 = sshll.u32 %s19286_s22, 4  ;;  %s13626_s29 = int_to_ptr.vmem [resolvable:$true] %s13625_s29 }
0x3474   :  { %v6858_v39 = vrot.slane %v6857_v36, 2 }
0x3476   :  { %v6859_v27 = vadd.f32 %v6858_v39, %v6857_v36 }
0x3478   :  { %v6860_v31 = vrot.slane %v6859_v27, 1 }
0x347a   :  { %v6861_v33 = vadd.f32 %v6860_v31, %v6859_v27 }
0x347c   :  { %v6862_v34 = vmul.f32 0.25, %v6861_v33 }
0x347e   :  { %16479 = vmatmul.mubr.msk.f32.vlgmr.msra.gmra.mrb[94].mxu1 %vm587_vm0, %v6862_v34 }
0x347f   :  { %17768 = vmatpush3.bf16.msra.mxu1 %v20466_v8  ;;  %16485 = vmatprep.mubr.msk.f32.mxu1 %vm19282_vm2, %v19283_v14 }
0x3480   :  { %17769 = vmatprep.subr.bf16.mxu1 %v19281_v21 }
0x3551   :  { %v6932_v37 = vpop.f32.mrb[94].mxu1 }
0x3552   :  { %v16480_v38 = vpop.f32.mrb[95].mxu1  ;;  %16486 = vmatmul.mubr.msk.f32.vlgmr.msra.gmra.mrb[116].mxu1 %vm1894_vm9, %v6932_v37 }
0x3553   :  { %17771 = vmatpush3.bf16.msra.mxu1 %v20449_v45  ;;  %16496 = vmatprep.mubr.msk.f32.mxu1 %vm19282_vm2, %v19283_v14 }
0x3554   :  { %17772 = vmatprep.subr.bf16.mxu1 %v19281_v21 }
0x3557   :  { %17774 = vmatpush3.bf16.msra.mxu1 %v20457_v48 }
0x3558   :  { %16506 = vmatprep.subr.bf16.mxu1 %v19283_v14 }
0x3625   :  { %v7005_v40 = vpop.f32.mrb[116].mxu1 }
0x3626   :  { %v7012_v41 = vrot.slane %v7005_v40, %v19881_v35  ;;  %v16487_v42 = vpop.f32.mrb[117].mxu1 }
0x3628   :  { %v7013_v53 = vsub.f32 %v6841_v26, %v7012_v41 }
0x362a   :  { %v7014_v43 = vmul.f32 %v7013_v53, %v7013_v53 }
0x362c   :  { %v7015_v19 = vsel %vm5183_vm7, %v7014_v43, 0.0 }
0x362d   :  { %v7016_v44 = vrot.slane %v7015_v19, 4 }
0x362f   :  { %v7017_v51 = vadd.f32 %v7016_v44, %v7015_v19 }
0x3631   :  { %v7018_v57 = vrot.slane %v7017_v51, 2 }
0x3633   :  { %v7019_v60 = vadd.f32 %v7018_v57, %v7017_v51 }
0x3635   :  { %v7020_v55 = vrot.slane %v7019_v60, 1 }
0x3637   :  { %v7021_v56 = vadd.f32 %v7020_v55, %v7019_v60 }
0x3639   :  { %v7022_v1 = vmul.f32 0.25, %v7021_v56 }
0x363b   :  { %16497 = vmatmul.mubr.msk.f32.vlgmr.msra.gmra.mrb[118].mxu1 %vm587_vm0, %v7022_v1 }
0x363c   :  { %16508 = vmatprep.mubr.msk.bf16.mxu1 %vm19282_vm2, %v19283_v14 }
0x370e   :  { %v7092_v46 = vpop.f32.mrb[118].mxu1 }
0x370f   :  { %v16498_v47 = vpop.f32.mrb[119].mxu1  ;;  %16504 = vmatmul.mubr.msk.f32.vlgmr.msra.gmra.mrb[94].mxu0 %vm1894_vm9, %v7092_v46 }
0x3710   :  { %16516 = vmatprep.mubr.msk.bf16.mxu0 %vm19282_vm2, %v19283_v14  ;;  %16513 = vmatpush3.bf16.msra.mxu0 %v18374_v28 }
0x3711   :  { %16514 = vmatprep.subr.bf16.mxu0 %v19283_v14 }
0x3714   :  { %16515 = vmatpush3.bf16.msra.mxu0 %v18375_v49 }
0x3715   :  { %16528 = vmatprep.subr.bf16.mxu0 %v19283_v14 }
0x37e2   :  { %v7165_v50 = vpop.f32.mrb[94].mxu0 }
0x37e3   :  { %v7166_v5 = vadd.f32 1e-05, %v7165_v50  ;;  %v16505_v54 = vpop.f32.mrb[95].mxu0 }
0x37e5   :  { %18577 = vrsqrt.f32 %v7166_v5 }
0x37ef   :  { %v18578_v30 = vpop.eup %18577 }
0x37f0   :  { %v7173_v59 = vrot.slane %v18578_v30, %v19881_v35 }
0x37f2   :  { %v7174_v4 = vmul.f32 %v7173_v59, %v7013_v53 }
0x37f4   :  { %v7179_v24 = vmul.f32 %v7178_v62, %v7174_v4 }
0x37f6   :  { %v7184_v9 = vadd.f32 %v7183_v7, %v7179_v24  ;;  %v18378_v24 = vld [vmem:[%s21718_s14] sm:$0xff]  }
0x37f8   :  { %vm7185_vm4 = vcmp.ge.f32.partialorder %v7184_v9, 0.0  ;;  %v7186_v10 = vmul.f32 0.2, %v7184_v9 }
0x37fa   :  { %v7187_v11 = vsel %vm7185_vm4, %v7184_v9, %v7186_v10 }
0x37fb   :  { %v7188_v12 = vpack.c.bf16 %v7187_v11, %v7187_v11 }
0x37fd   :  { %v7195_v13 = vsel %vm4911_vm5, %v7188_v12, 0 }
0x37fe   :  { %16507 = vmatpush3.bf16.msra.mxu1 %v7195_v13 }
0x37ff   :  { %16520 = vmatprep.subr.bf16.mxu1 %v19283_v14 }
0x3801   :  { %16509 = vmatmul.mubr.msk.bf16.vlgmr.msra.gmra.mrb[120].mxu1 %vm4907_vm6, %v20604_v0 }
0x3802   :  { %16521 = vmatpush3.bf16.msra.mxu1 %v18372_v15  ;;  %16524 = vmatprep.mubr.msk.bf16.mxu1 %vm19282_vm2, %v19283_v14 }
0x3803   :  { %16522 = vmatprep.subr.bf16.mxu1 %v19283_v14 }
0x3806   :  { %16523 = vmatpush3.bf16.msra.mxu1 %v18373_v16 }
0x3807   :  { %16534 = vmatprep.subr.bf16.mxu1 %v19283_v14 }
0x3809   :  { %16525 = vmatmul.mubr.msk.bf16.vlgmr.msra.gmra.mrb[124].mxu1 %vm587_vm0, %v7188_v12  ;;  %v7454_v12 = vld [vmem:[#allocation34] sm:$0x3] }
0x380a   :  { %16538 = vmatprep.mubr.msk.bf16.mxu1 %vm19282_vm2, %v19283_v14  ;;  %16535 = vmatpush3.bf16.msra.mxu1 %v18376_v20  ;;  %v7778_v16 = vrot.slane %v7454_v12, %v19881_v35  ;;  %v18379_v20 = vld [vmem:[%s21718_s14 + $0x8] sm:$0xff]  }
0x380b   :  { %16536 = vmatprep.subr.bf16.mxu1 %v19283_v14 }
0x380e   :  { %16537 = vmatpush3.bf16.msra.mxu1 %v18377_v22 }
0x380f   :  { %17784 = vmatprep.subr.bf16.mxu1 %v19281_v21 }
0x38d4   :  { %v7231_v25 = vpop.f32.mrb[120].mxu1 }
0x38d5   :  { %v7237_v17 = vpack.c.bf16 %v7231_v25, %v7231_v25  ;;  %v16510_v18 = vpop.f32.mrb[121].mxu1 }
0x38d6   :  { %v7234_v61 = vpop.f32.mrb[122].mxu1 }
0x38d7   :  { %v16511_v0 = vpop.f32.mrb[123].mxu1  ;;  %16517 = vmatmul.mubr.msk.bf16.vlgmr.msra.gmra.mrb[112].mxu0 %vm587_vm0, %v7237_v17  ;;  %v7783_v17 = vrot.slane %v7454_v12, %v19903_v6 }
0x38d8   :  { %16529 = vmatpush3.bf16.msra.mxu0 %v7195_v13  ;;  %16530 = vmatprep.mubr.msk.bf16.mxu0 %vm19282_vm2, %v19283_v14 }
0x38d9   :  { %17778 = vmatprep.subr.bf16.mxu0 %v19281_v21 }
0x38dc   :  { %v7345_v63 = vpop.f32.mrb[124].mxu1 }
0x38dd   :  { %v16526_v2 = vpop.f32.mrb[125].mxu1 }
0x38de   :  { %v7348_v26 = vpop.f32.mrb[126].mxu1 }
0x38df   :  { %v16527_v29 = vpop.f32.mrb[127].mxu1  ;;  %16531 = vmatmul.mubr.msk.bf16.vlgmr.msra.gmra.mrb[116].mxu0 %vm4907_vm6, %v20606_v3 }
0x38e0   :  { %17780 = vmatpush3.bf16.msra.mxu0 %v20449_v45  ;;  %16550 = vmatprep.mubr.msk.f32.mxu0 %vm19282_vm2, %v19283_v14  ;;  %v7788_v29 = vld [vmem:[%s21719_s8] sm:$0xf] }
0x38e1   :  { %17781 = vmatprep.subr.bf16.mxu0 %v19281_v21 }
0x38e4   :  { %17783 = vmatpush3.bf16.msra.mxu0 %v20457_v48 }
0x38e5   :  { %17787 = vmatprep.subr.bf16.mxu0 %v19281_v21 }
0x39aa   :  { %v7291_v3 = vpop.f32.mrb[112].mxu0 }
0x39ab   :  { %v7346_v23 = vadd.f32 %v7345_v63, %v7291_v3  ;;  %v16518_v32 = vpop.f32.mrb[113].mxu0 }
0x39ac   :  { %v7294_v36 = vpop.f32.mrb[114].mxu0 }
0x39ad   :  { %v16519_v39 = vpop.f32.mrb[115].mxu0 }
0x39ae   :  { %v18380_v39 = vld [vmem:[%s21720_s1] sm:$0xff]  }
0x39b2   :  { %v7385_v27 = vpop.f32.mrb[116].mxu0 }
0x39b3   :  { %v7391_v31 = vpack.c.bf16 %v7385_v27, %v7385_v27  ;;  %v16532_v33 = vpop.f32.mrb[117].mxu0  ;;  %v18381_v27 = vld [vmem:[%s21720_s1 + $0x8] sm:$0xff]  }
0x39b4   :  { %v7388_v34 = vpop.f32.mrb[118].mxu0  ;;  %v18383_v33 = vld [vmem:[%s21720_s1 + $0x18] sm:$0xff]  }
0x39b5   :  { %v16533_v37 = vpop.f32.mrb[119].mxu0  ;;  %16539 = vmatmul.mubr.msk.bf16.vlgmr.msra.gmra.mrb[128].mxu1 %vm587_vm0, %v7391_v31  ;;  %v18382_v31 = vld [vmem:[%s21720_s1 + $0x10] sm:$0xff]  }
0x39b6   :  { %17786 = vmatpush3.bf16.msra.mxu1 %v20466_v8  ;;  %16557 = vmatprep.mubr.msk.f32.mxu1 %vm19282_vm2, %v19283_v14 }
0x39b7   :  { %17793 = vmatprep.subr.bf16.mxu1 %v19281_v21 }
0x3a88   :  { %v7446_v38 = vpop.f32.mrb[128].mxu1 }
0x3a89   :  { %v7452_v40 = vadd.f32 %v7446_v38, %v7346_v23  ;;  %v16540_v41 = vpop.f32.mrb[129].mxu1 }
0x3a8a   :  { %v7449_v42 = vpop.f32.mrb[130].mxu1 }
0x3a8b   :  { %v7453_v53 = vadd.f32 %v7452_v40, %v20599_v52  ;;  %v16541_v43 = vpop.f32.mrb[131].mxu1 }
0x3a8c   :  { %v20766_v43 = vld [vmem:[#allocation16 + $0x8] sm:$0xf] }
0x3a8d   :  { %v7455_v19 = vsel %vm5183_vm7, %v7453_v53, 0.0 }
0x3a8e   :  { %v7456_v44 = vrot.slane %v7455_v19, 4 }
0x3a90   :  { %v7457_v51 = vadd.f32 %v7456_v44, %v7455_v19  ;;  %v18384_v44 = vld [vmem:[%s21720_s1 + $0x20] sm:$0xff]  }
0x3a92   :  { %v7458_v57 = vrot.slane %v7457_v51, 2 }
0x3a94   :  { %v7459_v60 = vadd.f32 %v7458_v57, %v7457_v51 }
0x3a96   :  { %v7460_v55 = vrot.slane %v7459_v60, 1 }
0x3a98   :  { %v7461_v56 = vadd.f32 %v7460_v55, %v7459_v60 }
0x3a9a   :  { %v7462_v1 = vmul.f32 0.25, %v7461_v56  ;;  %v18385_v56 = vld [vmem:[%s21720_s1 + $0x28] sm:$0xff]  }
0x3a9c   :  { %16551 = vmatmul.mubr.msk.f32.vlgmr.msra.gmra.mrb[120].mxu0 %vm587_vm0, %v7462_v1  ;;  %v18386_v1 = vld [vmem:[%s21720_s1 + $0x30] sm:$0xff]  }
0x3a9d   :  { %17789 = vmatpush3.bf16.msra.mxu0 %v20449_v45  ;;  %16568 = vmatprep.mubr.msk.f32.mxu0 %vm19282_vm2, %v19283_v14 }
0x3a9e   :  { %17790 = vmatprep.subr.bf16.mxu0 %v19281_v21 }
0x3aa1   :  { %17792 = vmatpush3.bf16.msra.mxu0 %v20457_v48 }
0x3aa2   :  { %16584 = vmatprep.subr.bf16.mxu0 %v19283_v14 }
0x3b6f   :  { %v7532_v52 = vpop.f32.mrb[120].mxu0 }
0x3b70   :  { %v16552_v46 = vpop.f32.mrb[121].mxu0  ;;  %16558 = vmatmul.mubr.msk.f32.vlgmr.msra.gmra.mrb[132].mxu1 %vm1894_vm9, %v7532_v52 }
0x3b71   :  { %17795 = vmatpush3.bf16.msra.mxu1 %v20466_v8  ;;  %16575 = vmatprep.mubr.msk.f32.mxu1 %vm19282_vm2, %v19283_v14 }
0x3b72   :  { %16578 = vmatprep.subr.bf16.mxu1 %v19283_v14 }
0x3c43   :  { %v7605_v45 = vpop.f32.mrb[132].mxu1 }
0x3c44   :  { %v7612_v47 = vrot.slane %v7605_v45, %v19881_v35  ;;  %v16559_v28 = vpop.f32.mrb[133].mxu1 }
0x3c45   :  { %v18387_v28 = vld [vmem:[%s21720_s1 + $0x38] sm:$0xff]  }
0x3c46   :  { %v7613_v49 = vsub.f32 %v7453_v53, %v7612_v47  ;;  %v20758_v53 = vld [vmem:[#allocation16] sm:$0xf] }
0x3c48   :  { %v7614_v48 = vmul.f32 %v7613_v49, %v7613_v49 }
0x3c4a   :  { %v7615_v50 = vsel %vm5183_vm7, %v7614_v48, 0.0  ;;  %v18389_v48 = vld [vmem:[%s21720_s1 + $0x48] sm:$0xff]  }
0x3c4b   :  { %v7616_v5 = vrot.slane %v7615_v50, 4 }
0x3c4d   :  { %v7617_v54 = vadd.f32 %v7616_v5, %v7615_v50  ;;  %v18390_v50 = vld [vmem:[%s21720_s1 + $0x50] sm:$0xff]   ;;  %v18391_v5 = vld [vmem:[%s21720_s1 + $0x58] sm:$0xff]  }
0x3c4f   :  { %v7618_v58 = vrot.slane %v7617_v54, 2 }
0x3c51   :  { %v7619_v30 = vadd.f32 %v7618_v58, %v7617_v54  ;;  %v8217_v58 = vld [vmem:[%s21705_s17] sm:$0xff] }
0x3c53   :  { %v7620_v59 = vrot.slane %v7619_v30, 1 }
0x3c55   :  { %v7621_v8 = vadd.f32 %v7620_v59, %v7619_v30  ;;  %v8218_v30 = vld [vmem:[%s21705_s17 + $0x8] sm:$0xff] }
0x3c56   :  { %v20799_v59 = vpack.c.bf16 %v8218_v30, %v8217_v58 }
0x3c57   :  { %v7622_v62 = vmul.f32 0.25, %v7621_v8  ;;  %v8219_v8 = vld [vmem:[%s21705_s17 + $0x10] sm:$0xff] }
0x3c59   :  { %16569 = vmatmul.mubr.msk.f32.vlgmr.msra.gmra.mrb[122].mxu0 %vm587_vm0, %v7622_v62  ;;  %v8220_v62 = vld [vmem:[%s21705_s17 + $0x18] sm:$0xff] }
0x3c5a   :  { %16588 = vmatprep.mubr.msk.bf16.mxu0 %vm19282_vm2, %v19283_v14  ;;  %16585 = vmatpush3.bf16.msra.mxu0 %v18378_v24  ;;  %v8222_v24 = vld [vmem:[%s21705_s17 + $0x28] sm:$0xff] }
0x3c5b   :  { %16586 = vmatprep.subr.bf16.mxu0 %v19283_v14 }
0x3c5e   :  { %16587 = vmatpush3.bf16.msra.mxu0 %v18379_v20 }
0x3c5f   :  { %16598 = vmatprep.subr.bf16.mxu0 %v19283_v14 }
0x3d2c   :  { %v7692_v4 = vpop.f32.mrb[122].mxu0 }
0x3d2d   :  { %v16570_v7 = vpop.f32.mrb[123].mxu0  ;;  %16576 = vmatmul.mubr.msk.f32.vlgmr.msra.gmra.mrb[134].mxu1 %vm1894_vm9, %v7692_v4  ;;  %v20805_v4 = vpack.c.bf16 %v8220_v62, %v8219_v8 }
0x3d2e   :  { %16580 = vmatprep.mubr.msk.bf16.mxu1 %vm19282_vm2, %v19283_v14  ;;  %v8221_v7 = vld [vmem:[%s21705_s17 + $0x20] sm:$0xff] }
0x3e00   :  { %v7765_v9 = vpop.f32.mrb[134].mxu1 }
0x3e01   :  { %v7766_v10 = vadd.f32 1e-05, %v7765_v9  ;;  %v16577_v11 = vpop.f32.mrb[135].mxu1  ;;  %v20811_v9 = vpack.c.bf16 %v8222_v24, %v8221_v7 }
0x3e02   :  { %v8224_v11 = vld [vmem:[%s21705_s17 + $0x38] sm:$0xff] }
0x3e03   :  { %18579 = vrsqrt.f32 %v7766_v10  ;;  %v8223_v10 = vld [vmem:[%s21705_s17 + $0x30] sm:$0xff]  ;;  %s21729_s17 = sld [smem:[#allocation97_spill]] }
0x3e04   :  { %v20817_v12 = vpack.c.bf16 %v8224_v11, %v8223_v10  ;;  %v18392_v10 = vld [vmem:[%s21721_s2 + $0x20] sm:$0xff]   ;;  %v18393_v11 = vld [vmem:[%s21721_s2 + $0x28] sm:$0xff]  }
0x3e0d   :  { %v18580_v13 = vpop.eup %18579 }
0x3e0e   :  { %v7773_v15 = vrot.slane %v18580_v13, %v19881_v35 }
0x3e10   :  { %v7774_v25 = vmul.f32 %v7773_v15, %v7613_v49  ;;  %v18388_v49 = vld [vmem:[%s21720_s1 + $0x40] sm:$0xff]  }
0x3e12   :  { %v7779_v18 = vmul.f32 %v7778_v16, %v7774_v25 }
0x3e14   :  { %v7784_v61 = vadd.f32 %v7783_v17, %v7779_v18 }
0x3e16   :  { %vm7785_vm7 = vcmp.ge.f32.partialorder %v7784_v61, 0.0  ;;  %v7786_v0 = vmul.f32 0.2, %v7784_v61 }
0x3e18   :  { %v7787_v63 = vsel %vm7785_vm7, %v7784_v61, %v7786_v0 }
0x3e19   :  { %v7789_v2 = vpack.c.bf16 %v7787_v63, %v7787_v63 }
0x3e1b   :  { %v7794_v26 = vsel %vm4911_vm5, %v7789_v2, 0 }
0x3e1c   :  { %16579 = vmatpush3.bf16.msra.mxu1 %v7794_v26  ;;  %v8225_v26 = vld [vmem:[#allocation17] sm:$0xff] }
0x3e1d   :  { %16592 = vmatprep.subr.bf16.mxu1 %v19283_v14 }
0x3e1f   :  { %16581 = vmatmul.mubr.msk.bf16.vlgmr.msra.gmra.mrb[136].mxu1 %vm4907_vm6, %v7788_v29  ;;  %v8226_v29 = vld [vmem:[#allocation17 + $0x8] sm:$0xff] }
0x3e20   :  { %16594 = vmatprep.mubr.msk.bf16.mxu1 %vm19282_vm2, %v19283_v14 }
0x3ef2   :  { %v7830_v22 = vpop.f32.mrb[136].mxu1 }
0x3ef3   :  { %v7836_v3 = vpack.c.bf16 %v7830_v22, %v7830_v22  ;;  %v16582_v23 = vpop.f32.mrb[137].mxu1  ;;  %v20822_v22 = vpack.c.bf16 %v8226_v29, %v8225_v26  ;;  %v18402_v29 = vld [vmem:[%s21721_s2 + $0x50] sm:$0xff]  }
0x3ef4   :  { %v7833_v32 = vpop.f32.mrb[138].mxu1 }
0x3ef5   :  { %v16583_v36 = vpop.f32.mrb[139].mxu1  ;;  %16589 = vmatmul.mubr.msk.bf16.vlgmr.msra.gmra.mrb[124].mxu0 %vm587_vm0, %v7836_v3 }
0x3ef6   :  { %16606 = vmatprep.mubr.msk.bf16.mxu0 %vm19282_vm2, %v19283_v14  ;;  %16599 = vmatpush3.bf16.msra.mxu0 %v18380_v39 }
0x3ef7   :  { %16600 = vmatprep.subr.bf16.mxu0 %v19283_v14 }
0x3efa   :  { %16601 = vmatpush3.bf16.msra.mxu0 %v18381_v27 }
0x3efb   :  { %16602 = vmatprep.subr.bf16.mxu0 %v19283_v14 }
0x3efe   :  { %16603 = vmatpush3.bf16.msra.mxu0 %v18382_v31 }
0x3eff   :  { %16604 = vmatprep.subr.bf16.mxu0 %v19283_v14 }
0x3f02   :  { %16605 = vmatpush3.bf16.msra.mxu0 %v18383_v33 }
0x3f03   :  { %16610 = vmatprep.subr.bf16.mxu0 %v19283_v14 }
0x3fc8   :  { %v20753_v34 = vpop.f32.mrb[124].mxu0 }
0x3fc9   :  { %v7896_v37 = vpack.c.bf16 %v20753_v34, %v20753_v34  ;;  %v16590_v38 = vpop.f32.mrb[125].mxu0 }
0x3fca   :  { %v7893_v40 = vpop.f32.mrb[126].mxu0 }
0x3fcb   :  { %v16591_v41 = vpop.f32.mrb[127].mxu0  ;;  %v7911_v42 = vsel %vm3474_vm14, %v7896_v37, 0 }
0x3fcc   :  { %16593 = vmatpush3.bf16.msra.mxu1 %v7911_v42 }
0x3fcd   :  { %16622 = vmatprep.subr.bf16.mxu1 %v19283_v14 }
0x3fcf   :  { %16595 = vmatmul.mubr.msk.bf16.vlgmr.msra.gmra.mrb[140].mxu1 %vm1365_vm3, %v20758_v53 }
0x3fd0   :  { %16623 = vmatpush3.bf16.msra.mxu1 %v7911_v42  ;;  %16624 = vmatprep.mubr.msk.bf16.mxu1 %vm19282_vm2, %v19283_v14 }
0x3fd1   :  { %17796 = vmatprep.subr.bf16.mxu1 %v19281_v21 }
0x3fd7   :  { %16625 = vmatmul.mubr.msk.bf16.vlgmr.msra.gmra.mrb[144].mxu1 %vm1365_vm3, %v20766_v43 }
0x3fd8   :  { %16656 = vmatprep.mubr.msk.f32.mxu1 %vm19282_vm2, %v19283_v14  ;;  %17798 = vmatpush3.bf16.msra.mxu1 %v20799_v59 }
0x3fd9   :  { %17799 = vmatprep.subr.bf16.mxu1 %v19281_v21 }
0x3fdc   :  { %17801 = vmatpush3.bf16.msra.mxu1 %v20805_v4 }
0x3fdd   :  { %17802 = vmatprep.subr.bf16.mxu1 %v19281_v21 }
0x3fe0   :  { %17804 = vmatpush3.bf16.msra.mxu1 %v20811_v9 }
0x3fe1   :  { %17805 = vmatprep.subr.bf16.mxu1 %v19281_v21 }
0x3fe4   :  { %17807 = vmatpush3.bf16.msra.mxu1 %v20817_v12 }
0x3fe5   :  { %17808 = vmatprep.subr.bf16.mxu1 %v19281_v21 }
0x40a2   :  { %v7947_v19 = vpop.f32.mrb[140].mxu1 }
0x40a3   :  { %v7953_v51 = vpack.c.bf16 %v7947_v19, %v7947_v19  ;;  %v16596_v57 = vpop.f32.mrb[141].mxu1 }
0x40a4   :  { %v7950_v60 = vpop.f32.mrb[142].mxu1 }
0x40a5   :  { %v16597_v55 = vpop.f32.mrb[143].mxu1  ;;  %16607 = vmatmul.mubr.msk.bf16.vlgmr.msra.gmra.mrb[128].mxu0 %vm1833_vm8, %v7953_v51 }
0x40a6   :  { %16611 = vmatpush3.bf16.msra.mxu0 %v18384_v44  ;;  %16618 = vmatprep.mubr.msk.bf16.mxu0 %vm19282_vm2, %v19283_v14  ;;  %v18396_v55 = vld [vmem:[%s21721_s2] sm:$0xff]  }
0x40a7   :  { %16612 = vmatprep.subr.bf16.mxu0 %v19283_v14 }
0x40aa   :  { %16613 = vmatpush3.bf16.msra.mxu0 %v18385_v56  ;;  %v8133_v52 = vpop.f32.mrb[144].mxu1  ;;  %v18397_v56 = vld [vmem:[%s21721_s2 + $0x8] sm:$0xff]  }
0x40ab   :  { %16614 = vmatprep.subr.bf16.mxu0 %v19283_v14  ;;  %v16626_v46 = vpop.f32.mrb[145].mxu1  ;;  %v8139_v54 = vpack.c.bf16 %v8133_v52, %v8133_v52  ;;  %v18399_v52 = vld [vmem:[%s21721_s2 + $0x18] sm:$0xff]  }
0x40ac   :  { %v8136_v45 = vpop.f32.mrb[146].mxu1 }
0x40ad   :  { %v16627_v47 = vpop.f32.mrb[147].mxu1 }
0x40ae   :  { %16615 = vmatpush3.bf16.msra.mxu0 %v18386_v1  ;;  %v18398_v1 = vld [vmem:[%s21721_s2 + $0x10] sm:$0xff]  }
0x40af   :  { %16616 = vmatprep.subr.bf16.mxu0 %v19283_v14 }
0x40b2   :  { %16617 = vmatpush3.bf16.msra.mxu0 %v18387_v28  ;;  %v8227_v28 = vld [vmem:[%s21722_s25] sm:$0x3] }
0x40b3   :  { %16628 = vmatprep.subr.bf16.mxu0 %v19283_v14 }
0x40b5   :  { %16619 = vmatmul.mubr.msk.bf16.vlgmr.msra.gmra.mrb[128].mxu0 %vm1833_vm8, %v7896_v37 }
0x40b6   :  { %16629 = vmatpush3.bf16.msra.mxu0 %v18388_v49  ;;  %16636 = vmatprep.mubr.msk.bf16.mxu0 %vm19282_vm2, %v19283_v14 }
0x40b7   :  { %16630 = vmatprep.subr.bf16.mxu0 %v19283_v14 }
0x40ba   :  { %16631 = vmatpush3.bf16.msra.mxu0 %v18389_v48 }
0x40bb   :  { %16632 = vmatprep.subr.bf16.mxu0 %v19283_v14 }
0x40be   :  { %16633 = vmatpush3.bf16.msra.mxu0 %v18390_v50  ;;  %v8551_v50 = vrot.slane %v8227_v28, %v19881_v35 }
0x40bf   :  { %16634 = vmatprep.subr.bf16.mxu0 %v19283_v14 }
0x40c2   :  { %16635 = vmatpush3.bf16.msra.mxu0 %v18391_v5 }
0x40c3   :  { %16698 = vmatprep.subr.bf16.mxu0 %v19283_v14 }
0x40c5   :  { %16637 = vmatmul.mubr.msk.bf16.vlgmr.msra.gmra.mrb[128].mxu0 %vm1833_vm8, %v8139_v54  ;;  %v8556_v54 = vrot.slane %v8227_v28, %v19903_v6 }
0x40c6   :  { %16706 = vmatprep.mubr.msk.bf16.mxu0 %vm19282_vm2, %v19283_v14  ;;  %16699 = vmatpush3.bf16.msra.mxu0 %v18396_v55 }
0x40c7   :  { %16700 = vmatprep.subr.bf16.mxu0 %v19283_v14 }
0x40ca   :  { %16701 = vmatpush3.bf16.msra.mxu0 %v18397_v56 }
0x40cb   :  { %16702 = vmatprep.subr.bf16.mxu0 %v19283_v14 }
0x40ce   :  { %16703 = vmatpush3.bf16.msra.mxu0 %v18398_v1 }
0x40cf   :  { %16704 = vmatprep.subr.bf16.mxu0 %v19283_v14 }
0x40d2   :  { %16705 = vmatpush3.bf16.msra.mxu0 %v18399_v52 }
0x40d3   :  { %16722 = vmatprep.subr.bf16.mxu0 %v19283_v14 }
0x4198   :  { %v8210_v13 = vpop.f32.mrb[128].mxu0 }
0x4199   :  { %v8228_v15 = vsel %vm1833_vm8, %v8210_v13, 0.0  ;;  %v16638_v16 = vpop.f32.mrb[129].mxu0 }
0x419a   :  { %v8229_v25 = vrot.slane %v8228_v15, 4  ;;  %v8213_v17 = vpop.f32.mrb[130].mxu0 }
0x419b   :  { %v16639_v18 = vpop.f32.mrb[131].mxu0 }
0x419c   :  { %v8230_v61 = vadd.f32 %v8229_v25, %v8228_v15  ;;  %v18395_v15 = vld [vmem:[%s21721_s2 + $0x38] sm:$0xff]  }
0x419e   :  { %v8231_v0 = vrot.slane %v8230_v61, 2 }
0x41a0   :  { %v8232_v63 = vadd.f32 %v8231_v0, %v8230_v61 }
0x41a2   :  { %v8233_v2 = vrot.slane %v8232_v63, 1 }
0x41a4   :  { %v8234_v20 = vadd.f32 %v8233_v2, %v8232_v63 }
0x41a6   :  { %v8235_v3 = vmul.f32 0.125, %v8234_v20  ;;  %v18403_v20 = vld [vmem:[%s21721_s2 + $0x58] sm:$0xff]  }
0x41a8   :  { %16657 = vmatmul.mubr.msk.f32.vlgmr.msra.gmra.mrb[148].mxu1 %vm1833_vm8, %v8235_v3 }
0x41a9   :  { %17810 = vmatpush3.bf16.msra.mxu1 %v20822_v22  ;;  %16663 = vmatprep.mubr.msk.f32.mxu1 %vm19282_vm2, %v19283_v14 }
0x41aa   :  { %17811 = vmatprep.subr.bf16.mxu1 %v19281_v21 }
0x427b   :  { %v8305_v23 = vpop.f32.mrb[148].mxu1 }
0x427c   :  { %v16658_v32 = vpop.f32.mrb[149].mxu1  ;;  %16664 = vmatmul.mubr.msk.f32.vlgmr.msra.gmra.mrb[150].mxu1 %vm1894_vm9, %v8305_v23 }
0x427d   :  { %17813 = vmatpush3.bf16.msra.mxu1 %v20799_v59  ;;  %16682 = vmatprep.mubr.msk.f32.mxu1 %vm19282_vm2, %v19283_v14 }
0x427e   :  { %17814 = vmatprep.subr.bf16.mxu1 %v19281_v21 }
0x4281   :  { %17816 = vmatpush3.bf16.msra.mxu1 %v20805_v4 }
0x4282   :  { %17817 = vmatprep.subr.bf16.mxu1 %v19281_v21 }
0x4285   :  { %17819 = vmatpush3.bf16.msra.mxu1 %v20811_v9 }
0x4286   :  { %17820 = vmatprep.subr.bf16.mxu1 %v19281_v21 }
0x4289   :  { %17822 = vmatpush3.bf16.msra.mxu1 %v20817_v12 }
0x428a   :  { %17823 = vmatprep.subr.bf16.mxu1 %v19281_v21 }
0x434f   :  { %v8378_v36 = vpop.f32.mrb[150].mxu1 }
0x4350   :  { %v8385_v39 = vrot.slane %v8378_v36, %v19881_v35  ;;  %v16665_v27 = vpop.f32.mrb[151].mxu1 }
0x4352   :  { %v8386_v31 = vsub.f32 %v8210_v13, %v8385_v39  ;;  %v18394_v13 = vld [vmem:[%s21721_s2 + $0x30] sm:$0xff]  }
0x4354   :  { %v8387_v33 = vmul.f32 %v8386_v31, %v8386_v31 }
0x4356   :  { %v8388_v37 = vsel %vm1833_vm8, %v8387_v33, 0.0 }
0x4357   :  { %v8389_v38 = vrot.slane %v8388_v37, 4 }
0x4359   :  { %v8390_v40 = vadd.f32 %v8389_v38, %v8388_v37 }
0x435b   :  { %v8391_v41 = vrot.slane %v8390_v40, 2 }
0x435d   :  { %v8392_v42 = vadd.f32 %v8391_v41, %v8390_v40 }
0x435f   :  { %v8393_v19 = vrot.slane %v8392_v42, 1 }
0x4361   :  { %v8394_v44 = vadd.f32 %v8393_v19, %v8392_v42 }
0x4363   :  { %v8395_v51 = vmul.f32 0.125, %v8394_v44 }
0x4365   :  { %16683 = vmatmul.mubr.msk.f32.vlgmr.msra.gmra.mrb[152].mxu1 %vm1833_vm8, %v8395_v51 }
0x4366   :  { %17825 = vmatpush3.bf16.msra.mxu1 %v20822_v22  ;;  %16689 = vmatprep.mubr.msk.f32.mxu1 %vm19282_vm2, %v19283_v14 }
0x4367   :  { %16692 = vmatprep.subr.bf16.mxu1 %v19283_v14 }
0x4438   :  { %v8465_v57 = vpop.f32.mrb[152].mxu1 }
0x4439   :  { %v16684_v60 = vpop.f32.mrb[153].mxu1  ;;  %16690 = vmatmul.mubr.msk.f32.vlgmr.msra.gmra.mrb[154].mxu1 %vm1894_vm9, %v8465_v57 }
0x443a   :  { %16694 = vmatprep.mubr.msk.bf16.mxu1 %vm19282_vm2, %v19283_v14 }
0x450c   :  { %v8538_v46 = vpop.f32.mrb[154].mxu1 }
0x450d   :  { %v8539_v45 = vadd.f32 1e-05, %v8538_v46  ;;  %v16691_v47 = vpop.f32.mrb[155].mxu1 }
0x450f   :  { %18581 = vrsqrt.f32 %v8539_v45 }
0x4519   :  { %v18582_v49 = vpop.eup %18581 }
0x451a   :  { %v8546_v48 = vrot.slane %v18582_v49, %v19881_v35 }
0x451c   :  { %v8547_v5 = vmul.f32 %v8546_v48, %v8386_v31 }
0x451e   :  { %v8552_v58 = vmul.f32 %v8551_v50, %v8547_v5 }
0x4520   :  { %v8557_v30 = vadd.f32 %v8556_v54, %v8552_v58 }
0x4522   :  { %vm8558_vm5 = vcmp.ge.f32.partialorder %v8557_v30, 0.0  ;;  %v8559_v8 = vmul.f32 0.2, %v8557_v30 }
0x4524   :  { %v8560_v62 = vsel %vm8558_vm5, %v8557_v30, %v8559_v8 }
0x4525   :  { %v8561_v7 = vpack.c.bf16 %v8560_v62, %v8560_v62 }
0x4527   :  { %v8572_v24 = vsel %vm3474_vm14, %v8561_v7, 0 }
0x4528   :  { %16693 = vmatpush3.bf16.msra.mxu1 %v8572_v24 }
0x4529   :  { %16710 = vmatprep.subr.bf16.mxu1 %v19283_v14 }
0x452b   :  { %16695 = vmatmul.mubr.msk.bf16.vlgmr.msra.gmra.mrb[156].mxu1 %vm1365_vm3, %v20758_v53  ;;  %v18400_v53 = vld [vmem:[%s21721_s2 + $0x40] sm:$0xff]  }
0x452c   :  { %16711 = vmatpush3.bf16.msra.mxu1 %v18392_v10  ;;  %16718 = vmatprep.mubr.msk.bf16.mxu1 %vm19282_vm2, %v19283_v14 }
0x452d   :  { %16712 = vmatprep.subr.bf16.mxu1 %v19283_v14 }
0x4530   :  { %16713 = vmatpush3.bf16.msra.mxu1 %v18393_v11  ;;  %v8875_v11 = vld [vmem:[%s21723_s10] sm:$0x3] }
0x4531   :  { %16714 = vmatprep.subr.bf16.mxu1 %v19283_v14 }
0x4534   :  { %16715 = vmatpush3.bf16.msra.mxu1 %v18394_v13 }
0x4535   :  { %16716 = vmatprep.subr.bf16.mxu1 %v19283_v14 }
0x4538   :  { %16717 = vmatpush3.bf16.msra.mxu1 %v18395_v15 }
0x4539   :  { %16728 = vmatprep.subr.bf16.mxu1 %v19283_v14 }
0x453b   :  { %16719 = vmatmul.mubr.msk.bf16.vlgmr.msra.gmra.mrb[160].mxu1 %vm1833_vm8, %v8561_v7 }
0x453c   :  { %16736 = vmatprep.mubr.msk.bf16.mxu1 %vm19282_vm2, %v19283_v14  ;;  %16729 = vmatpush3.bf16.msra.mxu1 %v18400_v53  ;;  %v9199_v53 = vrot.slane %v8875_v11, %v19881_v35 }
0x453d   :  { %16730 = vmatprep.subr.bf16.mxu1 %v19283_v14 }
0x45fe   :  { %v8608_v16 = vpop.f32.mrb[156].mxu1 }
0x45ff   :  { %v8614_v25 = vpack.c.bf16 %v8608_v16, %v8608_v16  ;;  %v16696_v17 = vpop.f32.mrb[157].mxu1 }
0x4600   :  { %v8611_v18 = vpop.f32.mrb[158].mxu1 }
0x4601   :  { %v16697_v61 = vpop.f32.mrb[159].mxu1  ;;  %16707 = vmatmul.mubr.msk.bf16.vlgmr.msra.gmra.mrb[132].mxu0 %vm1833_vm8, %v8614_v25  ;;  %v9204_v25 = vrot.slane %v8875_v11, %v19903_v6  ;;  %v18432_v11 = vld [vmem:[%s21727_s15 + $0x68] sm:$0xff]  }
0x4602   :  { %16723 = vmatpush3.bf16.msra.mxu0 %v8572_v24  ;;  %16724 = vmatprep.mubr.msk.bf16.mxu0 %vm19282_vm2, %v19283_v14 }
0x4603   :  { %17826 = vmatprep.subr.bf16.mxu0 %v19281_v21 }
0x4609   :  { %16725 = vmatmul.mubr.msk.bf16.vlgmr.msra.gmra.mrb[136].mxu0 %vm1365_vm3, %v20766_v43  ;;  %v18401_v43 = vld [vmem:[%s21721_s2 + $0x48] sm:$0xff]  }
0x460a   :  { %17828 = vmatpush3.bf16.msra.mxu0 %v20799_v59  ;;  %16756 = vmatprep.mubr.msk.f32.mxu0 %vm19282_vm2, %v19283_v14 }
0x460b   :  { %17829 = vmatprep.subr.bf16.mxu0 %v19281_v21  ;;  %16731 = vmatpush3.bf16.msra.mxu1 %v18401_v43  ;;  %v18405_v43 = vld [vmem:[%s21725_s11] sm:$0xff]  }
0x460c   :  { %16732 = vmatprep.subr.bf16.mxu1 %v19283_v14 }
0x460e   :  { %v8750_v0 = vpop.f32.mrb[160].mxu1  ;;  %17831 = vmatpush3.bf16.msra.mxu0 %v20805_v4 }
0x460f   :  { %v16720_v63 = vpop.f32.mrb[161].mxu1  ;;  %17832 = vmatprep.subr.bf16.mxu0 %v19281_v21  ;;  %16733 = vmatpush3.bf16.msra.mxu1 %v18402_v29  ;;  %v18406_v29 = vld [vmem:[%s21725_s11 + $0x8] sm:$0xff]  }
0x4610   :  { %v8753_v2 = vpop.f32.mrb[162].mxu1  ;;  %16734 = vmatprep.subr.bf16.mxu1 %v19283_v14 }
0x4611   :  { %v16721_v26 = vpop.f32.mrb[163].mxu1 }
0x4612   :  { %17834 = vmatpush3.bf16.msra.mxu0 %v20811_v9  ;;  %v18404_v26 = vld [vmem:[%s21724_s3] sm:$0xff]  }
0x4613   :  { %17835 = vmatprep.subr.bf16.mxu0 %v19281_v21  ;;  %16735 = vmatpush3.bf16.msra.mxu1 %v18403_v20  ;;  %v18407_v20 = vld [vmem:[%s21725_s11 + $0x10] sm:$0xff]  }
0x4614   :  { %17841 = vmatprep.subr.bf16.mxu1 %v19281_v21 }
0x4616   :  { %17837 = vmatpush3.bf16.msra.mxu0 %v20817_v12 }
0x4617   :  { %17838 = vmatprep.subr.bf16.mxu0 %v19281_v21 }
0x46d4   :  { %v8684_v3 = vpop.f32.mrb[132].mxu0 }
0x46d5   :  { %v8751_v23 = vadd.f32 %v8750_v0, %v8684_v3  ;;  %v16708_v32 = vpop.f32.mrb[133].mxu0  ;;  %v18408_v3 = vld [vmem:[%s21725_s11 + $0x18] sm:$0xff]  }
0x46d6   :  { %v8687_v36 = vpop.f32.mrb[134].mxu0  ;;  %v18410_v32 = vld [vmem:[%s21726_s13 + $0x8] sm:$0xff]  }
0x46d7   :  { %v16709_v39 = vpop.f32.mrb[135].mxu0  ;;  %v18411_v36 = vld [vmem:[%s21726_s13 + $0x10] sm:$0xff]  }
0x46d8   :  { %v18412_v39 = vld [vmem:[%s21726_s13 + $0x18] sm:$0xff]  }
0x46dc   :  { %v8790_v27 = vpop.f32.mrb[136].mxu0 }
0x46dd   :  { %v8796_v31 = vpack.c.bf16 %v8790_v27, %v8790_v27  ;;  %v16726_v33 = vpop.f32.mrb[137].mxu0  ;;  %v18413_v27 = vld [vmem:[%s21726_s13 + $0x20] sm:$0xff]  }
0x46de   :  { %v8793_v37 = vpop.f32.mrb[138].mxu0  ;;  %v18415_v33 = vld [vmem:[%s21726_s13 + $0x30] sm:$0xff]  }
0x46df   :  { %v16727_v38 = vpop.f32.mrb[139].mxu0  ;;  %16737 = vmatmul.mubr.msk.bf16.vlgmr.msra.gmra.mrb[164].mxu1 %vm1833_vm8, %v8796_v31  ;;  %v18414_v31 = vld [vmem:[%s21726_s13 + $0x28] sm:$0xff]  }
0x46e0   :  { %17843 = vmatpush3.bf16.msra.mxu1 %v20799_v59  ;;  %16782 = vmatprep.mubr.msk.f32.mxu1 %vm19282_vm2, %v19283_v14 }
0x46e1   :  { %17844 = vmatprep.subr.bf16.mxu1 %v19281_v21 }
0x46e4   :  { %17846 = vmatpush3.bf16.msra.mxu1 %v20805_v4 }
0x46e5   :  { %17847 = vmatprep.subr.bf16.mxu1 %v19281_v21 }
0x46e8   :  { %17849 = vmatpush3.bf16.msra.mxu1 %v20811_v9 }
0x46e9   :  { %17850 = vmatprep.subr.bf16.mxu1 %v19281_v21 }
0x46ec   :  { %17852 = vmatpush3.bf16.msra.mxu1 %v20817_v12 }
0x46ed   :  { %16810 = vmatprep.subr.bf16.mxu1 %v19283_v14 }
0x47b2   :  { %v8867_v40 = vpop.f32.mrb[164].mxu1 }
0x47b3   :  { %v8873_v41 = vadd.f32 %v8867_v40, %v8751_v23  ;;  %v16738_v59 = vpop.f32.mrb[165].mxu1  ;;  %v18409_v23 = vld [vmem:[%s21726_s13] sm:$0xff]  }
0x47b4   :  { %v8870_v42 = vpop.f32.mrb[166].mxu1 }
0x47b5   :  { %v8874_v19 = vadd.f32 %v8873_v41, %v20753_v34  ;;  %v16739_v44 = vpop.f32.mrb[167].mxu1  ;;  %v18416_v42 = vld [vmem:[%s21726_s13 + $0x38] sm:$0xff]  }
0x47b7   :  { %v8876_v51 = vsel %vm1833_vm8, %v8874_v19, 0.0 }
0x47b8   :  { %v8877_v4 = vrot.slane %v8876_v51, 4 }
0x47ba   :  { %v8878_v57 = vadd.f32 %v8877_v4, %v8876_v51 }
0x47bc   :  { %v8879_v60 = vrot.slane %v8878_v57, 2 }
0x47be   :  { %v8880_v55 = vadd.f32 %v8879_v60, %v8878_v57  ;;  %v20973_v60 = vld [vmem:[#allocation8] sm:$0xff]  }
0x47c0   :  { %v8881_v9 = vrot.slane %v8880_v55, 1 }
0x47c2   :  { %v8882_v56 = vadd.f32 %v8881_v9, %v8880_v55  ;;  %v18419_v55 = vld [vmem:[%s21727_s15] sm:$0xff]  }
0x47c3   :  { %v20985_v9 = vld [vmem:[#allocation8 + $0x10] sm:$0xff]  }
0x47c4   :  { %v8883_v1 = vmul.f32 0.125, %v8882_v56  ;;  %v18420_v56 = vld [vmem:[%s21727_s15 + $0x8] sm:$0xff]  }
0x47c6   :  { %16757 = vmatmul.mubr.msk.f32.vlgmr.msra.gmra.mrb[140].mxu0 %vm1833_vm8, %v8883_v1  ;;  %v18421_v1 = vld [vmem:[%s21727_s15 + $0x10] sm:$0xff]  }
0x47c7   :  { %17840 = vmatpush3.bf16.msra.mxu0 %v20822_v22  ;;  %16763 = vmatprep.mubr.msk.f32.mxu0 %vm19282_vm2, %v19283_v14 }
0x47c8   :  { %17853 = vmatprep.subr.bf16.mxu0 %v19281_v21 }
0x4899   :  { %v8953_v34 = vpop.f32.mrb[140].mxu0 }
0x489a   :  { %v16758_v12 = vpop.f32.mrb[141].mxu0  ;;  %16764 = vmatmul.mubr.msk.f32.vlgmr.msra.gmra.mrb[142].mxu0 %vm1894_vm9, %v8953_v34  ;;  %v18422_v34 = vld [vmem:[%s21727_s15 + $0x18] sm:$0xff]  }
0x489b   :  { %17855 = vmatpush3.bf16.msra.mxu0 %v20822_v22  ;;  %16789 = vmatprep.mubr.msk.f32.mxu0 %vm19282_vm2, %v19283_v14  ;;  %v18423_v12 = vld [vmem:[%s21727_s15 + $0x20] sm:$0xff]  }
0x489c   :  { %16792 = vmatprep.subr.bf16.mxu0 %v19283_v14 }
0x496d   :  { %v9026_v52 = vpop.f32.mrb[142].mxu0 }
0x496e   :  { %v9033_v46 = vrot.slane %v9026_v52, %v19881_v35  ;;  %v16765_v45 = vpop.f32.mrb[143].mxu0  ;;  %v18424_v52 = vld [vmem:[%s21727_s15 + $0x28] sm:$0xff]  }
0x496f   :  { %v18426_v45 = vld [vmem:[%s21727_s15 + $0x38] sm:$0xff]  }
0x4970   :  { %v9034_v47 = vsub.f32 %v8874_v19, %v9033_v46  ;;  %v18425_v46 = vld [vmem:[%s21727_s15 + $0x30] sm:$0xff]  }
0x4972   :  { %v9035_v28 = vmul.f32 %v9034_v47, %v9034_v47 }
0x4974   :  { %v9036_v49 = vsel %vm1833_vm8, %v9035_v28, 0.0 }
0x4975   :  { %v9037_v48 = vrot.slane %v9036_v49, 4 }
0x4977   :  { %v9038_v50 = vadd.f32 %v9037_v48, %v9036_v49  ;;  %v18427_v48 = vld [vmem:[%s21727_s15 + $0x40] sm:$0xff]  }
0x4979   :  { %v9039_v5 = vrot.slane %v9038_v50, 2 }
0x497b   :  { %v9040_v54 = vadd.f32 %v9039_v5, %v9038_v50 }
0x497d   :  { %v9041_v58 = vrot.slane %v9040_v54, 1 }
0x497f   :  { %v9042_v22 = vadd.f32 %v9041_v58, %v9040_v54  ;;  %v18428_v58 = vld [vmem:[%s21727_s15 + $0x48] sm:$0xff]  }
0x4981   :  { %v9043_v30 = vmul.f32 0.125, %v9042_v22 }
0x4983   :  { %16783 = vmatmul.mubr.msk.f32.vlgmr.msra.gmra.mrb[168].mxu1 %vm1833_vm8, %v9043_v30 }
0x4984   :  { %16826 = vmatprep.mubr.msk.bf16.mxu1 %vm19282_vm2, %v19283_v14  ;;  %16811 = vmatpush3.bf16.msra.mxu1 %v18409_v23  ;;  %v9874_v23 = vld [vmem:[%s21728_s18 + $0x20] sm:$0xff] }
0x4985   :  { %16812 = vmatprep.subr.bf16.mxu1 %v19283_v14 }
0x4988   :  { %16813 = vmatpush3.bf16.msra.mxu1 %v18410_v32  ;;  %v9875_v32 = vld [vmem:[%s21728_s18 + $0x28] sm:$0xff] }
0x4989   :  { %16814 = vmatprep.subr.bf16.mxu1 %v19283_v14 }
0x498c   :  { %16815 = vmatpush3.bf16.msra.mxu1 %v18411_v36  ;;  %v21065_v36 = vpack.c.bf16 %v9875_v32, %v9874_v23 }
0x498d   :  { %16816 = vmatprep.subr.bf16.mxu1 %v19283_v14 }
0x4990   :  { %16817 = vmatpush3.bf16.msra.mxu1 %v18412_v39  ;;  %v9876_v39 = vld [vmem:[%s21728_s18 + $0x30] sm:$0xff] }
0x4991   :  { %16818 = vmatprep.subr.bf16.mxu1 %v19283_v14 }
0x4994   :  { %16819 = vmatpush3.bf16.msra.mxu1 %v18413_v27  ;;  %v9877_v27 = vld [vmem:[%s21728_s18 + $0x38] sm:$0xff] }
0x4995   :  { %16820 = vmatprep.subr.bf16.mxu1 %v19283_v14 }
0x4998   :  { %16821 = vmatpush3.bf16.msra.mxu1 %v18414_v31  ;;  %v21073_v31 = vpack.c.bf16 %v9877_v27, %v9876_v39 }
0x4999   :  { %16822 = vmatprep.subr.bf16.mxu1 %v19283_v14 }
0x499c   :  { %16823 = vmatpush3.bf16.msra.mxu1 %v18415_v33 }
0x499d   :  { %16824 = vmatprep.subr.bf16.mxu1 %v19283_v14 }
0x49a0   :  { %16825 = vmatpush3.bf16.msra.mxu1 %v18416_v42 }
0x49a1   :  { %16876 = vmatprep.subr.bf16.mxu1 %v19283_v14 }
0x4a56   :  { %v9113_v8 = vpop.f32.mrb[168].mxu1 }
0x4a57   :  { %v16784_v62 = vpop.f32.mrb[169].mxu1  ;;  %16790 = vmatmul.mubr.msk.f32.vlgmr.msra.gmra.mrb[144].mxu0 %vm1894_vm9, %v9113_v8 }
0x4a58   :  { %16794 = vmatprep.mubr.msk.bf16.mxu0 %vm19282_vm2, %v19283_v14 }
0x4b2a   :  { %v9186_v7 = vpop.f32.mrb[144].mxu0 }
0x4b2b   :  { %v9187_v24 = vadd.f32 1e-05, %v9186_v7  ;;  %v16791_v10 = vpop.f32.mrb[145].mxu0  ;;  %v18429_v7 = vld [vmem:[%s21727_s15 + $0x50] sm:$0xff]  }
0x4b2c   :  { %v18431_v10 = vld [vmem:[%s21727_s15 + $0x60] sm:$0xff]  }
0x4b2d   :  { %18583 = vrsqrt.f32 %v9187_v24  ;;  %v18430_v24 = vld [vmem:[%s21727_s15 + $0x58] sm:$0xff]  }
0x4b37   :  { %v18584_v13 = vpop.eup %18583 }
0x4b38   :  { %v9194_v15 = vrot.slane %v18584_v13, %v19881_v35  ;;  %v18433_v13 = vld [vmem:[%s21727_s15 + $0x70] sm:$0xff]  }
0x4b3a   :  { %v9195_v16 = vmul.f32 %v9194_v15, %v9034_v47  ;;  %v18434_v15 = vld [vmem:[%s21727_s15 + $0x78] sm:$0xff]  }
0x4b3c   :  { %v9200_v17 = vmul.f32 %v9199_v53, %v9195_v16  ;;  %v18435_v53 = vld [vmem:[%s21727_s15 + $0x80] sm:$0xff]   ;;  %v18436_v16 = vld [vmem:[%s21727_s15 + $0x88] sm:$0xff]  }
0x4b3e   :  { %v9205_v18 = vadd.f32 %v9204_v25, %v9200_v17  ;;  %v18437_v25 = vld [vmem:[%s21727_s15 + $0x90] sm:$0xff]   ;;  %v18438_v17 = vld [vmem:[%s21727_s15 + $0x98] sm:$0xff]  }
0x4b40   :  { %vm9206_vm6 = vcmp.ge.f32.partialorder %v9205_v18, 0.0  ;;  %v9207_v61 = vmul.f32 0.2, %v9205_v18 }
0x4b42   :  { %v9208_v0 = vsel %vm9206_vm6, %v9205_v18, %v9207_v61  ;;  %v18439_v18 = vld [vmem:[%s21727_s15 + $0xa0] sm:$0xff]   ;;  %v18440_v61 = vld [vmem:[%s21727_s15 + $0xa8] sm:$0xff]  }
0x4b43   :  { %v9211_v63 = vpack.c.bf16 %v9208_v0, %v9208_v0  ;;  %v18441_v0 = vld [vmem:[%s21727_s15 + $0xb0] sm:$0xff]  }
0x4b45   :  { %v9221_v2 = vsel %vm3474_vm14, %v9211_v63, 0  ;;  %v18442_v63 = vld [vmem:[%s21727_s15 + $0xb8] sm:$0xff]  }
0x4b46   :  { %16793 = vmatpush3.bf16.msra.mxu0 %v9221_v2  ;;  %v9870_v2 = vld [vmem:[%s21728_s18] sm:$0xff] }
0x4b47   :  { %16798 = vmatprep.subr.bf16.mxu0 %v19283_v14 }
0x4b49   :  { %16795 = vmatmul.mubr.msk.bf16.vlgmr.msra.gmra.mrb[148].mxu0 %vm1365_vm3, %v18404_v26  ;;  %v9871_v26 = vld [vmem:[%s21728_s18 + $0x8] sm:$0xff] }
0x4b4a   :  { %16799 = vmatpush3.bf16.msra.mxu0 %v18405_v43  ;;  %16806 = vmatprep.mubr.msk.bf16.mxu0 %vm19282_vm2, %v19283_v14  ;;  %v21049_v43 = vpack.c.bf16 %v9871_v26, %v9870_v2 }
0x4b4b   :  { %16800 = vmatprep.subr.bf16.mxu0 %v19283_v14 }
0x4b4e   :  { %16801 = vmatpush3.bf16.msra.mxu0 %v18406_v29  ;;  %v9872_v29 = vld [vmem:[%s21728_s18 + $0x10] sm:$0xff] }
0x4b4f   :  { %16802 = vmatprep.subr.bf16.mxu0 %v19283_v14 }
0x4b52   :  { %16803 = vmatpush3.bf16.msra.mxu0 %v18407_v20  ;;  %v9873_v20 = vld [vmem:[%s21728_s18 + $0x18] sm:$0xff] }
0x4b53   :  { %16804 = vmatprep.subr.bf16.mxu0 %v19283_v14 }
0x4b56   :  { %16805 = vmatpush3.bf16.msra.mxu0 %v18408_v3  ;;  %v21057_v3 = vpack.c.bf16 %v9873_v20, %v9872_v29 }
0x4b57   :  { %16830 = vmatprep.subr.bf16.mxu0 %v19283_v14 }
0x4c1c   :  { %v9257_v37 = vpop.f32.mrb[148].mxu0 }
0x4c1d   :  { %v16796_v38 = vpop.f32.mrb[149].mxu0 }
0x4c1e   :  { %v9260_v40 = vpop.f32.mrb[150].mxu0 }
0x4c1f   :  { %v9264_v41 = vpack.c.bf16 %v9260_v40, %v9257_v37  ;;  %v16797_v59 = vpop.f32.mrb[151].mxu0 }
0x4c21   :  { %16807 = vmatmul.mubr.msk.bf16.vlgmr.msra.gmra.mrb[152].mxu0 %vm1833_vm8, %v9264_v41 }
0x4c22   :  { %16832 = vmatprep.mubr.msk.bf16.mxu0 %vm19282_vm2, %v19283_v14 }
0x4cf4   :  { %v9334_v19 = vpop.f32.mrb[152].mxu0 }
0x4cf5   :  { %v16808_v44 = vpop.f32.mrb[153].mxu0 }
0x4cf6   :  { %v9337_v51 = vpop.f32.mrb[154].mxu0 }
0x4cf7   :  { %v20971_v4 = vpack.c.bf16 %v9337_v51, %v9334_v19  ;;  %v16809_v57 = vpop.f32.mrb[155].mxu0 }
0x4cf9   :  { %16827 = vmatmul.mubr.bf16.vlgmr.msra.gmra.mrb[172].mxu1 %v20971_v4  ;;  %16831 = vmatpush3.bf16.msra.mxu0 %v20971_v4 }
0x4cfa   :  { %16877 = vmatpush3.bf16.msra.mxu1 %v20971_v4  ;;  %16878 = vmatprep.mubr.msk.bf16.mxu1 %vm19282_vm2, %v19283_v14 }
0x4cfb   :  { %16836 = vmatprep.subr.bf16.mxu0 %v19283_v14  ;;  %17856 = vmatprep.subr.bf16.mxu1 %v19281_v21 }
0x4cfc   :  { %16833 = vmatmul.mubr.msk.bf16.vlgmr.msra.gmra.mrb[156].mxu0 %vm1894_vm9, %v20973_v60 }
0x4cfd   :  { %16837 = vmatpush3.bf16.msra.mxu0 %v18419_v55  ;;  %16852 = vmatprep.mubr.msk.bf16.mxu0 %vm19282_vm2, %v19283_v14 }
0x4cfe   :  { %16838 = vmatprep.subr.bf16.mxu0 %v19283_v14 }
0x4d01   :  { %16879 = vmatmul.mubr.msk.bf16.vlgmr.msra.gmra.mrb[176].mxu1 %vm1894_vm9, %v20985_v9  ;;  %16839 = vmatpush3.bf16.msra.mxu0 %v18420_v56 }
0x4d02   :  { %16840 = vmatprep.subr.bf16.mxu0 %v19283_v14  ;;  %16918 = vmatprep.mubr.msk.f32.mxu1 %vm19282_vm2, %v19283_v14 }
0x4d03   :  { %17858 = vmatpush3.bf16.msra.mxu1 %v21049_v43 }
0x4d04   :  { %17859 = vmatprep.subr.bf16.mxu1 %v19281_v21 }
0x4d05   :  { %16841 = vmatpush3.bf16.msra.mxu0 %v18421_v1  ;;  %v21085_v1 = vld [vmem:[%s21729_s17] sm:$0xff] }
0x4d06   :  { %16842 = vmatprep.subr.bf16.mxu0 %v19283_v14 }
0x4d07   :  { %17861 = vmatpush3.bf16.msra.mxu1 %v21057_v3 }
0x4d08   :  { %17862 = vmatprep.subr.bf16.mxu1 %v19281_v21 }
0x4d09   :  { %16843 = vmatpush3.bf16.msra.mxu0 %v18422_v34 }
0x4d0a   :  { %16844 = vmatprep.subr.bf16.mxu0 %v19283_v14 }
0x4d0b   :  { %17864 = vmatpush3.bf16.msra.mxu1 %v21065_v36 }
0x4d0c   :  { %17865 = vmatprep.subr.bf16.mxu1 %v19281_v21 }
0x4d0d   :  { %16845 = vmatpush3.bf16.msra.mxu0 %v18423_v12 }
0x4d0e   :  { %16846 = vmatprep.subr.bf16.mxu0 %v19283_v14 }
0x4d0f   :  { %17867 = vmatpush3.bf16.msra.mxu1 %v21073_v31 }
0x4d10   :  { %16921 = vmatprep.subr.mxu1 %v19283_v14 }
0x4d11   :  { %16847 = vmatpush3.bf16.msra.mxu0 %v18424_v52 }
0x4d12   :  { %16848 = vmatprep.subr.bf16.mxu0 %v19283_v14 }
0x4d15   :  { %16849 = vmatpush3.bf16.msra.mxu0 %v18425_v46 }
0x4d16   :  { %16850 = vmatprep.subr.bf16.mxu0 %v19283_v14 }
0x4d19   :  { %16851 = vmatpush3.bf16.msra.mxu0 %v18426_v45 }
0x4d1a   :  { %16856 = vmatprep.subr.bf16.mxu0 %v19283_v14 }
0x4dcf   :  { %v9508_v47 = vpop.f32.mrb[156].mxu0 }
0x4dd0   :  { %v16834_v28 = vpop.f32.mrb[157].mxu0 }
0x4dd1   :  { %v9511_v49 = vpop.f32.mrb[158].mxu0 }
0x4dd2   :  { %v9515_v50 = vpack.c.bf16 %v9511_v49, %v9508_v47  ;;  %v16835_v5 = vpop.f32.mrb[159].mxu0 }
0x4dd4   :  { %16853 = vmatmul.mubr.bf16.vlgmr.msra.gmra.mrb[160].mxu0 %v9515_v50  ;;  %v9754_v54 = vpop.f32.mrb[176].mxu1 }
0x4dd5   :  { %16857 = vmatpush3.bf16.msra.mxu0 %v18427_v48  ;;  %16872 = vmatprep.mubr.msk.bf16.mxu0 %vm19282_vm2, %v19283_v14  ;;  %v16880_v22 = vpop.f32.mrb[177].mxu1 }
0x4dd6   :  { %16858 = vmatprep.subr.bf16.mxu0 %v19283_v14  ;;  %v9757_v30 = vpop.f32.mrb[178].mxu1 }
0x4dd7   :  { %v9761_v8 = vpack.c.bf16 %v9757_v30, %v9754_v54  ;;  %v16881_v62 = vpop.f32.mrb[179].mxu1 }
0x4dd9   :  { %16859 = vmatpush3.bf16.msra.mxu0 %v18428_v58 }
0x4dda   :  { %16860 = vmatprep.subr.bf16.mxu0 %v19283_v14 }
0x4ddd   :  { %16861 = vmatpush3.bf16.msra.mxu0 %v18429_v7 }
0x4dde   :  { %16862 = vmatprep.subr.bf16.mxu0 %v19283_v14 }
0x4de1   :  { %16863 = vmatpush3.bf16.msra.mxu0 %v18430_v24 }
0x4de2   :  { %16864 = vmatprep.subr.bf16.mxu0 %v19283_v14 }
0x4de5   :  { %16865 = vmatpush3.bf16.msra.mxu0 %v18431_v10 }
0x4de6   :  { %16866 = vmatprep.subr.bf16.mxu0 %v19283_v14 }
0x4de9   :  { %16867 = vmatpush3.bf16.msra.mxu0 %v18432_v11 }
0x4dea   :  { %16868 = vmatprep.subr.bf16.mxu0 %v19283_v14 }
0x4ded   :  { %16869 = vmatpush3.bf16.msra.mxu0 %v18433_v13 }
0x4dee   :  { %16870 = vmatprep.subr.bf16.mxu0 %v19283_v14 }
0x4df1   :  { %16871 = vmatpush3.bf16.msra.mxu0 %v18434_v15 }
0x4df2   :  { %16882 = vmatprep.subr.bf16.mxu0 %v19283_v14 }
0x4df4   :  { %16873 = vmatmul.mubr.bf16.vlgmr.msra.gmra.mrb[160].mxu0 %v20971_v4 }
0x4df5   :  { %16883 = vmatpush3.bf16.msra.mxu0 %v18435_v53  ;;  %16898 = vmatprep.mubr.msk.bf16.mxu0 %vm19282_vm2, %v19283_v14 }
0x4df6   :  { %16884 = vmatprep.subr.bf16.mxu0 %v19283_v14 }
0x4df9   :  { %16885 = vmatpush3.bf16.msra.mxu0 %v18436_v16  ;;  %v9879_v16 = vld [vmem:[%s21730_s23] sm:$0x3] }
0x4dfa   :  { %16886 = vmatprep.subr.bf16.mxu0 %v19283_v14 }
0x4dfd   :  { %16887 = vmatpush3.bf16.msra.mxu0 %v18437_v25 }
0x4dfe   :  { %16888 = vmatprep.subr.bf16.mxu0 %v19283_v14 }
0x4e01   :  { %16889 = vmatpush3.bf16.msra.mxu0 %v18438_v17 }
0x4e02   :  { %16890 = vmatprep.subr.bf16.mxu0 %v19283_v14 }
0x4e05   :  { %16891 = vmatpush3.bf16.msra.mxu0 %v18439_v18  ;;  %v10210_v18 = vrot.slane %v9879_v16, %v19881_v35 }
0x4e06   :  { %16892 = vmatprep.subr.bf16.mxu0 %v19283_v14 }
0x4e09   :  { %16893 = vmatpush3.bf16.msra.mxu0 %v18440_v61 }
0x4e0a   :  { %16894 = vmatprep.subr.bf16.mxu0 %v19283_v14 }
0x4e0d   :  { %16895 = vmatpush3.bf16.msra.mxu0 %v18441_v0 }
0x4e0e   :  { %16896 = vmatprep.subr.bf16.mxu0 %v19283_v14 }
0x4e11   :  { %16897 = vmatpush3.bf16.msra.mxu0 %v18442_v63  ;;  %v10216_v63 = vrot.slane %v9879_v16, %v19903_v6 }
0x4e12   :  { %17880 = vmatprep.subr.bf16.mxu0 %v19281_v21 }
0x4e14   :  { %16899 = vmatmul.mubr.bf16.vlgmr.msra.gmra.mrb[160].mxu0 %v9761_v8 }
0x4e15   :  { %17014 = vmatprep.mubr.msk.f32.mxu0 %vm19282_vm2, %v19283_v14  ;;  %17882 = vmatpush3.bf16.msra.mxu0 %v21049_v43 }
0x4e16   :  { %17883 = vmatprep.subr.bf16.mxu0 %v19281_v21 }
0x4e19   :  { %17885 = vmatpush3.bf16.msra.mxu0 %v21057_v3 }
0x4e1a   :  { %17886 = vmatprep.subr.bf16.mxu0 %v19281_v21 }
0x4e1d   :  { %17888 = vmatpush3.bf16.msra.mxu0 %v21065_v36 }
0x4e1e   :  { %17889 = vmatprep.subr.bf16.mxu0 %v19281_v21 }
0x4e21   :  { %17891 = vmatpush3.bf16.msra.mxu0 %v21073_v31 }
0x4e22   :  { %17017 = vmatprep.subr.mxu0 %v19283_v14 }
0x4ee7   :  { %v9861_v33 = vpop.f32.mrb[160].mxu0 }
0x4ee8   :  { %v16900_v37 = vpop.f32.mrb[161].mxu0  ;;  %v9880_v40 = vsel %vm1833_vm8, %v9861_v33, 0.0 }
0x4ee9   :  { %v9864_v38 = vpop.f32.mrb[162].mxu0  ;;  %v18443_v37 = vld [vmem:[%s21731_s6] sm:$0xff]  }
0x4eea   :  { %v9881_v41 = vsel %vm1833_vm8, %v9864_v38, 0.0  ;;  %v16901_v59 = vpop.f32.mrb[163].mxu0 }
0x4eeb   :  { %v9882_v42 = vadd.f32 %v9881_v41, %v9880_v40  ;;  %v18445_v40 = vld [vmem:[%s21731_s6 + $0x10] sm:$0xff]   ;;  %v18446_v41 = vld [vmem:[%s21731_s6 + $0x18] sm:$0xff]  }
0x4eed   :  { %v9883_v19 = vrot.slane %v9882_v42, 4 }
0x4eef   :  { %v9884_v44 = vadd.f32 %v9883_v19, %v9882_v42  ;;  %v18447_v19 = vld [vmem:[%s21731_s6 + $0x20] sm:$0xff]  }
0x4ef1   :  { %v9885_v51 = vrot.slane %v9884_v44, 2 }
0x4ef3   :  { %v9886_v4 = vadd.f32 %v9885_v51, %v9884_v44 }
0x4ef5   :  { %v9887_v57 = vrot.slane %v9886_v4, 1 }
0x4ef7   :  { %v9888_v55 = vadd.f32 %v9887_v57, %v9886_v4  ;;  %v18448_v4 = vld [vmem:[%s21731_s6 + $0x28] sm:$0xff]   ;;  %v18449_v57 = vld [vmem:[%s21731_s6 + $0x30] sm:$0xff]  }
0x4ef9   :  { %v9889_v56 = vmul.f32 0.0625, %v9888_v55  ;;  %v18450_v55 = vld [vmem:[%s21731_s6 + $0x38] sm:$0xff]  }
0x4efb   :  { %16919 = vmatmul.mubr.msk.f32.vlgmr.msra.gmra.mrb[170].mxu1 %vm1833_vm8, %v9889_v56  ;;  %v18451_v56 = vld [vmem:[%s21731_s6 + $0x40] sm:$0xff]  }
0x4efc   :  { %16923 = vmatprep.mubr.msk.f32.mxu1 %vm19282_vm2, %v19283_v14  ;;  %16922 = vmatpush3.msra.mxu1 %v21085_v1 }
0x4efd   :  { %17868 = vmatprep.subr.bf16.mxu1 %v19281_v21 }
0x4fce   :  { %v9959_v34 = vpop.f32.mrb[170].mxu1 }
0x4fcf   :  { %v16920_v12 = vpop.f32.mrb[171].mxu1  ;;  %16924 = vmatmul.mubr.msk.f32.vlgmr.msra.gmra.mrb[180].mxu1 %vm1365_vm3, %v9959_v34  ;;  %v18452_v34 = vld [vmem:[%s21731_s6 + $0x48] sm:$0xff]  }
0x4fd0   :  { %17870 = vmatpush3.bf16.msra.mxu1 %v21049_v43  ;;  %16942 = vmatprep.mubr.msk.f32.mxu1 %vm19282_vm2, %v19283_v14  ;;  %v18453_v12 = vld [vmem:[%s21731_s6 + $0x50] sm:$0xff]  }
0x4fd1   :  { %17871 = vmatprep.subr.bf16.mxu1 %v19281_v21 }
0x4fd4   :  { %17873 = vmatpush3.bf16.msra.mxu1 %v21057_v3 }
0x4fd5   :  { %17874 = vmatprep.subr.bf16.mxu1 %v19281_v21 }
0x4fd8   :  { %17876 = vmatpush3.bf16.msra.mxu1 %v21065_v36 }
0x4fd9   :  { %17877 = vmatprep.subr.bf16.mxu1 %v19281_v21 }
0x4fdc   :  { %17879 = vmatpush3.bf16.msra.mxu1 %v21073_v31 }
0x4fdd   :  { %16945 = vmatprep.subr.mxu1 %v19283_v14 }
0x50a2   :  { %v10032_v52 = vpop.f32.mrb[180].mxu1 }
0x50a3   :  { %v10039_v46 = vrot.slane %v10032_v52, %v19881_v35  ;;  %v16925_v45 = vpop.f32.mrb[181].mxu1  ;;  %v18454_v52 = vld [vmem:[%s21731_s6 + $0x58] sm:$0xff]  }
0x50a5   :  { %v10040_v47 = vsub.f32 %v9861_v33, %v10039_v46  ;;  %v10041_v28 = vsub.f32 %v9864_v38, %v10039_v46  ;;  %v18444_v38 = vld [vmem:[%s21731_s6 + $0x8] sm:$0xff]  }
0x50a7   :  { %v10042_v49 = vmul.f32 %v10040_v47, %v10040_v47  ;;  %v10043_v48 = vmul.f32 %v10041_v28, %v10041_v28 }
0x50a9   :  { %v10044_v50 = vsel %vm1833_vm8, %v10042_v49, 0.0  ;;  %v10045_v5 = vsel %vm1833_vm8, %v10043_v48, 0.0 }
0x50aa   :  { %v10046_v54 = vadd.f32 %v10045_v5, %v10044_v50 }
0x50ac   :  { %v10047_v58 = vrot.slane %v10046_v54, 4 }
0x50ae   :  { %v10048_v22 = vadd.f32 %v10047_v58, %v10046_v54 }
0x50b0   :  { %v10049_v30 = vrot.slane %v10048_v22, 2 }
0x50b2   :  { %v10050_v8 = vadd.f32 %v10049_v30, %v10048_v22 }
0x50b4   :  { %v10051_v62 = vrot.slane %v10050_v8, 1 }
0x50b6   :  { %v10052_v7 = vadd.f32 %v10051_v62, %v10050_v8 }
0x50b8   :  { %v10053_v24 = vmul.f32 0.0625, %v10052_v7 }
0x50ba   :  { %16943 = vmatmul.mubr.msk.f32.vlgmr.msra.gmra.mrb[182].mxu1 %vm1833_vm8, %v10053_v24 }
0x50bb   :  { %16946 = vmatpush3.msra.mxu1 %v21085_v1  ;;  %16947 = vmatprep.mubr.msk.f32.mxu1 %vm19282_vm2, %v19283_v14 }
0x50bc   :  { %16950 = vmatprep.subr.bf16.mxu1 %v19283_v14 }
0x518d   :  { %v10123_v10 = vpop.f32.mrb[182].mxu1 }
0x518e   :  { %v16944_v11 = vpop.f32.mrb[183].mxu1  ;;  %16948 = vmatmul.mubr.msk.f32.vlgmr.msra.gmra.mrb[184].mxu1 %vm1365_vm3, %v10123_v10 }
0x518f   :  { %16952 = vmatprep.mubr.msk.bf16.mxu1 %vm19282_vm2, %v19283_v14 }
0x5261   :  { %v10196_v13 = vpop.f32.mrb[184].mxu1 }
0x5262   :  { %v10197_v15 = vadd.f32 1e-05, %v10196_v13  ;;  %v16949_v53 = vpop.f32.mrb[185].mxu1 }
0x5264   :  { %18585 = vrsqrt.f32 %v10197_v15 }
0x526e   :  { %v18586_v25 = vpop.eup %18585 }
0x526f   :  { %v10204_v17 = vrot.slane %v18586_v25, %v19881_v35 }
0x5271   :  { %v10205_v61 = vmul.f32 %v10204_v17, %v10040_v47  ;;  %v10206_v0 = vmul.f32 %v10204_v17, %v10041_v28 }
0x5273   :  { %v10211_v2 = vmul.f32 %v10210_v18, %v10205_v61  ;;  %v10212_v26 = vmul.f32 %v10210_v18, %v10206_v0 }
0x5275   :  { %v10217_v29 = vadd.f32 %v10216_v63, %v10211_v2  ;;  %v10218_v20 = vadd.f32 %v10216_v63, %v10212_v26 }
0x5277   :  { %vm10219_vm14 = vcmp.ge.f32.partialorder %v10217_v29, 0.0  ;;  %vm10220_vm10 = vcmp.ge.f32.partialorder %v10218_v20, 0.0  ;;  %v10221_v23 = vmul.f32 0.2, %v10217_v29  ;;  %v10222_v32 = vmul.f32 0.2, %v10218_v20 }
0x5279   :  { %v10223_v39 = vsel %vm10219_vm14, %v10217_v29, %v10221_v23  ;;  %v10224_v27 = vsel %vm10220_vm10, %v10218_v20, %v10222_v32 }
0x527a   :  { %v10225_v33 = vpack.c.bf16 %v10224_v27, %v10223_v39  ;;  %v18455_v39 = vld [vmem:[%s21732_s16] sm:$0xff]  }
0x527c   :  { %16951 = vmatpush3.bf16.msra.mxu1 %v10225_v33 }
0x527d   :  { %16956 = vmatprep.subr.bf16.mxu1 %v19283_v14 }
0x527f   :  { %16953 = vmatmul.mubr.msk.bf16.vlgmr.msra.gmra.mrb[188].mxu1 %vm1894_vm9, %v20973_v60 }
0x5280   :  { %16957 = vmatpush3.bf16.msra.mxu1 %v18443_v37  ;;  %16964 = vmatprep.mubr.msk.bf16.mxu1 %vm19282_vm2, %v19283_v14 }
0x5281   :  { %16958 = vmatprep.subr.bf16.mxu1 %v19283_v14 }
0x5284   :  { %16959 = vmatpush3.bf16.msra.mxu1 %v18444_v38  ;;  %v10544_v38 = vld [vmem:[%s21733_s4] sm:$0x3] }
0x5285   :  { %16960 = vmatprep.subr.bf16.mxu1 %v19283_v14 }
0x5288   :  { %16961 = vmatpush3.bf16.msra.mxu1 %v18445_v40 }
0x5289   :  { %16962 = vmatprep.subr.bf16.mxu1 %v19283_v14 }
0x528c   :  { %16963 = vmatpush3.bf16.msra.mxu1 %v18446_v41 }
0x528d   :  { %16968 = vmatprep.subr.bf16.mxu1 %v19283_v14 }
0x5352   :  { %v10269_v60 = vpop.f32.mrb[188].mxu1 }
0x5353   :  { %v16954_v59 = vpop.f32.mrb[189].mxu1 }
0x5354   :  { %v10272_v42 = vpop.f32.mrb[190].mxu1 }
0x5355   :  { %v10276_v44 = vpack.c.bf16 %v10272_v42, %v10269_v60  ;;  %v16955_v51 = vpop.f32.mrb[191].mxu1  ;;  %v10875_v60 = vrot.slane %v10544_v38, %v19881_v35 }
0x5357   :  { %16965 = vmatmul.mubr.msk.bf16.vlgmr.msra.gmra.mrb[172].mxu1 %vm1833_vm8, %v10276_v44 }
0x5358   :  { %16969 = vmatpush3.bf16.msra.mxu1 %v18447_v19  ;;  %16976 = vmatprep.mubr.msk.bf16.mxu1 %vm19282_vm2, %v19283_v14  ;;  %v10881_v19 = vrot.slane %v10544_v38, %v19903_v6 }
0x5359   :  { %16970 = vmatprep.subr.bf16.mxu1 %v19283_v14 }
0x535c   :  { %16971 = vmatpush3.bf16.msra.mxu1 %v18448_v4 }
0x535d   :  { %16972 = vmatprep.subr.bf16.mxu1 %v19283_v14 }
0x5360   :  { %16973 = vmatpush3.bf16.msra.mxu1 %v18449_v57 }
0x5361   :  { %16974 = vmatprep.subr.bf16.mxu1 %v19283_v14 }
0x5364   :  { %16975 = vmatpush3.bf16.msra.mxu1 %v18450_v55 }
0x5365   :  { %16980 = vmatprep.subr.bf16.mxu1 %v19283_v14 }
0x5367   :  { %16977 = vmatmul.mubr.msk.bf16.vlgmr.msra.gmra.mrb[172].mxu1 %vm1833_vm8, %v10225_v33 }
0x5368   :  { %16981 = vmatpush3.bf16.msra.mxu1 %v10225_v33  ;;  %16982 = vmatprep.mubr.msk.bf16.mxu1 %vm19282_vm2, %v19283_v14 }
0x5369   :  { %16986 = vmatprep.subr.bf16.mxu1 %v19283_v14 }
0x536f   :  { %16983 = vmatmul.mubr.msk.bf16.vlgmr.msra.gmra.mrb[192].mxu1 %vm1894_vm9, %v20985_v9 }
0x5370   :  { %16987 = vmatpush3.bf16.msra.mxu1 %v18451_v56  ;;  %16994 = vmatprep.mubr.msk.bf16.mxu1 %vm19282_vm2, %v19283_v14 }
0x5371   :  { %16988 = vmatprep.subr.bf16.mxu1 %v19283_v14 }
0x5374   :  { %16989 = vmatpush3.bf16.msra.mxu1 %v18452_v34 }
0x5375   :  { %16990 = vmatprep.subr.bf16.mxu1 %v19283_v14 }
0x5378   :  { %16991 = vmatpush3.bf16.msra.mxu1 %v18453_v12 }
0x5379   :  { %16992 = vmatprep.subr.bf16.mxu1 %v19283_v14 }
0x537c   :  { %16993 = vmatpush3.bf16.msra.mxu1 %v18454_v52 }
0x537d   :  { %17041 = vmatprep.subr.mxu1 %v19283_v14 }
0x5442   :  { %v10455_v46 = vpop.f32.mrb[192].mxu1 }
0x5443   :  { %v16984_v9 = vpop.f32.mrb[193].mxu1 }
0x5444   :  { %v10458_v45 = vpop.f32.mrb[194].mxu1  ;;  %v18456_v9 = vld [vmem:[%s21732_s16 + $0x8] sm:$0xff]  }
0x5445   :  { %v10462_v47 = vpack.c.bf16 %v10458_v45, %v10455_v46  ;;  %v16985_v28 = vpop.f32.mrb[195].mxu1  ;;  %v18457_v46 = vld [vmem:[%s21734_s20] sm:$0xff]   ;;  %v18458_v45 = vld [vmem:[%s21734_s20 + $0x8] sm:$0xff]  }
0x5446   :  { %v18460_v28 = vld [vmem:[%s21734_s20 + $0x18] sm:$0xff]  }
0x5447   :  { %16995 = vmatmul.mubr.msk.bf16.vlgmr.msra.gmra.mrb[172].mxu1 %vm1833_vm8, %v10462_v47  ;;  %v18459_v47 = vld [vmem:[%s21734_s20 + $0x10] sm:$0xff]  }
0x5448   :  { %17042 = vmatpush3.msra.mxu1 %v21085_v1  ;;  %17043 = vmatprep.mubr.msk.f32.mxu1 %vm19282_vm2, %v19283_v14 }
0x551a   :  { %v10533_v49 = vpop.f32.mrb[172].mxu1 }
0x551b   :  { %v16996_v48 = vpop.f32.mrb[173].mxu1  ;;  %v10545_v5 = vsel %vm1833_vm8, %v10533_v49, 0.0 }
0x551c   :  { %v10536_v50 = vpop.f32.mrb[174].mxu1 }
0x551d   :  { %v10546_v54 = vsel %vm1833_vm8, %v10536_v50, 0.0  ;;  %v16997_v58 = vpop.f32.mrb[175].mxu1 }
0x551e   :  { %v10547_v22 = vadd.f32 %v10546_v54, %v10545_v5 }
0x5520   :  { %v10548_v30 = vrot.slane %v10547_v22, 4 }
0x5522   :  { %v10549_v8 = vadd.f32 %v10548_v30, %v10547_v22  ;;  %v21196_v22 = vld [vmem:[%s21735_s26] sm:$0xff]  }
0x5523   :  { %v21201_v30 = vld [vmem:[%s21735_s26 + $0x20] sm:$0xff]  }
0x5524   :  { %v10550_v62 = vrot.slane %v10549_v8, 2 }
0x5526   :  { %v10551_v7 = vadd.f32 %v10550_v62, %v10549_v8 }
0x5528   :  { %v10552_v24 = vrot.slane %v10551_v7, 1 }
0x552a   :  { %v10553_v10 = vadd.f32 %v10552_v24, %v10551_v7 }
0x552c   :  { %v10554_v11 = vmul.f32 0.0625, %v10553_v10 }
0x552e   :  { %17015 = vmatmul.mubr.msk.f32.vlgmr.msra.gmra.mrb[146].mxu0 %vm1833_vm8, %v10554_v11 }
0x552f   :  { %17018 = vmatpush3.msra.mxu0 %v21085_v1  ;;  %17019 = vmatprep.mubr.msk.f32.mxu0 %vm19282_vm2, %v19283_v14 }
0x5530   :  { %17892 = vmatprep.subr.bf16.mxu0 %v19281_v21 }
0x5601   :  { %v10624_v13 = vpop.f32.mrb[146].mxu0 }
0x5602   :  { %v17016_v15 = vpop.f32.mrb[147].mxu0  ;;  %17020 = vmatmul.mubr.msk.f32.vlgmr.msra.gmra.mrb[164].mxu0 %vm1365_vm3, %v10624_v13  ;;  %v18465_v13 = vld [vmem:[%s21736_s28] sm:$0xff]  }
0x5603   :  { %17894 = vmatpush3.bf16.msra.mxu0 %v21049_v43  ;;  %17038 = vmatprep.mubr.msk.f32.mxu0 %vm19282_vm2, %v19283_v14  ;;  %v21229_v15 = vld [vmem:[%s21735_s26 + $0x8] sm:$0xff]  }
0x5604   :  { %17895 = vmatprep.subr.bf16.mxu0 %v19281_v21 }
0x5607   :  { %17897 = vmatpush3.bf16.msra.mxu0 %v21057_v3 }
0x5608   :  { %17898 = vmatprep.subr.bf16.mxu0 %v19281_v21 }
0x560b   :  { %17900 = vmatpush3.bf16.msra.mxu0 %v21065_v36 }
0x560c   :  { %17901 = vmatprep.subr.bf16.mxu0 %v19281_v21 }
0x560f   :  { %17903 = vmatpush3.bf16.msra.mxu0 %v21073_v31 }
0x56d5   :  { %v10697_v1 = vpop.f32.mrb[164].mxu0 }
0x56d6   :  { %v10704_v53 = vrot.slane %v10697_v1, %v19881_v35  ;;  %v17021_v16 = vpop.f32.mrb[165].mxu0  ;;  %v21232_v1 = vld [vmem:[%s21735_s26 + $0x28] sm:$0xff]  }
0x56d7   :  { %v18467_v16 = vld [vmem:[%s21736_s28 + $0x10] sm:$0xff]  }
0x56d8   :  { %v10705_v43 = vsub.f32 %v10533_v49, %v10704_v53  ;;  %v10706_v25 = vsub.f32 %v10536_v50, %v10704_v53  ;;  %v18466_v53 = vld [vmem:[%s21736_s28 + $0x8] sm:$0xff]  }
0x56da   :  { %v10707_v17 = vmul.f32 %v10705_v43, %v10705_v43  ;;  %v10708_v18 = vmul.f32 %v10706_v25, %v10706_v25 }
0x56dc   :  { %v10709_v61 = vsel %vm1833_vm8, %v10707_v17, 0.0  ;;  %v10710_v3 = vsel %vm1833_vm8, %v10708_v18, 0.0  ;;  %v18470_v17 = vld [vmem:[%s21736_s28 + $0x28] sm:$0xff]   ;;  %v18471_v18 = vld [vmem:[%s21736_s28 + $0x30] sm:$0xff]  }
0x56dd   :  { %v10711_v0 = vadd.f32 %v10710_v3, %v10709_v61  ;;  %v18472_v61 = vld [vmem:[%s21736_s28 + $0x38] sm:$0xff]   ;;  %v18473_v3 = vld [vmem:[%s21736_s28 + $0x40] sm:$0xff]  }
0x56df   :  { %v10712_v63 = vrot.slane %v10711_v0, 4 }
0x56e1   :  { %v10713_v36 = vadd.f32 %v10712_v63, %v10711_v0  ;;  %v11539_v0 = vld [vmem:[%s21697_s7] sm:$0xff]  ;;  %v11540_v63 = vld [vmem:[%s21697_s7 + $0x8] sm:$0xff] }
0x56e3   :  { %v10714_v2 = vrot.slane %v10713_v36, 2 }
0x56e5   :  { %v10715_v26 = vadd.f32 %v10714_v2, %v10713_v36  ;;  %v11541_v36 = vld [vmem:[%s21697_s7 + $0x10] sm:$0xff]  ;;  %v21254_v2 = vpack.c.bf16 %v11540_v63, %v11539_v0 }
0x56e7   :  { %v10716_v31 = vrot.slane %v10715_v26, 1 }
0x56e9   :  { %v10717_v29 = vadd.f32 %v10716_v31, %v10715_v26  ;;  %v11542_v26 = vld [vmem:[%s21697_s7 + $0x18] sm:$0xff] }
0x56ea   :  { %v21258_v31 = vpack.c.bf16 %v11542_v26, %v11541_v36 }
0x56eb   :  { %v10718_v20 = vmul.f32 0.0625, %v10717_v29 }
0x56ed   :  { %17039 = vmatmul.mubr.msk.f32.vlgmr.msra.gmra.mrb[166].mxu0 %vm1833_vm8, %v10718_v20 }
0x56ee   :  { %17068 = vmatprep.mubr.msk.bf16.mxu0 %vm587_vm0, %v21196_v22 }
0x57c0   :  { %v10788_v23 = vpop.f32.mrb[166].mxu0 }
0x57c1   :  { %v17040_v32 = vpop.f32.mrb[167].mxu0  ;;  %17044 = vmatmul.mubr.msk.f32.vlgmr.msra.gmra.mrb[186].mxu1 %vm1365_vm3, %v10788_v23 }
0x57c2   :  { %17048 = vmatprep.mubr.msk.bf16.mxu1 %vm1894_vm9, %v18455_v39 }
0x5894   :  { %v10861_v27 = vpop.f32.mrb[186].mxu1 }
0x5895   :  { %v10862_v33 = vadd.f32 1e-05, %v10861_v27  ;;  %v17045_v37 = vpop.f32.mrb[187].mxu1 }
0x5897   :  { %18587 = vrsqrt.f32 %v10862_v33 }
0x58a1   :  { %v18588_v40 = vpop.eup %18587 }
0x58a2   :  { %v10869_v41 = vrot.slane %v18588_v40, %v19881_v35 }
0x58a4   :  { %v10870_v59 = vmul.f32 %v10869_v41, %v10705_v43  ;;  %v10871_v42 = vmul.f32 %v10869_v41, %v10706_v25  ;;  %v18468_v43 = vld [vmem:[%s21736_s28 + $0x18] sm:$0xff]   ;;  %v18469_v25 = vld [vmem:[%s21736_s28 + $0x20] sm:$0xff]  }
0x58a6   :  { %v10876_v44 = vmul.f32 %v10875_v60, %v10870_v59  ;;  %v10877_v51 = vmul.f32 %v10875_v60, %v10871_v42  ;;  %v18474_v59 = vld [vmem:[%s21736_s28 + $0x48] sm:$0xff]   ;;  %v18475_v42 = vld [vmem:[%s21736_s28 + $0x50] sm:$0xff]  }
0x58a8   :  { %v10882_v4 = vadd.f32 %v10881_v19, %v10876_v44  ;;  %v10883_v57 = vadd.f32 %v10881_v19, %v10877_v51  ;;  %v18476_v19 = vld [vmem:[%s21736_s28 + $0x58] sm:$0xff]   ;;  %v18477_v44 = vld [vmem:[%s21736_s28 + $0x60] sm:$0xff]   ;;  %v18478_v51 = vld [vmem:[%s21736_s28 + $0x68] sm:$0xff]  }
0x58aa   :  { %vm10884_vm11 = vcmp.ge.f32.partialorder %v10882_v4, 0.0  ;;  %vm10885_vm12 = vcmp.ge.f32.partialorder %v10883_v57, 0.0  ;;  %v10886_v55 = vmul.f32 0.2, %v10882_v4  ;;  %v10887_v56 = vmul.f32 0.2, %v10883_v57 }
0x58ac   :  { %v10888_v34 = vsel %vm10884_vm11, %v10882_v4, %v10886_v55  ;;  %v10889_v12 = vsel %vm10885_vm12, %v10883_v57, %v10887_v56  ;;  %v18479_v4 = vld [vmem:[%s21736_s28 + $0x70] sm:$0xff]   ;;  %v18480_v57 = vld [vmem:[%s21736_s28 + $0x78] sm:$0xff]   ;;  %v18481_v55 = vld [vmem:[%s21736_s28 + $0x80] sm:$0xff]  }
0x58ad   :  { %v10894_v52 = vpack.c.bf16 %v10889_v12, %v10888_v34  ;;  %v18482_v56 = vld [vmem:[%s21736_s28 + $0x88] sm:$0xff]   ;;  %v18483_v34 = vld [vmem:[%s21736_s28 + $0x90] sm:$0xff]   ;;  %v18484_v12 = vld [vmem:[%s21736_s28 + $0x98] sm:$0xff]  }
0x58af   :  { %17046 = vmatprep.subr.bf16.mxu1 %v10894_v52 }
0x58b0   :  { %17047 = vmatpush3.bf16.msra.mxu1 %v10894_v52  ;;  %v18485_v52 = vld [vmem:[%s21736_s28 + $0xa0] sm:$0xff]  }
0x58b1   :  { %17052 = vmatprep.subr.bf16.mxu1 %v18457_v46 }
0x58b3   :  { %17049 = vmatmul.mubr.msk.bf16.vlgmr.msra.gmra.mrb[196].mxu1 %vm1894_vm9, %v18456_v9  ;;  %v18487_v9 = vld [vmem:[%s21736_s28 + $0xb0] sm:$0xff]  }
0x58b4   :  { %17053 = vmatpush3.bf16.msra.mxu1 %v18457_v46  ;;  %v18486_v46 = vld [vmem:[%s21736_s28 + $0xa8] sm:$0xff]  }
0x58b5   :  { %17054 = vmatprep.subr.bf16.mxu1 %v18458_v45 }
0x58b8   :  { %17055 = vmatpush3.bf16.msra.mxu1 %v18458_v45  ;;  %v18488_v45 = vld [vmem:[%s21736_s28 + $0xb8] sm:$0xff]  }
0x58b9   :  { %17056 = vmatprep.subr.bf16.mxu1 %v18459_v47 }
0x58bc   :  { %17057 = vmatpush3.bf16.msra.mxu1 %v18459_v47  ;;  %v11543_v47 = vld [vmem:[%s21697_s7 + $0x20] sm:$0xff] }
0x58bd   :  { %17058 = vmatprep.subr.bf16.mxu1 %v18460_v28 }
0x58c0   :  { %17059 = vmatpush3.bf16.msra.mxu1 %v18460_v28  ;;  %v11544_v28 = vld [vmem:[%s21697_s7 + $0x28] sm:$0xff] }
0x5986   :  { %v17050_v49 = vpop.f32.mrb[196].mxu1 }
0x5987   :  { %v10945_v48 = vpop.f32.mrb[197].mxu1 }
0x5988   :  { %v17051_v50 = vpop.f32.mrb[198].mxu1 }
0x5989   :  { %v10961_v5 = vpack.c.bf16 %v17051_v50, %v17050_v49  ;;  %v10948_v54 = vpop.f32.mrb[199].mxu1  ;;  %v21284_v49 = vpack.c.bf16 %v11544_v28, %v11543_v47  ;;  %v11546_v50 = vld [vmem:[%s21697_s7 + $0x38] sm:$0xff] }
0x598a   :  { %v10960_v58 = vpack.c.bf16 %v10948_v54, %v10945_v48  ;;  %v11545_v48 = vld [vmem:[%s21697_s7 + $0x30] sm:$0xff]  ;;  %v11547_v54 = vld [vmem:[%s21697_s7 + $0x40] sm:$0xff] }
0x598c   :  { %17060 = vmatprep.mubr.msk.bf16.mxu1 %vm1833_vm8, %v10960_v58  ;;  %v11548_v58 = vld [vmem:[%s21697_s7 + $0x48] sm:$0xff] }
0x598d   :  { %17061 = vmatmul.mubr.msk.bf16.vlgmr.msra.gmra.mrb[200].mxu1 %vm1833_vm8, %v10961_v5  ;;  %v21290_v5 = vpack.c.bf16 %v11546_v50, %v11545_v48 }
0x598e   :  { %17116 = vmatprep.mubr.msk.bf16.mxu1 %vm587_vm0, %v21201_v30 }
0x5a60   :  { %v21205_v8 = vpop.f32.mrb[200].mxu1 }
0x5a61   :  { %v21207_v62 = vpop.f32.mrb[201].mxu1 }
0x5a62   :  { %v21209_v7 = vpop.f32.mrb[202].mxu1 }
0x5a63   :  { %v21213_v24 = vpack.c.bf16 %v21209_v7, %v21205_v8  ;;  %v21215_v10 = vpop.f32.mrb[203].mxu1 }
0x5a64   :  { %v21219_v11 = vpack.c.bf16 %v21215_v10, %v21207_v62 }
0x5a66   :  { %17064 = vmatprep.subr.bf16.mxu0 %v21219_v11  ;;  %17112 = vmatprep.subr.bf16.mxu1 %v21219_v11 }
0x5a67   :  { %17065 = vmatpush3.bf16.msra.mxu0 %v21219_v11  ;;  %17113 = vmatpush3.bf16.msra.mxu1 %v21219_v11 }
0x5a68   :  { %17066 = vmatprep.subr.bf16.mxu0 %v21213_v24  ;;  %17114 = vmatprep.subr.bf16.mxu1 %v21213_v24 }
0x5a6b   :  { %17067 = vmatpush3.bf16.msra.mxu0 %v21213_v24  ;;  %17115 = vmatpush3.bf16.msra.mxu1 %v21213_v24 }
0x5a6c   :  { %17072 = vmatprep.subr.bf16.mxu0 %v18465_v13  ;;  %17904 = vmatprep.subr.bf16.mxu1 %v19281_v21 }
0x5a6e   :  { %17069 = vmatmul.mubr.msk.bf16.vlgmr.msra.gmra.mrb[168].mxu0 %vm587_vm0, %v21229_v15  ;;  %17117 = vmatmul.mubr.msk.bf16.vlgmr.msra.gmra.mrb[204].mxu1 %vm587_vm0, %v21232_v1 }
0x5a6f   :  { %17073 = vmatpush3.bf16.msra.mxu0 %v18465_v13  ;;  %17172 = vmatprep.mubr.msk.f32.mxu1 %vm19282_vm2, %v19283_v14 }
0x5a70   :  { %17074 = vmatprep.subr.bf16.mxu0 %v18466_v53  ;;  %17906 = vmatpush3.bf16.msra.mxu1 %v21254_v2 }
0x5a71   :  { %17907 = vmatprep.subr.bf16.mxu1 %v19281_v21 }
0x5a73   :  { %17075 = vmatpush3.bf16.msra.mxu0 %v18466_v53  ;;  %v11551_v53 = vld [vmem:[%s21697_s7 + $0x60] sm:$0xff] }
0x5a74   :  { %17076 = vmatprep.subr.bf16.mxu0 %v18467_v16  ;;  %17909 = vmatpush3.bf16.msra.mxu1 %v21258_v31 }
0x5a75   :  { %17910 = vmatprep.subr.bf16.mxu1 %v19281_v21 }
0x5a77   :  { %17077 = vmatpush3.bf16.msra.mxu0 %v18467_v16  ;;  %v11552_v16 = vld [vmem:[%s21697_s7 + $0x68] sm:$0xff] }
0x5a78   :  { %17078 = vmatprep.subr.bf16.mxu0 %v18468_v43  ;;  %17912 = vmatpush3.bf16.msra.mxu1 %v21284_v49 }
0x5a79   :  { %17913 = vmatprep.subr.bf16.mxu1 %v19281_v21 }
0x5a7b   :  { %17079 = vmatpush3.bf16.msra.mxu0 %v18468_v43  ;;  %v21308_v43 = vpack.c.bf16 %v11552_v16, %v11551_v53 }
0x5a7c   :  { %17080 = vmatprep.subr.bf16.mxu0 %v18469_v25  ;;  %17915 = vmatpush3.bf16.msra.mxu1 %v21290_v5 }
0x5a7d   :  { %17916 = vmatprep.subr.bf16.mxu1 %v19281_v21 }
0x5a7f   :  { %17081 = vmatpush3.bf16.msra.mxu0 %v18469_v25  ;;  %v11553_v25 = vld [vmem:[%s21697_s7 + $0x70] sm:$0xff] }
0x5a80   :  { %17082 = vmatprep.subr.bf16.mxu0 %v18470_v17 }
0x5a83   :  { %17083 = vmatpush3.bf16.msra.mxu0 %v18470_v17  ;;  %v11554_v17 = vld [vmem:[%s21697_s7 + $0x78] sm:$0xff] }
0x5a84   :  { %17084 = vmatprep.subr.bf16.mxu0 %v18471_v18 }
0x5a87   :  { %17085 = vmatpush3.bf16.msra.mxu0 %v18471_v18  ;;  %v21313_v18 = vpack.c.bf16 %v11554_v17, %v11553_v25 }
0x5a88   :  { %17086 = vmatprep.subr.bf16.mxu0 %v18472_v61 }
0x5a8b   :  { %17087 = vmatpush3.bf16.msra.mxu0 %v18472_v61 }
0x5a8c   :  { %17092 = vmatprep.subr.bf16.mxu0 %v18473_v3 }
0x5b41   :  { %v17070_v29 = vpop.f32.mrb[168].mxu0  ;;  %v17118_v20 = vpop.f32.mrb[204].mxu1 }
0x5b42   :  { %v11122_v23 = vpop.f32.mrb[169].mxu0  ;;  %v11404_v32 = vpop.f32.mrb[205].mxu1 }
0x5b43   :  { %v17071_v39 = vpop.f32.mrb[170].mxu0  ;;  %v17119_v27 = vpop.f32.mrb[206].mxu1 }
0x5b44   :  { %v11138_v33 = vpack.c.bf16 %v17071_v39, %v17070_v29  ;;  %v11125_v37 = vpop.f32.mrb[171].mxu0  ;;  %v11420_v38 = vpack.c.bf16 %v17119_v27, %v17118_v20  ;;  %v11407_v40 = vpop.f32.mrb[207].mxu1 }
0x5b45   :  { %v11137_v41 = vpack.c.bf16 %v11125_v37, %v11122_v23  ;;  %v11419_v60 = vpack.c.bf16 %v11407_v40, %v11404_v32 }
0x5b47   :  { %17088 = vmatprep.mubr.bf16.mxu0 %v11137_v41 }
0x5b48   :  { %17089 = vmatmul.mubr.bf16.vlgmr.msra.gmra.mrb[172].mxu0 %v11138_v33 }
0x5b49   :  { %17093 = vmatpush3.bf16.msra.mxu0 %v18473_v3  ;;  %17108 = vmatprep.mubr.bf16.mxu0 %v21219_v11  ;;  %v11550_v11 = vld [vmem:[%s21697_s7 + $0x58] sm:$0xff] }
0x5b4a   :  { %17094 = vmatprep.subr.bf16.mxu0 %v18474_v59 }
0x5b4d   :  { %17095 = vmatpush3.bf16.msra.mxu0 %v18474_v59 }
0x5b4e   :  { %17096 = vmatprep.subr.bf16.mxu0 %v18475_v42 }
0x5b51   :  { %17097 = vmatpush3.bf16.msra.mxu0 %v18475_v42 }
0x5b52   :  { %17098 = vmatprep.subr.bf16.mxu0 %v18476_v19 }
0x5b55   :  { %17099 = vmatpush3.bf16.msra.mxu0 %v18476_v19 }
0x5b56   :  { %17100 = vmatprep.subr.bf16.mxu0 %v18477_v44 }
0x5b59   :  { %17101 = vmatpush3.bf16.msra.mxu0 %v18477_v44 }
0x5b5a   :  { %17102 = vmatprep.subr.bf16.mxu0 %v18478_v51 }
0x5b5d   :  { %17103 = vmatpush3.bf16.msra.mxu0 %v18478_v51 }
0x5b5e   :  { %17104 = vmatprep.subr.bf16.mxu0 %v18479_v4 }
0x5b61   :  { %17105 = vmatpush3.bf16.msra.mxu0 %v18479_v4 }
0x5b62   :  { %17106 = vmatprep.subr.bf16.mxu0 %v18480_v57 }
0x5b65   :  { %17107 = vmatpush3.bf16.msra.mxu0 %v18480_v57 }
0x5b66   :  { %17120 = vmatprep.subr.bf16.mxu0 %v18481_v55 }
0x5b68   :  { %17109 = vmatmul.mubr.bf16.vlgmr.msra.gmra.mrb[172].mxu0 %v21213_v24  ;;  %v11549_v24 = vld [vmem:[%s21697_s7 + $0x50] sm:$0xff]  ;;  %s21737_s7 = sld [smem:[#allocation106_spill]] }
0x5b69   :  { %17121 = vmatpush3.bf16.msra.mxu0 %v18481_v55  ;;  %17136 = vmatprep.mubr.bf16.mxu0 %v11419_v60  ;;  %v21302_v13 = vpack.c.bf16 %v11550_v11, %v11549_v24 }
0x5b6a   :  { %17122 = vmatprep.subr.bf16.mxu0 %v18482_v56 }
0x5b6d   :  { %17123 = vmatpush3.bf16.msra.mxu0 %v18482_v56 }
0x5b6e   :  { %17124 = vmatprep.subr.bf16.mxu0 %v18483_v34  ;;  %v11556_v25 = vld [vmem:[%s21737_s7] sm:$0x3] }
0x5b71   :  { %17125 = vmatpush3.bf16.msra.mxu0 %v18483_v34 }
0x5b72   :  { %17126 = vmatprep.subr.bf16.mxu0 %v18484_v12 }
0x5b75   :  { %17127 = vmatpush3.bf16.msra.mxu0 %v18484_v12 }
0x5b76   :  { %17128 = vmatprep.subr.bf16.mxu0 %v18485_v52 }
0x5b79   :  { %17129 = vmatpush3.bf16.msra.mxu0 %v18485_v52 }
0x5b7a   :  { %17130 = vmatprep.subr.bf16.mxu0 %v18486_v46 }
0x5b7d   :  { %17131 = vmatpush3.bf16.msra.mxu0 %v18486_v46 }
0x5b7e   :  { %17132 = vmatprep.subr.bf16.mxu0 %v18487_v9 }
0x5b81   :  { %17133 = vmatpush3.bf16.msra.mxu0 %v18487_v9 }
0x5b82   :  { %17134 = vmatprep.subr.bf16.mxu0 %v18488_v45 }
0x5b85   :  { %17135 = vmatpush3.bf16.msra.mxu0 %v18488_v45 }
0x5b88   :  { %17137 = vmatmul.mubr.bf16.vlgmr.msra.gmra.mrb[172].mxu0 %v11420_v38  ;;  %v21320_v38 = vld [vmem:[#allocation2] sm:$0xff] }
0x5b89   :  { %17272 = vmatprep.mubr.msk.bf16.mxu0 %vm587_vm0, %v21201_v30  ;;  %v21296_v30 = vpack.c.bf16 %v11548_v58, %v11547_v54 }
0x5b8b   :  { %17918 = vmatpush3.bf16.msra.mxu1 %v21296_v30 }
0x5b8c   :  { %17919 = vmatprep.subr.bf16.mxu1 %v19281_v21 }
0x5b8f   :  { %17921 = vmatpush3.bf16.msra.mxu1 %v21302_v13 }
0x5b90   :  { %17922 = vmatprep.subr.bf16.mxu1 %v19281_v21 }
0x5b93   :  { %17924 = vmatpush3.bf16.msra.mxu1 %v21308_v43 }
0x5b94   :  { %17925 = vmatprep.subr.bf16.mxu1 %v19281_v21 }
0x5b97   :  { %17927 = vmatpush3.bf16.msra.mxu1 %v21313_v18 }
0x5b98   :  { %17175 = vmatprep.subr.mxu1 %v19283_v14 }
0x5c5b   :  { %v17138_v61 = vpop.f32.mrb[172].mxu0 }
0x5c5c   :  { %v11520_v3 = vpop.f32.mrb[173].mxu0 }
0x5c5d   :  { %v17139_v0 = vpop.f32.mrb[174].mxu0 }
0x5c5e   :  { %v11523_v63 = vpop.f32.mrb[175].mxu0 }
0x5c5f   :  { %v11557_v36 = vadd.f32 %v11523_v63, %v11520_v3 }
0x5c61   :  { %v11558_v26 = vadd.f32 %v17138_v61, %v11557_v36 }
0x5c63   :  { %v11559_v29 = vadd.f32 %v17139_v0, %v11558_v26 }
0x5c65   :  { %v11560_v20 = vrot.slane %v11559_v29, 4 }
0x5c67   :  { %v11561_v23 = vadd.f32 %v11560_v20, %v11559_v29 }
0x5c69   :  { %v11562_v32 = vrot.slane %v11561_v23, 2 }
0x5c6b   :  { %v11563_v39 = vadd.f32 %v11562_v32, %v11561_v23 }
0x5c6d   :  { %v11564_v27 = vrot.slane %v11563_v39, 1 }
0x5c6f   :  { %v11565_v33 = vadd.f32 %v11564_v27, %v11563_v39 }
0x5c71   :  { %v11566_v37 = vmul.f32 0.03125, %v11565_v33 }
0x5c73   :  { %17173 = vmatmul.mubr.f32.vlgmr.msra.gmra.mrb[208].mxu1 %v11566_v37 }
0x5c74   :  { %17177 = vmatprep.mubr.msk.f32.mxu1 %vm19282_vm2, %v19283_v14  ;;  %17176 = vmatpush3.msra.mxu1 %v21320_v38 }
0x5c75   :  { %17928 = vmatprep.subr.bf16.mxu1 %v19281_v21 }
0x5d46   :  { %v11633_v40 = vpop.f32.mrb[208].mxu1 }
0x5d47   :  { %v17174_v41 = vpop.f32.mrb[209].mxu1  ;;  %17178 = vmatmul.mubr.msk.f32.vlgmr.msra.gmra.mrb[210].mxu1 %vm1365_vm3, %v11633_v40 }
0x5d48   :  { %17930 = vmatpush3.bf16.msra.mxu1 %v21254_v2  ;;  %17212 = vmatprep.mubr.msk.f32.mxu1 %vm19282_vm2, %v19283_v14 }
0x5d49   :  { %17931 = vmatprep.subr.bf16.mxu1 %v19281_v21 }
0x5d4c   :  { %17933 = vmatpush3.bf16.msra.mxu1 %v21258_v31 }
0x5d4d   :  { %17934 = vmatprep.subr.bf16.mxu1 %v19281_v21 }
0x5d50   :  { %17936 = vmatpush3.bf16.msra.mxu1 %v21284_v49 }
0x5d51   :  { %17937 = vmatprep.subr.bf16.mxu1 %v19281_v21 }
0x5d54   :  { %17939 = vmatpush3.bf16.msra.mxu1 %v21290_v5 }
0x5d55   :  { %17940 = vmatprep.subr.bf16.mxu1 %v19281_v21 }
0x5d58   :  { %17942 = vmatpush3.bf16.msra.mxu1 %v21296_v30 }
0x5d59   :  { %17943 = vmatprep.subr.bf16.mxu1 %v19281_v21 }
0x5d5c   :  { %17945 = vmatpush3.bf16.msra.mxu1 %v21302_v13 }
0x5d5d   :  { %17946 = vmatprep.subr.bf16.mxu1 %v19281_v21 }
0x5d60   :  { %17948 = vmatpush3.bf16.msra.mxu1 %v21308_v43 }
0x5d61   :  { %17949 = vmatprep.subr.bf16.mxu1 %v19281_v21 }
0x5d64   :  { %17951 = vmatpush3.bf16.msra.mxu1 %v21313_v18 }
0x5d65   :  { %17215 = vmatprep.subr.mxu1 %v19283_v14 }
0x5e1a   :  { %v11706_v60 = vpop.f32.mrb[210].mxu1 }
0x5e1b   :  { %v11713_v59 = vrot.slane %v11706_v60, %v19881_v35  ;;  %v17179_v42 = vpop.f32.mrb[211].mxu1 }
0x5e1d   :  { %v11714_v19 = vsub.f32 %v11520_v3, %v11713_v59  ;;  %v11715_v44 = vsub.f32 %v11523_v63, %v11713_v59  ;;  %v11716_v51 = vsub.f32 %v17138_v61, %v11713_v59  ;;  %v11717_v4 = vsub.f32 %v17139_v0, %v11713_v59 }
0x5e1e   :  { %v11887_v3 = vrot.slane %v11556_v25, %v19881_v35  ;;  %v11895_v0 = vrot.slane %v11556_v25, %v19903_v6 }
0x5e1f   :  { %v11718_v57 = vmul.f32 %v11714_v19, %v11714_v19  ;;  %v11719_v55 = vmul.f32 %v11715_v44, %v11715_v44  ;;  %v11720_v56 = vmul.f32 %v11716_v51, %v11716_v51  ;;  %v11721_v12 = vmul.f32 %v11717_v4, %v11717_v4 }
0x5e21   :  { %v11722_v34 = vadd.f32 %v11719_v55, %v11718_v57  ;;  %v18489_v55 = vld [vmem:[%s21738_s24] sm:$0xff]  }
0x5e23   :  { %v11723_v52 = vadd.f32 %v11722_v34, %v11720_v56  ;;  %v18490_v56 = vld [vmem:[%s21738_s24 + $0x8] sm:$0xff]   ;;  %v18491_v34 = vld [vmem:[%s21738_s24 + $0x10] sm:$0xff]  }
0x5e25   :  { %v11724_v46 = vadd.f32 %v11723_v52, %v11721_v12  ;;  %v18494_v12 = vld [vmem:[%s21738_s24 + $0x28] sm:$0xff]   ;;  %v18495_v52 = vld [vmem:[%s21738_s24 + $0x30] sm:$0xff]  }
0x5e27   :  { %v11725_v9 = vrot.slane %v11724_v46, 4 }
0x5e29   :  { %v11726_v45 = vadd.f32 %v11725_v9, %v11724_v46  ;;  %v18496_v46 = vld [vmem:[%s21738_s24 + $0x38] sm:$0xff]   ;;  %v18497_v9 = vld [vmem:[%s21738_s24 + $0x40] sm:$0xff]  }
0x5e2b   :  { %v11727_v47 = vrot.slane %v11726_v45, 2 }
0x5e2d   :  { %v11728_v28 = vadd.f32 %v11727_v47, %v11726_v45 }
0x5e2f   :  { %v11729_v48 = vrot.slane %v11728_v28, 1 }
0x5e31   :  { %v11730_v50 = vadd.f32 %v11729_v48, %v11728_v28 }
0x5e33   :  { %v11731_v54 = vmul.f32 0.03125, %v11730_v50 }
0x5e35   :  { %17213 = vmatmul.mubr.f32.vlgmr.msra.gmra.mrb[212].mxu1 %v11731_v54 }
0x5e36   :  { %17216 = vmatpush3.msra.mxu1 %v21320_v38  ;;  %17217 = vmatprep.mubr.msk.f32.mxu1 %vm19282_vm2, %v19283_v14 }
0x5f08   :  { %v11798_v58 = vpop.f32.mrb[212].mxu1 }
0x5f09   :  { %v17214_v24 = vpop.f32.mrb[213].mxu1  ;;  %17218 = vmatmul.mubr.msk.f32.vlgmr.msra.gmra.mrb[214].mxu1 %vm1365_vm3, %v11798_v58 }
0x5f0a   :  { %17224 = vmatprep.mubr.msk.bf16.mxu1 %vm587_vm0, %v21196_v22 }
0x5fdc   :  { %v11871_v11 = vpop.f32.mrb[214].mxu1 }
0x5fdd   :  { %v11872_v53 = vadd.f32 1e-05, %v11871_v11  ;;  %v17219_v16 = vpop.f32.mrb[215].mxu1 }
0x5fdf   :  { %18589 = vrsqrt.f32 %v11872_v53 }
0x5fe9   :  { %v18590_v17 = vpop.eup %18589 }
0x5fea   :  { %v11879_v61 = vrot.slane %v18590_v17, %v19881_v35  ;;  %v18498_v17 = vld [vmem:[%s21738_s24 + $0x48] sm:$0xff]  }
0x5fec   :  { %v11880_v63 = vmul.f32 %v11879_v61, %v11714_v19  ;;  %v11881_v36 = vmul.f32 %v11879_v61, %v11715_v44  ;;  %v11882_v26 = vmul.f32 %v11879_v61, %v11716_v51  ;;  %v11883_v29 = vmul.f32 %v11879_v61, %v11717_v4  ;;  %v18499_v61 = vld [vmem:[%s21738_s24 + $0x50] sm:$0xff]  }
0x5fee   :  { %v11888_v20 = vmul.f32 %v11887_v3, %v11880_v63  ;;  %v11889_v23 = vmul.f32 %v11887_v3, %v11881_v36  ;;  %v11890_v32 = vmul.f32 %v11887_v3, %v11882_v26  ;;  %v11891_v22 = vmul.f32 %v11887_v3, %v11883_v29  ;;  %v18500_v3 = vld [vmem:[%s21738_s24 + $0x58] sm:$0xff]   ;;  %v18502_v63 = vld [vmem:[%s21738_s24 + $0x68] sm:$0xff]   ;;  %v18503_v36 = vld [vmem:[%s21738_s24 + $0x70] sm:$0xff]  }
0x5fef   :  { %v18504_v26 = vld [vmem:[%s21738_s24 + $0x78] sm:$0xff]   ;;  %v18505_v29 = vld [vmem:[%s21738_s24 + $0x80] sm:$0xff]  }
0x5ff0   :  { %v11896_v39 = vadd.f32 %v11895_v0, %v11888_v20  ;;  %v11897_v27 = vadd.f32 %v11895_v0, %v11889_v23  ;;  %v11898_v33 = vadd.f32 %v11895_v0, %v11890_v32  ;;  %v11899_v37 = vadd.f32 %v11895_v0, %v11891_v22  ;;  %v18501_v0 = vld [vmem:[%s21738_s24 + $0x60] sm:$0xff]   ;;  %v18506_v20 = vld [vmem:[%s21738_s24 + $0x88] sm:$0xff]   ;;  %v18507_v23 = vld [vmem:[%s21738_s24 + $0x90] sm:$0xff]  }
0x5ff1   :  { %v18508_v32 = vld [vmem:[%s21738_s24 + $0x98] sm:$0xff]   ;;  %v18509_v22 = vld [vmem:[%s21738_s24 + $0xa0] sm:$0xff]  }
0x5ff2   :  { %vm11900_vm8 = vcmp.ge.f32.partialorder %v11896_v39, 0.0  ;;  %vm11901_vm9 = vcmp.ge.f32.partialorder %v11897_v27, 0.0  ;;  %v11904_v40 = vmul.f32 0.2, %v11896_v39  ;;  %v11905_v41 = vmul.f32 0.2, %v11897_v27 }
0x5ff3   :  { %vm11902_vm13 = vcmp.ge.f32.partialorder %v11898_v33, 0.0  ;;  %vm11903_vm15 = vcmp.ge.f32.partialorder %v11899_v37, 0.0  ;;  %v11906_v60 = vmul.f32 0.2, %v11898_v33  ;;  %v11907_v59 = vmul.f32 0.2, %v11899_v37 }
0x5ff4   :  { %v11908_v42 = vsel %vm11900_vm8, %v11896_v39, %v11904_v40  ;;  %v11909_v19 = vsel %vm11901_vm9, %v11897_v27, %v11905_v41  ;;  %v18510_v39 = vld [vmem:[%s21738_s24 + $0xa8] sm:$0xff]   ;;  %v18511_v27 = vld [vmem:[%s21738_s24 + $0xb0] sm:$0xff]  }
0x5ff5   :  { %v21354_v44 = vpack.c.bf16 %v11909_v19, %v11908_v42  ;;  %v11910_v51 = vsel %vm11902_vm13, %v11898_v33, %v11906_v60  ;;  %v11911_v4 = vsel %vm11903_vm15, %v11899_v37, %v11907_v59  ;;  %v18512_v33 = vld [vmem:[%s21738_s24 + $0xb8] sm:$0xff]  }
0x5ff6   :  { %v21358_v57 = vpack.c.bf16 %v11911_v4, %v11910_v51 }
0x5ff7   :  { %17220 = vmatprep.subr.bf16.mxu1 %v21354_v44  ;;  %17268 = vmatprep.subr.bf16.mxu0 %v21354_v44 }
0x5ff8   :  { %17221 = vmatpush3.bf16.msra.mxu1 %v21354_v44  ;;  %17269 = vmatpush3.bf16.msra.mxu0 %v21354_v44 }
0x5ff9   :  { %17222 = vmatprep.subr.bf16.mxu1 %v21358_v57  ;;  %17270 = vmatprep.subr.bf16.mxu0 %v21358_v57 }
0x5ffc   :  { %17223 = vmatpush3.bf16.msra.mxu1 %v21358_v57  ;;  %17271 = vmatpush3.bf16.msra.mxu0 %v21358_v57 }
0x5ffd   :  { %17228 = vmatprep.subr.bf16.mxu1 %v18489_v55  ;;  %17952 = vmatprep.subr.bf16.mxu0 %v19281_v21 }
0x5fff   :  { %17225 = vmatmul.mubr.msk.bf16.vlgmr.msra.gmra.mrb[216].mxu1 %vm587_vm0, %v21229_v15  ;;  %17273 = vmatmul.mubr.msk.bf16.vlgmr.msra.gmra.mrb[176].mxu0 %vm587_vm0, %v21232_v1  ;;  %v18492_v15 = vld [vmem:[%s21738_s24 + $0x18] sm:$0xff]   ;;  %v18493_v1 = vld [vmem:[%s21738_s24 + $0x20] sm:$0xff]  }
0x6000   :  { %17229 = vmatpush3.bf16.msra.mxu1 %v18489_v55  ;;  %17954 = vmatpush3.bf16.msra.mxu0 %v21254_v2 }
0x6001   :  { %17230 = vmatprep.subr.bf16.mxu1 %v18490_v56  ;;  %17955 = vmatprep.subr.bf16.mxu0 %v19281_v21 }
0x6002   :  { %17328 = vmatprep.mubr.msk.f32.mxu0 %vm19282_vm2, %v19283_v14 }
0x6004   :  { %17231 = vmatpush3.bf16.msra.mxu1 %v18490_v56  ;;  %17957 = vmatpush3.bf16.msra.mxu0 %v21258_v31 }
0x6005   :  { %17232 = vmatprep.subr.bf16.mxu1 %v18491_v34  ;;  %17958 = vmatprep.subr.bf16.mxu0 %v19281_v21 }
0x6008   :  { %17233 = vmatpush3.bf16.msra.mxu1 %v18491_v34  ;;  %17960 = vmatpush3.bf16.msra.mxu0 %v21284_v49 }
0x6009   :  { %17234 = vmatprep.subr.bf16.mxu1 %v18492_v15  ;;  %17961 = vmatprep.subr.bf16.mxu0 %v19281_v21 }
0x600c   :  { %17235 = vmatpush3.bf16.msra.mxu1 %v18492_v15  ;;  %17963 = vmatpush3.bf16.msra.mxu0 %v21290_v5 }
0x600d   :  { %17236 = vmatprep.subr.bf16.mxu1 %v18493_v1  ;;  %17964 = vmatprep.subr.bf16.mxu0 %v19281_v21 }
0x6010   :  { %17237 = vmatpush3.bf16.msra.mxu1 %v18493_v1  ;;  %17966 = vmatpush3.bf16.msra.mxu0 %v21296_v30 }
0x6011   :  { %17238 = vmatprep.subr.bf16.mxu1 %v18494_v12  ;;  %17967 = vmatprep.subr.bf16.mxu0 %v19281_v21 }
0x6014   :  { %17239 = vmatpush3.bf16.msra.mxu1 %v18494_v12  ;;  %17969 = vmatpush3.bf16.msra.mxu0 %v21302_v13 }
0x6015   :  { %17240 = vmatprep.subr.bf16.mxu1 %v18495_v52  ;;  %17970 = vmatprep.subr.bf16.mxu0 %v19281_v21 }
0x6018   :  { %17241 = vmatpush3.bf16.msra.mxu1 %v18495_v52  ;;  %17972 = vmatpush3.bf16.msra.mxu0 %v21308_v43 }
0x6019   :  { %17973 = vmatprep.subr.bf16.mxu0 %v19281_v21  ;;  %17242 = vmatprep.subr.bf16.mxu1 %v18496_v46 }
0x601c   :  { %17975 = vmatpush3.bf16.msra.mxu0 %v21313_v18  ;;  %17243 = vmatpush3.bf16.msra.mxu1 %v18496_v46 }
0x601d   :  { %17331 = vmatprep.subr.mxu0 %v19283_v14  ;;  %17248 = vmatprep.subr.bf16.mxu1 %v18497_v9 }
0x60d2   :  { %v17226_v45 = vpop.f32.mrb[216].mxu1  ;;  %v17274_v47 = vpop.f32.mrb[176].mxu0 }
0x60d3   :  { %v11965_v28 = vpop.f32.mrb[217].mxu1  ;;  %v12226_v48 = vpop.f32.mrb[177].mxu0 }
0x60d4   :  { %v17227_v50 = vpop.f32.mrb[218].mxu1  ;;  %v17275_v54 = vpop.f32.mrb[178].mxu0 }
0x60d5   :  { %v11981_v58 = vpack.c.bf16 %v17227_v50, %v17226_v45  ;;  %v11968_v24 = vpop.f32.mrb[219].mxu1  ;;  %v12242_v11 = vpack.c.bf16 %v17275_v54, %v17274_v47  ;;  %v12229_v53 = vpop.f32.mrb[179].mxu0 }
0x60d6   :  { %v11980_v16 = vpack.c.bf16 %v11968_v24, %v11965_v28  ;;  %v12241_v25 = vpack.c.bf16 %v12229_v53, %v12226_v48 }
0x60d8   :  { %17244 = vmatprep.mubr.bf16.mxu1 %v11980_v16  ;;  %v18513_v16 = vld [vmem:[%s21695_s12] sm:$0xff]  }
0x60d9   :  { %17245 = vmatmul.mubr.bf16.vlgmr.msra.gmra.mrb[220].mxu1 %v11981_v58 }
0x60da   :  { %17249 = vmatpush3.bf16.msra.mxu1 %v18497_v9  ;;  %17264 = vmatprep.mubr.bf16.mxu1 %v21354_v44 }
0x60db   :  { %17250 = vmatprep.subr.bf16.mxu1 %v18498_v17 }
0x60de   :  { %17251 = vmatpush3.bf16.msra.mxu1 %v18498_v17 }
0x60df   :  { %17252 = vmatprep.subr.bf16.mxu1 %v18499_v61 }
0x60e2   :  { %17253 = vmatpush3.bf16.msra.mxu1 %v18499_v61 }
0x60e3   :  { %17254 = vmatprep.subr.bf16.mxu1 %v18500_v3 }
0x60e6   :  { %17255 = vmatpush3.bf16.msra.mxu1 %v18500_v3 }
0x60e7   :  { %17256 = vmatprep.subr.bf16.mxu1 %v18501_v0 }
0x60ea   :  { %17257 = vmatpush3.bf16.msra.mxu1 %v18501_v0  ;;  %v12365_v0 = vld [vmem:[%s21739_s19] sm:$0x3] }
0x60eb   :  { %17258 = vmatprep.subr.bf16.mxu1 %v18502_v63 }
0x60ee   :  { %17259 = vmatpush3.bf16.msra.mxu1 %v18502_v63 }
0x60ef   :  { %17260 = vmatprep.subr.bf16.mxu1 %v18503_v36 }
0x60f2   :  { %17261 = vmatpush3.bf16.msra.mxu1 %v18503_v36  ;;  %v12704_v36 = vrot.slane %v12365_v0, %v19903_v6 }
0x60f3   :  { %17262 = vmatprep.subr.bf16.mxu1 %v18504_v26 }
0x60f6   :  { %17263 = vmatpush3.bf16.msra.mxu1 %v18504_v26 }
0x60f7   :  { %17276 = vmatprep.subr.bf16.mxu1 %v18505_v29 }
0x60f9   :  { %17265 = vmatmul.mubr.bf16.vlgmr.msra.gmra.mrb[220].mxu1 %v21358_v57 }
0x60fa   :  { %17277 = vmatpush3.bf16.msra.mxu1 %v18505_v29  ;;  %17292 = vmatprep.mubr.bf16.mxu1 %v12241_v25  ;;  %v18515_v25 = vld [vmem:[%s21695_s12 + $0x10] sm:$0xff]  }
0x60fb   :  { %17278 = vmatprep.subr.bf16.mxu1 %v18506_v20 }
0x60fe   :  { %17279 = vmatpush3.bf16.msra.mxu1 %v18506_v20 }
0x60ff   :  { %17280 = vmatprep.subr.bf16.mxu1 %v18507_v23 }
0x6102   :  { %17281 = vmatpush3.bf16.msra.mxu1 %v18507_v23 }
0x6103   :  { %17282 = vmatprep.subr.bf16.mxu1 %v18508_v32 }
0x6106   :  { %17283 = vmatpush3.bf16.msra.mxu1 %v18508_v32 }
0x6107   :  { %17284 = vmatprep.subr.bf16.mxu1 %v18509_v22 }
0x610a   :  { %17285 = vmatpush3.bf16.msra.mxu1 %v18509_v22 }
0x610b   :  { %17286 = vmatprep.subr.bf16.mxu1 %v18510_v39 }
0x610e   :  { %17287 = vmatpush3.bf16.msra.mxu1 %v18510_v39 }
0x610f   :  { %17288 = vmatprep.subr.bf16.mxu1 %v18511_v27 }
0x6112   :  { %17289 = vmatpush3.bf16.msra.mxu1 %v18511_v27 }
0x6113   :  { %17290 = vmatprep.subr.bf16.mxu1 %v18512_v33 }
0x6116   :  { %17291 = vmatpush3.bf16.msra.mxu1 %v18512_v33 }
0x6119   :  { %17293 = vmatmul.mubr.bf16.vlgmr.msra.gmra.mrb[220].mxu1 %v12242_v11 }
0x611a   :  { %17428 = vmatprep.mubr.msk.bf16.mxu1 %vm587_vm0, %v18515_v25 }
0x61ec   :  { %v17294_v37 = vpop.f32.mrb[220].mxu1 }
0x61ed   :  { %v12363_v40 = vadd.f32 %v17294_v37, %v21205_v8  ;;  %v12342_v41 = vpop.f32.mrb[221].mxu1 }
0x61ee   :  { %v12361_v60 = vadd.f32 %v12342_v41, %v21207_v62  ;;  %v17295_v59 = vpop.f32.mrb[222].mxu1 }
0x61ef   :  { %v12364_v42 = vadd.f32 %v17295_v59, %v21209_v7  ;;  %v12345_v19 = vpop.f32.mrb[223].mxu1 }
0x61f0   :  { %v12362_v44 = vadd.f32 %v12345_v19, %v21215_v10 }
0x61f2   :  { %v12366_v51 = vadd.f32 %v12362_v44, %v12361_v60 }
0x61f4   :  { %v12367_v4 = vadd.f32 %v12366_v51, %v12363_v40 }
0x61f6   :  { %v12368_v57 = vadd.f32 %v12367_v4, %v12364_v42 }
0x61f8   :  { %v12369_v55 = vrot.slane %v12368_v57, 4 }
0x61fa   :  { %v12370_v56 = vadd.f32 %v12369_v55, %v12368_v57  ;;  %v18521_v55 = vld [vmem:[%s21740_s9] sm:$0xff]  }
0x61fc   :  { %v12371_v34 = vrot.slane %v12370_v56, 2 }
0x61fe   :  { %v12372_v15 = vadd.f32 %v12371_v34, %v12370_v56  ;;  %v18514_v56 = vld [vmem:[%s21695_s12 + $0x8] sm:$0xff]   ;;  %v18516_v34 = vld [vmem:[%s21695_s12 + $0x18] sm:$0xff]  }
0x6200   :  { %v12373_v1 = vrot.slane %v12372_v15, 1 }
0x6202   :  { %v12374_v12 = vadd.f32 %v12373_v1, %v12372_v15  ;;  %v18517_v15 = vld [vmem:[%s21695_s12 + $0x30] sm:$0xff]   ;;  %v18522_v1 = vld [vmem:[%s21740_s9 + $0x8] sm:$0xff]  }
0x6204   :  { %v12375_v52 = vmul.f32 0.03125, %v12374_v12  ;;  %v18523_v12 = vld [vmem:[%s21740_s9 + $0x10] sm:$0xff]  }
0x6206   :  { %17329 = vmatmul.mubr.f32.vlgmr.msra.gmra.mrb[180].mxu0 %v12375_v52  ;;  %v18518_v52 = vld [vmem:[%s21695_s12 + $0x38] sm:$0xff]  }
0x6207   :  { %17332 = vmatpush3.msra.mxu0 %v21320_v38  ;;  %17333 = vmatprep.mubr.msk.f32.mxu0 %vm19282_vm2, %v19283_v14 }
0x6208   :  { %17976 = vmatprep.subr.bf16.mxu0 %v19281_v21 }
0x62d9   :  { %v12442_v8 = vpop.f32.mrb[180].mxu0 }
0x62da   :  { %v17330_v62 = vpop.f32.mrb[181].mxu0  ;;  %17334 = vmatmul.mubr.msk.f32.vlgmr.msra.gmra.mrb[182].mxu0 %vm1365_vm3, %v12442_v8  ;;  %v18519_v8 = vld [vmem:[%s21695_s12 + $0x40] sm:$0xff]  }
0x62db   :  { %17978 = vmatpush3.bf16.msra.mxu0 %v21254_v2  ;;  %17368 = vmatprep.mubr.msk.f32.mxu0 %vm19282_vm2, %v19283_v14  ;;  %v18524_v62 = vld [vmem:[%s21740_s9 + $0x18] sm:$0xff]  }
0x62dc   :  { %17979 = vmatprep.subr.bf16.mxu0 %v19281_v21 }
0x62df   :  { %17981 = vmatpush3.bf16.msra.mxu0 %v21258_v31 }
0x62e0   :  { %17982 = vmatprep.subr.bf16.mxu0 %v19281_v21 }
0x62e3   :  { %17984 = vmatpush3.bf16.msra.mxu0 %v21284_v49 }
0x62e4   :  { %17985 = vmatprep.subr.bf16.mxu0 %v19281_v21 }
0x62e7   :  { %17987 = vmatpush3.bf16.msra.mxu0 %v21290_v5 }
0x62e8   :  { %17988 = vmatprep.subr.bf16.mxu0 %v19281_v21 }
0x62eb   :  { %17990 = vmatpush3.bf16.msra.mxu0 %v21296_v30 }
0x62ec   :  { %17991 = vmatprep.subr.bf16.mxu0 %v19281_v21 }
0x62ef   :  { %17993 = vmatpush3.bf16.msra.mxu0 %v21302_v13 }
0x62f0   :  { %17994 = vmatprep.subr.bf16.mxu0 %v19281_v21 }
0x62f3   :  { %17996 = vmatpush3.bf16.msra.mxu0 %v21308_v43 }
0x62f4   :  { %17997 = vmatprep.subr.bf16.mxu0 %v19281_v21 }
0x62f7   :  { %17999 = vmatpush3.bf16.msra.mxu0 %v21313_v18 }
0x62f8   :  { %17371 = vmatprep.subr.mxu0 %v19283_v14 }
0x63ad   :  { %v12515_v7 = vpop.f32.mrb[182].mxu0 }
0x63ae   :  { %v12522_v10 = vrot.slane %v12515_v7, %v19881_v35  ;;  %v17335_v2 = vpop.f32.mrb[183].mxu0  ;;  %v18525_v7 = vld [vmem:[%s21740_s9 + $0x20] sm:$0xff]  }
0x63af   :  { %v18526_v2 = vld [vmem:[%s21740_s9 + $0x28] sm:$0xff]  }
0x63b0   :  { %v12523_v31 = vsub.f32 %v12361_v60, %v12522_v10  ;;  %v12524_v49 = vsub.f32 %v12362_v44, %v12522_v10  ;;  %v12525_v5 = vsub.f32 %v12363_v40, %v12522_v10  ;;  %v12526_v30 = vsub.f32 %v12364_v42, %v12522_v10  ;;  %v18520_v10 = vld [vmem:[%s21695_s12 + $0x48] sm:$0xff]   ;;  %s19285_s12 = smov [#allocation38]  }
0x63b1   :  { %s13635_s0 = sshll.u32 %s19285_s12, 4  ;;  %s13636_s0 = int_to_ptr.vmem [resolvable:$true] %s13635_s0 }
0x63b2   :  { %v12527_v46 = vmul.f32 %v12523_v31, %v12523_v31  ;;  %v12528_v13 = vmul.f32 %v12524_v49, %v12524_v49  ;;  %v12529_v9 = vmul.f32 %v12525_v5, %v12525_v5  ;;  %v12530_v47 = vmul.f32 %v12526_v30, %v12526_v30  ;;  %s19085_s14 = scalar_lea.vmem %s13636_s0, 32  ;;  %p19090_p9 = scmp.lt.s32.totalorder %s13636_s0, %s13636_s0 }
0x63b3   :  { %p19086_p8 = scmp.ne.s32.totalorder %s13636_s0, %s19085_s14  ;;  %p19091_p10 = scmp.lt.s32.totalorder %s19085_s14, %s19085_s14 }
0x63b4   :  { %v12531_v45 = vadd.f32 %v12528_v13, %v12527_v46 }
0x63b5   :  { %p19092_p11 = por %p19091_p10, %p19090_p9 }
0x63b6   :  { %v12532_v43 = vadd.f32 %v12531_v45, %v12529_v9 }
0x63b7   :  { %p19093_p12 = pnand %p19092_p11, %p19086_p8 }
0x63b8   :  { %v12533_v21 = vadd.f32 %v12532_v43, %v12530_v47 }
0x63ba   :  { %v12534_v18 = vrot.slane %v12533_v21, 4 }
0x63bc   :  { %v12535_v28 = vadd.f32 %v12534_v18, %v12533_v21 }
0x63be   :  { %v12536_v48 = vrot.slane %v12535_v28, 2 }
0x63c0   :  { %v12537_v50 = vadd.f32 %v12536_v48, %v12535_v28 }
0x63c2   :  { %v12538_v54 = vrot.slane %v12537_v50, 1 }
0x63c4   :  { %v12539_v58 = vadd.f32 %v12538_v54, %v12537_v50  ;;  %v18530_v54 = vld [vmem:[%s21740_s9 + $0x88] sm:$0xff]  }
0x63c6   :  { %v12540_v24 = vmul.f32 0.03125, %v12539_v58 }
0x63c8   :  { %17369 = vmatmul.mubr.f32.vlgmr.msra.gmra.mrb[184].mxu0 %v12540_v24  ;;  %v18531_v24 = vld [vmem:[%s21740_s9 + $0x90] sm:$0xff]  }
0x63c9   :  { %17372 = vmatpush3.msra.mxu0 %v21320_v38  ;;  %17373 = vmatprep.mubr.msk.f32.mxu0 %vm19282_vm2, %v19283_v14  ;;  %v12696_v14 = vrot.slane %v12365_v0, %v19881_v35  ;;  %v18533_v0 = vld [vmem:[%s21740_s9 + $0xa0] sm:$0xff]  }
0x649b   :  { %v12607_v11 = vpop.f32.mrb[184].mxu0 }
0x649c   :  { %v17370_v53 = vpop.f32.mrb[185].mxu0  ;;  %17374 = vmatmul.mubr.msk.f32.vlgmr.msra.gmra.mrb[186].mxu0 %vm1365_vm3, %v12607_v11 }
0x649d   :  { %17380 = vmatprep.mubr.msk.bf16.mxu0 %vm587_vm0, %v18513_v16 }
0x656f   :  { %v12680_v17 = vpop.f32.mrb[186].mxu0 }
0x6570   :  { %v12681_v61 = vadd.f32 1e-05, %v12680_v17  ;;  %v17375_v3 = vpop.f32.mrb[187].mxu0 }
0x6572   :  { %18591 = vrsqrt.f32 %v12681_v61  ;;  %v18532_v61 = vld [vmem:[%s21740_s9 + $0x98] sm:$0xff]  }
0x657c   :  { %v18592_v63 = vpop.eup %18591 }
0x657d   :  { %v12688_v38 = vrot.slane %v18592_v63, %v19881_v35 }
0x657f   :  { %v12689_v26 = vmul.f32 %v12688_v38, %v12523_v31  ;;  %v12690_v29 = vmul.f32 %v12688_v38, %v12524_v49  ;;  %v12691_v20 = vmul.f32 %v12688_v38, %v12525_v5  ;;  %v12692_v23 = vmul.f32 %v12688_v38, %v12526_v30  ;;  %v18527_v31 = vld [vmem:[%s21740_s9 + $0x30] sm:$0xff]   ;;  %v18528_v49 = vld [vmem:[%s21740_s9 + $0x38] sm:$0xff]   ;;  %v18529_v5 = vld [vmem:[%s21740_s9 + $0x80] sm:$0xff]  }
0x6581   :  { %v12697_v32 = vmul.f32 %v12696_v14, %v12689_v26  ;;  %v12698_v22 = vmul.f32 %v12696_v14, %v12690_v29  ;;  %v12699_v39 = vmul.f32 %v12696_v14, %v12691_v20  ;;  %v12700_v27 = vmul.f32 %v12696_v14, %v12692_v23  ;;  %v18534_v29 = vld [vmem:[%s21740_s9 + $0xa8] sm:$0xff]   ;;  %v18535_v20 = vld [vmem:[%s21740_s9 + $0xb0] sm:$0xff]   ;;  %v18536_v23 = vld [vmem:[%s21740_s9 + $0xb8] sm:$0xff]  }
0x6583   :  { %v12705_v33 = vadd.f32 %v12704_v36, %v12697_v32  ;;  %v12706_v37 = vadd.f32 %v12704_v36, %v12698_v22  ;;  %v12707_v40 = vadd.f32 %v12704_v36, %v12699_v39  ;;  %v12708_v41 = vadd.f32 %v12704_v36, %v12700_v27  ;;  %v18537_v32 = vld [vmem:[%s21740_s9 + $0x40] sm:$0xff]   ;;  %v18538_v22 = vld [vmem:[%s21740_s9 + $0x48] sm:$0xff]   ;;  %v18539_v39 = vld [vmem:[%s21740_s9 + $0x50] sm:$0xff]  }
0x6584   :  { %v18540_v27 = vld [vmem:[%s21740_s9 + $0x58] sm:$0xff]  }
0x6585   :  { %vm12709_vm2 = vcmp.ge.f32.partialorder %v12705_v33, 0.0  ;;  %vm12710_vm3 = vcmp.ge.f32.partialorder %v12706_v37, 0.0  ;;  %vm12711_vm4 = vcmp.ge.f32.partialorder %v12707_v40, 0.0  ;;  %vm12712_vm7 = vcmp.ge.f32.partialorder %v12708_v41, 0.0 }
0x6586   :  { %v12713_v60 = vmul.f32 0.2, %v12705_v33  ;;  %v12714_v35 = vmul.f32 0.2, %v12706_v37  ;;  %v12715_v6 = vmul.f32 0.2, %v12707_v40 }
0x6587   :  { %v12716_v59 = vmul.f32 0.2, %v12708_v41 }
0x6588   :  { %v12717_v42 = vsel %vm12709_vm2, %v12705_v33, %v12713_v60  ;;  %v12718_v19 = vsel %vm12710_vm3, %v12706_v37, %v12714_v35  ;;  %v12719_v44 = vsel %vm12711_vm4, %v12707_v40, %v12715_v6  ;;  %v18541_v33 = vld [vmem:[%s21740_s9 + $0x60] sm:$0xff]   ;;  %v18542_v37 = vld [vmem:[%s21740_s9 + $0x68] sm:$0xff]   ;;  %v18543_v40 = vld [vmem:[%s21740_s9 + $0x70] sm:$0xff]  }
0x6589   :  { %v12720_v51 = vsel %vm12712_vm7, %v12708_v41, %v12716_v59  ;;  %v21455_v4 = vpack.c.bf16 %v12718_v19, %v12717_v42  ;;  %v18544_v41 = vld [vmem:[%s21740_s9 + $0x78] sm:$0xff]   ;;  %v18545_v60 = vld [vmem:[%s21740_s9 + $0xc0] sm:$0xff]   ;;  %v18546_v35 = vld [vmem:[%s21740_s9 + $0xc8] sm:$0xff]  }
0x658a   :  { %v21457_v57 = vpack.c.bf16 %v12720_v51, %v12719_v44  ;;  %v18547_v6 = vld [vmem:[%s21740_s9 + $0xd0] sm:$0xff]   ;;  %v18548_v59 = vld [vmem:[%s21740_s9 + $0xd8] sm:$0xff]   ;;  %v18549_v42 = vld [vmem:[%s21740_s9 + $0xe0] sm:$0xff]  }
0x658b   :  { %17376 = vmatprep.subr.bf16.mxu0 %v21455_v4  ;;  %17424 = vmatprep.subr.bf16.mxu1 %v21455_v4  ;;  %v18550_v19 = vld [vmem:[%s21740_s9 + $0xe8] sm:$0xff]   ;;  %v18551_v44 = vld [vmem:[%s21740_s9 + $0xf0] sm:$0xff]   ;;  %v18552_v51 = vld [vmem:[%s21740_s9 + $0xf8] sm:$0xff]  }
0x658c   :  { %17377 = vmatpush3.bf16.msra.mxu0 %v21455_v4  ;;  %17425 = vmatpush3.bf16.msra.mxu1 %v21455_v4 }
0x658d   :  { %17378 = vmatprep.subr.bf16.mxu0 %v21457_v57  ;;  %17426 = vmatprep.subr.bf16.mxu1 %v21457_v57 }
0x6590   :  { %17379 = vmatpush3.bf16.msra.mxu0 %v21457_v57  ;;  %17427 = vmatpush3.bf16.msra.mxu1 %v21457_v57 }
0x6591   :  { %17452 = vmatprep.subr.bf16.mxu1 %v21455_v4  ;;  %17384 = vmatprep.subr.bf16.mxu0 %v18521_v55 }
0x6593   :  { %17381 = vmatmul.mubr.msk.bf16.vlgmr.msra.gmra.mrb[188].mxu0 %vm587_vm0, %v18514_v56  ;;  %17429 = vmatmul.mubr.msk.bf16.vlgmr.msra.gmra.mrb[224].mxu1 %vm587_vm0, %v18516_v34  ;;  %v18556_v56 = vld [vmem:[%s21740_s9 + $0x118] sm:$0xff]   ;;  %v18557_v34 = vld [vmem:[%s21740_s9 + $0x120] sm:$0xff]  }
0x6594   :  { %17453 = vmatpush3.bf16.msra.mxu1 %v21455_v4  ;;  %17456 = vmatprep.mubr.msk.bf16.mxu1 %vm587_vm0, %v18517_v15  ;;  %v18558_v15 = vld [vmem:[%s21740_s9 + $0x128] sm:$0xff]  }
0x6595   :  { %17454 = vmatprep.subr.bf16.mxu1 %v21457_v57  ;;  %17385 = vmatpush3.bf16.msra.mxu0 %v18521_v55  ;;  %v18555_v55 = vld [vmem:[%s21740_s9 + $0x110] sm:$0xff]  }
0x6596   :  { %17386 = vmatprep.subr.bf16.mxu0 %v18522_v1 }
0x6598   :  { %17455 = vmatpush3.bf16.msra.mxu1 %v21457_v57 }
0x6599   :  { %17480 = vmatprep.subr.bf16.mxu1 %v21455_v4  ;;  %17387 = vmatpush3.bf16.msra.mxu0 %v18522_v1  ;;  %v18559_v1 = vld [vmem:[%s21740_s9 + $0x130] sm:$0xff]  }
0x659a   :  { %17388 = vmatprep.subr.bf16.mxu0 %v18523_v12 }
0x659b   :  { %17457 = vmatmul.mubr.msk.bf16.vlgmr.msra.gmra.mrb[228].mxu1 %vm587_vm0, %v18518_v52 }
0x659c   :  { %17481 = vmatpush3.bf16.msra.mxu1 %v21455_v4  ;;  %17484 = vmatprep.mubr.msk.bf16.mxu1 %vm587_vm0, %v18519_v8 }
0x659d   :  { %17482 = vmatprep.subr.bf16.mxu1 %v21457_v57  ;;  %17389 = vmatpush3.bf16.msra.mxu0 %v18523_v12  ;;  %v18560_v12 = vld [vmem:[%s21740_s9 + $0x138] sm:$0xff]  }
0x659e   :  { %17390 = vmatprep.subr.bf16.mxu0 %v18524_v62 }
0x65a0   :  { %17483 = vmatpush3.bf16.msra.mxu1 %v21457_v57 }
0x65a1   :  { %17391 = vmatpush3.bf16.msra.mxu0 %v18524_v62 }
0x65a2   :  { %17392 = vmatprep.subr.bf16.mxu0 %v18525_v7 }
0x65a3   :  { %17485 = vmatmul.mubr.msk.bf16.vlgmr.msra.gmra.mrb[232].mxu1 %vm587_vm0, %v18520_v10 }
0x65a5   :  { %17393 = vmatpush3.bf16.msra.mxu0 %v18525_v7 }
0x65a6   :  { %17394 = vmatprep.subr.bf16.mxu0 %v18526_v2 }
0x65a9   :  { %17395 = vmatpush3.bf16.msra.mxu0 %v18526_v2 }
0x65aa   :  { %17396 = vmatprep.subr.bf16.mxu0 %v18527_v31 }
0x65ad   :  { %17397 = vmatpush3.bf16.msra.mxu0 %v18527_v31 }
0x65ae   :  { %17398 = vmatprep.subr.bf16.mxu0 %v18528_v49 }
0x65b1   :  { %17399 = vmatpush3.bf16.msra.mxu0 %v18528_v49 }
0x65b2   :  { %17404 = vmatprep.subr.bf16.mxu0 %v18529_v5 }
0x6666   :  { %v17382_v30 = vpop.f32.mrb[188].mxu0  ;;  %v21496_v46 = vpop.f32.mrb[224].mxu1 }
0x6667   :  { %v12794_v13 = vpop.f32.mrb[189].mxu0  ;;  %v13075_v9 = vpop.f32.mrb[225].mxu1 }
0x6668   :  { %v17383_v45 = vpop.f32.mrb[190].mxu0  ;;  %v21498_v47 = vpop.f32.mrb[226].mxu1 }
0x6669   :  { %v12810_v43 = vpack.c.bf16 %v17383_v45, %v17382_v30  ;;  %v12797_v21 = vpop.f32.mrb[191].mxu0  ;;  %v13091_v18 = vpack.c.bf16 %v21498_v47, %v21496_v46  ;;  %v13078_v28 = vpop.f32.mrb[227].mxu1 }
0x666a   :  { %v12809_v48 = vpack.c.bf16 %v12797_v21, %v12794_v13  ;;  %v13090_v50 = vpack.c.bf16 %v13078_v28, %v13075_v9 }
0x666c   :  { %17400 = vmatprep.mubr.bf16.mxu0 %v12809_v48 }
0x666d   :  { %17401 = vmatmul.mubr.bf16.vlgmr.msra.gmra.mrb[192].mxu0 %v12810_v43 }
0x666e   :  { %17405 = vmatpush3.bf16.msra.mxu0 %v18529_v5  ;;  %17420 = vmatprep.mubr.bf16.mxu0 %v21455_v4  ;;  %v21504_v58 = vpop.f32.mrb[228].mxu1  ;;  %v18553_v4 = vld [vmem:[%s21740_s9 + $0x100] sm:$0xff]  }
0x666f   :  { %17406 = vmatprep.subr.bf16.mxu0 %v18530_v54  ;;  %v13264_v11 = vpop.f32.mrb[229].mxu1 }
0x6670   :  { %v21507_v53 = vpop.f32.mrb[230].mxu1 }
0x6671   :  { %v13280_v16 = vpack.c.bf16 %v21507_v53, %v21504_v58  ;;  %v13267_v25 = vpop.f32.mrb[231].mxu1 }
0x6672   :  { %17407 = vmatpush3.bf16.msra.mxu0 %v18530_v54  ;;  %v13279_v17 = vpack.c.bf16 %v13267_v25, %v13264_v11 }
0x6673   :  { %17408 = vmatprep.subr.bf16.mxu0 %v18531_v24 }
0x6676   :  { %17409 = vmatpush3.bf16.msra.mxu0 %v18531_v24  ;;  %v21512_v3 = vpop.f32.mrb[232].mxu1 }
0x6677   :  { %17410 = vmatprep.subr.bf16.mxu0 %v18532_v61  ;;  %v21515_v63 = vpop.f32.mrb[233].mxu1 }
0x6678   :  { %v21517_v38 = vpop.f32.mrb[234].mxu1 }
0x6679   :  { %v13469_v14 = vpack.c.bf16 %v21517_v38, %v21512_v3  ;;  %v21521_v36 = vpop.f32.mrb[235].mxu1 }
0x667a   :  { %17411 = vmatpush3.bf16.msra.mxu0 %v18532_v61  ;;  %v13468_v26 = vpack.c.bf16 %v21521_v36, %v21515_v63 }
0x667b   :  { %17412 = vmatprep.subr.bf16.mxu0 %v18533_v0 }
0x667e   :  { %17413 = vmatpush3.bf16.msra.mxu0 %v18533_v0 }
0x667f   :  { %17414 = vmatprep.subr.bf16.mxu0 %v18534_v29 }
0x6682   :  { %17415 = vmatpush3.bf16.msra.mxu0 %v18534_v29 }
0x6683   :  { %17416 = vmatprep.subr.bf16.mxu0 %v18535_v20 }
0x6686   :  { %17417 = vmatpush3.bf16.msra.mxu0 %v18535_v20 }
0x6687   :  { %17418 = vmatprep.subr.bf16.mxu0 %v18536_v23 }
0x668a   :  { %17419 = vmatpush3.bf16.msra.mxu0 %v18536_v23 }
0x668b   :  { %17432 = vmatprep.subr.bf16.mxu0 %v18537_v32 }
0x668d   :  { %17421 = vmatmul.mubr.bf16.vlgmr.msra.gmra.mrb[192].mxu0 %v21457_v57  ;;  %v18554_v57 = vld [vmem:[%s21740_s9 + $0x108] sm:$0xff]  }
0x668e   :  { %17433 = vmatpush3.bf16.msra.mxu0 %v18537_v32  ;;  %17448 = vmatprep.mubr.bf16.mxu0 %v13090_v50 }
0x668f   :  { %17434 = vmatprep.subr.bf16.mxu0 %v18538_v22 }
0x6692   :  { %17435 = vmatpush3.bf16.msra.mxu0 %v18538_v22 }
0x6693   :  { %17436 = vmatprep.subr.bf16.mxu0 %v18539_v39 }
0x6696   :  { %17437 = vmatpush3.bf16.msra.mxu0 %v18539_v39 }
0x6697   :  { %17438 = vmatprep.subr.bf16.mxu0 %v18540_v27 }
0x669a   :  { %17439 = vmatpush3.bf16.msra.mxu0 %v18540_v27 }
0x669b   :  { %17440 = vmatprep.subr.bf16.mxu0 %v18541_v33 }
0x669e   :  { %17441 = vmatpush3.bf16.msra.mxu0 %v18541_v33 }
0x669f   :  { %17442 = vmatprep.subr.bf16.mxu0 %v18542_v37 }
0x66a2   :  { %17443 = vmatpush3.bf16.msra.mxu0 %v18542_v37 }
0x66a3   :  { %17444 = vmatprep.subr.bf16.mxu0 %v18543_v40 }
0x66a6   :  { %17445 = vmatpush3.bf16.msra.mxu0 %v18543_v40 }
0x66a7   :  { %17446 = vmatprep.subr.bf16.mxu0 %v18544_v41 }
0x66aa   :  { %17447 = vmatpush3.bf16.msra.mxu0 %v18544_v41 }
0x66ab   :  { %17460 = vmatprep.subr.bf16.mxu0 %v18545_v60 }
0x66ad   :  { %17449 = vmatmul.mubr.bf16.vlgmr.msra.gmra.mrb[192].mxu0 %v13091_v18 }
0x66ae   :  { %17461 = vmatpush3.bf16.msra.mxu0 %v18545_v60  ;;  %17476 = vmatprep.mubr.bf16.mxu0 %v13279_v17 }
0x66af   :  { %17462 = vmatprep.subr.bf16.mxu0 %v18546_v35 }
0x66b2   :  { %17463 = vmatpush3.bf16.msra.mxu0 %v18546_v35 }
0x66b3   :  { %17464 = vmatprep.subr.bf16.mxu0 %v18547_v6 }
0x66b6   :  { %17465 = vmatpush3.bf16.msra.mxu0 %v18547_v6 }
0x66b7   :  { %17466 = vmatprep.subr.bf16.mxu0 %v18548_v59 }
0x66ba   :  { %17467 = vmatpush3.bf16.msra.mxu0 %v18548_v59 }
0x66bb   :  { %17468 = vmatprep.subr.bf16.mxu0 %v18549_v42 }
0x66be   :  { %17469 = vmatpush3.bf16.msra.mxu0 %v18549_v42 }
0x66bf   :  { %17470 = vmatprep.subr.bf16.mxu0 %v18550_v19 }
0x66c2   :  { %17471 = vmatpush3.bf16.msra.mxu0 %v18550_v19 }
0x66c3   :  { %17472 = vmatprep.subr.bf16.mxu0 %v18551_v44 }
0x66c6   :  { %17473 = vmatpush3.bf16.msra.mxu0 %v18551_v44 }
0x66c7   :  { %17474 = vmatprep.subr.bf16.mxu0 %v18552_v51 }
0x66ca   :  { %17475 = vmatpush3.bf16.msra.mxu0 %v18552_v51 }
0x66cb   :  { %17488 = vmatprep.subr.bf16.mxu0 %v18553_v4 }
0x66cd   :  { %17477 = vmatmul.mubr.bf16.vlgmr.msra.gmra.mrb[192].mxu0 %v13280_v16 }
0x66ce   :  { %17489 = vmatpush3.bf16.msra.mxu0 %v18553_v4  ;;  %17504 = vmatprep.mubr.bf16.mxu0 %v13468_v26 }
0x66cf   :  { %17490 = vmatprep.subr.bf16.mxu0 %v18554_v57 }
0x66d2   :  { %17491 = vmatpush3.bf16.msra.mxu0 %v18554_v57 }
0x66d3   :  { %17492 = vmatprep.subr.bf16.mxu0 %v18555_v55 }
0x66d6   :  { %17493 = vmatpush3.bf16.msra.mxu0 %v18555_v55 }
0x66d7   :  { %17494 = vmatprep.subr.bf16.mxu0 %v18556_v56 }
0x66da   :  { %17495 = vmatpush3.bf16.msra.mxu0 %v18556_v56 }
0x66db   :  { %17496 = vmatprep.subr.bf16.mxu0 %v18557_v34 }
0x66de   :  { %17497 = vmatpush3.bf16.msra.mxu0 %v18557_v34 }
0x66df   :  { %17498 = vmatprep.subr.bf16.mxu0 %v18558_v15 }
0x66e2   :  { %17499 = vmatpush3.bf16.msra.mxu0 %v18558_v15 }
0x66e3   :  { %17500 = vmatprep.subr.bf16.mxu0 %v18559_v1 }
0x66e6   :  { %17501 = vmatpush3.bf16.msra.mxu0 %v18559_v1 }
0x66e7   :  { %17502 = vmatprep.subr.bf16.mxu0 %v18560_v12 }
0x66ea   :  { %17503 = vmatpush3.bf16.msra.mxu0 %v18560_v12 }
0x66ed   :  { %17505 = vmatmul.mubr.bf16.vlgmr.msra.gmra.mrb[192].mxu0 %v13469_v14 }
0x66ee   :  { %19096 = shalt.err (!%p19093_p12)
}
0x66ef   :  { %s19097_s8 = scalar_lea.hbm %s19646_s27, 32 }
0x66f0   :  { %p19098_p13 = scmp.ne.s32.totalorder %s19646_s27, %s19097_s8  ;;  %p19101_p0 = scmp.lt.u32.totalorder %s19097_s8, %s19646_s27 }
0x66f2   :  { %p19103_p1 = pnand %p19101_p0, %p19098_p13 }
0x66f4   :  { %19106 = shalt.err (!%p19103_p1)
}
0x66f5   :  { %13638 = dma.vmem_to_hbm [thread:$0]  %s13636_s0, 32, %s19646_s27, [#allocation39]  }
0x66f6   :  { %s19107_s1 = scalar_lea.vmem %s13626_s29, 32  ;;  %p19112_p3 = scmp.lt.s32.totalorder %s13626_s29, %s13626_s29 }
0x66f7   :  { %p19108_p2 = scmp.ne.s32.totalorder %s13626_s29, %s19107_s1  ;;  %p19113_p4 = scmp.lt.s32.totalorder %s19107_s1, %s19107_s1 }
0x66f9   :  { %p19114_p5 = por %p19113_p4, %p19112_p3 }
0x66fb   :  { %p19115_p6 = pnand %p19114_p5, %p19108_p2 }
0x66fd   :  { %19118 = shalt.err (!%p19115_p6)
}
0x66fe   :  { %s19119_s2 = scalar_lea.hbm %s19641_s5, 32 }
0x66ff   :  { %p19120_p7 = scmp.ne.s32.totalorder %s19641_s5, %s19119_s2  ;;  %p19123_p8 = scmp.lt.u32.totalorder %s19119_s2, %s19641_s5 }
0x6701   :  { %p19125_p9 = pnand %p19123_p8, %p19120_p7 }
0x6703   :  { %19128 = shalt.err (!%p19125_p9)
}
0x6704   :  { %13628 = dma.vmem_to_hbm [thread:$0]  %s13626_s29, 32, %s19641_s5, [#allocation4]  }
0x6705   :  { %s19287_s25 = smov [#allocation40]  }
0x6706   :  { %s13645_s27 = sshll.u32 %s19287_s25, 4  ;;  %s13646_s27 = int_to_ptr.vmem [resolvable:$true] %s13645_s27 }
0x6707   :  { %s19129_s10 = scalar_lea.vmem %s13646_s27, 32  ;;  %p19134_p11 = scmp.lt.s32.totalorder %s13646_s27, %s13646_s27 }
0x6708   :  { %p19130_p10 = scmp.ne.s32.totalorder %s13646_s27, %s19129_s10  ;;  %p19135_p12 = scmp.lt.s32.totalorder %s19129_s10, %s19129_s10 }
0x670a   :  { %p19136_p13 = por %p19135_p12, %p19134_p11 }
0x670c   :  { %p19137_p0 = pnand %p19136_p13, %p19130_p10 }
0x670e   :  { %19140 = shalt.err (!%p19137_p0)
}
0x670f   :  { %s19141_s3 = scalar_lea.hbm %s19651_s30, 32 }
0x6710   :  { %p19142_p1 = scmp.ne.s32.totalorder %s19651_s30, %s19141_s3  ;;  %p19145_p2 = scmp.lt.u32.totalorder %s19141_s3, %s19651_s30 }
0x6712   :  { %p19147_p3 = pnand %p19145_p2, %p19142_p1 }
0x6714   :  { %19150 = shalt.err (!%p19147_p3)
}
0x6715   :  { %13648 = dma.vmem_to_hbm [thread:$0]  %s13646_s27, 32, %s19651_s30, [#allocation39]   ;;  %v14605_v52 = vld [vmem:[#allocation35] ss:$0 sm:$0xff] }
0x67c0   :  { %v17506_v8 = vpop.f32.mrb[192].mxu0 }
0x67c1   :  { %v13597_v62 = vadd.f32 %v17506_v8, %v14605_v52  ;;  %v13569_v7 = vpop.f32.mrb[193].mxu0 }
0x67c2   :  { %v13595_v10 = vadd.f32 %v14605_v52, %v13569_v7  ;;  %v17507_v2 = vpop.f32.mrb[194].mxu0 }
0x67c3   :  { %v13601_v31 = vmul.f32 0.5, %v13597_v62  ;;  %v13598_v49 = vadd.f32 %v17507_v2, %v14605_v52  ;;  %v13572_v5 = vpop.f32.mrb[195].mxu0 }
0x67c4   :  { %v13599_v30 = vmul.f32 0.5, %v13595_v10  ;;  %v13596_v46 = vadd.f32 %v14605_v52, %v13572_v5 }
0x67c5   :  { %18593 = vtanh.f32 %v13601_v31  ;;  %v13602_v13 = vmul.f32 0.5, %v13598_v49 }
0x67c6   :  { %18595 = vtanh.f32 %v13599_v30  ;;  %v13600_v9 = vmul.f32 0.5, %v13596_v46 }
0x67c7   :  { %18597 = vtanh.f32 %v13602_v13 }
0x67c8   :  { %18599 = vtanh.f32 %v13600_v9 }
0x67cf   :  { %v18594_v45 = vpop.eup %18593 }
0x67d0   :  { %v18596_v47 = vpop.eup %18595  ;;  %v13609_v43 = vadd.f32 1.0, %v18594_v45 }
0x67d1   :  { %v18598_v21 = vpop.eup %18597  ;;  %v13607_v18 = vadd.f32 1.0, %v18596_v47 }
0x67d2   :  { %v18600_v28 = vpop.eup %18599  ;;  %v13613_v48 = vmul.f32 0.5, %v13609_v43  ;;  %v13610_v50 = vadd.f32 1.0, %v18598_v21 }
0x67d3   :  { %v13611_v54 = vmul.f32 0.5, %v13607_v18  ;;  %v13608_v58 = vadd.f32 1.0, %v18600_v28 }
0x67d4   :  { %13617 = vst.msk [vmem:[%s19656_s21 + $0x10] sm:$0xff] %vm669_vm1, %v13613_v48  ;;  %v13614_v24 = vmul.f32 0.5, %v13610_v50 }
0x67d5   :  { %13615 = vst.msk [vmem:[%s19656_s21] sm:$0xff] %vm669_vm1, %v13611_v54  ;;  %v13612_v11 = vmul.f32 0.5, %v13608_v58 }
0x67d6   :  { %13618 = vst.msk [vmem:[%s19656_s21 + $0x18] sm:$0xff] %vm669_vm1, %v13614_v24 }
0x67d7   :  { %13616 = vst.msk [vmem:[%s19656_s21 + $0x8] sm:$0xff] %vm669_vm1, %v13612_v11 }
0x67d8   :  { %19175 = dma.done.wait [#allocation4], 32  }
0x67d9   :  { %19176 = vsyncadd [#allocation4], 4294967264 }
0x67da   :  { %19177 = dma.done.wait [#allocation39], 64  }
0x67db   :  { %19178 = vsyncadd [#allocation39], 4294967232 }
0x67dc   :  { %13662 = vsyncpa [#allocation3], 1 }
0x67dd   :  { %13663 = vsyncpa [#allocation6], 1 }
0x67de   :  { %13664 = vsyncpa [#allocation9], 1 }
0x67df   :  { %13665 = vsyncpa [#allocation12], 1 }
0x67e0   :  { %13666 = vsyncpa [#allocation15], 1 }
0x67e1   :  { %13667 = vsyncpa [#allocation18], 1 }
0x67e2   :  { %13668 = vsyncpa [#allocation21], 1 }
0x67e3   :  { %13669 = vsyncpa [#allocation24], 1 }
0x67e4   :  { %13670 = vsyncpa [#allocation27], 1 }
0x67e5   :  { %13671 = vsyncpa [#allocation30], 1 }
0x67e6   :  { %13672 = vsyncpa [#allocation33], 1 }
0x67e7   :  { %13673 = vsyncpa [#allocation36], 1 }
0x67e8   :  { %13674 = vsyncpa [#allocation4], 1 }
0x67e9   :  { %13675 = vsyncpa [#allocation39], 1 }

</bundles_post_ra>
